<compile_context>
chip_gen: v7x
topology: tpu7x:2x2x1
jax: 0.10.0
libtpu: 0.0.40
codegen_flags: <defaults>
</compile_context>

<pallas_src>
import jax
import jax.numpy as jnp
from jax.experimental import pallas as pl
from jax.experimental.pallas import tpu as pltpu

# ----------------------------- config (small) -----------------------------
B = 2                      # batch
C = 3                      # image channels
IMG = 16                   # image H = W
PATCH = 8                  # patch size
NPATCH = (IMG // PATCH) ** 2        # 4 patch tokens per image
PATCH_DIM = C * PATCH * PATCH       # 192
VTOK = NPATCH + 1                   # patches + class token
NPROWS = B * NPATCH                 # 8 folded patch rows
LV = B * VTOK                       # 10 folded vision rows (patches first, cls last)

DV = 128                   # vision width  (128 -> lane-dense stores)
VH = 4                     # vision heads
VDH = DV // VH             # 32
VDEPTH = 2                 # vision blocks
VMLP = 256

VOCAB = 64                 # text vocab
SEQ = 8                    # text sequence length
LT = B * SEQ               # 16 folded text rows
DT = 128                   # text width    (128 -> lane-dense stores)
TH = 4                     # text heads
TDH = DT // TH
TDEPTH = 2                 # text layers
TMLP = 256

# Per-transformer-block parameter refs (stacked over depth on the leading axis).
BLOCK_KEYS = ("ln1_g", "ln1_b", "wqkv", "bqkv", "wo", "bo",
              "ln2_g", "ln2_b", "fc1_w", "fc1_b", "fc2_w", "fc2_b")
VIS_STATIC = ("patches", "pos", "mask", "pool",
              "patch_w", "patch_b", "norm_g", "norm_b")
TXT_STATIC = ("onehot", "pos", "mask", "eos",
              "tok_emb", "final_g", "final_b")


# ------------------------- in-kernel math helpers --------------------------
def _ln(x, g, b, eps):
    mu = jnp.mean(x, axis=-1, keepdims=True)
    xc = x - mu
    var = jnp.mean(xc * xc, axis=-1, keepdims=True)
    return xc * jax.lax.rsqrt(var + eps) * g + b


def _gelu_tanh(y):
    # TODO(synk): timm ViT default is exact erf-GELU; tanh approximation used here.
    c = 0.7978845608028654
    return 0.5 * y * (1.0 + jnp.tanh(c * (y + 0.044715 * y * y * y)))


def _quick_gelu(y):
    return y * jax.nn.sigmoid(1.702 * y)


def _bdot(a, w):
    """Weight GEMM: bf16 x bf16 operands on the MXU, f32 accumulation."""
    return jnp.dot(a.astype(jnp.bfloat16), w.astype(jnp.bfloat16),
                   preferred_element_type=jnp.float32)


def _attention(n1, blk, li, n_heads, dh, mask):
    """Fused-QKV multi-head self-attention on [L, D] values.

    One [D,3D] GEMM for Q/K/V, one [D,D] GEMM on the lane-concatenated head
    outputs; only the tiny per-head score/context matmuls remain per-head
    (those stay f32 — negligible cost, better numerics)."""
    D = n1.shape[-1]
    qkv = _bdot(n1, blk["wqkv"][li]) + blk["bqkv"][li]          # [L, 3D] f32
    q, k, v = qkv[:, :D], qkv[:, D:2 * D], qkv[:, 2 * D:]
    scale = 1.0 / (dh ** 0.5)
    heads = []
    for h in range(n_heads):
        qh = q[:, h * dh:(h + 1) * dh]
        kh = k[:, h * dh:(h + 1) * dh]
        vh = v[:, h * dh:(h + 1) * dh]
        s = jax.lax.dot_general(qh, kh, (((1,), (1,)), ((), ())),
                                preferred_element_type=jnp.float32)   # [L, L]
        s = s * scale + mask
        s = s - jnp.max(s, axis=-1, keepdims=True)
        p = jnp.exp(s)
        p = p * pl.reciprocal(jnp.sum(p, axis=-1, keepdims=True), approx=True)
        heads.append(jnp.dot(p, vh, preferred_element_type=jnp.float32))
    ctx = jnp.concatenate(heads, axis=-1)                        # [L, D]
    return _bdot(ctx, blk["wo"][li]) + blk["bo"][li]


def _block(x, blk, li, n_heads, dh, eps, act, mask):
    """Pre-LN transformer block: x + attn(LN1 x); x + mlp(LN2 x)."""
    n1 = _ln(x, blk["ln1_g"][li], blk["ln1_b"][li], eps)
    x = x + _attention(n1, blk, li, n_heads, dh, mask)
    n2 = _ln(x, blk["ln2_g"][li], blk["ln2_b"][li], eps)
    m = _bdot(n2, blk["fc1_w"][li]) + blk["fc1_b"][li]
    m = _gelu_tanh(m) if act == "gelu" else _quick_gelu(m)
    m = _bdot(m, blk["fc2_w"][li]) + blk["fc2_b"][li]
    return x + m


# --------------------------- fused two-branch kernel ------------------------
def _fused_kernel(*refs):
    nv, nb, nt = len(VIS_STATIC), len(BLOCK_KEYS), len(TXT_STATIC)
    i = 0
    vis = dict(zip(VIS_STATIC, refs[i:i + nv])); i += nv
    vblk = dict(zip(BLOCK_KEYS, refs[i:i + nb])); i += nb
    txt = dict(zip(TXT_STATIC, refs[i:i + nt])); i += nt
    tblk = dict(zip(BLOCK_KEYS, refs[i:i + nb])); i += nb
    per_layer_ref, feat_ref, raw_ref, pooled_ref = refs[i:]

    # ---------------- vision branch (timm ViT, pre-LN, mean-pool) ----------
    v_mask = vis["mask"][...]                                     # hoisted, reused by all layers/heads
    # Patch embed (stride-P conv) as one GEMM.  The last B rows of `patches`
    # are zero and the matching rows of `pos` already carry (cls + pos - patch_b),
    # so the class tokens appear as the last rows of the folded sequence.
    x = (_bdot(vis["patches"][...], vis["patch_w"][...])
         + vis["patch_b"][...] + vis["pos"][...])                 # [LV, DV] f32
    for li in range(VDEPTH):
        x = _block(x, vblk, li, VH, VDH, 1e-6, "gelu", v_mask)
        normed = _ln(x, vis["norm_g"][...], vis["norm_b"][...], 1e-6)
        patch_tok = normed[:NPROWS, :]                            # drop class tokens (aligned rows)
        per_layer_ref[li] = patch_tok                             # full 8x128 unmasked store
        if li == VDEPTH - 1:
            # features = per-image mean over patch tokens of the last normed layer.
            feat_ref[...] = jnp.dot(vis["pool"][...], patch_tok,
                                    preferred_element_type=jnp.float32)

    # ---------------- text branch (CLIP text, causal, quick-GELU) ----------
    t_mask = txt["mask"][...]
    # Token-embedding lookup as a one-hot GEMM (keeps the gather on the MXU).
    y = _bdot(txt["onehot"][...], txt["tok_emb"][...]) + txt["pos"][...]   # [LT, DT]
    for li in range(TDEPTH):
        y = _block(y, tblk, li, TH, TDH, 1e-5, "quick_gelu", t_mask)
    h = _ln(y, txt["final_g"][...], txt["final_b"][...], 1e-5)
    raw_ref[...] = h
    # pooler_output: hidden state at argmax(input_ids) (EOS) -- one-hot select.
    pooled_ref[...] = jnp.dot(txt["eos"][...], h, preferred_element_type=jnp.float32)


# ------------------------------ call wrapper --------------------------------
def _full_spec(arr):
    zeros = (0,) * arr.ndim
    return pl.BlockSpec(arr.shape, lambda b, _z=zeros: _z)


def _fused_forward(image, input_ids, params):
    """Both branches in one pallas_call; all reshapes here are tiny layout glue."""
    pv, pt = params["vision"], params["text"]
    Bn = image.shape[0]

    # ---- vision glue: patchify NCHW and fold batch into rows --------------
    x = image.reshape(Bn, C, IMG // PATCH, PATCH, IMG // PATCH, PATCH)
    x = x.transpose(0, 2, 4, 1, 3, 5).reshape(Bn * NPATCH, PATCH_DIM)
    patches = jnp.concatenate(
        [x, jnp.zeros((Bn, PATCH_DIM), jnp.float32)], axis=0)          # [LV, PD]
    # positional table for the folded layout; cls embedding folded into the
    # rows occupied by the (zero) class-token patch rows.
    pos_patch = jnp.tile(pv["pos"][:NPATCH], (Bn, 1))
    pos_cls = jnp.tile(pv["pos"][NPATCH:] + pv["cls"] - pv["patch_b"], (Bn, 1))
    v_pos = jnp.concatenate([pos_patch, pos_cls], axis=0)               # [LV, DV]
    # per-image block-diagonal additive attention mask (hoisted out of kernel loops)
    bid = jnp.concatenate([jnp.repeat(jnp.arange(Bn), NPATCH), jnp.arange(Bn)])
    v_mask = jnp.where(bid[:, None] == bid[None, :], 0.0, -1e9).astype(jnp.float32)
    # per-image mean-pool matrix over the patch rows
    rb = jnp.repeat(jnp.arange(Bn), NPATCH)
    v_pool = (rb[None, :] == jnp.arange(Bn)[:, None]).astype(jnp.float32) / NPATCH

    # ---- text glue: one-hot ids, folded positions, causal mask, EOS -------
    ids = input_ids.reshape(Bn * SEQ)
    onehot = jax.nn.one_hot(ids, VOCAB, dtype=jnp.bfloat16)             # [LT, VOCAB]
    t_pos = jnp.tile(pt["pos_emb"], (Bn, 1))                            # [LT, DT]
    r = jnp.arange(Bn * SEQ)
    same = (r[:, None] // SEQ) == (r[None, :] // SEQ)
    causal = (r[None, :] % SEQ) <= (r[:, None] % SEQ)
    t_mask = jnp.where(same & causal, 0.0, -1e9).astype(jnp.float32)
    eos_pos = jnp.argmax(input_ids, axis=-1) + jnp.arange(Bn) * SEQ
    eos = jax.nn.one_hot(eos_pos, Bn * SEQ, dtype=jnp.float32)          # [Bn, LT]

    vis_static = (patches, v_pos, v_mask, v_pool,
                  pv["patch_w"], pv["patch_b"], pv["norm_g"], pv["norm_b"])
    txt_static = (onehot, t_pos, t_mask, eos,
                  pt["tok_emb"], pt["final_g"], pt["final_b"])
    inputs = (vis_static + tuple(pv[k] for k in BLOCK_KEYS)
              + txt_static + tuple(pt[k] for k in BLOCK_KEYS))

    out_shapes = (
        jax.ShapeDtypeStruct((VDEPTH, Bn * NPATCH, DV), jnp.float32),   # per-layer patch tokens
        jax.ShapeDtypeStruct((Bn, DV), jnp.float32),                    # vision features
        jax.ShapeDtypeStruct((Bn * SEQ, DT), jnp.float32),              # text last_hidden_state
        jax.ShapeDtypeStruct((Bn, DT), jnp.float32),                    # text pooler_output
    )

    per_layer, feat, raw, pooled = pl.pallas_call(
        _fused_kernel,
        grid=(1,),                                                      # single launch, single step
        in_specs=[_full_spec(a) for a in inputs],
        out_specs=tuple(pl.BlockSpec(s.shape, lambda b, _z=(0,) * len(s.shape): _z)
                        for s in out_shapes),
        out_shape=out_shapes,
        compiler_params=pltpu.CompilerParams(
            dimension_semantics=("arbitrary",),
            vmem_limit_bytes=32 * 1024 * 1024),
    )(*inputs)

    per_layer = per_layer.reshape(VDEPTH, Bn, NPATCH, DV)
    raw = raw.reshape(Bn, SEQ, DT)
    return per_layer, feat, raw, pooled


# --------------------------- adapter forward pass ---------------------------
def timm_clip_adapter_forward(params, image=None, text=None):
    if image is None and text is None:
        raise ValueError("Must provide at least one input modality")
    # The fused kernel computes both branches in one launch; a missing modality
    # is fed zeros (negligible at these shapes) and its outputs are dropped.
    Bn = image.shape[0] if image is not None else text.shape[0]
    img_in = image if image is not None else jnp.zeros((Bn, C, IMG, IMG), jnp.float32)
    txt_in = text if text is not None else jnp.zeros((Bn, SEQ), jnp.int32)

    per_layer, feat, raw, pooled = _fused_forward(img_in, txt_in, params)

    out = {}
    if image is not None:
        per_layer_list = [per_layer[i] for i in range(VDEPTH)]
        out["image"] = {
            "classifier": feat,
            "features": feat,
            "raw_features": per_layer_list[-1],
            "per_layer_raw_features": per_layer_list,
        }
    if text is not None:
        out["text"] = {"features": pooled, "raw_features": raw}
    return out


# ----------------------------- parameter init ------------------------------
def init_params(key):
    keys = iter(jax.random.split(key, 64))

    def nrm(shape, dtype=jnp.float32, scale=0.02):
        return (scale * jax.random.normal(next(keys), shape, jnp.float32)).astype(dtype)

    def stacked_blocks(depth, dim, mlp):
        return {
            "ln1_g": jnp.ones((depth, 1, dim), jnp.float32),
            "ln1_b": jnp.zeros((depth, 1, dim), jnp.float32),
            # fused QKV projection: one [D, 3D] GEMM per layer (wide MXU RHS)
            "wqkv": nrm((depth, dim, 3 * dim), jnp.bfloat16),
            "bqkv": jnp.zeros((depth, 1, 3 * dim), jnp.float32),
            "wo": nrm((depth, dim, dim), jnp.bfloat16),
            "bo": jnp.zeros((depth, 1, dim), jnp.float32),
            "ln2_g": jnp.ones((depth, 1, dim), jnp.float32),
            "ln2_b": jnp.zeros((depth, 1, dim), jnp.float32),
            "fc1_w": nrm((depth, dim, mlp), jnp.bfloat16),
            "fc1_b": jnp.zeros((depth, 1, mlp), jnp.float32),
            "fc2_w": nrm((depth, mlp, dim), jnp.bfloat16),
            "fc2_b": jnp.zeros((depth, 1, dim), jnp.float32),
        }

    vision = {
        "patch_w": nrm((PATCH_DIM, DV), jnp.bfloat16),
        "patch_b": jnp.zeros((1, DV), jnp.float32),
        "cls": nrm((1, DV)),
        "pos": nrm((VTOK, DV)),          # per-token positional embedding (cls = row NPATCH)
        "norm_g": jnp.ones((1, DV), jnp.float32),
        "norm_b": jnp.zeros((1, DV), jnp.float32),
        **stacked_blocks(VDEPTH, DV, VMLP),
    }
    text = {
        "tok_emb": nrm((VOCAB, DT), jnp.bfloat16),
        "pos_emb": nrm((SEQ, DT)),
        "final_g": jnp.ones((1, DT), jnp.float32),
        "final_b": jnp.zeros((1, DT), jnp.float32),
        **stacked_blocks(TDEPTH, DT, TMLP),
    }
    return {"vision": vision, "text": text}


# ---------------------------------- main ------------------------------------
if __name__ == "__main__":
    root = jax.random.PRNGKey(0)
    k_param, k_img, k_txt = jax.random.split(root, 3)

    params = init_params(k_param)
    image = jax.random.normal(k_img, (B, C, IMG, IMG), dtype=jnp.float32)
    text = jax.random.randint(k_txt, (B, SEQ), 1, VOCAB, dtype=jnp.int32)

    fwd = jax.jit(lambda p, im, tx: timm_clip_adapter_forward(p, image=im, text=tx))
    out = jax.block_until_ready(fwd(params, image, text))

    # sanity shape checks mirroring the PyTorch module's outputs
    assert out["image"]["raw_features"].shape == (B, NPATCH, DV)
    assert out["image"]["features"].shape == (B, DV)
    assert out["image"]["classifier"].shape == (B, DV)
    assert len(out["image"]["per_layer_raw_features"]) == VDEPTH
    assert all(t.shape == (B, NPATCH, DV)
               for t in out["image"]["per_layer_raw_features"])
    assert out["text"]["raw_features"].shape == (B, SEQ, DT)
    assert out["text"]["features"].shape == (B, DT)
    assert bool(jnp.isfinite(out["image"]["features"]).all())
    assert bool(jnp.isfinite(out["text"]["features"]).all())

    print("KERNEL_OK")
</pallas_src>

<mosaic_0001>
module attributes {stable_mosaic.version = 11 : i64} {
  func.func @_fused_kernel(%arg0: i32, %arg1: memref<10x192xf32, #tpu.memory_space<vmem>>, %arg2: memref<10x128xf32, #tpu.memory_space<vmem>>, %arg3: memref<10x10xf32, #tpu.memory_space<vmem>>, %arg4: memref<2x8xf32, #tpu.memory_space<vmem>>, %arg5: memref<192x128xbf16, #tpu.memory_space<vmem>>, %arg6: memref<1x128xf32, #tpu.memory_space<vmem>>, %arg7: memref<1x128xf32, #tpu.memory_space<vmem>>, %arg8: memref<1x128xf32, #tpu.memory_space<vmem>>, %arg9: memref<2x1x128xf32, #tpu.memory_space<vmem>>, %arg10: memref<2x1x128xf32, #tpu.memory_space<vmem>>, %arg11: memref<2x128x384xbf16, #tpu.memory_space<vmem>>, %arg12: memref<2x1x384xf32, #tpu.memory_space<vmem>>, %arg13: memref<2x128x128xbf16, #tpu.memory_space<vmem>>, %arg14: memref<2x1x128xf32, #tpu.memory_space<vmem>>, %arg15: memref<2x1x128xf32, #tpu.memory_space<vmem>>, %arg16: memref<2x1x128xf32, #tpu.memory_space<vmem>>, %arg17: memref<2x128x256xbf16, #tpu.memory_space<vmem>>, %arg18: memref<2x1x256xf32, #tpu.memory_space<vmem>>, %arg19: memref<2x256x128xbf16, #tpu.memory_space<vmem>>, %arg20: memref<2x1x128xf32, #tpu.memory_space<vmem>>, %arg21: memref<16x64xbf16, #tpu.memory_space<vmem>>, %arg22: memref<16x128xf32, #tpu.memory_space<vmem>>, %arg23: memref<16x16xf32, #tpu.memory_space<vmem>>, %arg24: memref<2x16xf32, #tpu.memory_space<vmem>>, %arg25: memref<64x128xbf16, #tpu.memory_space<vmem>>, %arg26: memref<1x128xf32, #tpu.memory_space<vmem>>, %arg27: memref<1x128xf32, #tpu.memory_space<vmem>>, %arg28: memref<2x1x128xf32, #tpu.memory_space<vmem>>, %arg29: memref<2x1x128xf32, #tpu.memory_space<vmem>>, %arg30: memref<2x128x384xbf16, #tpu.memory_space<vmem>>, %arg31: memref<2x1x384xf32, #tpu.memory_space<vmem>>, %arg32: memref<2x128x128xbf16, #tpu.memory_space<vmem>>, %arg33: memref<2x1x128xf32, #tpu.memory_space<vmem>>, %arg34: memref<2x1x128xf32, #tpu.memory_space<vmem>>, %arg35: memref<2x1x128xf32, #tpu.memory_space<vmem>>, %arg36: memref<2x128x256xbf16, #tpu.memory_space<vmem>>, %arg37: memref<2x1x256xf32, #tpu.memory_space<vmem>>, %arg38: memref<2x256x128xbf16, #tpu.memory_space<vmem>>, %arg39: memref<2x1x128xf32, #tpu.memory_space<vmem>>, %arg40: memref<2x8x128xf32, #tpu.memory_space<vmem>>, %arg41: memref<2x128xf32, #tpu.memory_space<vmem>>, %arg42: memref<16x128xf32, #tpu.memory_space<vmem>>, %arg43: memref<2x128xf32, #tpu.memory_space<vmem>>) attributes {dimension_semantics = [#tpu.dimension_semantics<arbitrary>], iteration_bounds = array<i64: 1>, scalar_prefetch = 0 : i64, scratch_operands = 0 : i64, tpu.core_type = #tpu.core_type<tc>, window_params = [{pipeline_mode = #tpu.pipeline_mode<synchronous>, transform_indices = @transform_0, window_bounds = array<i64: 10, 192>}, {pipeline_mode = #tpu.pipeline_mode<synchronous>, transform_indices = @transform_1, window_bounds = array<i64: 10, 128>}, {pipeline_mode = #tpu.pipeline_mode<synchronous>, transform_indices = @transform_2, window_bounds = array<i64: 10, 10>}, {pipeline_mode = #tpu.pipeline_mode<synchronous>, transform_indices = @transform_3, window_bounds = array<i64: 2, 8>}, {pipeline_mode = #tpu.pipeline_mode<synchronous>, transform_indices = @transform_4, window_bounds = array<i64: 192, 128>}, {pipeline_mode = #tpu.pipeline_mode<synchronous>, transform_indices = @transform_5, window_bounds = array<i64: 1, 128>}, {pipeline_mode = #tpu.pipeline_mode<synchronous>, transform_indices = @transform_6, window_bounds = array<i64: 1, 128>}, {pipeline_mode = #tpu.pipeline_mode<synchronous>, transform_indices = @transform_7, window_bounds = array<i64: 1, 128>}, {pipeline_mode = #tpu.pipeline_mode<synchronous>, transform_indices = @transform_8, window_bounds = array<i64: 2, 1, 128>}, {pipeline_mode = #tpu.pipeline_mode<synchronous>, transform_indices = @transform_9, window_bounds = array<i64: 2, 1, 128>}, {pipeline_mode = #tpu.pipeline_mode<synchronous>, transform_indices = @transform_10, window_bounds = array<i64: 2, 128, 384>}, {pipeline_mode = #tpu.pipeline_mode<synchronous>, transform_indices = @transform_11, window_bounds = array<i64: 2, 1, 384>}, {pipeline_mode = #tpu.pipeline_mode<synchronous>, transform_indices = @transform_12, window_bounds = array<i64: 2, 128, 128>}, {pipeline_mode = #tpu.pipeline_mode<synchronous>, transform_indices = @transform_13, window_bounds = array<i64: 2, 1, 128>}, {pipeline_mode = #tpu.pipeline_mode<synchronous>, transform_indices = @transform_14, window_bounds = array<i64: 2, 1, 128>}, {pipeline_mode = #tpu.pipeline_mode<synchronous>, transform_indices = @transform_15, window_bounds = array<i64: 2, 1, 128>}, {pipeline_mode = #tpu.pipeline_mode<synchronous>, transform_indices = @transform_16, window_bounds = array<i64: 2, 128, 256>}, {pipeline_mode = #tpu.pipeline_mode<synchronous>, transform_indices = @transform_17, window_bounds = array<i64: 2, 1, 256>}, {pipeline_mode = #tpu.pipeline_mode<synchronous>, transform_indices = @transform_18, window_bounds = array<i64: 2, 256, 128>}, {pipeline_mode = #tpu.pipeline_mode<synchronous>, transform_indices = @transform_19, window_bounds = array<i64: 2, 1, 128>}, {pipeline_mode = #tpu.pipeline_mode<synchronous>, transform_indices = @transform_20, window_bounds = array<i64: 16, 64>}, {pipeline_mode = #tpu.pipeline_mode<synchronous>, transform_indices = @transform_21, window_bounds = array<i64: 16, 128>}, {pipeline_mode = #tpu.pipeline_mode<synchronous>, transform_indices = @transform_22, window_bounds = array<i64: 16, 16>}, {pipeline_mode = #tpu.pipeline_mode<synchronous>, transform_indices = @transform_23, window_bounds = array<i64: 2, 16>}, {pipeline_mode = #tpu.pipeline_mode<synchronous>, transform_indices = @transform_24, window_bounds = array<i64: 64, 128>}, {pipeline_mode = #tpu.pipeline_mode<synchronous>, transform_indices = @transform_25, window_bounds = array<i64: 1, 128>}, {pipeline_mode = #tpu.pipeline_mode<synchronous>, transform_indices = @transform_26, window_bounds = array<i64: 1, 128>}, {pipeline_mode = #tpu.pipeline_mode<synchronous>, transform_indices = @transform_27, window_bounds = array<i64: 2, 1, 128>}, {pipeline_mode = #tpu.pipeline_mode<synchronous>, transform_indices = @transform_28, window_bounds = array<i64: 2, 1, 128>}, {pipeline_mode = #tpu.pipeline_mode<synchronous>, transform_indices = @transform_29, window_bounds = array<i64: 2, 128, 384>}, {pipeline_mode = #tpu.pipeline_mode<synchronous>, transform_indices = @transform_30, window_bounds = array<i64: 2, 1, 384>}, {pipeline_mode = #tpu.pipeline_mode<synchronous>, transform_indices = @transform_31, window_bounds = array<i64: 2, 128, 128>}, {pipeline_mode = #tpu.pipeline_mode<synchronous>, transform_indices = @transform_32, window_bounds = array<i64: 2, 1, 128>}, {pipeline_mode = #tpu.pipeline_mode<synchronous>, transform_indices = @transform_33, window_bounds = array<i64: 2, 1, 128>}, {pipeline_mode = #tpu.pipeline_mode<synchronous>, transform_indices = @transform_34, window_bounds = array<i64: 2, 1, 128>}, {pipeline_mode = #tpu.pipeline_mode<synchronous>, transform_indices = @transform_35, window_bounds = array<i64: 2, 128, 256>}, {pipeline_mode = #tpu.pipeline_mode<synchronous>, transform_indices = @transform_36, window_bounds = array<i64: 2, 1, 256>}, {pipeline_mode = #tpu.pipeline_mode<synchronous>, transform_indices = @transform_37, window_bounds = array<i64: 2, 256, 128>}, {pipeline_mode = #tpu.pipeline_mode<synchronous>, transform_indices = @transform_38, window_bounds = array<i64: 2, 1, 128>}, {pipeline_mode = #tpu.pipeline_mode<synchronous>, transform_indices = @transform_39, window_bounds = array<i64: 2, 8, 128>}, {pipeline_mode = #tpu.pipeline_mode<synchronous>, transform_indices = @transform_40, window_bounds = array<i64: 2, 128>}, {pipeline_mode = #tpu.pipeline_mode<synchronous>, transform_indices = @transform_41, window_bounds = array<i64: 16, 128>}, {pipeline_mode = #tpu.pipeline_mode<synchronous>, transform_indices = @transform_42, window_bounds = array<i64: 2, 128>}]} {
    %c0 = arith.constant 0 : index
    %c0_0 = arith.constant 0 : index
    %0 = vector.load %arg3[%c0, %c0_0] : memref<10x10xf32, #tpu.memory_space<vmem>>, vector<10x10xf32>
    %c0_1 = arith.constant 0 : index
    %c0_2 = arith.constant 0 : index
    %1 = vector.load %arg1[%c0_1, %c0_2] : memref<10x192xf32, #tpu.memory_space<vmem>>, vector<10x192xf32>
    %c0_3 = arith.constant 0 : index
    %c0_4 = arith.constant 0 : index
    %2 = vector.load %arg5[%c0_3, %c0_4] : memref<192x128xbf16, #tpu.memory_space<vmem>>, vector<192x128xbf16>
    %3 = arith.truncf %1 : vector<10x192xf32> to vector<10x192xbf16>
    %cst = arith.constant dense<0.000000e+00> : vector<10x128xf32>
    %4 = tpu.matmul %3, %2, %cst {dimension_numbers = #tpu.dot_dimension_numbers<[1], [0], [0], [1], [0, 0, 1, 1], [], []>} : vector<10x192xbf16>, vector<192x128xbf16>, vector<10x128xf32> -> vector<10x128xf32>
    %c0_5 = arith.constant 0 : index
    %c0_6 = arith.constant 0 : index
    %5 = vector.load %arg6[%c0_5, %c0_6] : memref<1x128xf32, #tpu.memory_space<vmem>>, vector<1x128xf32>
    %6 = vector.broadcast %5 : vector<1x128xf32> to vector<10x128xf32>
    %7 = arith.addf %4, %6 : vector<10x128xf32>
    %c0_7 = arith.constant 0 : index
    %c0_8 = arith.constant 0 : index
    %8 = vector.load %arg2[%c0_7, %c0_8] : memref<10x128xf32, #tpu.memory_space<vmem>>, vector<10x128xf32>
    %9 = arith.addf %7, %8 : vector<10x128xf32>
    %c0_9 = arith.constant 0 : index
    %c0_10 = arith.constant 0 : index
    %c0_11 = arith.constant 0 : index
    %10 = vector.load %arg9[%c0_9, %c0_10, %c0_11] : memref<2x1x128xf32, #tpu.memory_space<vmem>>, vector<1x1x128xf32>
    %11 = vector.shape_cast %10 : vector<1x1x128xf32> to vector<1x128xf32>
    %c0_12 = arith.constant 0 : index
    %c0_13 = arith.constant 0 : index
    %c0_14 = arith.constant 0 : index
    %12 = vector.load %arg10[%c0_12, %c0_13, %c0_14] : memref<2x1x128xf32, #tpu.memory_space<vmem>>, vector<1x1x128xf32>
    %13 = vector.shape_cast %12 : vector<1x1x128xf32> to vector<1x128xf32>
    %cst_15 = arith.constant dense<0.000000e+00> : vector<10xf32>
    %14 = vector.multi_reduction <add>, %9, %cst_15 [1] : vector<10x128xf32> to vector<10xf32>
    %15 = vector.shape_cast %14 : vector<10xf32> to vector<10x1xf32>
    %cst_16 = arith.constant 1.280000e+02 : f32
    %16 = vector.broadcast %cst_16 : f32 to vector<10x1xf32>
    %17 = arith.divf %15, %16 : vector<10x1xf32>
    %18 = vector.broadcast %17 : vector<10x1xf32> to vector<10x128xf32>
    %19 = arith.subf %9, %18 : vector<10x128xf32>
    %20 = arith.mulf %19, %19 : vector<10x128xf32>
    %cst_17 = arith.constant dense<0.000000e+00> : vector<10xf32>
    %21 = vector.multi_reduction <add>, %20, %cst_17 [1] : vector<10x128xf32> to vector<10xf32>
    %22 = vector.shape_cast %21 : vector<10xf32> to vector<10x1xf32>
    %cst_18 = arith.constant 1.280000e+02 : f32
    %23 = vector.broadcast %cst_18 : f32 to vector<10x1xf32>
    %24 = arith.divf %22, %23 : vector<10x1xf32>
    %cst_19 = arith.constant 9.99999997E-7 : f32
    %25 = vector.broadcast %cst_19 : f32 to vector<10x1xf32>
    %26 = arith.addf %24, %25 : vector<10x1xf32>
    %27 = math.rsqrt %26 : vector<10x1xf32>
    %28 = vector.broadcast %27 : vector<10x1xf32> to vector<10x128xf32>
    %29 = arith.mulf %19, %28 : vector<10x128xf32>
    %30 = vector.broadcast %11 : vector<1x128xf32> to vector<10x128xf32>
    %31 = arith.mulf %29, %30 : vector<10x128xf32>
    %32 = vector.broadcast %13 : vector<1x128xf32> to vector<10x128xf32>
    %33 = arith.addf %31, %32 : vector<10x128xf32>
    %c0_20 = arith.constant 0 : index
    %c0_21 = arith.constant 0 : index
    %c0_22 = arith.constant 0 : index
    %34 = vector.load %arg11[%c0_20, %c0_21, %c0_22] : memref<2x128x384xbf16, #tpu.memory_space<vmem>>, vector<1x128x384xbf16>
    %35 = vector.shape_cast %34 : vector<1x128x384xbf16> to vector<128x384xbf16>
    %36 = arith.truncf %33 : vector<10x128xf32> to vector<10x128xbf16>
    %cst_23 = arith.constant dense<0.000000e+00> : vector<10x384xf32>
    %37 = tpu.matmul %36, %35, %cst_23 {dimension_numbers = #tpu.dot_dimension_numbers<[1], [0], [0], [1], [0, 0, 1, 1], [], []>} : vector<10x128xbf16>, vector<128x384xbf16>, vector<10x384xf32> -> vector<10x384xf32>
    %c0_24 = arith.constant 0 : index
    %c0_25 = arith.constant 0 : index
    %c0_26 = arith.constant 0 : index
    %38 = vector.load %arg12[%c0_24, %c0_25, %c0_26] : memref<2x1x384xf32, #tpu.memory_space<vmem>>, vector<1x1x384xf32>
    %39 = vector.shape_cast %38 : vector<1x1x384xf32> to vector<1x384xf32>
    %40 = vector.broadcast %39 : vector<1x384xf32> to vector<10x384xf32>
    %41 = arith.addf %37, %40 : vector<10x384xf32>
    %42 = vector.extract_strided_slice %41 {offsets = [0, 0], sizes = [10, 128], strides = [1, 1]} : vector<10x384xf32> to vector<10x128xf32>
    %43 = vector.extract_strided_slice %41 {offsets = [0, 128], sizes = [10, 128], strides = [1, 1]} : vector<10x384xf32> to vector<10x128xf32>
    %44 = vector.extract_strided_slice %41 {offsets = [0, 256], sizes = [10, 128], strides = [1, 1]} : vector<10x384xf32> to vector<10x128xf32>
    %45 = vector.extract_strided_slice %42 {offsets = [0, 0], sizes = [10, 32], strides = [1, 1]} : vector<10x128xf32> to vector<10x32xf32>
    %46 = vector.extract_strided_slice %43 {offsets = [0, 0], sizes = [10, 32], strides = [1, 1]} : vector<10x128xf32> to vector<10x32xf32>
    %47 = vector.extract_strided_slice %44 {offsets = [0, 0], sizes = [10, 32], strides = [1, 1]} : vector<10x128xf32> to vector<10x32xf32>
    %cst_27 = arith.constant dense<0.000000e+00> : vector<10x10xf32>
    %48 = tpu.matmul %45, %46, %cst_27 {dimension_numbers = #tpu.dot_dimension_numbers<[1], [1], [0], [0], [0, 0, 1, 0], [], []>} : vector<10x32xf32>, vector<10x32xf32>, vector<10x10xf32> -> vector<10x10xf32>
    %cst_28 = arith.constant 0.176776692 : f32
    %49 = vector.broadcast %cst_28 : f32 to vector<10x10xf32>
    %50 = arith.mulf %48, %49 : vector<10x10xf32>
    %51 = arith.addf %50, %0 : vector<10x10xf32>
    %cst_29 = arith.constant dense<0xFF800000> : vector<10xf32>
    %52 = vector.multi_reduction <maximumf>, %51, %cst_29 [1] : vector<10x10xf32> to vector<10xf32>
    %53 = vector.shape_cast %52 : vector<10xf32> to vector<10x1xf32>
    %54 = vector.broadcast %53 : vector<10x1xf32> to vector<10x10xf32>
    %55 = arith.subf %51, %54 : vector<10x10xf32>
    %56 = math.exp %55 : vector<10x10xf32>
    %cst_30 = arith.constant dense<0.000000e+00> : vector<10xf32>
    %57 = vector.multi_reduction <add>, %56, %cst_30 [1] : vector<10x10xf32> to vector<10xf32>
    %58 = vector.shape_cast %57 : vector<10xf32> to vector<10x1xf32>
    %59 = tpu.reciprocal %58 {approx = true} : vector<10x1xf32> -> vector<10x1xf32>
    %60 = vector.broadcast %59 : vector<10x1xf32> to vector<10x10xf32>
    %61 = arith.mulf %56, %60 : vector<10x10xf32>
    %cst_31 = arith.constant dense<0.000000e+00> : vector<10x32xf32>
    %62 = tpu.matmul %61, %47, %cst_31 {dimension_numbers = #tpu.dot_dimension_numbers<[1], [0], [0], [1], [0, 0, 1, 1], [], []>} : vector<10x10xf32>, vector<10x32xf32>, vector<10x32xf32> -> vector<10x32xf32>
    %63 = vector.extract_strided_slice %42 {offsets = [0, 32], sizes = [10, 32], strides = [1, 1]} : vector<10x128xf32> to vector<10x32xf32>
    %64 = vector.extract_strided_slice %43 {offsets = [0, 32], sizes = [10, 32], strides = [1, 1]} : vector<10x128xf32> to vector<10x32xf32>
    %65 = vector.extract_strided_slice %44 {offsets = [0, 32], sizes = [10, 32], strides = [1, 1]} : vector<10x128xf32> to vector<10x32xf32>
    %cst_32 = arith.constant dense<0.000000e+00> : vector<10x10xf32>
    %66 = tpu.matmul %63, %64, %cst_32 {dimension_numbers = #tpu.dot_dimension_numbers<[1], [1], [0], [0], [0, 0, 1, 0], [], []>} : vector<10x32xf32>, vector<10x32xf32>, vector<10x10xf32> -> vector<10x10xf32>
    %cst_33 = arith.constant 0.176776692 : f32
    %67 = vector.broadcast %cst_33 : f32 to vector<10x10xf32>
    %68 = arith.mulf %66, %67 : vector<10x10xf32>
    %69 = arith.addf %68, %0 : vector<10x10xf32>
    %cst_34 = arith.constant dense<0xFF800000> : vector<10xf32>
    %70 = vector.multi_reduction <maximumf>, %69, %cst_34 [1] : vector<10x10xf32> to vector<10xf32>
    %71 = vector.shape_cast %70 : vector<10xf32> to vector<10x1xf32>
    %72 = vector.broadcast %71 : vector<10x1xf32> to vector<10x10xf32>
    %73 = arith.subf %69, %72 : vector<10x10xf32>
    %74 = math.exp %73 : vector<10x10xf32>
    %cst_35 = arith.constant dense<0.000000e+00> : vector<10xf32>
    %75 = vector.multi_reduction <add>, %74, %cst_35 [1] : vector<10x10xf32> to vector<10xf32>
    %76 = vector.shape_cast %75 : vector<10xf32> to vector<10x1xf32>
    %77 = tpu.reciprocal %76 {approx = true} : vector<10x1xf32> -> vector<10x1xf32>
    %78 = vector.broadcast %77 : vector<10x1xf32> to vector<10x10xf32>
    %79 = arith.mulf %74, %78 : vector<10x10xf32>
    %cst_36 = arith.constant dense<0.000000e+00> : vector<10x32xf32>
    %80 = tpu.matmul %79, %65, %cst_36 {dimension_numbers = #tpu.dot_dimension_numbers<[1], [0], [0], [1], [0, 0, 1, 1], [], []>} : vector<10x10xf32>, vector<10x32xf32>, vector<10x32xf32> -> vector<10x32xf32>
    %81 = vector.extract_strided_slice %42 {offsets = [0, 64], sizes = [10, 32], strides = [1, 1]} : vector<10x128xf32> to vector<10x32xf32>
    %82 = vector.extract_strided_slice %43 {offsets = [0, 64], sizes = [10, 32], strides = [1, 1]} : vector<10x128xf32> to vector<10x32xf32>
    %83 = vector.extract_strided_slice %44 {offsets = [0, 64], sizes = [10, 32], strides = [1, 1]} : vector<10x128xf32> to vector<10x32xf32>
    %cst_37 = arith.constant dense<0.000000e+00> : vector<10x10xf32>
    %84 = tpu.matmul %81, %82, %cst_37 {dimension_numbers = #tpu.dot_dimension_numbers<[1], [1], [0], [0], [0, 0, 1, 0], [], []>} : vector<10x32xf32>, vector<10x32xf32>, vector<10x10xf32> -> vector<10x10xf32>
    %cst_38 = arith.constant 0.176776692 : f32
    %85 = vector.broadcast %cst_38 : f32 to vector<10x10xf32>
    %86 = arith.mulf %84, %85 : vector<10x10xf32>
    %87 = arith.addf %86, %0 : vector<10x10xf32>
    %cst_39 = arith.constant dense<0xFF800000> : vector<10xf32>
    %88 = vector.multi_reduction <maximumf>, %87, %cst_39 [1] : vector<10x10xf32> to vector<10xf32>
    %89 = vector.shape_cast %88 : vector<10xf32> to vector<10x1xf32>
    %90 = vector.broadcast %89 : vector<10x1xf32> to vector<10x10xf32>
    %91 = arith.subf %87, %90 : vector<10x10xf32>
    %92 = math.exp %91 : vector<10x10xf32>
    %cst_40 = arith.constant dense<0.000000e+00> : vector<10xf32>
    %93 = vector.multi_reduction <add>, %92, %cst_40 [1] : vector<10x10xf32> to vector<10xf32>
    %94 = vector.shape_cast %93 : vector<10xf32> to vector<10x1xf32>
    %95 = tpu.reciprocal %94 {approx = true} : vector<10x1xf32> -> vector<10x1xf32>
    %96 = vector.broadcast %95 : vector<10x1xf32> to vector<10x10xf32>
    %97 = arith.mulf %92, %96 : vector<10x10xf32>
    %cst_41 = arith.constant dense<0.000000e+00> : vector<10x32xf32>
    %98 = tpu.matmul %97, %83, %cst_41 {dimension_numbers = #tpu.dot_dimension_numbers<[1], [0], [0], [1], [0, 0, 1, 1], [], []>} : vector<10x10xf32>, vector<10x32xf32>, vector<10x32xf32> -> vector<10x32xf32>
    %99 = vector.extract_strided_slice %42 {offsets = [0, 96], sizes = [10, 32], strides = [1, 1]} : vector<10x128xf32> to vector<10x32xf32>
    %100 = vector.extract_strided_slice %43 {offsets = [0, 96], sizes = [10, 32], strides = [1, 1]} : vector<10x128xf32> to vector<10x32xf32>
    %101 = vector.extract_strided_slice %44 {offsets = [0, 96], sizes = [10, 32], strides = [1, 1]} : vector<10x128xf32> to vector<10x32xf32>
    %cst_42 = arith.constant dense<0.000000e+00> : vector<10x10xf32>
    %102 = tpu.matmul %99, %100, %cst_42 {dimension_numbers = #tpu.dot_dimension_numbers<[1], [1], [0], [0], [0, 0, 1, 0], [], []>} : vector<10x32xf32>, vector<10x32xf32>, vector<10x10xf32> -> vector<10x10xf32>
    %cst_43 = arith.constant 0.176776692 : f32
    %103 = vector.broadcast %cst_43 : f32 to vector<10x10xf32>
    %104 = arith.mulf %102, %103 : vector<10x10xf32>
    %105 = arith.addf %104, %0 : vector<10x10xf32>
    %cst_44 = arith.constant dense<0xFF800000> : vector<10xf32>
    %106 = vector.multi_reduction <maximumf>, %105, %cst_44 [1] : vector<10x10xf32> to vector<10xf32>
    %107 = vector.shape_cast %106 : vector<10xf32> to vector<10x1xf32>
    %108 = vector.broadcast %107 : vector<10x1xf32> to vector<10x10xf32>
    %109 = arith.subf %105, %108 : vector<10x10xf32>
    %110 = math.exp %109 : vector<10x10xf32>
    %cst_45 = arith.constant dense<0.000000e+00> : vector<10xf32>
    %111 = vector.multi_reduction <add>, %110, %cst_45 [1] : vector<10x10xf32> to vector<10xf32>
    %112 = vector.shape_cast %111 : vector<10xf32> to vector<10x1xf32>
    %113 = tpu.reciprocal %112 {approx = true} : vector<10x1xf32> -> vector<10x1xf32>
    %114 = vector.broadcast %113 : vector<10x1xf32> to vector<10x10xf32>
    %115 = arith.mulf %110, %114 : vector<10x10xf32>
    %cst_46 = arith.constant dense<0.000000e+00> : vector<10x32xf32>
    %116 = tpu.matmul %115, %101, %cst_46 {dimension_numbers = #tpu.dot_dimension_numbers<[1], [0], [0], [1], [0, 0, 1, 1], [], []>} : vector<10x10xf32>, vector<10x32xf32>, vector<10x32xf32> -> vector<10x32xf32>
    %117 = tpu.concatenate %62, %80, %98, %116 in 1 : vector<10x32xf32>, vector<10x32xf32>, vector<10x32xf32>, vector<10x32xf32> -> vector<10x128xf32>
    %c0_47 = arith.constant 0 : index
    %c0_48 = arith.constant 0 : index
    %c0_49 = arith.constant 0 : index
    %118 = vector.load %arg13[%c0_47, %c0_48, %c0_49] : memref<2x128x128xbf16, #tpu.memory_space<vmem>>, vector<1x128x128xbf16>
    %119 = vector.shape_cast %118 : vector<1x128x128xbf16> to vector<128x128xbf16>
    %120 = arith.truncf %117 : vector<10x128xf32> to vector<10x128xbf16>
    %cst_50 = arith.constant dense<0.000000e+00> : vector<10x128xf32>
    %121 = tpu.matmul %120, %119, %cst_50 {dimension_numbers = #tpu.dot_dimension_numbers<[1], [0], [0], [1], [0, 0, 1, 1], [], []>} : vector<10x128xbf16>, vector<128x128xbf16>, vector<10x128xf32> -> vector<10x128xf32>
    %c0_51 = arith.constant 0 : index
    %c0_52 = arith.constant 0 : index
    %c0_53 = arith.constant 0 : index
    %122 = vector.load %arg14[%c0_51, %c0_52, %c0_53] : memref<2x1x128xf32, #tpu.memory_space<vmem>>, vector<1x1x128xf32>
    %123 = vector.shape_cast %122 : vector<1x1x128xf32> to vector<1x128xf32>
    %124 = vector.broadcast %123 : vector<1x128xf32> to vector<10x128xf32>
    %125 = arith.addf %121, %124 : vector<10x128xf32>
    %126 = arith.addf %9, %125 : vector<10x128xf32>
    %c0_54 = arith.constant 0 : index
    %c0_55 = arith.constant 0 : index
    %c0_56 = arith.constant 0 : index
    %127 = vector.load %arg15[%c0_54, %c0_55, %c0_56] : memref<2x1x128xf32, #tpu.memory_space<vmem>>, vector<1x1x128xf32>
    %128 = vector.shape_cast %127 : vector<1x1x128xf32> to vector<1x128xf32>
    %c0_57 = arith.constant 0 : index
    %c0_58 = arith.constant 0 : index
    %c0_59 = arith.constant 0 : index
    %129 = vector.load %arg16[%c0_57, %c0_58, %c0_59] : memref<2x1x128xf32, #tpu.memory_space<vmem>>, vector<1x1x128xf32>
    %130 = vector.shape_cast %129 : vector<1x1x128xf32> to vector<1x128xf32>
    %cst_60 = arith.constant dense<0.000000e+00> : vector<10xf32>
    %131 = vector.multi_reduction <add>, %126, %cst_60 [1] : vector<10x128xf32> to vector<10xf32>
    %132 = vector.shape_cast %131 : vector<10xf32> to vector<10x1xf32>
    %cst_61 = arith.constant 1.280000e+02 : f32
    %133 = vector.broadcast %cst_61 : f32 to vector<10x1xf32>
    %134 = arith.divf %132, %133 : vector<10x1xf32>
    %135 = vector.broadcast %134 : vector<10x1xf32> to vector<10x128xf32>
    %136 = arith.subf %126, %135 : vector<10x128xf32>
    %137 = arith.mulf %136, %136 : vector<10x128xf32>
    %cst_62 = arith.constant dense<0.000000e+00> : vector<10xf32>
    %138 = vector.multi_reduction <add>, %137, %cst_62 [1] : vector<10x128xf32> to vector<10xf32>
    %139 = vector.shape_cast %138 : vector<10xf32> to vector<10x1xf32>
    %cst_63 = arith.constant 1.280000e+02 : f32
    %140 = vector.broadcast %cst_63 : f32 to vector<10x1xf32>
    %141 = arith.divf %139, %140 : vector<10x1xf32>
    %cst_64 = arith.constant 9.99999997E-7 : f32
    %142 = vector.broadcast %cst_64 : f32 to vector<10x1xf32>
    %143 = arith.addf %141, %142 : vector<10x1xf32>
    %144 = math.rsqrt %143 : vector<10x1xf32>
    %145 = vector.broadcast %144 : vector<10x1xf32> to vector<10x128xf32>
    %146 = arith.mulf %136, %145 : vector<10x128xf32>
    %147 = vector.broadcast %128 : vector<1x128xf32> to vector<10x128xf32>
    %148 = arith.mulf %146, %147 : vector<10x128xf32>
    %149 = vector.broadcast %130 : vector<1x128xf32> to vector<10x128xf32>
    %150 = arith.addf %148, %149 : vector<10x128xf32>
    %c0_65 = arith.constant 0 : index
    %c0_66 = arith.constant 0 : index
    %c0_67 = arith.constant 0 : index
    %151 = vector.load %arg17[%c0_65, %c0_66, %c0_67] : memref<2x128x256xbf16, #tpu.memory_space<vmem>>, vector<1x128x256xbf16>
    %152 = vector.shape_cast %151 : vector<1x128x256xbf16> to vector<128x256xbf16>
    %153 = arith.truncf %150 : vector<10x128xf32> to vector<10x128xbf16>
    %cst_68 = arith.constant dense<0.000000e+00> : vector<10x256xf32>
    %154 = tpu.matmul %153, %152, %cst_68 {dimension_numbers = #tpu.dot_dimension_numbers<[1], [0], [0], [1], [0, 0, 1, 1], [], []>} : vector<10x128xbf16>, vector<128x256xbf16>, vector<10x256xf32> -> vector<10x256xf32>
    %c0_69 = arith.constant 0 : index
    %c0_70 = arith.constant 0 : index
    %c0_71 = arith.constant 0 : index
    %155 = vector.load %arg18[%c0_69, %c0_70, %c0_71] : memref<2x1x256xf32, #tpu.memory_space<vmem>>, vector<1x1x256xf32>
    %156 = vector.shape_cast %155 : vector<1x1x256xf32> to vector<1x256xf32>
    %157 = vector.broadcast %156 : vector<1x256xf32> to vector<10x256xf32>
    %158 = arith.addf %154, %157 : vector<10x256xf32>
    %cst_72 = arith.constant 5.000000e-01 : f32
    %159 = vector.broadcast %cst_72 : f32 to vector<10x256xf32>
    %160 = arith.mulf %159, %158 : vector<10x256xf32>
    %cst_73 = arith.constant 4.471500e-02 : f32
    %161 = vector.broadcast %cst_73 : f32 to vector<10x256xf32>
    %162 = arith.mulf %161, %158 : vector<10x256xf32>
    %163 = arith.mulf %162, %158 : vector<10x256xf32>
    %164 = arith.mulf %163, %158 : vector<10x256xf32>
    %165 = arith.addf %158, %164 : vector<10x256xf32>
    %cst_74 = arith.constant 0.797884583 : f32
    %166 = vector.broadcast %cst_74 : f32 to vector<10x256xf32>
    %167 = arith.mulf %166, %165 : vector<10x256xf32>
    %168 = math.tanh %167 : vector<10x256xf32>
    %cst_75 = arith.constant 1.000000e+00 : f32
    %169 = vector.broadcast %cst_75 : f32 to vector<10x256xf32>
    %170 = arith.addf %169, %168 : vector<10x256xf32>
    %171 = arith.mulf %160, %170 : vector<10x256xf32>
    %c0_76 = arith.constant 0 : index
    %c0_77 = arith.constant 0 : index
    %c0_78 = arith.constant 0 : index
    %172 = vector.load %arg19[%c0_76, %c0_77, %c0_78] : memref<2x256x128xbf16, #tpu.memory_space<vmem>>, vector<1x256x128xbf16>
    %173 = vector.shape_cast %172 : vector<1x256x128xbf16> to vector<256x128xbf16>
    %174 = arith.truncf %171 : vector<10x256xf32> to vector<10x256xbf16>
    %cst_79 = arith.constant dense<0.000000e+00> : vector<10x128xf32>
    %175 = tpu.matmul %174, %173, %cst_79 {dimension_numbers = #tpu.dot_dimension_numbers<[1], [0], [0], [1], [0, 0, 1, 1], [], []>} : vector<10x256xbf16>, vector<256x128xbf16>, vector<10x128xf32> -> vector<10x128xf32>
    %c0_80 = arith.constant 0 : index
    %c0_81 = arith.constant 0 : index
    %c0_82 = arith.constant 0 : index
    %176 = vector.load %arg20[%c0_80, %c0_81, %c0_82] : memref<2x1x128xf32, #tpu.memory_space<vmem>>, vector<1x1x128xf32>
    %177 = vector.shape_cast %176 : vector<1x1x128xf32> to vector<1x128xf32>
    %178 = vector.broadcast %177 : vector<1x128xf32> to vector<10x128xf32>
    %179 = arith.addf %175, %178 : vector<10x128xf32>
    %180 = arith.addf %126, %179 : vector<10x128xf32>
    %c0_83 = arith.constant 0 : index
    %c0_84 = arith.constant 0 : index
    %181 = vector.load %arg7[%c0_83, %c0_84] : memref<1x128xf32, #tpu.memory_space<vmem>>, vector<1x128xf32>
    %c0_85 = arith.constant 0 : index
    %c0_86 = arith.constant 0 : index
    %182 = vector.load %arg8[%c0_85, %c0_86] : memref<1x128xf32, #tpu.memory_space<vmem>>, vector<1x128xf32>
    %cst_87 = arith.constant dense<0.000000e+00> : vector<10xf32>
    %183 = vector.multi_reduction <add>, %180, %cst_87 [1] : vector<10x128xf32> to vector<10xf32>
    %184 = vector.shape_cast %183 : vector<10xf32> to vector<10x1xf32>
    %cst_88 = arith.constant 1.280000e+02 : f32
    %185 = vector.broadcast %cst_88 : f32 to vector<10x1xf32>
    %186 = arith.divf %184, %185 : vector<10x1xf32>
    %187 = vector.broadcast %186 : vector<10x1xf32> to vector<10x128xf32>
    %188 = arith.subf %180, %187 : vector<10x128xf32>
    %189 = arith.mulf %188, %188 : vector<10x128xf32>
    %cst_89 = arith.constant dense<0.000000e+00> : vector<10xf32>
    %190 = vector.multi_reduction <add>, %189, %cst_89 [1] : vector<10x128xf32> to vector<10xf32>
    %191 = vector.shape_cast %190 : vector<10xf32> to vector<10x1xf32>
    %cst_90 = arith.constant 1.280000e+02 : f32
    %192 = vector.broadcast %cst_90 : f32 to vector<10x1xf32>
    %193 = arith.divf %191, %192 : vector<10x1xf32>
    %cst_91 = arith.constant 9.99999997E-7 : f32
    %194 = vector.broadcast %cst_91 : f32 to vector<10x1xf32>
    %195 = arith.addf %193, %194 : vector<10x1xf32>
    %196 = math.rsqrt %195 : vector<10x1xf32>
    %197 = vector.broadcast %196 : vector<10x1xf32> to vector<10x128xf32>
    %198 = arith.mulf %188, %197 : vector<10x128xf32>
    %199 = vector.broadcast %181 : vector<1x128xf32> to vector<10x128xf32>
    %200 = arith.mulf %198, %199 : vector<10x128xf32>
    %201 = vector.broadcast %182 : vector<1x128xf32> to vector<10x128xf32>
    %202 = arith.addf %200, %201 : vector<10x128xf32>
    %203 = vector.extract_strided_slice %202 {offsets = [0, 0], sizes = [8, 128], strides = [1, 1]} : vector<10x128xf32> to vector<8x128xf32>
    %c0_92 = arith.constant 0 : index
    %c0_93 = arith.constant 0 : index
    %c0_94 = arith.constant 0 : index
    %204 = vector.load %arg40[%c0_92, %c0_93, %c0_94] : memref<2x8x128xf32, #tpu.memory_space<vmem>>, vector<1x8x128xf32>
    %205 = vector.shape_cast %204 : vector<1x8x128xf32> to vector<8x128xf32>
    %206 = vector.shape_cast %203 : vector<8x128xf32> to vector<1x8x128xf32>
    tpu.vector_store %arg40[%c0_92, %c0_93, %c0_94], %206 {strides = array<i32>} : memref<2x8x128xf32, #tpu.memory_space<vmem>>, vector<1x8x128xf32>,
    %c1 = arith.constant 1 : index
    %c0_95 = arith.constant 0 : index
    %c0_96 = arith.constant 0 : index
    %207 = vector.load %arg9[%c1, %c0_95, %c0_96] : memref<2x1x128xf32, #tpu.memory_space<vmem>>, vector<1x1x128xf32>
    %208 = vector.shape_cast %207 : vector<1x1x128xf32> to vector<1x128xf32>
    %c1_97 = arith.constant 1 : index
    %c0_98 = arith.constant 0 : index
    %c0_99 = arith.constant 0 : index
    %209 = vector.load %arg10[%c1_97, %c0_98, %c0_99] : memref<2x1x128xf32, #tpu.memory_space<vmem>>, vector<1x1x128xf32>
    %210 = vector.shape_cast %209 : vector<1x1x128xf32> to vector<1x128xf32>
    %cst_100 = arith.constant dense<0.000000e+00> : vector<10xf32>
    %211 = vector.multi_reduction <add>, %180, %cst_100 [1] : vector<10x128xf32> to vector<10xf32>
    %212 = vector.shape_cast %211 : vector<10xf32> to vector<10x1xf32>
    %cst_101 = arith.constant 1.280000e+02 : f32
    %213 = vector.broadcast %cst_101 : f32 to vector<10x1xf32>
    %214 = arith.divf %212, %213 : vector<10x1xf32>
    %215 = vector.broadcast %214 : vector<10x1xf32> to vector<10x128xf32>
    %216 = arith.subf %180, %215 : vector<10x128xf32>
    %217 = arith.mulf %216, %216 : vector<10x128xf32>
    %cst_102 = arith.constant dense<0.000000e+00> : vector<10xf32>
    %218 = vector.multi_reduction <add>, %217, %cst_102 [1] : vector<10x128xf32> to vector<10xf32>
    %219 = vector.shape_cast %218 : vector<10xf32> to vector<10x1xf32>
    %cst_103 = arith.constant 1.280000e+02 : f32
    %220 = vector.broadcast %cst_103 : f32 to vector<10x1xf32>
    %221 = arith.divf %219, %220 : vector<10x1xf32>
    %cst_104 = arith.constant 9.99999997E-7 : f32
    %222 = vector.broadcast %cst_104 : f32 to vector<10x1xf32>
    %223 = arith.addf %221, %222 : vector<10x1xf32>
    %224 = math.rsqrt %223 : vector<10x1xf32>
    %225 = vector.broadcast %224 : vector<10x1xf32> to vector<10x128xf32>
    %226 = arith.mulf %216, %225 : vector<10x128xf32>
    %227 = vector.broadcast %208 : vector<1x128xf32> to vector<10x128xf32>
    %228 = arith.mulf %226, %227 : vector<10x128xf32>
    %229 = vector.broadcast %210 : vector<1x128xf32> to vector<10x128xf32>
    %230 = arith.addf %228, %229 : vector<10x128xf32>
    %c1_105 = arith.constant 1 : index
    %c0_106 = arith.constant 0 : index
    %c0_107 = arith.constant 0 : index
    %231 = vector.load %arg11[%c1_105, %c0_106, %c0_107] : memref<2x128x384xbf16, #tpu.memory_space<vmem>>, vector<1x128x384xbf16>
    %232 = vector.shape_cast %231 : vector<1x128x384xbf16> to vector<128x384xbf16>
    %233 = arith.truncf %230 : vector<10x128xf32> to vector<10x128xbf16>
    %cst_108 = arith.constant dense<0.000000e+00> : vector<10x384xf32>
    %234 = tpu.matmul %233, %232, %cst_108 {dimension_numbers = #tpu.dot_dimension_numbers<[1], [0], [0], [1], [0, 0, 1, 1], [], []>} : vector<10x128xbf16>, vector<128x384xbf16>, vector<10x384xf32> -> vector<10x384xf32>
    %c1_109 = arith.constant 1 : index
    %c0_110 = arith.constant 0 : index
    %c0_111 = arith.constant 0 : index
    %235 = vector.load %arg12[%c1_109, %c0_110, %c0_111] : memref<2x1x384xf32, #tpu.memory_space<vmem>>, vector<1x1x384xf32>
    %236 = vector.shape_cast %235 : vector<1x1x384xf32> to vector<1x384xf32>
    %237 = vector.broadcast %236 : vector<1x384xf32> to vector<10x384xf32>
    %238 = arith.addf %234, %237 : vector<10x384xf32>
    %239 = vector.extract_strided_slice %238 {offsets = [0, 0], sizes = [10, 128], strides = [1, 1]} : vector<10x384xf32> to vector<10x128xf32>
    %240 = vector.extract_strided_slice %238 {offsets = [0, 128], sizes = [10, 128], strides = [1, 1]} : vector<10x384xf32> to vector<10x128xf32>
    %241 = vector.extract_strided_slice %238 {offsets = [0, 256], sizes = [10, 128], strides = [1, 1]} : vector<10x384xf32> to vector<10x128xf32>
    %242 = vector.extract_strided_slice %239 {offsets = [0, 0], sizes = [10, 32], strides = [1, 1]} : vector<10x128xf32> to vector<10x32xf32>
    %243 = vector.extract_strided_slice %240 {offsets = [0, 0], sizes = [10, 32], strides = [1, 1]} : vector<10x128xf32> to vector<10x32xf32>
    %244 = vector.extract_strided_slice %241 {offsets = [0, 0], sizes = [10, 32], strides = [1, 1]} : vector<10x128xf32> to vector<10x32xf32>
    %cst_112 = arith.constant dense<0.000000e+00> : vector<10x10xf32>
    %245 = tpu.matmul %242, %243, %cst_112 {dimension_numbers = #tpu.dot_dimension_numbers<[1], [1], [0], [0], [0, 0, 1, 0], [], []>} : vector<10x32xf32>, vector<10x32xf32>, vector<10x10xf32> -> vector<10x10xf32>
    %cst_113 = arith.constant 0.176776692 : f32
    %246 = vector.broadcast %cst_113 : f32 to vector<10x10xf32>
    %247 = arith.mulf %245, %246 : vector<10x10xf32>
    %248 = arith.addf %247, %0 : vector<10x10xf32>
    %cst_114 = arith.constant dense<0xFF800000> : vector<10xf32>
    %249 = vector.multi_reduction <maximumf>, %248, %cst_114 [1] : vector<10x10xf32> to vector<10xf32>
    %250 = vector.shape_cast %249 : vector<10xf32> to vector<10x1xf32>
    %251 = vector.broadcast %250 : vector<10x1xf32> to vector<10x10xf32>
    %252 = arith.subf %248, %251 : vector<10x10xf32>
    %253 = math.exp %252 : vector<10x10xf32>
    %cst_115 = arith.constant dense<0.000000e+00> : vector<10xf32>
    %254 = vector.multi_reduction <add>, %253, %cst_115 [1] : vector<10x10xf32> to vector<10xf32>
    %255 = vector.shape_cast %254 : vector<10xf32> to vector<10x1xf32>
    %256 = tpu.reciprocal %255 {approx = true} : vector<10x1xf32> -> vector<10x1xf32>
    %257 = vector.broadcast %256 : vector<10x1xf32> to vector<10x10xf32>
    %258 = arith.mulf %253, %257 : vector<10x10xf32>
    %cst_116 = arith.constant dense<0.000000e+00> : vector<10x32xf32>
    %259 = tpu.matmul %258, %244, %cst_116 {dimension_numbers = #tpu.dot_dimension_numbers<[1], [0], [0], [1], [0, 0, 1, 1], [], []>} : vector<10x10xf32>, vector<10x32xf32>, vector<10x32xf32> -> vector<10x32xf32>
    %260 = vector.extract_strided_slice %239 {offsets = [0, 32], sizes = [10, 32], strides = [1, 1]} : vector<10x128xf32> to vector<10x32xf32>
    %261 = vector.extract_strided_slice %240 {offsets = [0, 32], sizes = [10, 32], strides = [1, 1]} : vector<10x128xf32> to vector<10x32xf32>
    %262 = vector.extract_strided_slice %241 {offsets = [0, 32], sizes = [10, 32], strides = [1, 1]} : vector<10x128xf32> to vector<10x32xf32>
    %cst_117 = arith.constant dense<0.000000e+00> : vector<10x10xf32>
    %263 = tpu.matmul %260, %261, %cst_117 {dimension_numbers = #tpu.dot_dimension_numbers<[1], [1], [0], [0], [0, 0, 1, 0], [], []>} : vector<10x32xf32>, vector<10x32xf32>, vector<10x10xf32> -> vector<10x10xf32>
    %cst_118 = arith.constant 0.176776692 : f32
    %264 = vector.broadcast %cst_118 : f32 to vector<10x10xf32>
    %265 = arith.mulf %263, %264 : vector<10x10xf32>
    %266 = arith.addf %265, %0 : vector<10x10xf32>
    %cst_119 = arith.constant dense<0xFF800000> : vector<10xf32>
    %267 = vector.multi_reduction <maximumf>, %266, %cst_119 [1] : vector<10x10xf32> to vector<10xf32>
    %268 = vector.shape_cast %267 : vector<10xf32> to vector<10x1xf32>
    %269 = vector.broadcast %268 : vector<10x1xf32> to vector<10x10xf32>
    %270 = arith.subf %266, %269 : vector<10x10xf32>
    %271 = math.exp %270 : vector<10x10xf32>
    %cst_120 = arith.constant dense<0.000000e+00> : vector<10xf32>
    %272 = vector.multi_reduction <add>, %271, %cst_120 [1] : vector<10x10xf32> to vector<10xf32>
    %273 = vector.shape_cast %272 : vector<10xf32> to vector<10x1xf32>
    %274 = tpu.reciprocal %273 {approx = true} : vector<10x1xf32> -> vector<10x1xf32>
    %275 = vector.broadcast %274 : vector<10x1xf32> to vector<10x10xf32>
    %276 = arith.mulf %271, %275 : vector<10x10xf32>
    %cst_121 = arith.constant dense<0.000000e+00> : vector<10x32xf32>
    %277 = tpu.matmul %276, %262, %cst_121 {dimension_numbers = #tpu.dot_dimension_numbers<[1], [0], [0], [1], [0, 0, 1, 1], [], []>} : vector<10x10xf32>, vector<10x32xf32>, vector<10x32xf32> -> vector<10x32xf32>
    %278 = vector.extract_strided_slice %239 {offsets = [0, 64], sizes = [10, 32], strides = [1, 1]} : vector<10x128xf32> to vector<10x32xf32>
    %279 = vector.extract_strided_slice %240 {offsets = [0, 64], sizes = [10, 32], strides = [1, 1]} : vector<10x128xf32> to vector<10x32xf32>
    %280 = vector.extract_strided_slice %241 {offsets = [0, 64], sizes = [10, 32], strides = [1, 1]} : vector<10x128xf32> to vector<10x32xf32>
    %cst_122 = arith.constant dense<0.000000e+00> : vector<10x10xf32>
    %281 = tpu.matmul %278, %279, %cst_122 {dimension_numbers = #tpu.dot_dimension_numbers<[1], [1], [0], [0], [0, 0, 1, 0], [], []>} : vector<10x32xf32>, vector<10x32xf32>, vector<10x10xf32> -> vector<10x10xf32>
    %cst_123 = arith.constant 0.176776692 : f32
    %282 = vector.broadcast %cst_123 : f32 to vector<10x10xf32>
    %283 = arith.mulf %281, %282 : vector<10x10xf32>
    %284 = arith.addf %283, %0 : vector<10x10xf32>
    %cst_124 = arith.constant dense<0xFF800000> : vector<10xf32>
    %285 = vector.multi_reduction <maximumf>, %284, %cst_124 [1] : vector<10x10xf32> to vector<10xf32>
    %286 = vector.shape_cast %285 : vector<10xf32> to vector<10x1xf32>
    %287 = vector.broadcast %286 : vector<10x1xf32> to vector<10x10xf32>
    %288 = arith.subf %284, %287 : vector<10x10xf32>
    %289 = math.exp %288 : vector<10x10xf32>
    %cst_125 = arith.constant dense<0.000000e+00> : vector<10xf32>
    %290 = vector.multi_reduction <add>, %289, %cst_125 [1] : vector<10x10xf32> to vector<10xf32>
    %291 = vector.shape_cast %290 : vector<10xf32> to vector<10x1xf32>
    %292 = tpu.reciprocal %291 {approx = true} : vector<10x1xf32> -> vector<10x1xf32>
    %293 = vector.broadcast %292 : vector<10x1xf32> to vector<10x10xf32>
    %294 = arith.mulf %289, %293 : vector<10x10xf32>
    %cst_126 = arith.constant dense<0.000000e+00> : vector<10x32xf32>
    %295 = tpu.matmul %294, %280, %cst_126 {dimension_numbers = #tpu.dot_dimension_numbers<[1], [0], [0], [1], [0, 0, 1, 1], [], []>} : vector<10x10xf32>, vector<10x32xf32>, vector<10x32xf32> -> vector<10x32xf32>
    %296 = vector.extract_strided_slice %239 {offsets = [0, 96], sizes = [10, 32], strides = [1, 1]} : vector<10x128xf32> to vector<10x32xf32>
    %297 = vector.extract_strided_slice %240 {offsets = [0, 96], sizes = [10, 32], strides = [1, 1]} : vector<10x128xf32> to vector<10x32xf32>
    %298 = vector.extract_strided_slice %241 {offsets = [0, 96], sizes = [10, 32], strides = [1, 1]} : vector<10x128xf32> to vector<10x32xf32>
    %cst_127 = arith.constant dense<0.000000e+00> : vector<10x10xf32>
    %299 = tpu.matmul %296, %297, %cst_127 {dimension_numbers = #tpu.dot_dimension_numbers<[1], [1], [0], [0], [0, 0, 1, 0], [], []>} : vector<10x32xf32>, vector<10x32xf32>, vector<10x10xf32> -> vector<10x10xf32>
    %cst_128 = arith.constant 0.176776692 : f32
    %300 = vector.broadcast %cst_128 : f32 to vector<10x10xf32>
    %301 = arith.mulf %299, %300 : vector<10x10xf32>
    %302 = arith.addf %301, %0 : vector<10x10xf32>
    %cst_129 = arith.constant dense<0xFF800000> : vector<10xf32>
    %303 = vector.multi_reduction <maximumf>, %302, %cst_129 [1] : vector<10x10xf32> to vector<10xf32>
    %304 = vector.shape_cast %303 : vector<10xf32> to vector<10x1xf32>
    %305 = vector.broadcast %304 : vector<10x1xf32> to vector<10x10xf32>
    %306 = arith.subf %302, %305 : vector<10x10xf32>
    %307 = math.exp %306 : vector<10x10xf32>
    %cst_130 = arith.constant dense<0.000000e+00> : vector<10xf32>
    %308 = vector.multi_reduction <add>, %307, %cst_130 [1] : vector<10x10xf32> to vector<10xf32>
    %309 = vector.shape_cast %308 : vector<10xf32> to vector<10x1xf32>
    %310 = tpu.reciprocal %309 {approx = true} : vector<10x1xf32> -> vector<10x1xf32>
    %311 = vector.broadcast %310 : vector<10x1xf32> to vector<10x10xf32>
    %312 = arith.mulf %307, %311 : vector<10x10xf32>
    %cst_131 = arith.constant dense<0.000000e+00> : vector<10x32xf32>
    %313 = tpu.matmul %312, %298, %cst_131 {dimension_numbers = #tpu.dot_dimension_numbers<[1], [0], [0], [1], [0, 0, 1, 1], [], []>} : vector<10x10xf32>, vector<10x32xf32>, vector<10x32xf32> -> vector<10x32xf32>
    %314 = tpu.concatenate %259, %277, %295, %313 in 1 : vector<10x32xf32>, vector<10x32xf32>, vector<10x32xf32>, vector<10x32xf32> -> vector<10x128xf32>
    %c1_132 = arith.constant 1 : index
    %c0_133 = arith.constant 0 : index
    %c0_134 = arith.constant 0 : index
    %315 = vector.load %arg13[%c1_132, %c0_133, %c0_134] : memref<2x128x128xbf16, #tpu.memory_space<vmem>>, vector<1x128x128xbf16>
    %316 = vector.shape_cast %315 : vector<1x128x128xbf16> to vector<128x128xbf16>
    %317 = arith.truncf %314 : vector<10x128xf32> to vector<10x128xbf16>
    %cst_135 = arith.constant dense<0.000000e+00> : vector<10x128xf32>
    %318 = tpu.matmul %317, %316, %cst_135 {dimension_numbers = #tpu.dot_dimension_numbers<[1], [0], [0], [1], [0, 0, 1, 1], [], []>} : vector<10x128xbf16>, vector<128x128xbf16>, vector<10x128xf32> -> vector<10x128xf32>
    %c1_136 = arith.constant 1 : index
    %c0_137 = arith.constant 0 : index
    %c0_138 = arith.constant 0 : index
    %319 = vector.load %arg14[%c1_136, %c0_137, %c0_138] : memref<2x1x128xf32, #tpu.memory_space<vmem>>, vector<1x1x128xf32>
    %320 = vector.shape_cast %319 : vector<1x1x128xf32> to vector<1x128xf32>
    %321 = vector.broadcast %320 : vector<1x128xf32> to vector<10x128xf32>
    %322 = arith.addf %318, %321 : vector<10x128xf32>
    %323 = arith.addf %180, %322 : vector<10x128xf32>
    %c1_139 = arith.constant 1 : index
    %c0_140 = arith.constant 0 : index
    %c0_141 = arith.constant 0 : index
    %324 = vector.load %arg15[%c1_139, %c0_140, %c0_141] : memref<2x1x128xf32, #tpu.memory_space<vmem>>, vector<1x1x128xf32>
    %325 = vector.shape_cast %324 : vector<1x1x128xf32> to vector<1x128xf32>
    %c1_142 = arith.constant 1 : index
    %c0_143 = arith.constant 0 : index
    %c0_144 = arith.constant 0 : index
    %326 = vector.load %arg16[%c1_142, %c0_143, %c0_144] : memref<2x1x128xf32, #tpu.memory_space<vmem>>, vector<1x1x128xf32>
    %327 = vector.shape_cast %326 : vector<1x1x128xf32> to vector<1x128xf32>
    %cst_145 = arith.constant dense<0.000000e+00> : vector<10xf32>
    %328 = vector.multi_reduction <add>, %323, %cst_145 [1] : vector<10x128xf32> to vector<10xf32>
    %329 = vector.shape_cast %328 : vector<10xf32> to vector<10x1xf32>
    %cst_146 = arith.constant 1.280000e+02 : f32
    %330 = vector.broadcast %cst_146 : f32 to vector<10x1xf32>
    %331 = arith.divf %329, %330 : vector<10x1xf32>
    %332 = vector.broadcast %331 : vector<10x1xf32> to vector<10x128xf32>
    %333 = arith.subf %323, %332 : vector<10x128xf32>
    %334 = arith.mulf %333, %333 : vector<10x128xf32>
    %cst_147 = arith.constant dense<0.000000e+00> : vector<10xf32>
    %335 = vector.multi_reduction <add>, %334, %cst_147 [1] : vector<10x128xf32> to vector<10xf32>
    %336 = vector.shape_cast %335 : vector<10xf32> to vector<10x1xf32>
    %cst_148 = arith.constant 1.280000e+02 : f32
    %337 = vector.broadcast %cst_148 : f32 to vector<10x1xf32>
    %338 = arith.divf %336, %337 : vector<10x1xf32>
    %cst_149 = arith.constant 9.99999997E-7 : f32
    %339 = vector.broadcast %cst_149 : f32 to vector<10x1xf32>
    %340 = arith.addf %338, %339 : vector<10x1xf32>
    %341 = math.rsqrt %340 : vector<10x1xf32>
    %342 = vector.broadcast %341 : vector<10x1xf32> to vector<10x128xf32>
    %343 = arith.mulf %333, %342 : vector<10x128xf32>
    %344 = vector.broadcast %325 : vector<1x128xf32> to vector<10x128xf32>
    %345 = arith.mulf %343, %344 : vector<10x128xf32>
    %346 = vector.broadcast %327 : vector<1x128xf32> to vector<10x128xf32>
    %347 = arith.addf %345, %346 : vector<10x128xf32>
    %c1_150 = arith.constant 1 : index
    %c0_151 = arith.constant 0 : index
    %c0_152 = arith.constant 0 : index
    %348 = vector.load %arg17[%c1_150, %c0_151, %c0_152] : memref<2x128x256xbf16, #tpu.memory_space<vmem>>, vector<1x128x256xbf16>
    %349 = vector.shape_cast %348 : vector<1x128x256xbf16> to vector<128x256xbf16>
    %350 = arith.truncf %347 : vector<10x128xf32> to vector<10x128xbf16>
    %cst_153 = arith.constant dense<0.000000e+00> : vector<10x256xf32>
    %351 = tpu.matmul %350, %349, %cst_153 {dimension_numbers = #tpu.dot_dimension_numbers<[1], [0], [0], [1], [0, 0, 1, 1], [], []>} : vector<10x128xbf16>, vector<128x256xbf16>, vector<10x256xf32> -> vector<10x256xf32>
    %c1_154 = arith.constant 1 : index
    %c0_155 = arith.constant 0 : index
    %c0_156 = arith.constant 0 : index
    %352 = vector.load %arg18[%c1_154, %c0_155, %c0_156] : memref<2x1x256xf32, #tpu.memory_space<vmem>>, vector<1x1x256xf32>
    %353 = vector.shape_cast %352 : vector<1x1x256xf32> to vector<1x256xf32>
    %354 = vector.broadcast %353 : vector<1x256xf32> to vector<10x256xf32>
    %355 = arith.addf %351, %354 : vector<10x256xf32>
    %cst_157 = arith.constant 5.000000e-01 : f32
    %356 = vector.broadcast %cst_157 : f32 to vector<10x256xf32>
    %357 = arith.mulf %356, %355 : vector<10x256xf32>
    %cst_158 = arith.constant 4.471500e-02 : f32
    %358 = vector.broadcast %cst_158 : f32 to vector<10x256xf32>
    %359 = arith.mulf %358, %355 : vector<10x256xf32>
    %360 = arith.mulf %359, %355 : vector<10x256xf32>
    %361 = arith.mulf %360, %355 : vector<10x256xf32>
    %362 = arith.addf %355, %361 : vector<10x256xf32>
    %cst_159 = arith.constant 0.797884583 : f32
    %363 = vector.broadcast %cst_159 : f32 to vector<10x256xf32>
    %364 = arith.mulf %363, %362 : vector<10x256xf32>
    %365 = math.tanh %364 : vector<10x256xf32>
    %cst_160 = arith.constant 1.000000e+00 : f32
    %366 = vector.broadcast %cst_160 : f32 to vector<10x256xf32>
    %367 = arith.addf %366, %365 : vector<10x256xf32>
    %368 = arith.mulf %357, %367 : vector<10x256xf32>
    %c1_161 = arith.constant 1 : index
    %c0_162 = arith.constant 0 : index
    %c0_163 = arith.constant 0 : index
    %369 = vector.load %arg19[%c1_161, %c0_162, %c0_163] : memref<2x256x128xbf16, #tpu.memory_space<vmem>>, vector<1x256x128xbf16>
    %370 = vector.shape_cast %369 : vector<1x256x128xbf16> to vector<256x128xbf16>
    %371 = arith.truncf %368 : vector<10x256xf32> to vector<10x256xbf16>
    %cst_164 = arith.constant dense<0.000000e+00> : vector<10x128xf32>
    %372 = tpu.matmul %371, %370, %cst_164 {dimension_numbers = #tpu.dot_dimension_numbers<[1], [0], [0], [1], [0, 0, 1, 1], [], []>} : vector<10x256xbf16>, vector<256x128xbf16>, vector<10x128xf32> -> vector<10x128xf32>
    %c1_165 = arith.constant 1 : index
    %c0_166 = arith.constant 0 : index
    %c0_167 = arith.constant 0 : index
    %373 = vector.load %arg20[%c1_165, %c0_166, %c0_167] : memref<2x1x128xf32, #tpu.memory_space<vmem>>, vector<1x1x128xf32>
    %374 = vector.shape_cast %373 : vector<1x1x128xf32> to vector<1x128xf32>
    %375 = vector.broadcast %374 : vector<1x128xf32> to vector<10x128xf32>
    %376 = arith.addf %372, %375 : vector<10x128xf32>
    %377 = arith.addf %323, %376 : vector<10x128xf32>
    %c0_168 = arith.constant 0 : index
    %c0_169 = arith.constant 0 : index
    %378 = vector.load %arg7[%c0_168, %c0_169] : memref<1x128xf32, #tpu.memory_space<vmem>>, vector<1x128xf32>
    %c0_170 = arith.constant 0 : index
    %c0_171 = arith.constant 0 : index
    %379 = vector.load %arg8[%c0_170, %c0_171] : memref<1x128xf32, #tpu.memory_space<vmem>>, vector<1x128xf32>
    %cst_172 = arith.constant dense<0.000000e+00> : vector<10xf32>
    %380 = vector.multi_reduction <add>, %377, %cst_172 [1] : vector<10x128xf32> to vector<10xf32>
    %381 = vector.shape_cast %380 : vector<10xf32> to vector<10x1xf32>
    %cst_173 = arith.constant 1.280000e+02 : f32
    %382 = vector.broadcast %cst_173 : f32 to vector<10x1xf32>
    %383 = arith.divf %381, %382 : vector<10x1xf32>
    %384 = vector.broadcast %383 : vector<10x1xf32> to vector<10x128xf32>
    %385 = arith.subf %377, %384 : vector<10x128xf32>
    %386 = arith.mulf %385, %385 : vector<10x128xf32>
    %cst_174 = arith.constant dense<0.000000e+00> : vector<10xf32>
    %387 = vector.multi_reduction <add>, %386, %cst_174 [1] : vector<10x128xf32> to vector<10xf32>
    %388 = vector.shape_cast %387 : vector<10xf32> to vector<10x1xf32>
    %cst_175 = arith.constant 1.280000e+02 : f32
    %389 = vector.broadcast %cst_175 : f32 to vector<10x1xf32>
    %390 = arith.divf %388, %389 : vector<10x1xf32>
    %cst_176 = arith.constant 9.99999997E-7 : f32
    %391 = vector.broadcast %cst_176 : f32 to vector<10x1xf32>
    %392 = arith.addf %390, %391 : vector<10x1xf32>
    %393 = math.rsqrt %392 : vector<10x1xf32>
    %394 = vector.broadcast %393 : vector<10x1xf32> to vector<10x128xf32>
    %395 = arith.mulf %385, %394 : vector<10x128xf32>
    %396 = vector.broadcast %378 : vector<1x128xf32> to vector<10x128xf32>
    %397 = arith.mulf %395, %396 : vector<10x128xf32>
    %398 = vector.broadcast %379 : vector<1x128xf32> to vector<10x128xf32>
    %399 = arith.addf %397, %398 : vector<10x128xf32>
    %400 = vector.extract_strided_slice %399 {offsets = [0, 0], sizes = [8, 128], strides = [1, 1]} : vector<10x128xf32> to vector<8x128xf32>
    %c1_177 = arith.constant 1 : index
    %c0_178 = arith.constant 0 : index
    %c0_179 = arith.constant 0 : index
    %401 = vector.load %arg40[%c1_177, %c0_178, %c0_179] : memref<2x8x128xf32, #tpu.memory_space<vmem>>, vector<1x8x128xf32>
    %402 = vector.shape_cast %401 : vector<1x8x128xf32> to vector<8x128xf32>
    %403 = vector.shape_cast %400 : vector<8x128xf32> to vector<1x8x128xf32>
    tpu.vector_store %arg40[%c1_177, %c0_178, %c0_179], %403 {strides = array<i32>} : memref<2x8x128xf32, #tpu.memory_space<vmem>>, vector<1x8x128xf32>,
    %c0_180 = arith.constant 0 : index
    %c0_181 = arith.constant 0 : index
    %404 = vector.load %arg4[%c0_180, %c0_181] : memref<2x8xf32, #tpu.memory_space<vmem>>, vector<2x8xf32>
    %cst_182 = arith.constant dense<0.000000e+00> : vector<2x128xf32>
    %405 = tpu.matmul %404, %400, %cst_182 {dimension_numbers = #tpu.dot_dimension_numbers<[1], [0], [0], [1], [0, 0, 1, 1], [], []>} : vector<2x8xf32>, vector<8x128xf32>, vector<2x128xf32> -> vector<2x128xf32>
    %c0_183 = arith.constant 0 : index
    %c0_184 = arith.constant 0 : index
    %406 = vector.load %arg41[%c0_183, %c0_184] : memref<2x128xf32, #tpu.memory_space<vmem>>, vector<2x128xf32>
    tpu.vector_store %arg41[%c0_183, %c0_184], %405 {strides = array<i32>} : memref<2x128xf32, #tpu.memory_space<vmem>>, vector<2x128xf32>,
    %c0_185 = arith.constant 0 : index
    %c0_186 = arith.constant 0 : index
    %407 = vector.load %arg23[%c0_185, %c0_186] : memref<16x16xf32, #tpu.memory_space<vmem>>, vector<16x16xf32>
    %c0_187 = arith.constant 0 : index
    %c0_188 = arith.constant 0 : index
    %408 = vector.load %arg21[%c0_187, %c0_188] : memref<16x64xbf16, #tpu.memory_space<vmem>>, vector<16x64xbf16>
    %c0_189 = arith.constant 0 : index
    %c0_190 = arith.constant 0 : index
    %409 = vector.load %arg25[%c0_189, %c0_190] : memref<64x128xbf16, #tpu.memory_space<vmem>>, vector<64x128xbf16>
    %cst_191 = arith.constant dense<0.000000e+00> : vector<16x128xf32>
    %410 = tpu.matmul %408, %409, %cst_191 {dimension_numbers = #tpu.dot_dimension_numbers<[1], [0], [0], [1], [0, 0, 1, 1], [], []>} : vector<16x64xbf16>, vector<64x128xbf16>, vector<16x128xf32> -> vector<16x128xf32>
    %c0_192 = arith.constant 0 : index
    %c0_193 = arith.constant 0 : index
    %411 = vector.load %arg22[%c0_192, %c0_193] : memref<16x128xf32, #tpu.memory_space<vmem>>, vector<16x128xf32>
    %412 = arith.addf %410, %411 : vector<16x128xf32>
    %c0_194 = arith.constant 0 : index
    %c0_195 = arith.constant 0 : index
    %c0_196 = arith.constant 0 : index
    %413 = vector.load %arg28[%c0_194, %c0_195, %c0_196] : memref<2x1x128xf32, #tpu.memory_space<vmem>>, vector<1x1x128xf32>
    %414 = vector.shape_cast %413 : vector<1x1x128xf32> to vector<1x128xf32>
    %c0_197 = arith.constant 0 : index
    %c0_198 = arith.constant 0 : index
    %c0_199 = arith.constant 0 : index
    %415 = vector.load %arg29[%c0_197, %c0_198, %c0_199] : memref<2x1x128xf32, #tpu.memory_space<vmem>>, vector<1x1x128xf32>
    %416 = vector.shape_cast %415 : vector<1x1x128xf32> to vector<1x128xf32>
    %cst_200 = arith.constant dense<0.000000e+00> : vector<16xf32>
    %417 = vector.multi_reduction <add>, %412, %cst_200 [1] : vector<16x128xf32> to vector<16xf32>
    %418 = vector.shape_cast %417 : vector<16xf32> to vector<16x1xf32>
    %cst_201 = arith.constant 1.280000e+02 : f32
    %419 = vector.broadcast %cst_201 : f32 to vector<16x1xf32>
    %420 = arith.divf %418, %419 : vector<16x1xf32>
    %421 = vector.broadcast %420 : vector<16x1xf32> to vector<16x128xf32>
    %422 = arith.subf %412, %421 : vector<16x128xf32>
    %423 = arith.mulf %422, %422 : vector<16x128xf32>
    %cst_202 = arith.constant dense<0.000000e+00> : vector<16xf32>
    %424 = vector.multi_reduction <add>, %423, %cst_202 [1] : vector<16x128xf32> to vector<16xf32>
    %425 = vector.shape_cast %424 : vector<16xf32> to vector<16x1xf32>
    %cst_203 = arith.constant 1.280000e+02 : f32
    %426 = vector.broadcast %cst_203 : f32 to vector<16x1xf32>
    %427 = arith.divf %425, %426 : vector<16x1xf32>
    %cst_204 = arith.constant 9.99999974E-6 : f32
    %428 = vector.broadcast %cst_204 : f32 to vector<16x1xf32>
    %429 = arith.addf %427, %428 : vector<16x1xf32>
    %430 = math.rsqrt %429 : vector<16x1xf32>
    %431 = vector.broadcast %430 : vector<16x1xf32> to vector<16x128xf32>
    %432 = arith.mulf %422, %431 : vector<16x128xf32>
    %433 = vector.broadcast %414 : vector<1x128xf32> to vector<16x128xf32>
    %434 = arith.mulf %432, %433 : vector<16x128xf32>
    %435 = vector.broadcast %416 : vector<1x128xf32> to vector<16x128xf32>
    %436 = arith.addf %434, %435 : vector<16x128xf32>
    %c0_205 = arith.constant 0 : index
    %c0_206 = arith.constant 0 : index
    %c0_207 = arith.constant 0 : index
    %437 = vector.load %arg30[%c0_205, %c0_206, %c0_207] : memref<2x128x384xbf16, #tpu.memory_space<vmem>>, vector<1x128x384xbf16>
    %438 = vector.shape_cast %437 : vector<1x128x384xbf16> to vector<128x384xbf16>
    %439 = arith.truncf %436 : vector<16x128xf32> to vector<16x128xbf16>
    %cst_208 = arith.constant dense<0.000000e+00> : vector<16x384xf32>
    %440 = tpu.matmul %439, %438, %cst_208 {dimension_numbers = #tpu.dot_dimension_numbers<[1], [0], [0], [1], [0, 0, 1, 1], [], []>} : vector<16x128xbf16>, vector<128x384xbf16>, vector<16x384xf32> -> vector<16x384xf32>
    %c0_209 = arith.constant 0 : index
    %c0_210 = arith.constant 0 : index
    %c0_211 = arith.constant 0 : index
    %441 = vector.load %arg31[%c0_209, %c0_210, %c0_211] : memref<2x1x384xf32, #tpu.memory_space<vmem>>, vector<1x1x384xf32>
    %442 = vector.shape_cast %441 : vector<1x1x384xf32> to vector<1x384xf32>
    %443 = vector.broadcast %442 : vector<1x384xf32> to vector<16x384xf32>
    %444 = arith.addf %440, %443 : vector<16x384xf32>
    %445 = vector.extract_strided_slice %444 {offsets = [0, 0], sizes = [16, 128], strides = [1, 1]} : vector<16x384xf32> to vector<16x128xf32>
    %446 = vector.extract_strided_slice %444 {offsets = [0, 128], sizes = [16, 128], strides = [1, 1]} : vector<16x384xf32> to vector<16x128xf32>
    %447 = vector.extract_strided_slice %444 {offsets = [0, 256], sizes = [16, 128], strides = [1, 1]} : vector<16x384xf32> to vector<16x128xf32>
    %448 = vector.extract_strided_slice %445 {offsets = [0, 0], sizes = [16, 32], strides = [1, 1]} : vector<16x128xf32> to vector<16x32xf32>
    %449 = vector.extract_strided_slice %446 {offsets = [0, 0], sizes = [16, 32], strides = [1, 1]} : vector<16x128xf32> to vector<16x32xf32>
    %450 = vector.extract_strided_slice %447 {offsets = [0, 0], sizes = [16, 32], strides = [1, 1]} : vector<16x128xf32> to vector<16x32xf32>
    %cst_212 = arith.constant dense<0.000000e+00> : vector<16x16xf32>
    %451 = tpu.matmul %448, %449, %cst_212 {dimension_numbers = #tpu.dot_dimension_numbers<[1], [1], [0], [0], [0, 0, 1, 0], [], []>} : vector<16x32xf32>, vector<16x32xf32>, vector<16x16xf32> -> vector<16x16xf32>
    %cst_213 = arith.constant 0.176776692 : f32
    %452 = vector.broadcast %cst_213 : f32 to vector<16x16xf32>
    %453 = arith.mulf %451, %452 : vector<16x16xf32>
    %454 = arith.addf %453, %407 : vector<16x16xf32>
    %cst_214 = arith.constant dense<0xFF800000> : vector<16xf32>
    %455 = vector.multi_reduction <maximumf>, %454, %cst_214 [1] : vector<16x16xf32> to vector<16xf32>
    %456 = vector.shape_cast %455 : vector<16xf32> to vector<16x1xf32>
    %457 = vector.broadcast %456 : vector<16x1xf32> to vector<16x16xf32>
    %458 = arith.subf %454, %457 : vector<16x16xf32>
    %459 = math.exp %458 : vector<16x16xf32>
    %cst_215 = arith.constant dense<0.000000e+00> : vector<16xf32>
    %460 = vector.multi_reduction <add>, %459, %cst_215 [1] : vector<16x16xf32> to vector<16xf32>
    %461 = vector.shape_cast %460 : vector<16xf32> to vector<16x1xf32>
    %462 = tpu.reciprocal %461 {approx = true} : vector<16x1xf32> -> vector<16x1xf32>
    %463 = vector.broadcast %462 : vector<16x1xf32> to vector<16x16xf32>
    %464 = arith.mulf %459, %463 : vector<16x16xf32>
    %cst_216 = arith.constant dense<0.000000e+00> : vector<16x32xf32>
    %465 = tpu.matmul %464, %450, %cst_216 {dimension_numbers = #tpu.dot_dimension_numbers<[1], [0], [0], [1], [0, 0, 1, 1], [], []>} : vector<16x16xf32>, vector<16x32xf32>, vector<16x32xf32> -> vector<16x32xf32>
    %466 = vector.extract_strided_slice %445 {offsets = [0, 32], sizes = [16, 32], strides = [1, 1]} : vector<16x128xf32> to vector<16x32xf32>
    %467 = vector.extract_strided_slice %446 {offsets = [0, 32], sizes = [16, 32], strides = [1, 1]} : vector<16x128xf32> to vector<16x32xf32>
    %468 = vector.extract_strided_slice %447 {offsets = [0, 32], sizes = [16, 32], strides = [1, 1]} : vector<16x128xf32> to vector<16x32xf32>
    %cst_217 = arith.constant dense<0.000000e+00> : vector<16x16xf32>
    %469 = tpu.matmul %466, %467, %cst_217 {dimension_numbers = #tpu.dot_dimension_numbers<[1], [1], [0], [0], [0, 0, 1, 0], [], []>} : vector<16x32xf32>, vector<16x32xf32>, vector<16x16xf32> -> vector<16x16xf32>
    %cst_218 = arith.constant 0.176776692 : f32
    %470 = vector.broadcast %cst_218 : f32 to vector<16x16xf32>
    %471 = arith.mulf %469, %470 : vector<16x16xf32>
    %472 = arith.addf %471, %407 : vector<16x16xf32>
    %cst_219 = arith.constant dense<0xFF800000> : vector<16xf32>
    %473 = vector.multi_reduction <maximumf>, %472, %cst_219 [1] : vector<16x16xf32> to vector<16xf32>
    %474 = vector.shape_cast %473 : vector<16xf32> to vector<16x1xf32>
    %475 = vector.broadcast %474 : vector<16x1xf32> to vector<16x16xf32>
    %476 = arith.subf %472, %475 : vector<16x16xf32>
    %477 = math.exp %476 : vector<16x16xf32>
    %cst_220 = arith.constant dense<0.000000e+00> : vector<16xf32>
    %478 = vector.multi_reduction <add>, %477, %cst_220 [1] : vector<16x16xf32> to vector<16xf32>
    %479 = vector.shape_cast %478 : vector<16xf32> to vector<16x1xf32>
    %480 = tpu.reciprocal %479 {approx = true} : vector<16x1xf32> -> vector<16x1xf32>
    %481 = vector.broadcast %480 : vector<16x1xf32> to vector<16x16xf32>
    %482 = arith.mulf %477, %481 : vector<16x16xf32>
    %cst_221 = arith.constant dense<0.000000e+00> : vector<16x32xf32>
    %483 = tpu.matmul %482, %468, %cst_221 {dimension_numbers = #tpu.dot_dimension_numbers<[1], [0], [0], [1], [0, 0, 1, 1], [], []>} : vector<16x16xf32>, vector<16x32xf32>, vector<16x32xf32> -> vector<16x32xf32>
    %484 = vector.extract_strided_slice %445 {offsets = [0, 64], sizes = [16, 32], strides = [1, 1]} : vector<16x128xf32> to vector<16x32xf32>
    %485 = vector.extract_strided_slice %446 {offsets = [0, 64], sizes = [16, 32], strides = [1, 1]} : vector<16x128xf32> to vector<16x32xf32>
    %486 = vector.extract_strided_slice %447 {offsets = [0, 64], sizes = [16, 32], strides = [1, 1]} : vector<16x128xf32> to vector<16x32xf32>
    %cst_222 = arith.constant dense<0.000000e+00> : vector<16x16xf32>
    %487 = tpu.matmul %484, %485, %cst_222 {dimension_numbers = #tpu.dot_dimension_numbers<[1], [1], [0], [0], [0, 0, 1, 0], [], []>} : vector<16x32xf32>, vector<16x32xf32>, vector<16x16xf32> -> vector<16x16xf32>
    %cst_223 = arith.constant 0.176776692 : f32
    %488 = vector.broadcast %cst_223 : f32 to vector<16x16xf32>
    %489 = arith.mulf %487, %488 : vector<16x16xf32>
    %490 = arith.addf %489, %407 : vector<16x16xf32>
    %cst_224 = arith.constant dense<0xFF800000> : vector<16xf32>
    %491 = vector.multi_reduction <maximumf>, %490, %cst_224 [1] : vector<16x16xf32> to vector<16xf32>
    %492 = vector.shape_cast %491 : vector<16xf32> to vector<16x1xf32>
    %493 = vector.broadcast %492 : vector<16x1xf32> to vector<16x16xf32>
    %494 = arith.subf %490, %493 : vector<16x16xf32>
    %495 = math.exp %494 : vector<16x16xf32>
    %cst_225 = arith.constant dense<0.000000e+00> : vector<16xf32>
    %496 = vector.multi_reduction <add>, %495, %cst_225 [1] : vector<16x16xf32> to vector<16xf32>
    %497 = vector.shape_cast %496 : vector<16xf32> to vector<16x1xf32>
    %498 = tpu.reciprocal %497 {approx = true} : vector<16x1xf32> -> vector<16x1xf32>
    %499 = vector.broadcast %498 : vector<16x1xf32> to vector<16x16xf32>
    %500 = arith.mulf %495, %499 : vector<16x16xf32>
    %cst_226 = arith.constant dense<0.000000e+00> : vector<16x32xf32>
    %501 = tpu.matmul %500, %486, %cst_226 {dimension_numbers = #tpu.dot_dimension_numbers<[1], [0], [0], [1], [0, 0, 1, 1], [], []>} : vector<16x16xf32>, vector<16x32xf32>, vector<16x32xf32> -> vector<16x32xf32>
    %502 = vector.extract_strided_slice %445 {offsets = [0, 96], sizes = [16, 32], strides = [1, 1]} : vector<16x128xf32> to vector<16x32xf32>
    %503 = vector.extract_strided_slice %446 {offsets = [0, 96], sizes = [16, 32], strides = [1, 1]} : vector<16x128xf32> to vector<16x32xf32>
    %504 = vector.extract_strided_slice %447 {offsets = [0, 96], sizes = [16, 32], strides = [1, 1]} : vector<16x128xf32> to vector<16x32xf32>
    %cst_227 = arith.constant dense<0.000000e+00> : vector<16x16xf32>
    %505 = tpu.matmul %502, %503, %cst_227 {dimension_numbers = #tpu.dot_dimension_numbers<[1], [1], [0], [0], [0, 0, 1, 0], [], []>} : vector<16x32xf32>, vector<16x32xf32>, vector<16x16xf32> -> vector<16x16xf32>
    %cst_228 = arith.constant 0.176776692 : f32
    %506 = vector.broadcast %cst_228 : f32 to vector<16x16xf32>
    %507 = arith.mulf %505, %506 : vector<16x16xf32>
    %508 = arith.addf %507, %407 : vector<16x16xf32>
    %cst_229 = arith.constant dense<0xFF800000> : vector<16xf32>
    %509 = vector.multi_reduction <maximumf>, %508, %cst_229 [1] : vector<16x16xf32> to vector<16xf32>
    %510 = vector.shape_cast %509 : vector<16xf32> to vector<16x1xf32>
    %511 = vector.broadcast %510 : vector<16x1xf32> to vector<16x16xf32>
    %512 = arith.subf %508, %511 : vector<16x16xf32>
    %513 = math.exp %512 : vector<16x16xf32>
    %cst_230 = arith.constant dense<0.000000e+00> : vector<16xf32>
    %514 = vector.multi_reduction <add>, %513, %cst_230 [1] : vector<16x16xf32> to vector<16xf32>
    %515 = vector.shape_cast %514 : vector<16xf32> to vector<16x1xf32>
    %516 = tpu.reciprocal %515 {approx = true} : vector<16x1xf32> -> vector<16x1xf32>
    %517 = vector.broadcast %516 : vector<16x1xf32> to vector<16x16xf32>
    %518 = arith.mulf %513, %517 : vector<16x16xf32>
    %cst_231 = arith.constant dense<0.000000e+00> : vector<16x32xf32>
    %519 = tpu.matmul %518, %504, %cst_231 {dimension_numbers = #tpu.dot_dimension_numbers<[1], [0], [0], [1], [0, 0, 1, 1], [], []>} : vector<16x16xf32>, vector<16x32xf32>, vector<16x32xf32> -> vector<16x32xf32>
    %520 = tpu.concatenate %465, %483, %501, %519 in 1 : vector<16x32xf32>, vector<16x32xf32>, vector<16x32xf32>, vector<16x32xf32> -> vector<16x128xf32>
    %c0_232 = arith.constant 0 : index
    %c0_233 = arith.constant 0 : index
    %c0_234 = arith.constant 0 : index
    %521 = vector.load %arg32[%c0_232, %c0_233, %c0_234] : memref<2x128x128xbf16, #tpu.memory_space<vmem>>, vector<1x128x128xbf16>
    %522 = vector.shape_cast %521 : vector<1x128x128xbf16> to vector<128x128xbf16>
    %523 = arith.truncf %520 : vector<16x128xf32> to vector<16x128xbf16>
    %cst_235 = arith.constant dense<0.000000e+00> : vector<16x128xf32>
    %524 = tpu.matmul %523, %522, %cst_235 {dimension_numbers = #tpu.dot_dimension_numbers<[1], [0], [0], [1], [0, 0, 1, 1], [], []>} : vector<16x128xbf16>, vector<128x128xbf16>, vector<16x128xf32> -> vector<16x128xf32>
    %c0_236 = arith.constant 0 : index
    %c0_237 = arith.constant 0 : index
    %c0_238 = arith.constant 0 : index
    %525 = vector.load %arg33[%c0_236, %c0_237, %c0_238] : memref<2x1x128xf32, #tpu.memory_space<vmem>>, vector<1x1x128xf32>
    %526 = vector.shape_cast %525 : vector<1x1x128xf32> to vector<1x128xf32>
    %527 = vector.broadcast %526 : vector<1x128xf32> to vector<16x128xf32>
    %528 = arith.addf %524, %527 : vector<16x128xf32>
    %529 = arith.addf %412, %528 : vector<16x128xf32>
    %c0_239 = arith.constant 0 : index
    %c0_240 = arith.constant 0 : index
    %c0_241 = arith.constant 0 : index
    %530 = vector.load %arg34[%c0_239, %c0_240, %c0_241] : memref<2x1x128xf32, #tpu.memory_space<vmem>>, vector<1x1x128xf32>
    %531 = vector.shape_cast %530 : vector<1x1x128xf32> to vector<1x128xf32>
    %c0_242 = arith.constant 0 : index
    %c0_243 = arith.constant 0 : index
    %c0_244 = arith.constant 0 : index
    %532 = vector.load %arg35[%c0_242, %c0_243, %c0_244] : memref<2x1x128xf32, #tpu.memory_space<vmem>>, vector<1x1x128xf32>
    %533 = vector.shape_cast %532 : vector<1x1x128xf32> to vector<1x128xf32>
    %cst_245 = arith.constant dense<0.000000e+00> : vector<16xf32>
    %534 = vector.multi_reduction <add>, %529, %cst_245 [1] : vector<16x128xf32> to vector<16xf32>
    %535 = vector.shape_cast %534 : vector<16xf32> to vector<16x1xf32>
    %cst_246 = arith.constant 1.280000e+02 : f32
    %536 = vector.broadcast %cst_246 : f32 to vector<16x1xf32>
    %537 = arith.divf %535, %536 : vector<16x1xf32>
    %538 = vector.broadcast %537 : vector<16x1xf32> to vector<16x128xf32>
    %539 = arith.subf %529, %538 : vector<16x128xf32>
    %540 = arith.mulf %539, %539 : vector<16x128xf32>
    %cst_247 = arith.constant dense<0.000000e+00> : vector<16xf32>
    %541 = vector.multi_reduction <add>, %540, %cst_247 [1] : vector<16x128xf32> to vector<16xf32>
    %542 = vector.shape_cast %541 : vector<16xf32> to vector<16x1xf32>
    %cst_248 = arith.constant 1.280000e+02 : f32
    %543 = vector.broadcast %cst_248 : f32 to vector<16x1xf32>
    %544 = arith.divf %542, %543 : vector<16x1xf32>
    %cst_249 = arith.constant 9.99999974E-6 : f32
    %545 = vector.broadcast %cst_249 : f32 to vector<16x1xf32>
    %546 = arith.addf %544, %545 : vector<16x1xf32>
    %547 = math.rsqrt %546 : vector<16x1xf32>
    %548 = vector.broadcast %547 : vector<16x1xf32> to vector<16x128xf32>
    %549 = arith.mulf %539, %548 : vector<16x128xf32>
    %550 = vector.broadcast %531 : vector<1x128xf32> to vector<16x128xf32>
    %551 = arith.mulf %549, %550 : vector<16x128xf32>
    %552 = vector.broadcast %533 : vector<1x128xf32> to vector<16x128xf32>
    %553 = arith.addf %551, %552 : vector<16x128xf32>
    %c0_250 = arith.constant 0 : index
    %c0_251 = arith.constant 0 : index
    %c0_252 = arith.constant 0 : index
    %554 = vector.load %arg36[%c0_250, %c0_251, %c0_252] : memref<2x128x256xbf16, #tpu.memory_space<vmem>>, vector<1x128x256xbf16>
    %555 = vector.shape_cast %554 : vector<1x128x256xbf16> to vector<128x256xbf16>
    %556 = arith.truncf %553 : vector<16x128xf32> to vector<16x128xbf16>
    %cst_253 = arith.constant dense<0.000000e+00> : vector<16x256xf32>
    %557 = tpu.matmul %556, %555, %cst_253 {dimension_numbers = #tpu.dot_dimension_numbers<[1], [0], [0], [1], [0, 0, 1, 1], [], []>} : vector<16x128xbf16>, vector<128x256xbf16>, vector<16x256xf32> -> vector<16x256xf32>
    %c0_254 = arith.constant 0 : index
    %c0_255 = arith.constant 0 : index
    %c0_256 = arith.constant 0 : index
    %558 = vector.load %arg37[%c0_254, %c0_255, %c0_256] : memref<2x1x256xf32, #tpu.memory_space<vmem>>, vector<1x1x256xf32>
    %559 = vector.shape_cast %558 : vector<1x1x256xf32> to vector<1x256xf32>
    %560 = vector.broadcast %559 : vector<1x256xf32> to vector<16x256xf32>
    %561 = arith.addf %557, %560 : vector<16x256xf32>
    %cst_257 = arith.constant 1.702000e+00 : f32
    %562 = vector.broadcast %cst_257 : f32 to vector<16x256xf32>
    %563 = arith.mulf %562, %561 : vector<16x256xf32>
    %564 = arith.negf %563 : vector<16x256xf32>
    %565 = math.exp %564 : vector<16x256xf32>
    %cst_258 = arith.constant 1.000000e+00 : f32
    %566 = vector.broadcast %cst_258 : f32 to vector<16x256xf32>
    %567 = arith.addf %566, %565 : vector<16x256xf32>
    %568 = arith.divf %566, %567 : vector<16x256xf32>
    %569 = arith.mulf %561, %568 : vector<16x256xf32>
    %c0_259 = arith.constant 0 : index
    %c0_260 = arith.constant 0 : index
    %c0_261 = arith.constant 0 : index
    %570 = vector.load %arg38[%c0_259, %c0_260, %c0_261] : memref<2x256x128xbf16, #tpu.memory_space<vmem>>, vector<1x256x128xbf16>
    %571 = vector.shape_cast %570 : vector<1x256x128xbf16> to vector<256x128xbf16>
    %572 = arith.truncf %569 : vector<16x256xf32> to vector<16x256xbf16>
    %cst_262 = arith.constant dense<0.000000e+00> : vector<16x128xf32>
    %573 = tpu.matmul %572, %571, %cst_262 {dimension_numbers = #tpu.dot_dimension_numbers<[1], [0], [0], [1], [0, 0, 1, 1], [], []>} : vector<16x256xbf16>, vector<256x128xbf16>, vector<16x128xf32> -> vector<16x128xf32>
    %c0_263 = arith.constant 0 : index
    %c0_264 = arith.constant 0 : index
    %c0_265 = arith.constant 0 : index
    %574 = vector.load %arg39[%c0_263, %c0_264, %c0_265] : memref<2x1x128xf32, #tpu.memory_space<vmem>>, vector<1x1x128xf32>
    %575 = vector.shape_cast %574 : vector<1x1x128xf32> to vector<1x128xf32>
    %576 = vector.broadcast %575 : vector<1x128xf32> to vector<16x128xf32>
    %577 = arith.addf %573, %576 : vector<16x128xf32>
    %578 = arith.addf %529, %577 : vector<16x128xf32>
    %c1_266 = arith.constant 1 : index
    %c0_267 = arith.constant 0 : index
    %c0_268 = arith.constant 0 : index
    %579 = vector.load %arg28[%c1_266, %c0_267, %c0_268] : memref<2x1x128xf32, #tpu.memory_space<vmem>>, vector<1x1x128xf32>
    %580 = vector.shape_cast %579 : vector<1x1x128xf32> to vector<1x128xf32>
    %c1_269 = arith.constant 1 : index
    %c0_270 = arith.constant 0 : index
    %c0_271 = arith.constant 0 : index
    %581 = vector.load %arg29[%c1_269, %c0_270, %c0_271] : memref<2x1x128xf32, #tpu.memory_space<vmem>>, vector<1x1x128xf32>
    %582 = vector.shape_cast %581 : vector<1x1x128xf32> to vector<1x128xf32>
    %cst_272 = arith.constant dense<0.000000e+00> : vector<16xf32>
    %583 = vector.multi_reduction <add>, %578, %cst_272 [1] : vector<16x128xf32> to vector<16xf32>
    %584 = vector.shape_cast %583 : vector<16xf32> to vector<16x1xf32>
    %cst_273 = arith.constant 1.280000e+02 : f32
    %585 = vector.broadcast %cst_273 : f32 to vector<16x1xf32>
    %586 = arith.divf %584, %585 : vector<16x1xf32>
    %587 = vector.broadcast %586 : vector<16x1xf32> to vector<16x128xf32>
    %588 = arith.subf %578, %587 : vector<16x128xf32>
    %589 = arith.mulf %588, %588 : vector<16x128xf32>
    %cst_274 = arith.constant dense<0.000000e+00> : vector<16xf32>
    %590 = vector.multi_reduction <add>, %589, %cst_274 [1] : vector<16x128xf32> to vector<16xf32>
    %591 = vector.shape_cast %590 : vector<16xf32> to vector<16x1xf32>
    %cst_275 = arith.constant 1.280000e+02 : f32
    %592 = vector.broadcast %cst_275 : f32 to vector<16x1xf32>
    %593 = arith.divf %591, %592 : vector<16x1xf32>
    %cst_276 = arith.constant 9.99999974E-6 : f32
    %594 = vector.broadcast %cst_276 : f32 to vector<16x1xf32>
    %595 = arith.addf %593, %594 : vector<16x1xf32>
    %596 = math.rsqrt %595 : vector<16x1xf32>
    %597 = vector.broadcast %596 : vector<16x1xf32> to vector<16x128xf32>
    %598 = arith.mulf %588, %597 : vector<16x128xf32>
    %599 = vector.broadcast %580 : vector<1x128xf32> to vector<16x128xf32>
    %600 = arith.mulf %598, %599 : vector<16x128xf32>
    %601 = vector.broadcast %582 : vector<1x128xf32> to vector<16x128xf32>
    %602 = arith.addf %600, %601 : vector<16x128xf32>
    %c1_277 = arith.constant 1 : index
    %c0_278 = arith.constant 0 : index
    %c0_279 = arith.constant 0 : index
    %603 = vector.load %arg30[%c1_277, %c0_278, %c0_279] : memref<2x128x384xbf16, #tpu.memory_space<vmem>>, vector<1x128x384xbf16>
    %604 = vector.shape_cast %603 : vector<1x128x384xbf16> to vector<128x384xbf16>
    %605 = arith.truncf %602 : vector<16x128xf32> to vector<16x128xbf16>
    %cst_280 = arith.constant dense<0.000000e+00> : vector<16x384xf32>
    %606 = tpu.matmul %605, %604, %cst_280 {dimension_numbers = #tpu.dot_dimension_numbers<[1], [0], [0], [1], [0, 0, 1, 1], [], []>} : vector<16x128xbf16>, vector<128x384xbf16>, vector<16x384xf32> -> vector<16x384xf32>
    %c1_281 = arith.constant 1 : index
    %c0_282 = arith.constant 0 : index
    %c0_283 = arith.constant 0 : index
    %607 = vector.load %arg31[%c1_281, %c0_282, %c0_283] : memref<2x1x384xf32, #tpu.memory_space<vmem>>, vector<1x1x384xf32>
    %608 = vector.shape_cast %607 : vector<1x1x384xf32> to vector<1x384xf32>
    %609 = vector.broadcast %608 : vector<1x384xf32> to vector<16x384xf32>
    %610 = arith.addf %606, %609 : vector<16x384xf32>
    %611 = vector.extract_strided_slice %610 {offsets = [0, 0], sizes = [16, 128], strides = [1, 1]} : vector<16x384xf32> to vector<16x128xf32>
    %612 = vector.extract_strided_slice %610 {offsets = [0, 128], sizes = [16, 128], strides = [1, 1]} : vector<16x384xf32> to vector<16x128xf32>
    %613 = vector.extract_strided_slice %610 {offsets = [0, 256], sizes = [16, 128], strides = [1, 1]} : vector<16x384xf32> to vector<16x128xf32>
    %614 = vector.extract_strided_slice %611 {offsets = [0, 0], sizes = [16, 32], strides = [1, 1]} : vector<16x128xf32> to vector<16x32xf32>
    %615 = vector.extract_strided_slice %612 {offsets = [0, 0], sizes = [16, 32], strides = [1, 1]} : vector<16x128xf32> to vector<16x32xf32>
    %616 = vector.extract_strided_slice %613 {offsets = [0, 0], sizes = [16, 32], strides = [1, 1]} : vector<16x128xf32> to vector<16x32xf32>
    %cst_284 = arith.constant dense<0.000000e+00> : vector<16x16xf32>
    %617 = tpu.matmul %614, %615, %cst_284 {dimension_numbers = #tpu.dot_dimension_numbers<[1], [1], [0], [0], [0, 0, 1, 0], [], []>} : vector<16x32xf32>, vector<16x32xf32>, vector<16x16xf32> -> vector<16x16xf32>
    %cst_285 = arith.constant 0.176776692 : f32
    %618 = vector.broadcast %cst_285 : f32 to vector<16x16xf32>
    %619 = arith.mulf %617, %618 : vector<16x16xf32>
    %620 = arith.addf %619, %407 : vector<16x16xf32>
    %cst_286 = arith.constant dense<0xFF800000> : vector<16xf32>
    %621 = vector.multi_reduction <maximumf>, %620, %cst_286 [1] : vector<16x16xf32> to vector<16xf32>
    %622 = vector.shape_cast %621 : vector<16xf32> to vector<16x1xf32>
    %623 = vector.broadcast %622 : vector<16x1xf32> to vector<16x16xf32>
    %624 = arith.subf %620, %623 : vector<16x16xf32>
    %625 = math.exp %624 : vector<16x16xf32>
    %cst_287 = arith.constant dense<0.000000e+00> : vector<16xf32>
    %626 = vector.multi_reduction <add>, %625, %cst_287 [1] : vector<16x16xf32> to vector<16xf32>
    %627 = vector.shape_cast %626 : vector<16xf32> to vector<16x1xf32>
    %628 = tpu.reciprocal %627 {approx = true} : vector<16x1xf32> -> vector<16x1xf32>
    %629 = vector.broadcast %628 : vector<16x1xf32> to vector<16x16xf32>
    %630 = arith.mulf %625, %629 : vector<16x16xf32>
    %cst_288 = arith.constant dense<0.000000e+00> : vector<16x32xf32>
    %631 = tpu.matmul %630, %616, %cst_288 {dimension_numbers = #tpu.dot_dimension_numbers<[1], [0], [0], [1], [0, 0, 1, 1], [], []>} : vector<16x16xf32>, vector<16x32xf32>, vector<16x32xf32> -> vector<16x32xf32>
    %632 = vector.extract_strided_slice %611 {offsets = [0, 32], sizes = [16, 32], strides = [1, 1]} : vector<16x128xf32> to vector<16x32xf32>
    %633 = vector.extract_strided_slice %612 {offsets = [0, 32], sizes = [16, 32], strides = [1, 1]} : vector<16x128xf32> to vector<16x32xf32>
    %634 = vector.extract_strided_slice %613 {offsets = [0, 32], sizes = [16, 32], strides = [1, 1]} : vector<16x128xf32> to vector<16x32xf32>
    %cst_289 = arith.constant dense<0.000000e+00> : vector<16x16xf32>
    %635 = tpu.matmul %632, %633, %cst_289 {dimension_numbers = #tpu.dot_dimension_numbers<[1], [1], [0], [0], [0, 0, 1, 0], [], []>} : vector<16x32xf32>, vector<16x32xf32>, vector<16x16xf32> -> vector<16x16xf32>
    %cst_290 = arith.constant 0.176776692 : f32
    %636 = vector.broadcast %cst_290 : f32 to vector<16x16xf32>
    %637 = arith.mulf %635, %636 : vector<16x16xf32>
    %638 = arith.addf %637, %407 : vector<16x16xf32>
    %cst_291 = arith.constant dense<0xFF800000> : vector<16xf32>
    %639 = vector.multi_reduction <maximumf>, %638, %cst_291 [1] : vector<16x16xf32> to vector<16xf32>
    %640 = vector.shape_cast %639 : vector<16xf32> to vector<16x1xf32>
    %641 = vector.broadcast %640 : vector<16x1xf32> to vector<16x16xf32>
    %642 = arith.subf %638, %641 : vector<16x16xf32>
    %643 = math.exp %642 : vector<16x16xf32>
    %cst_292 = arith.constant dense<0.000000e+00> : vector<16xf32>
    %644 = vector.multi_reduction <add>, %643, %cst_292 [1] : vector<16x16xf32> to vector<16xf32>
    %645 = vector.shape_cast %644 : vector<16xf32> to vector<16x1xf32>
    %646 = tpu.reciprocal %645 {approx = true} : vector<16x1xf32> -> vector<16x1xf32>
    %647 = vector.broadcast %646 : vector<16x1xf32> to vector<16x16xf32>
    %648 = arith.mulf %643, %647 : vector<16x16xf32>
    %cst_293 = arith.constant dense<0.000000e+00> : vector<16x32xf32>
    %649 = tpu.matmul %648, %634, %cst_293 {dimension_numbers = #tpu.dot_dimension_numbers<[1], [0], [0], [1], [0, 0, 1, 1], [], []>} : vector<16x16xf32>, vector<16x32xf32>, vector<16x32xf32> -> vector<16x32xf32>
    %650 = vector.extract_strided_slice %611 {offsets = [0, 64], sizes = [16, 32], strides = [1, 1]} : vector<16x128xf32> to vector<16x32xf32>
    %651 = vector.extract_strided_slice %612 {offsets = [0, 64], sizes = [16, 32], strides = [1, 1]} : vector<16x128xf32> to vector<16x32xf32>
    %652 = vector.extract_strided_slice %613 {offsets = [0, 64], sizes = [16, 32], strides = [1, 1]} : vector<16x128xf32> to vector<16x32xf32>
    %cst_294 = arith.constant dense<0.000000e+00> : vector<16x16xf32>
    %653 = tpu.matmul %650, %651, %cst_294 {dimension_numbers = #tpu.dot_dimension_numbers<[1], [1], [0], [0], [0, 0, 1, 0], [], []>} : vector<16x32xf32>, vector<16x32xf32>, vector<16x16xf32> -> vector<16x16xf32>
    %cst_295 = arith.constant 0.176776692 : f32
    %654 = vector.broadcast %cst_295 : f32 to vector<16x16xf32>
    %655 = arith.mulf %653, %654 : vector<16x16xf32>
    %656 = arith.addf %655, %407 : vector<16x16xf32>
    %cst_296 = arith.constant dense<0xFF800000> : vector<16xf32>
    %657 = vector.multi_reduction <maximumf>, %656, %cst_296 [1] : vector<16x16xf32> to vector<16xf32>
    %658 = vector.shape_cast %657 : vector<16xf32> to vector<16x1xf32>
    %659 = vector.broadcast %658 : vector<16x1xf32> to vector<16x16xf32>
    %660 = arith.subf %656, %659 : vector<16x16xf32>
    %661 = math.exp %660 : vector<16x16xf32>
    %cst_297 = arith.constant dense<0.000000e+00> : vector<16xf32>
    %662 = vector.multi_reduction <add>, %661, %cst_297 [1] : vector<16x16xf32> to vector<16xf32>
    %663 = vector.shape_cast %662 : vector<16xf32> to vector<16x1xf32>
    %664 = tpu.reciprocal %663 {approx = true} : vector<16x1xf32> -> vector<16x1xf32>
    %665 = vector.broadcast %664 : vector<16x1xf32> to vector<16x16xf32>
    %666 = arith.mulf %661, %665 : vector<16x16xf32>
    %cst_298 = arith.constant dense<0.000000e+00> : vector<16x32xf32>
    %667 = tpu.matmul %666, %652, %cst_298 {dimension_numbers = #tpu.dot_dimension_numbers<[1], [0], [0], [1], [0, 0, 1, 1], [], []>} : vector<16x16xf32>, vector<16x32xf32>, vector<16x32xf32> -> vector<16x32xf32>
    %668 = vector.extract_strided_slice %611 {offsets = [0, 96], sizes = [16, 32], strides = [1, 1]} : vector<16x128xf32> to vector<16x32xf32>
    %669 = vector.extract_strided_slice %612 {offsets = [0, 96], sizes = [16, 32], strides = [1, 1]} : vector<16x128xf32> to vector<16x32xf32>
    %670 = vector.extract_strided_slice %613 {offsets = [0, 96], sizes = [16, 32], strides = [1, 1]} : vector<16x128xf32> to vector<16x32xf32>
    %cst_299 = arith.constant dense<0.000000e+00> : vector<16x16xf32>
    %671 = tpu.matmul %668, %669, %cst_299 {dimension_numbers = #tpu.dot_dimension_numbers<[1], [1], [0], [0], [0, 0, 1, 0], [], []>} : vector<16x32xf32>, vector<16x32xf32>, vector<16x16xf32> -> vector<16x16xf32>
    %cst_300 = arith.constant 0.176776692 : f32
    %672 = vector.broadcast %cst_300 : f32 to vector<16x16xf32>
    %673 = arith.mulf %671, %672 : vector<16x16xf32>
    %674 = arith.addf %673, %407 : vector<16x16xf32>
    %cst_301 = arith.constant dense<0xFF800000> : vector<16xf32>
    %675 = vector.multi_reduction <maximumf>, %674, %cst_301 [1] : vector<16x16xf32> to vector<16xf32>
    %676 = vector.shape_cast %675 : vector<16xf32> to vector<16x1xf32>
    %677 = vector.broadcast %676 : vector<16x1xf32> to vector<16x16xf32>
    %678 = arith.subf %674, %677 : vector<16x16xf32>
    %679 = math.exp %678 : vector<16x16xf32>
    %cst_302 = arith.constant dense<0.000000e+00> : vector<16xf32>
    %680 = vector.multi_reduction <add>, %679, %cst_302 [1] : vector<16x16xf32> to vector<16xf32>
    %681 = vector.shape_cast %680 : vector<16xf32> to vector<16x1xf32>
    %682 = tpu.reciprocal %681 {approx = true} : vector<16x1xf32> -> vector<16x1xf32>
    %683 = vector.broadcast %682 : vector<16x1xf32> to vector<16x16xf32>
    %684 = arith.mulf %679, %683 : vector<16x16xf32>
    %cst_303 = arith.constant dense<0.000000e+00> : vector<16x32xf32>
    %685 = tpu.matmul %684, %670, %cst_303 {dimension_numbers = #tpu.dot_dimension_numbers<[1], [0], [0], [1], [0, 0, 1, 1], [], []>} : vector<16x16xf32>, vector<16x32xf32>, vector<16x32xf32> -> vector<16x32xf32>
    %686 = tpu.concatenate %631, %649, %667, %685 in 1 : vector<16x32xf32>, vector<16x32xf32>, vector<16x32xf32>, vector<16x32xf32> -> vector<16x128xf32>
    %c1_304 = arith.constant 1 : index
    %c0_305 = arith.constant 0 : index
    %c0_306 = arith.constant 0 : index
    %687 = vector.load %arg32[%c1_304, %c0_305, %c0_306] : memref<2x128x128xbf16, #tpu.memory_space<vmem>>, vector<1x128x128xbf16>
    %688 = vector.shape_cast %687 : vector<1x128x128xbf16> to vector<128x128xbf16>
    %689 = arith.truncf %686 : vector<16x128xf32> to vector<16x128xbf16>
    %cst_307 = arith.constant dense<0.000000e+00> : vector<16x128xf32>
    %690 = tpu.matmul %689, %688, %cst_307 {dimension_numbers = #tpu.dot_dimension_numbers<[1], [0], [0], [1], [0, 0, 1, 1], [], []>} : vector<16x128xbf16>, vector<128x128xbf16>, vector<16x128xf32> -> vector<16x128xf32>
    %c1_308 = arith.constant 1 : index
    %c0_309 = arith.constant 0 : index
    %c0_310 = arith.constant 0 : index
    %691 = vector.load %arg33[%c1_308, %c0_309, %c0_310] : memref<2x1x128xf32, #tpu.memory_space<vmem>>, vector<1x1x128xf32>
    %692 = vector.shape_cast %691 : vector<1x1x128xf32> to vector<1x128xf32>
    %693 = vector.broadcast %692 : vector<1x128xf32> to vector<16x128xf32>
    %694 = arith.addf %690, %693 : vector<16x128xf32>
    %695 = arith.addf %578, %694 : vector<16x128xf32>
    %c1_311 = arith.constant 1 : index
    %c0_312 = arith.constant 0 : index
    %c0_313 = arith.constant 0 : index
    %696 = vector.load %arg34[%c1_311, %c0_312, %c0_313] : memref<2x1x128xf32, #tpu.memory_space<vmem>>, vector<1x1x128xf32>
    %697 = vector.shape_cast %696 : vector<1x1x128xf32> to vector<1x128xf32>
    %c1_314 = arith.constant 1 : index
    %c0_315 = arith.constant 0 : index
    %c0_316 = arith.constant 0 : index
    %698 = vector.load %arg35[%c1_314, %c0_315, %c0_316] : memref<2x1x128xf32, #tpu.memory_space<vmem>>, vector<1x1x128xf32>
    %699 = vector.shape_cast %698 : vector<1x1x128xf32> to vector<1x128xf32>
    %cst_317 = arith.constant dense<0.000000e+00> : vector<16xf32>
    %700 = vector.multi_reduction <add>, %695, %cst_317 [1] : vector<16x128xf32> to vector<16xf32>
    %701 = vector.shape_cast %700 : vector<16xf32> to vector<16x1xf32>
    %cst_318 = arith.constant 1.280000e+02 : f32
    %702 = vector.broadcast %cst_318 : f32 to vector<16x1xf32>
    %703 = arith.divf %701, %702 : vector<16x1xf32>
    %704 = vector.broadcast %703 : vector<16x1xf32> to vector<16x128xf32>
    %705 = arith.subf %695, %704 : vector<16x128xf32>
    %706 = arith.mulf %705, %705 : vector<16x128xf32>
    %cst_319 = arith.constant dense<0.000000e+00> : vector<16xf32>
    %707 = vector.multi_reduction <add>, %706, %cst_319 [1] : vector<16x128xf32> to vector<16xf32>
    %708 = vector.shape_cast %707 : vector<16xf32> to vector<16x1xf32>
    %cst_320 = arith.constant 1.280000e+02 : f32
    %709 = vector.broadcast %cst_320 : f32 to vector<16x1xf32>
    %710 = arith.divf %708, %709 : vector<16x1xf32>
    %cst_321 = arith.constant 9.99999974E-6 : f32
    %711 = vector.broadcast %cst_321 : f32 to vector<16x1xf32>
    %712 = arith.addf %710, %711 : vector<16x1xf32>
    %713 = math.rsqrt %712 : vector<16x1xf32>
    %714 = vector.broadcast %713 : vector<16x1xf32> to vector<16x128xf32>
    %715 = arith.mulf %705, %714 : vector<16x128xf32>
    %716 = vector.broadcast %697 : vector<1x128xf32> to vector<16x128xf32>
    %717 = arith.mulf %715, %716 : vector<16x128xf32>
    %718 = vector.broadcast %699 : vector<1x128xf32> to vector<16x128xf32>
    %719 = arith.addf %717, %718 : vector<16x128xf32>
    %c1_322 = arith.constant 1 : index
    %c0_323 = arith.constant 0 : index
    %c0_324 = arith.constant 0 : index
    %720 = vector.load %arg36[%c1_322, %c0_323, %c0_324] : memref<2x128x256xbf16, #tpu.memory_space<vmem>>, vector<1x128x256xbf16>
    %721 = vector.shape_cast %720 : vector<1x128x256xbf16> to vector<128x256xbf16>
    %722 = arith.truncf %719 : vector<16x128xf32> to vector<16x128xbf16>
    %cst_325 = arith.constant dense<0.000000e+00> : vector<16x256xf32>
    %723 = tpu.matmul %722, %721, %cst_325 {dimension_numbers = #tpu.dot_dimension_numbers<[1], [0], [0], [1], [0, 0, 1, 1], [], []>} : vector<16x128xbf16>, vector<128x256xbf16>, vector<16x256xf32> -> vector<16x256xf32>
    %c1_326 = arith.constant 1 : index
    %c0_327 = arith.constant 0 : index
    %c0_328 = arith.constant 0 : index
    %724 = vector.load %arg37[%c1_326, %c0_327, %c0_328] : memref<2x1x256xf32, #tpu.memory_space<vmem>>, vector<1x1x256xf32>
    %725 = vector.shape_cast %724 : vector<1x1x256xf32> to vector<1x256xf32>
    %726 = vector.broadcast %725 : vector<1x256xf32> to vector<16x256xf32>
    %727 = arith.addf %723, %726 : vector<16x256xf32>
    %cst_329 = arith.constant 1.702000e+00 : f32
    %728 = vector.broadcast %cst_329 : f32 to vector<16x256xf32>
    %729 = arith.mulf %728, %727 : vector<16x256xf32>
    %730 = arith.negf %729 : vector<16x256xf32>
    %731 = math.exp %730 : vector<16x256xf32>
    %cst_330 = arith.constant 1.000000e+00 : f32
    %732 = vector.broadcast %cst_330 : f32 to vector<16x256xf32>
    %733 = arith.addf %732, %731 : vector<16x256xf32>
    %734 = arith.divf %732, %733 : vector<16x256xf32>
    %735 = arith.mulf %727, %734 : vector<16x256xf32>
    %c1_331 = arith.constant 1 : index
    %c0_332 = arith.constant 0 : index
    %c0_333 = arith.constant 0 : index
    %736 = vector.load %arg38[%c1_331, %c0_332, %c0_333] : memref<2x256x128xbf16, #tpu.memory_space<vmem>>, vector<1x256x128xbf16>
    %737 = vector.shape_cast %736 : vector<1x256x128xbf16> to vector<256x128xbf16>
    %738 = arith.truncf %735 : vector<16x256xf32> to vector<16x256xbf16>
    %cst_334 = arith.constant dense<0.000000e+00> : vector<16x128xf32>
    %739 = tpu.matmul %738, %737, %cst_334 {dimension_numbers = #tpu.dot_dimension_numbers<[1], [0], [0], [1], [0, 0, 1, 1], [], []>} : vector<16x256xbf16>, vector<256x128xbf16>, vector<16x128xf32> -> vector<16x128xf32>
    %c1_335 = arith.constant 1 : index
    %c0_336 = arith.constant 0 : index
    %c0_337 = arith.constant 0 : index
    %740 = vector.load %arg39[%c1_335, %c0_336, %c0_337] : memref<2x1x128xf32, #tpu.memory_space<vmem>>, vector<1x1x128xf32>
    %741 = vector.shape_cast %740 : vector<1x1x128xf32> to vector<1x128xf32>
    %742 = vector.broadcast %741 : vector<1x128xf32> to vector<16x128xf32>
    %743 = arith.addf %739, %742 : vector<16x128xf32>
    %744 = arith.addf %695, %743 : vector<16x128xf32>
    %c0_338 = arith.constant 0 : index
    %c0_339 = arith.constant 0 : index
    %745 = vector.load %arg26[%c0_338, %c0_339] : memref<1x128xf32, #tpu.memory_space<vmem>>, vector<1x128xf32>
    %c0_340 = arith.constant 0 : index
    %c0_341 = arith.constant 0 : index
    %746 = vector.load %arg27[%c0_340, %c0_341] : memref<1x128xf32, #tpu.memory_space<vmem>>, vector<1x128xf32>
    %cst_342 = arith.constant dense<0.000000e+00> : vector<16xf32>
    %747 = vector.multi_reduction <add>, %744, %cst_342 [1] : vector<16x128xf32> to vector<16xf32>
    %748 = vector.shape_cast %747 : vector<16xf32> to vector<16x1xf32>
    %cst_343 = arith.constant 1.280000e+02 : f32
    %749 = vector.broadcast %cst_343 : f32 to vector<16x1xf32>
    %750 = arith.divf %748, %749 : vector<16x1xf32>
    %751 = vector.broadcast %750 : vector<16x1xf32> to vector<16x128xf32>
    %752 = arith.subf %744, %751 : vector<16x128xf32>
    %753 = arith.mulf %752, %752 : vector<16x128xf32>
    %cst_344 = arith.constant dense<0.000000e+00> : vector<16xf32>
    %754 = vector.multi_reduction <add>, %753, %cst_344 [1] : vector<16x128xf32> to vector<16xf32>
    %755 = vector.shape_cast %754 : vector<16xf32> to vector<16x1xf32>
    %cst_345 = arith.constant 1.280000e+02 : f32
    %756 = vector.broadcast %cst_345 : f32 to vector<16x1xf32>
    %757 = arith.divf %755, %756 : vector<16x1xf32>
    %cst_346 = arith.constant 9.99999974E-6 : f32
    %758 = vector.broadcast %cst_346 : f32 to vector<16x1xf32>
    %759 = arith.addf %757, %758 : vector<16x1xf32>
    %760 = math.rsqrt %759 : vector<16x1xf32>
    %761 = vector.broadcast %760 : vector<16x1xf32> to vector<16x128xf32>
    %762 = arith.mulf %752, %761 : vector<16x128xf32>
    %763 = vector.broadcast %745 : vector<1x128xf32> to vector<16x128xf32>
    %764 = arith.mulf %762, %763 : vector<16x128xf32>
    %765 = vector.broadcast %746 : vector<1x128xf32> to vector<16x128xf32>
    %766 = arith.addf %764, %765 : vector<16x128xf32>
    %c0_347 = arith.constant 0 : index
    %c0_348 = arith.constant 0 : index
    %767 = vector.load %arg42[%c0_347, %c0_348] : memref<16x128xf32, #tpu.memory_space<vmem>>, vector<16x128xf32>
    tpu.vector_store %arg42[%c0_347, %c0_348], %766 {strides = array<i32>} : memref<16x128xf32, #tpu.memory_space<vmem>>, vector<16x128xf32>,
    %c0_349 = arith.constant 0 : index
    %c0_350 = arith.constant 0 : index
    %768 = vector.load %arg24[%c0_349, %c0_350] : memref<2x16xf32, #tpu.memory_space<vmem>>, vector<2x16xf32>
    %cst_351 = arith.constant dense<0.000000e+00> : vector<2x128xf32>
    %769 = tpu.matmul %768, %766, %cst_351 {dimension_numbers = #tpu.dot_dimension_numbers<[1], [0], [0], [1], [0, 0, 1, 1], [], []>} : vector<2x16xf32>, vector<16x128xf32>, vector<2x128xf32> -> vector<2x128xf32>
    %c0_352 = arith.constant 0 : index
    %c0_353 = arith.constant 0 : index
    %770 = vector.load %arg43[%c0_352, %c0_353] : memref<2x128xf32, #tpu.memory_space<vmem>>, vector<2x128xf32>
    tpu.vector_store %arg43[%c0_352, %c0_353], %769 {strides = array<i32>} : memref<2x128xf32, #tpu.memory_space<vmem>>, vector<2x128xf32>,
    return
  }
  func.func @transform_0(%arg0: i32) -> (i32, i32) {
    %c0_i32 = arith.constant 0 : i32
    %c0_i32_0 = arith.constant 0 : i32
    %c0_i32_1 = arith.constant 0 : i32
    return %c0_i32, %c0_i32_0 : i32, i32
  }
  func.func @transform_1(%arg0: i32) -> (i32, i32) {
    %c0_i32 = arith.constant 0 : i32
    %c0_i32_0 = arith.constant 0 : i32
    %c0_i32_1 = arith.constant 0 : i32
    return %c0_i32, %c0_i32_0 : i32, i32
  }
  func.func @transform_2(%arg0: i32) -> (i32, i32) {
    %c0_i32 = arith.constant 0 : i32
    %c0_i32_0 = arith.constant 0 : i32
    %c0_i32_1 = arith.constant 0 : i32
    return %c0_i32, %c0_i32_0 : i32, i32
  }
  func.func @transform_3(%arg0: i32) -> (i32, i32) {
    %c0_i32 = arith.constant 0 : i32
    %c0_i32_0 = arith.constant 0 : i32
    %c0_i32_1 = arith.constant 0 : i32
    return %c0_i32, %c0_i32_0 : i32, i32
  }
  func.func @transform_4(%arg0: i32) -> (i32, i32) {
    %c0_i32 = arith.constant 0 : i32
    %c0_i32_0 = arith.constant 0 : i32
    %c0_i32_1 = arith.constant 0 : i32
    return %c0_i32, %c0_i32_0 : i32, i32
  }
  func.func @transform_5(%arg0: i32) -> (i32, i32) {
    %c0_i32 = arith.constant 0 : i32
    %c0_i32_0 = arith.constant 0 : i32
    %c0_i32_1 = arith.constant 0 : i32
    return %c0_i32, %c0_i32_0 : i32, i32
  }
  func.func @transform_6(%arg0: i32) -> (i32, i32) {
    %c0_i32 = arith.constant 0 : i32
    %c0_i32_0 = arith.constant 0 : i32
    %c0_i32_1 = arith.constant 0 : i32
    return %c0_i32, %c0_i32_0 : i32, i32
  }
  func.func @transform_7(%arg0: i32) -> (i32, i32) {
    %c0_i32 = arith.constant 0 : i32
    %c0_i32_0 = arith.constant 0 : i32
    %c0_i32_1 = arith.constant 0 : i32
    return %c0_i32, %c0_i32_0 : i32, i32
  }
  func.func @transform_8(%arg0: i32) -> (i32, i32, i32) {
    %c0_i32 = arith.constant 0 : i32
    %c0_i32_0 = arith.constant 0 : i32
    %c0_i32_1 = arith.constant 0 : i32
    %c0_i32_2 = arith.constant 0 : i32
    return %c0_i32, %c0_i32_0, %c0_i32_1 : i32, i32, i32
  }
  func.func @transform_9(%arg0: i32) -> (i32, i32, i32) {
    %c0_i32 = arith.constant 0 : i32
    %c0_i32_0 = arith.constant 0 : i32
    %c0_i32_1 = arith.constant 0 : i32
    %c0_i32_2 = arith.constant 0 : i32
    return %c0_i32, %c0_i32_0, %c0_i32_1 : i32, i32, i32
  }
  func.func @transform_10(%arg0: i32) -> (i32, i32, i32) {
    %c0_i32 = arith.constant 0 : i32
    %c0_i32_0 = arith.constant 0 : i32
    %c0_i32_1 = arith.constant 0 : i32
    %c0_i32_2 = arith.constant 0 : i32
    return %c0_i32, %c0_i32_0, %c0_i32_1 : i32, i32, i32
  }
  func.func @transform_11(%arg0: i32) -> (i32, i32, i32) {
    %c0_i32 = arith.constant 0 : i32
    %c0_i32_0 = arith.constant 0 : i32
    %c0_i32_1 = arith.constant 0 : i32
    %c0_i32_2 = arith.constant 0 : i32
    return %c0_i32, %c0_i32_0, %c0_i32_1 : i32, i32, i32
  }
  func.func @transform_12(%arg0: i32) -> (i32, i32, i32) {
    %c0_i32 = arith.constant 0 : i32
    %c0_i32_0 = arith.constant 0 : i32
    %c0_i32_1 = arith.constant 0 : i32
    %c0_i32_2 = arith.constant 0 : i32
    return %c0_i32, %c0_i32_0, %c0_i32_1 : i32, i32, i32
  }
  func.func @transform_13(%arg0: i32) -> (i32, i32, i32) {
    %c0_i32 = arith.constant 0 : i32
    %c0_i32_0 = arith.constant 0 : i32
    %c0_i32_1 = arith.constant 0 : i32
    %c0_i32_2 = arith.constant 0 : i32
    return %c0_i32, %c0_i32_0, %c0_i32_1 : i32, i32, i32
  }
  func.func @transform_14(%arg0: i32) -> (i32, i32, i32) {
    %c0_i32 = arith.constant 0 : i32
    %c0_i32_0 = arith.constant 0 : i32
    %c0_i32_1 = arith.constant 0 : i32
    %c0_i32_2 = arith.constant 0 : i32
    return %c0_i32, %c0_i32_0, %c0_i32_1 : i32, i32, i32
  }
  func.func @transform_15(%arg0: i32) -> (i32, i32, i32) {
    %c0_i32 = arith.constant 0 : i32
    %c0_i32_0 = arith.constant 0 : i32
    %c0_i32_1 = arith.constant 0 : i32
    %c0_i32_2 = arith.constant 0 : i32
    return %c0_i32, %c0_i32_0, %c0_i32_1 : i32, i32, i32
  }
  func.func @transform_16(%arg0: i32) -> (i32, i32, i32) {
    %c0_i32 = arith.constant 0 : i32
    %c0_i32_0 = arith.constant 0 : i32
    %c0_i32_1 = arith.constant 0 : i32
    %c0_i32_2 = arith.constant 0 : i32
    return %c0_i32, %c0_i32_0, %c0_i32_1 : i32, i32, i32
  }
  func.func @transform_17(%arg0: i32) -> (i32, i32, i32) {
    %c0_i32 = arith.constant 0 : i32
    %c0_i32_0 = arith.constant 0 : i32
    %c0_i32_1 = arith.constant 0 : i32
    %c0_i32_2 = arith.constant 0 : i32
    return %c0_i32, %c0_i32_0, %c0_i32_1 : i32, i32, i32
  }
  func.func @transform_18(%arg0: i32) -> (i32, i32, i32) {
    %c0_i32 = arith.constant 0 : i32
    %c0_i32_0 = arith.constant 0 : i32
    %c0_i32_1 = arith.constant 0 : i32
    %c0_i32_2 = arith.constant 0 : i32
    return %c0_i32, %c0_i32_0, %c0_i32_1 : i32, i32, i32
  }
  func.func @transform_19(%arg0: i32) -> (i32, i32, i32) {
    %c0_i32 = arith.constant 0 : i32
    %c0_i32_0 = arith.constant 0 : i32
    %c0_i32_1 = arith.constant 0 : i32
    %c0_i32_2 = arith.constant 0 : i32
    return %c0_i32, %c0_i32_0, %c0_i32_1 : i32, i32, i32
  }
  func.func @transform_20(%arg0: i32) -> (i32, i32) {
    %c0_i32 = arith.constant 0 : i32
    %c0_i32_0 = arith.constant 0 : i32
    %c0_i32_1 = arith.constant 0 : i32
    return %c0_i32, %c0_i32_0 : i32, i32
  }
  func.func @transform_21(%arg0: i32) -> (i32, i32) {
    %c0_i32 = arith.constant 0 : i32
    %c0_i32_0 = arith.constant 0 : i32
    %c0_i32_1 = arith.constant 0 : i32
    return %c0_i32, %c0_i32_0 : i32, i32
  }
  func.func @transform_22(%arg0: i32) -> (i32, i32) {
    %c0_i32 = arith.constant 0 : i32
    %c0_i32_0 = arith.constant 0 : i32
    %c0_i32_1 = arith.constant 0 : i32
    return %c0_i32, %c0_i32_0 : i32, i32
  }
  func.func @transform_23(%arg0: i32) -> (i32, i32) {
    %c0_i32 = arith.constant 0 : i32
    %c0_i32_0 = arith.constant 0 : i32
    %c0_i32_1 = arith.constant 0 : i32
    return %c0_i32, %c0_i32_0 : i32, i32
  }
  func.func @transform_24(%arg0: i32) -> (i32, i32) {
    %c0_i32 = arith.constant 0 : i32
    %c0_i32_0 = arith.constant 0 : i32
    %c0_i32_1 = arith.constant 0 : i32
    return %c0_i32, %c0_i32_0 : i32, i32
  }
  func.func @transform_25(%arg0: i32) -> (i32, i32) {
    %c0_i32 = arith.constant 0 : i32
    %c0_i32_0 = arith.constant 0 : i32
    %c0_i32_1 = arith.constant 0 : i32
    return %c0_i32, %c0_i32_0 : i32, i32
  }
  func.func @transform_26(%arg0: i32) -> (i32, i32) {
    %c0_i32 = arith.constant 0 : i32
    %c0_i32_0 = arith.constant 0 : i32
    %c0_i32_1 = arith.constant 0 : i32
    return %c0_i32, %c0_i32_0 : i32, i32
  }
  func.func @transform_27(%arg0: i32) -> (i32, i32, i32) {
    %c0_i32 = arith.constant 0 : i32
    %c0_i32_0 = arith.constant 0 : i32
    %c0_i32_1 = arith.constant 0 : i32
    %c0_i32_2 = arith.constant 0 : i32
    return %c0_i32, %c0_i32_0, %c0_i32_1 : i32, i32, i32
  }
  func.func @transform_28(%arg0: i32) -> (i32, i32, i32) {
    %c0_i32 = arith.constant 0 : i32
    %c0_i32_0 = arith.constant 0 : i32
    %c0_i32_1 = arith.constant 0 : i32
    %c0_i32_2 = arith.constant 0 : i32
    return %c0_i32, %c0_i32_0, %c0_i32_1 : i32, i32, i32
  }
  func.func @transform_29(%arg0: i32) -> (i32, i32, i32) {
    %c0_i32 = arith.constant 0 : i32
    %c0_i32_0 = arith.constant 0 : i32
    %c0_i32_1 = arith.constant 0 : i32
    %c0_i32_2 = arith.constant 0 : i32
    return %c0_i32, %c0_i32_0, %c0_i32_1 : i32, i32, i32
  }
  func.func @transform_30(%arg0: i32) -> (i32, i32, i32) {
    %c0_i32 = arith.constant 0 : i32
    %c0_i32_0 = arith.constant 0 : i32
    %c0_i32_1 = arith.constant 0 : i32
    %c0_i32_2 = arith.constant 0 : i32
    return %c0_i32, %c0_i32_0, %c0_i32_1 : i32, i32, i32
  }
  func.func @transform_31(%arg0: i32) -> (i32, i32, i32) {
    %c0_i32 = arith.constant 0 : i32
    %c0_i32_0 = arith.constant 0 : i32
    %c0_i32_1 = arith.constant 0 : i32
    %c0_i32_2 = arith.constant 0 : i32
    return %c0_i32, %c0_i32_0, %c0_i32_1 : i32, i32, i32
  }
  func.func @transform_32(%arg0: i32) -> (i32, i32, i32) {
    %c0_i32 = arith.constant 0 : i32
    %c0_i32_0 = arith.constant 0 : i32
    %c0_i32_1 = arith.constant 0 : i32
    %c0_i32_2 = arith.constant 0 : i32
    return %c0_i32, %c0_i32_0, %c0_i32_1 : i32, i32, i32
  }
  func.func @transform_33(%arg0: i32) -> (i32, i32, i32) {
    %c0_i32 = arith.constant 0 : i32
    %c0_i32_0 = arith.constant 0 : i32
    %c0_i32_1 = arith.constant 0 : i32
    %c0_i32_2 = arith.constant 0 : i32
    return %c0_i32, %c0_i32_0, %c0_i32_1 : i32, i32, i32
  }
  func.func @transform_34(%arg0: i32) -> (i32, i32, i32) {
    %c0_i32 = arith.constant 0 : i32
    %c0_i32_0 = arith.constant 0 : i32
    %c0_i32_1 = arith.constant 0 : i32
    %c0_i32_2 = arith.constant 0 : i32
    return %c0_i32, %c0_i32_0, %c0_i32_1 : i32, i32, i32
  }
  func.func @transform_35(%arg0: i32) -> (i32, i32, i32) {
    %c0_i32 = arith.constant 0 : i32
    %c0_i32_0 = arith.constant 0 : i32
    %c0_i32_1 = arith.constant 0 : i32
    %c0_i32_2 = arith.constant 0 : i32
    return %c0_i32, %c0_i32_0, %c0_i32_1 : i32, i32, i32
  }
  func.func @transform_36(%arg0: i32) -> (i32, i32, i32) {
    %c0_i32 = arith.constant 0 : i32
    %c0_i32_0 = arith.constant 0 : i32
    %c0_i32_1 = arith.constant 0 : i32
    %c0_i32_2 = arith.constant 0 : i32
    return %c0_i32, %c0_i32_0, %c0_i32_1 : i32, i32, i32
  }
  func.func @transform_37(%arg0: i32) -> (i32, i32, i32) {
    %c0_i32 = arith.constant 0 : i32
    %c0_i32_0 = arith.constant 0 : i32
    %c0_i32_1 = arith.constant 0 : i32
    %c0_i32_2 = arith.constant 0 : i32
    return %c0_i32, %c0_i32_0, %c0_i32_1 : i32, i32, i32
  }
  func.func @transform_38(%arg0: i32) -> (i32, i32, i32) {
    %c0_i32 = arith.constant 0 : i32
    %c0_i32_0 = arith.constant 0 : i32
    %c0_i32_1 = arith.constant 0 : i32
    %c0_i32_2 = arith.constant 0 : i32
    return %c0_i32, %c0_i32_0, %c0_i32_1 : i32, i32, i32
  }
  func.func @transform_39(%arg0: i32) -> (i32, i32, i32) {
    %c0_i32 = arith.constant 0 : i32
    %c0_i32_0 = arith.constant 0 : i32
    %c0_i32_1 = arith.constant 0 : i32
    %c0_i32_2 = arith.constant 0 : i32
    return %c0_i32, %c0_i32_0, %c0_i32_1 : i32, i32, i32
  }
  func.func @transform_40(%arg0: i32) -> (i32, i32) {
    %c0_i32 = arith.constant 0 : i32
    %c0_i32_0 = arith.constant 0 : i32
    %c0_i32_1 = arith.constant 0 : i32
    return %c0_i32, %c0_i32_0 : i32, i32
  }
  func.func @transform_41(%arg0: i32) -> (i32, i32) {
    %c0_i32 = arith.constant 0 : i32
    %c0_i32_0 = arith.constant 0 : i32
    %c0_i32_1 = arith.constant 0 : i32
    return %c0_i32, %c0_i32_0 : i32, i32
  }
  func.func @transform_42(%arg0: i32) -> (i32, i32) {
    %c0_i32 = arith.constant 0 : i32
    %c0_i32_0 = arith.constant 0 : i32
    %c0_i32_1 = arith.constant 0 : i32
    return %c0_i32, %c0_i32_0 : i32, i32
  }
}

</mosaic_0001>

<bundles_post_ra>
// kernel: eq.1
= control target key start
LH: loop header
LB: loop body
LE: loop exit
PB: predicated region body
PF: predicated region fallthrough
CT: control target
= control target key end

     0   :  { %2 = vsyncpa [#allocation1], 0  ;;  %s58_s6 = smov [#allocation0]   ;;  %s85_s0 = inlined_call_operand.hbm [shape: s32[2,8], index: 0, kind: input, shape index: {}]   ;;  %s86_s1 = inlined_call_operand.vmem [shape: s32[16], index: 1, kind: output, shape index: {}]  }
   0x1   :  { %s7_s7 = sshll.u32 %s58_s6, 4  ;;  %s34_s10 = scalar_lea.hbm %s85_s0, 32  ;;  %s8_s7 = int_to_ptr.vmem [resolvable:$true] %s7_s7 }
   0x2   :  { %p35_p0 = scmp.ne.s32.totalorder %s85_s0, %s34_s10  ;;  %p38_p1 = scmp.lt.u32.totalorder %s34_s10, %s85_s0 }
   0x4   :  { %p40_p2 = pnand %p38_p1, %p35_p0 }
   0x6   :  { %43 = shalt.err (!%p40_p2)
}
   0x7   :  { %s44_s15 = scalar_lea.vmem %s8_s7, 32  ;;  %p49_p4 = scmp.lt.s32.totalorder %s8_s7, %s8_s7 }
   0x8   :  { %p45_p3 = scmp.ne.s32.totalorder %s8_s7, %s44_s15  ;;  %p50_p5 = scmp.lt.s32.totalorder %s44_s15, %s44_s15 }
   0xa   :  { %p51_p6 = por %p50_p5, %p49_p4 }
   0xc   :  { %p52_p7 = pnand %p51_p6, %p45_p3 }
   0xe   :  { %55 = shalt.err (!%p52_p7)
}
   0xf   :  { %10 = dma.hbm_to_vmem [thread:$0]  %s85_s0, 32, %s8_s7, [#allocation1]  }
  0x10   :  { %56 = dma.done.wait [#allocation1], 32  }
  0x11   :  { %57 = vsyncadd [#allocation1], 4294967264  ;;  %v14_v0 = vld [vmem:[#allocation0] sm:$0x3]  ;;  %vm17_vm0 = vcmask 64512   ;;  %s59_s0 = smov 8  }
  0x12   :  { %15 = vst [vmem:[#allocation3] sm:$0x3] %v14_v0  ;;  %vm23_vm1 = vcmask 130112  }
  0x19   :  { %v16_v1 = vld [vmem:[#allocation3] sm:$0x1]   ;;  %v20_v2 = vld [vmem:[#allocation3 + $0x1] sm:$0x1]  }
  0x1a   :  { %21 = vrot.lane.b32.xlu0 %v20_v2, %s59_s0  ;;  %18 = vst.msk [vmem:[#allocation2] sm:$0x1] %vm17_vm0, %v16_v1  }
  0x8c   :  { %v22_v3 = vpop.permute.xlu0 %21  }
  0x8d   :  { %24 = vst.msk [vmem:[#allocation2] sm:$0x1] %vm23_vm1, %v22_v3  }
  0x94   :  { %v28_v4 = vld [vmem:[#allocation2] sm:$0x1] }
  0x95   :  { %30 = vst [vmem:[%s86_s1] sm:$0x1] %v28_v4 }
  0x96   :  { %31 = vsyncpa [#allocation1], 1 }

// kernel: _lambda_.1
= control target key start
LH: loop header
LB: loop body
LE: loop exit
PB: predicated region body
PF: predicated region fallthrough
CT: control target
= control target key end

     0   :  { %s10364_s6 = smov 1   ;;  %s10365_s10 = smov 2   ;;  %s11663_s0 = inlined_call_operand.smem [shape: u32[43], index: -1, kind: input, shape index: {}] }
   0x1   :  { %s10450_s5 = sld [smem:[%s11663_s0]]   ;;  %s10366_s14 = smov 3  }
   0x2   :  { %s10455_s9 = sld [smem:[%s11663_s0 + %s10364_s6]]   ;;  %s10367_s18 = smov 4  }
   0x3   :  { %s10460_s13 = sld [smem:[%s11663_s0 + %s10365_s10]]   ;;  %s10368_s22 = smov 5  }
   0x4   :  { %s10465_s17 = sld [smem:[%s11663_s0 + %s10366_s14]]   ;;  %s10369_s26 = smov 6  }
   0x5   :  { %s10470_s21 = sld [smem:[%s11663_s0 + %s10367_s18]]   ;;  %s10370_s30 = smov 7  }
   0x6   :  { %s10475_s25 = sld [smem:[%s11663_s0 + %s10368_s22]]   ;;  %s10371_s4 = smov 8  }
   0x7   :  { %11685 = sst [smem:[#allocation46_spill]] %s10450_s5  ;;  %s10372_s10 = smov 9  }
   0x8   :  { %11686 = sst [smem:[#allocation47_spill]] %s10455_s9  ;;  %s10373_s15 = smov 10  }
   0x9   :  { %11687 = sst [smem:[#allocation48_spill]] %s10460_s13  ;;  %s10374_s20 = smov 11  }
   0xa   :  { %11688 = sst [smem:[#allocation49_spill]] %s10465_s17  ;;  %s10376_s1 = smov 13  }
   0xb   :  { %s10480_s29 = sld [smem:[%s11663_s0 + %s10369_s26]]   ;;  %s10375_s26 = smov 12  }
   0xc   :  { %11689 = sst [smem:[#allocation50_spill]] %s10475_s25  ;;  %s10377_s7 = smov 14  }
   0xd   :  { %s10485_s3 = sld [smem:[%s11663_s0 + %s10370_s30]]   ;;  %s10379_s22 = smov 16  }
   0xe   :  { %s10490_s8 = sld [smem:[%s11663_s0 + %s10371_s4]]   ;;  %s10380_s28 = smov 17  }
   0xf   :  { %s10495_s14 = sld [smem:[%s11663_s0 + %s10372_s10]]  }
  0x10   :  { %s10500_s19 = sld [smem:[%s11663_s0 + %s10373_s15]]   ;;  %s10378_s15 = smov 15  }
  0x11   :  { %11690 = sst [smem:[#allocation51_spill]] %s10480_s29 }
  0x12   :  { %s10505_s24 = sld [smem:[%s11663_s0 + %s10374_s20]]  }
  0x13   :  { %11691 = sst [smem:[#allocation52_spill]] %s10485_s3 }
  0x14   :  { %11692 = sst [smem:[#allocation53_spill]] %s10490_s8 }
  0x15   :  { %11693 = sst [smem:[#allocation54_spill]] %s10495_s14 }
  0x16   :  { %11694 = sst [smem:[#allocation55_spill]] %s10500_s19 }
  0x17   :  { %s10510_s30 = sld [smem:[%s11663_s0 + %s10375_s26]]  }
  0x18   :  { %11695 = sst [smem:[#allocation56_spill]] %s10505_s24 }
  0x19   :  { %s10515_s6 = sld [smem:[%s11663_s0 + %s10376_s1]]  }
  0x1a   :  { %s10520_s12 = sld [smem:[%s11663_s0 + %s10377_s7]]   ;;  %s10381_s7 = smov 18  }
  0x1b   :  { %s10525_s20 = sld [smem:[%s11663_s0 + %s10378_s15]]   ;;  %s10382_s15 = smov 19  }
  0x1c   :  { %s10530_s27 = sld [smem:[%s11663_s0 + %s10379_s22]]   ;;  %s10383_s22 = smov 20  }
  0x1d   :  { %11696 = sst [smem:[#allocation57_spill]] %s10510_s30 }
  0x1e   :  { %s10535_s4 = sld [smem:[%s11663_s0 + %s10380_s28]]   ;;  %s10384_s28 = smov 21  }
  0x1f   :  { %11697 = sst [smem:[#allocation58_spill]] %s10515_s6 }
  0x20   :  { %11698 = sst [smem:[#allocation59_spill]] %s10520_s12 }
  0x21   :  { %11699 = sst [smem:[#allocation60_spill]] %s10525_s20 }
  0x22   :  { %11700 = sst [smem:[#allocation61_spill]] %s10530_s27 }
  0x23   :  { %s10540_s17 = sld [smem:[%s11663_s0 + %s10381_s7]]   ;;  %s10385_s7 = smov 22  }
  0x24   :  { %s10545_s3 = sld [smem:[%s11663_s0 + %s10382_s15]]   ;;  %s10386_s15 = smov 23  }
  0x25   :  { %s10550_s29 = sld [smem:[%s11663_s0 + %s10383_s22]]   ;;  %s10387_s22 = smov 24  }
  0x26   :  { %s10555_s20 = sld [smem:[%s11663_s0 + %s10384_s28]]   ;;  %s10388_s28 = smov 25  }
  0x27   :  { %s10560_s12 = sld [smem:[%s11663_s0 + %s10385_s7]]   ;;  %s10389_s7 = smov 26  }
  0x28   :  { %s10565_s27 = sld [smem:[%s11663_s0 + %s10386_s15]]   ;;  %s10390_s15 = smov 27  }
  0x2b   :  { %11701 = sst [smem:[#allocation62_spill]] %s10550_s29 }
  0x2c   :  { %11702 = sst [smem:[#allocation63_spill]] %s10555_s20 }
  0x2d   :  { %11703 = sst [smem:[#allocation64_spill]] %s10560_s12 }
  0x2e   :  { %11704 = sst [smem:[#allocation65_spill]] %s10565_s27 }
  0x2f   :  { %s10570_s29 = sld [smem:[%s11663_s0 + %s10387_s22]]   ;;  %s10391_s22 = smov 28  }
  0x30   :  { %s10575_s20 = sld [smem:[%s11663_s0 + %s10388_s28]]   ;;  %s10392_s28 = smov 29  }
  0x31   :  { %s10580_s12 = sld [smem:[%s11663_s0 + %s10389_s7]]   ;;  %s10393_s7 = smov 30  }
  0x32   :  { %s10585_s27 = sld [smem:[%s11663_s0 + %s10390_s15]]   ;;  %s10394_s15 = smov 31  }
  0x33   :  { %s10590_s6 = sld [smem:[%s11663_s0 + %s10391_s22]]   ;;  %s10395_s22 = smov 32  }
  0x34   :  { %s10595_s30 = sld [smem:[%s11663_s0 + %s10392_s28]]   ;;  %s10396_s28 = smov 33  }
  0x35   :  { %s10600_s13 = sld [smem:[%s11663_s0 + %s10393_s7]]   ;;  %s10397_s7 = smov 34  }
  0x36   :  { %s10605_s24 = sld [smem:[%s11663_s0 + %s10394_s15]]   ;;  %s10398_s15 = smov 35  }
  0x37   :  { %s10610_s14 = sld [smem:[%s11663_s0 + %s10395_s22]]   ;;  %s10399_s22 = smov 36  }
  0x38   :  { %s10620_s8 = sld [smem:[%s11663_s0 + %s10397_s7]]   ;;  %s10401_s7 = smov 38  }
  0x39   :  { %s10625_s19 = sld [smem:[%s11663_s0 + %s10398_s15]]   ;;  %s10402_s15 = smov 39  }
  0x3a   :  { %11705 = sst [smem:[#allocation66_spill]] %s10595_s30 }
  0x3b   :  { %s10615_s30 = sld [smem:[%s11663_s0 + %s10396_s28]]   ;;  %s10400_s28 = smov 37  }
  0x3c   :  { %s10630_s9 = sld [smem:[%s11663_s0 + %s10399_s22]]   ;;  %s10403_s22 = smov 40  }
  0x3d   :  { %s10635_s25 = sld [smem:[%s11663_s0 + %s10400_s28]]   ;;  %s10404_s28 = smov 41  }
  0x3e   :  { %s10640_s5 = sld [smem:[%s11663_s0 + %s10401_s7]]   ;;  %s10405_s7 = smov 42  }
  0x3f   :  { %11707 = sst [smem:[#allocation68_spill]] %s10625_s19 }
  0x40   :  { %s10645_s19 = sld [smem:[%s11663_s0 + %s10402_s15]]  }
  0x41   :  { %11706 = sst [smem:[#allocation67_spill]] %s10615_s30 }
  0x42   :  { %s10650_s30 = sld [smem:[%s11663_s0 + %s10403_s22]]  }
  0x43   :  { %11708 = sst [smem:[#allocation69_spill]] %s10635_s25 }
  0x44   :  { %11709 = sst [smem:[#allocation70_spill]] %s10640_s5 }
  0x45   :  { %s10655_s25 = sld [smem:[%s11663_s0 + %s10404_s28]]  }
  0x46   :  { %s10660_s5 = sld [smem:[%s11663_s0 + %s10405_s7]]  }
  0x47   :  { %91 = vsyncpa [#allocation3], 0 }
  0x48   :  { %92 = vsyncpa [#allocation6], 0 }
  0x49   :  { %93 = vsyncpa [#allocation9], 0 }
  0x4a   :  { %94 = vsyncpa [#allocation12], 0 }
  0x4b   :  { %95 = vsyncpa [#allocation15], 0 }
  0x4c   :  { %96 = vsyncpa [#allocation18], 0 }
  0x4d   :  { %97 = vsyncpa [#allocation21], 0 }
  0x4e   :  { %98 = vsyncpa [#allocation24], 0 }
  0x4f   :  { %99 = vsyncpa [#allocation27], 0 }
  0x50   :  { %100 = vsyncpa [#allocation30], 0 }
  0x51   :  { %101 = vsyncpa [#allocation4], 0 }
  0x52   :  { %102 = vsyncpa [#allocation33], 0  ;;  %s10406_s15 = smov [#allocation5]   ;;  %s9900_s0 = scalar_lea.hbm %s10535_s4, 64 }
  0x53   :  { %s152_s16 = sshll.u32 %s10406_s15, 4  ;;  %p9901_p0 = scmp.ne.s32.totalorder %s10535_s4, %s9900_s0  ;;  %s153_s16 = int_to_ptr.vmem [resolvable:$true] %s152_s16 }
  0x54   :  { %p9904_p1 = scmp.lt.u32.totalorder %s9900_s0, %s10535_s4 }
  0x56   :  { %p9906_p2 = pnand %p9904_p1, %p9901_p0 }
  0x58   :  { %9909 = shalt.err (!%p9906_p2)
}
  0x59   :  { %s9910_s18 = scalar_lea.vmem %s153_s16, 64  ;;  %p9915_p4 = scmp.lt.s32.totalorder %s153_s16, %s153_s16 }
  0x5a   :  { %p9911_p3 = scmp.ne.s32.totalorder %s153_s16, %s9910_s18  ;;  %p9916_p5 = scmp.lt.s32.totalorder %s9910_s18, %s9910_s18 }
  0x5c   :  { %p9917_p6 = por %p9916_p5, %p9915_p4 }
  0x5e   :  { %p9918_p7 = pnand %p9917_p6, %p9911_p3 }
  0x60   :  { %9921 = shalt.err (!%p9918_p7)
}
  0x61   :  { %s10407_s22 = smov 32   ;;  %s10408_s23 = smov 2  }
  0x62   :  { %158 = dma.hbm_to_vmem [thread:$0]  %s10535_s4, 64, %s153_s16, [#allocation6], %s10407_s22, %s10407_s22, %s10408_s23  }
  0x63   :  { %s10409_s26 = smov [#allocation8]   ;;  %s9922_s1 = scalar_lea.hbm %s10545_s3, 32 }
  0x64   :  { %s176_s28 = sshll.u32 %s10409_s26, 4  ;;  %p9923_p8 = scmp.ne.s32.totalorder %s10545_s3, %s9922_s1  ;;  %s177_s28 = int_to_ptr.vmem [resolvable:$true] %s176_s28 }
  0x65   :  { %p9926_p9 = scmp.lt.u32.totalorder %s9922_s1, %s10545_s3 }
  0x67   :  { %p9928_p10 = pnand %p9926_p9, %p9923_p8 }
  0x69   :  { %9931 = shalt.err (!%p9928_p10)
}
  0x6a   :  { %s9932_s2 = scalar_lea.vmem %s177_s28, 32  ;;  %p9937_p12 = scmp.lt.s32.totalorder %s177_s28, %s177_s28 }
  0x6b   :  { %p9933_p11 = scmp.ne.s32.totalorder %s177_s28, %s9932_s2  ;;  %p9938_p13 = scmp.lt.s32.totalorder %s9932_s2, %s9932_s2 }
  0x6d   :  { %p9939_p0 = por %p9938_p13, %p9937_p12 }
  0x6f   :  { %p9940_p1 = pnand %p9939_p0, %p9933_p11 }
  0x71   :  { %9943 = shalt.err (!%p9940_p1)
}
  0x72   :  { %s10410_s7 = smov 16   ;;  %s10411_s4 = smov 1  }
  0x73   :  { %182 = dma.hbm_to_vmem [thread:$0]  %s10545_s3, 32, %s177_s28, [#allocation9], %s10410_s7, %s10410_s7, %s10411_s4  }
  0x74   :  { %s10412_s10 = smov [#allocation11]   ;;  %s10413_s15 = smov [#allocation14]  }
  0x75   :  { %s209_s11 = sshll.u32 %s10412_s10, 4  ;;  %s228_s16 = sshll.u32 %s10413_s15, 4  ;;  %s210_s11 = int_to_ptr.vmem [resolvable:$true] %s209_s11  ;;  %s10676_s16 = int_to_ptr.vmem [resolvable:$true] %s228_s16 }
  0x76   :  { %s9944_s0 = scalar_lea.hbm %s10575_s20, 16 }
  0x77   :  { %p9945_p2 = scmp.ne.s32.totalorder %s10575_s20, %s9944_s0  ;;  %p9948_p3 = scmp.lt.u32.totalorder %s9944_s0, %s10575_s20 }
  0x79   :  { %p9950_p4 = pnand %p9948_p3, %p9945_p2 }
  0x7b   :  { %9953 = shalt.err (!%p9950_p4)
}
  0x7c   :  { %s9954_s18 = scalar_lea.vmem %s210_s11, 16  ;;  %s9958_s26 = scalar_lea.vmem %s210_s11, 32 }
  0x7d   :  { %p9955_p5 = scmp.ne.s32.totalorder %s210_s11, %s9954_s18  ;;  %p9959_p6 = scmp.lt.s32.totalorder %s210_s11, %s210_s11 }
  0x7e   :  { %p9960_p7 = scmp.lt.s32.totalorder %s9958_s26, %s9954_s18 }
  0x80   :  { %p9961_p8 = por %p9960_p7, %p9959_p6 }
  0x82   :  { %p9962_p9 = pnand %p9961_p8, %p9955_p5 }
  0x84   :  { %9965 = shalt.err (!%p9962_p9)
}
  0x85   :  { %212 = dma.hbm_to_vmem [thread:$0]  %s10575_s20, 16, %s210_s11, [#allocation12]  }
  0x86   :  { %s9966_s3 = scalar_lea.hbm %s10585_s27, 32 }
  0x87   :  { %p9967_p10 = scmp.ne.s32.totalorder %s10585_s27, %s9966_s3  ;;  %p9970_p11 = scmp.lt.u32.totalorder %s9966_s3, %s10585_s27 }
  0x89   :  { %p9972_p12 = pnand %p9970_p11, %p9967_p10 }
  0x8b   :  { %9975 = shalt.err (!%p9972_p12)
}
  0x8c   :  { %s9976_s28 = scalar_lea.vmem %s10676_s16, 32  ;;  %p9981_p0 = scmp.lt.s32.totalorder %s10676_s16, %s10676_s16 }
  0x8d   :  { %p9977_p13 = scmp.ne.s32.totalorder %s10676_s16, %s9976_s28  ;;  %p9982_p1 = scmp.lt.s32.totalorder %s9976_s28, %s9976_s28 }
  0x8f   :  { %p9983_p2 = por %p9982_p1, %p9981_p0 }
  0x91   :  { %p9984_p3 = pnand %p9983_p2, %p9977_p13 }
  0x93   :  { %9987 = shalt.err (!%p9984_p3)
}
  0x94   :  { %234 = dma.hbm_to_vmem [thread:$0]  %s10585_s27, 32, %s10676_s16, [#allocation15], %s10410_s7, %s10410_s7, %s10411_s4  }
  0x95   :  { %s10414_s20 = smov [#allocation17]   ;;  %s9988_s2 = scalar_lea.hbm %s10600_s13, 96 }
  0x96   :  { %s254_s1 = sshll.u32 %s10414_s20, 4  ;;  %p9989_p4 = scmp.ne.s32.totalorder %s10600_s13, %s9988_s2  ;;  %s255_s1 = int_to_ptr.vmem [resolvable:$true] %s254_s1 }
  0x97   :  { %p9992_p5 = scmp.lt.u32.totalorder %s9988_s2, %s10600_s13 }
  0x99   :  { %p9994_p6 = pnand %p9992_p5, %p9989_p4 }
  0x9b   :  { %9997 = shalt.err (!%p9994_p6)
}
  0x9c   :  { %s9998_s10 = scalar_lea.vmem %s255_s1, 96  ;;  %p10003_p8 = scmp.lt.s32.totalorder %s255_s1, %s255_s1 }
  0x9d   :  { %p9999_p7 = scmp.ne.s32.totalorder %s255_s1, %s9998_s10  ;;  %p10004_p9 = scmp.lt.s32.totalorder %s9998_s10, %s9998_s10 }
  0x9f   :  { %p10005_p10 = por %p10004_p9, %p10003_p8 }
  0xa1   :  { %p10006_p11 = pnand %p10005_p10, %p9999_p7 }
  0xa3   :  { %10009 = shalt.err (!%p10006_p11)
}
  0xa4   :  { %s10415_s11 = smov 48   ;;  %s10416_s27 = smov 3  }
  0xa5   :  { %260 = dma.hbm_to_vmem [thread:$0]  %s10600_s13, 96, %s255_s1, [#allocation18], %s10415_s11, %s10415_s11, %s10416_s27  }
  0xa6   :  { %s10417_s15 = smov [#allocation20]   ;;  %s10418_s0 = smov [#allocation23]  }
  0xa7   :  { %s278_s16 = sshll.u32 %s10417_s15, 4  ;;  %s302_s18 = sshll.u32 %s10418_s0, 4  ;;  %s279_s16 = int_to_ptr.vmem [resolvable:$true] %s278_s16  ;;  %s303_s18 = int_to_ptr.vmem [resolvable:$true] %s302_s18 }
  0xa8   :  { %s10010_s26 = scalar_lea.hbm %s10610_s14, 32 }
  0xa9   :  { %p10011_p12 = scmp.ne.s32.totalorder %s10610_s14, %s10010_s26  ;;  %p10014_p13 = scmp.lt.u32.totalorder %s10010_s26, %s10610_s14 }
  0xab   :  { %p10016_p0 = pnand %p10014_p13, %p10011_p12 }
  0xad   :  { %10019 = shalt.err (!%p10016_p0)
}
  0xae   :  { %s10020_s3 = scalar_lea.vmem %s279_s16, 32  ;;  %p10025_p2 = scmp.lt.s32.totalorder %s279_s16, %s279_s16 }
  0xaf   :  { %p10021_p1 = scmp.ne.s32.totalorder %s279_s16, %s10020_s3  ;;  %p10026_p3 = scmp.lt.s32.totalorder %s10020_s3, %s10020_s3 }
  0xb1   :  { %p10027_p4 = por %p10026_p3, %p10025_p2 }
  0xb3   :  { %p10028_p5 = pnand %p10027_p4, %p10021_p1 }
  0xb5   :  { %10031 = shalt.err (!%p10028_p5)
}
  0xb6   :  { %284 = dma.hbm_to_vmem [thread:$0]  %s10610_s14, 32, %s279_s16, [#allocation21], %s10410_s7, %s10410_s7, %s10411_s4  }
  0xb7   :  { %s10032_s13 = scalar_lea.hbm %s10620_s8, 32 }
  0xb8   :  { %p10033_p6 = scmp.ne.s32.totalorder %s10620_s8, %s10032_s13  ;;  %p10036_p7 = scmp.lt.u32.totalorder %s10032_s13, %s10620_s8 }
  0xba   :  { %p10038_p8 = pnand %p10036_p7, %p10033_p6 }
  0xbc   :  { %10041 = shalt.err (!%p10038_p8)
}
  0xbd   :  { %s10042_s28 = scalar_lea.vmem %s303_s18, 32  ;;  %p10047_p10 = scmp.lt.s32.totalorder %s303_s18, %s303_s18 }
  0xbe   :  { %p10043_p9 = scmp.ne.s32.totalorder %s303_s18, %s10042_s28  ;;  %p10048_p11 = scmp.lt.s32.totalorder %s10042_s28, %s10042_s28 }
  0xc0   :  { %p10049_p12 = por %p10048_p11, %p10047_p10 }
  0xc2   :  { %p10050_p13 = pnand %p10049_p12, %p10043_p9 }
  0xc4   :  { %10053 = shalt.err (!%p10050_p13)
}
  0xc5   :  { %308 = dma.hbm_to_vmem [thread:$0]  %s10620_s8, 32, %s303_s18, [#allocation24], %s10410_s7, %s10410_s7, %s10411_s4  }
  0xc6   :  { %s10419_s14 = smov [#allocation26]   ;;  %s10420_s1 = smov [#allocation2]  }
  0xc7   :  { %s326_s20 = sshll.u32 %s10419_s14, 4  ;;  %s116_s2 = sshll.u32 %s10420_s1, 4  ;;  %s327_s20 = int_to_ptr.vmem [resolvable:$true] %s326_s20  ;;  %s117_s2 = int_to_ptr.vmem [resolvable:$true] %s116_s2 }
  0xc8   :  { %s10054_s10 = scalar_lea.hbm %s10630_s9, 64 }
  0xc9   :  { %p10055_p0 = scmp.ne.s32.totalorder %s10630_s9, %s10054_s10  ;;  %p10058_p1 = scmp.lt.u32.totalorder %s10054_s10, %s10630_s9 }
  0xcb   :  { %p10060_p2 = pnand %p10058_p1, %p10055_p0 }
  0xcd   :  { %10063 = shalt.err (!%p10060_p2)
}
  0xce   :  { %s10064_s11 = scalar_lea.vmem %s327_s20, 64  ;;  %p10069_p4 = scmp.lt.s32.totalorder %s327_s20, %s327_s20 }
  0xcf   :  { %p10065_p3 = scmp.ne.s32.totalorder %s327_s20, %s10064_s11  ;;  %p10070_p5 = scmp.lt.s32.totalorder %s10064_s11, %s10064_s11 }
  0xd1   :  { %p10071_p6 = por %p10070_p5, %p10069_p4 }
  0xd3   :  { %p10072_p7 = pnand %p10071_p6, %p10065_p3 }
  0xd5   :  { %10075 = shalt.err (!%p10072_p7)
}
  0xd6   :  { %332 = dma.hbm_to_vmem [thread:$0]  %s10630_s9, 64, %s327_s20, [#allocation27], %s10407_s22, %s10407_s22, %s10408_s23  }
  0xd7   :  { %s10076_s8 = scalar_lea.hbm %s10470_s21, 1536 }
  0xd8   :  { %p10077_p8 = scmp.ne.s32.totalorder %s10470_s21, %s10076_s8  ;;  %p10080_p9 = scmp.lt.u32.totalorder %s10076_s8, %s10470_s21 }
  0xda   :  { %p10082_p10 = pnand %p10080_p9, %p10077_p8 }
  0xdc   :  { %10085 = shalt.err (!%p10082_p10)
}
  0xdd   :  { %s10086_s27 = scalar_lea.vmem %s117_s2, 1536  ;;  %p10091_p12 = scmp.lt.s32.totalorder %s117_s2, %s117_s2 }
  0xde   :  { %p10087_p11 = scmp.ne.s32.totalorder %s117_s2, %s10086_s27  ;;  %p10092_p13 = scmp.lt.s32.totalorder %s10086_s27, %s10086_s27 }
  0xe0   :  { %p10093_p0 = por %p10092_p13, %p10091_p12 }
  0xe2   :  { %p10094_p1 = pnand %p10093_p0, %p10087_p11 }
  0xe4   :  { %10097 = shalt.err (!%p10094_p1)
}
  0xe5   :  { %s10421_s15 = smov 64   ;;  %s10422_s16 = smov 4  }
  0xe6   :  { %122 = dma.hbm_to_vmem [thread:$0]  %s10470_s21, 1536, %s117_s2, [#allocation3], %s10421_s15, %s10421_s15, %s10422_s16  }
  0xe7   :  { %s10423_s9 = smov [#allocation7]   ;;  %s10424_s0 = smov [#allocation10]  }
  0xe8   :  { %s164_s23 = sshll.u32 %s10423_s9, 4  ;;  %s196_s18 = sshll.u32 %s10424_s0, 4  ;;  %s165_s23 = int_to_ptr.vmem [resolvable:$true] %s164_s23  ;;  %s197_s18 = int_to_ptr.vmem [resolvable:$true] %s196_s18 }
  0xe9   :  { %s10098_s26 = scalar_lea.hbm %s10540_s17, 4096 }
  0xea   :  { %p10099_p2 = scmp.ne.s32.totalorder %s10540_s17, %s10098_s26  ;;  %p10102_p3 = scmp.lt.u32.totalorder %s10098_s26, %s10540_s17 }
  0xec   :  { %p10104_p4 = pnand %p10102_p3, %p10099_p2 }
  0xee   :  { %10107 = shalt.err (!%p10104_p4)
}
  0xef   :  { %s10108_s3 = scalar_lea.vmem %s165_s23, 4096  ;;  %p10113_p6 = scmp.lt.s32.totalorder %s165_s23, %s165_s23 }
  0xf0   :  { %p10109_p5 = scmp.ne.s32.totalorder %s165_s23, %s10108_s3  ;;  %p10114_p7 = scmp.lt.s32.totalorder %s10108_s3, %s10108_s3 }
  0xf2   :  { %p10115_p8 = por %p10114_p7, %p10113_p6 }
  0xf4   :  { %p10116_p9 = pnand %p10115_p8, %p10109_p5 }
  0xf6   :  { %10119 = shalt.err (!%p10116_p9)
}
  0xf7   :  { %170 = dma.hbm_to_vmem [thread:$0]  %s10540_s17, 4096, %s165_s23, [#allocation6], %s10421_s15, %s10421_s15, %s10422_s16  }
  0xf8   :  { %s10120_s21 = scalar_lea.hbm %s10570_s29, 512 }
  0xf9   :  { %p10121_p10 = scmp.ne.s32.totalorder %s10570_s29, %s10120_s21  ;;  %p10124_p11 = scmp.lt.u32.totalorder %s10120_s21, %s10570_s29 }
  0xfb   :  { %p10126_p12 = pnand %p10124_p11, %p10121_p10 }
  0xfd   :  { %10129 = shalt.err (!%p10126_p12)
}
  0xfe   :  { %s10130_s13 = scalar_lea.vmem %s197_s18, 512  ;;  %p10135_p0 = scmp.lt.s32.totalorder %s197_s18, %s197_s18 }
  0xff   :  { %p10131_p13 = scmp.ne.s32.totalorder %s197_s18, %s10130_s13  ;;  %p10136_p1 = scmp.lt.s32.totalorder %s10130_s13, %s10130_s13 }
 0x101   :  { %p10137_p2 = por %p10136_p1, %p10135_p0 }
 0x103   :  { %p10138_p3 = pnand %p10137_p2, %p10131_p13 }
 0x105   :  { %10141 = shalt.err (!%p10138_p3)
}
 0x106   :  { %202 = dma.hbm_to_vmem [thread:$0]  %s10570_s29, 512, %s197_s18, [#allocation9], %s10421_s15, %s10421_s15, %s10422_s16  }
 0x107   :  { %s10425_s17 = smov [#allocation13]   ;;  %s10426_s14 = smov [#allocation16]  }
 0x108   :  { %s219_s28 = sshll.u32 %s10425_s17, 4  ;;  %s240_s20 = sshll.u32 %s10426_s14, 4  ;;  %s220_s28 = int_to_ptr.vmem [resolvable:$true] %s219_s28  ;;  %s241_s20 = int_to_ptr.vmem [resolvable:$true] %s240_s20 }
 0x109   :  { %s10142_s1 = scalar_lea.hbm %s10580_s12, 16 }
 0x10a   :  { %p10143_p4 = scmp.ne.s32.totalorder %s10580_s12, %s10142_s1  ;;  %p10146_p5 = scmp.lt.u32.totalorder %s10142_s1, %s10580_s12 }
 0x10c   :  { %p10148_p6 = pnand %p10146_p5, %p10143_p4 }
 0x10e   :  { %10151 = shalt.err (!%p10148_p6)
}
 0x10f   :  { %s10152_s2 = scalar_lea.vmem %s220_s28, 16  ;;  %s10156_s10 = scalar_lea.vmem %s220_s28, 32 }
 0x110   :  { %p10153_p7 = scmp.ne.s32.totalorder %s220_s28, %s10152_s2  ;;  %p10157_p8 = scmp.lt.s32.totalorder %s220_s28, %s220_s28 }
 0x111   :  { %p10158_p9 = scmp.lt.s32.totalorder %s10156_s10, %s10152_s2 }
 0x113   :  { %p10159_p10 = por %p10158_p9, %p10157_p8 }
 0x115   :  { %p10160_p11 = pnand %p10159_p10, %p10153_p7 }
 0x117   :  { %10163 = shalt.err (!%p10160_p11)
}
 0x118   :  { %222 = dma.hbm_to_vmem [thread:$0]  %s10580_s12, 16, %s220_s28, [#allocation12]  }
 0x119   :  { %s10164_s29 = scalar_lea.hbm %s10590_s6, 32 }
 0x11a   :  { %p10165_p12 = scmp.ne.s32.totalorder %s10590_s6, %s10164_s29  ;;  %p10168_p13 = scmp.lt.u32.totalorder %s10164_s29, %s10590_s6 }
 0x11c   :  { %p10170_p0 = pnand %p10168_p13, %p10165_p12 }
 0x11e   :  { %10173 = shalt.err (!%p10170_p0)
}
 0x11f   :  { %s10174_s11 = scalar_lea.vmem %s241_s20, 32  ;;  %p10179_p2 = scmp.lt.s32.totalorder %s241_s20, %s241_s20 }
 0x120   :  { %p10175_p1 = scmp.ne.s32.totalorder %s241_s20, %s10174_s11  ;;  %p10180_p3 = scmp.lt.s32.totalorder %s10174_s11, %s10174_s11 }
 0x122   :  { %p10181_p4 = por %p10180_p3, %p10179_p2 }
 0x124   :  { %p10182_p5 = pnand %p10181_p4, %p10175_p1 }
 0x126   :  { %10185 = shalt.err (!%p10182_p5)
}
 0x127   :  { %246 = dma.hbm_to_vmem [thread:$0]  %s10590_s6, 32, %s241_s20, [#allocation15], %s10410_s7, %s10410_s7, %s10411_s4  }
 0x128   :  { %s10427_s12 = smov [#allocation19]   ;;  %s10428_s27 = smov [#allocation22]  }
 0x129   :  { %s266_s8 = sshll.u32 %s10427_s12, 4  ;;  %s290_s9 = sshll.u32 %s10428_s27, 4  ;;  %s267_s8 = int_to_ptr.vmem [resolvable:$true] %s266_s8  ;;  %s291_s9 = int_to_ptr.vmem [resolvable:$true] %s290_s9 }
 0x12a   :  { %s10186_s23 = scalar_lea.hbm %s10605_s24, 2048 }
 0x12b   :  { %p10187_p6 = scmp.ne.s32.totalorder %s10605_s24, %s10186_s23  ;;  %p10190_p7 = scmp.lt.u32.totalorder %s10186_s23, %s10605_s24 }
 0x12d   :  { %p10192_p8 = pnand %p10190_p7, %p10187_p6 }
 0x12f   :  { %10195 = shalt.err (!%p10192_p8)
}
 0x130   :  { %s10196_s0 = scalar_lea.vmem %s267_s8, 2048  ;;  %p10201_p10 = scmp.lt.s32.totalorder %s267_s8, %s267_s8 }
 0x131   :  { %p10197_p9 = scmp.ne.s32.totalorder %s267_s8, %s10196_s0  ;;  %p10202_p11 = scmp.lt.s32.totalorder %s10196_s0, %s10196_s0 }
 0x133   :  { %p10203_p12 = por %p10202_p11, %p10201_p10 }
 0x135   :  { %p10204_p13 = pnand %p10203_p12, %p10197_p9 }
 0x137   :  { %10207 = shalt.err (!%p10204_p13)
}
 0x138   :  { %s11710_s6 = sld [smem:[#allocation67_spill]] }
 0x139   :  { %272 = dma.hbm_to_vmem [thread:$0]  %s10605_s24, 2048, %s267_s8, [#allocation18], %s10421_s15, %s10421_s15, %s10422_s16  }
 0x13e   :  { %s10208_s18 = scalar_lea.hbm %s11710_s6, 32 }
 0x13f   :  { %p10209_p0 = scmp.ne.s32.totalorder %s11710_s6, %s10208_s18  ;;  %p10212_p1 = scmp.lt.u32.totalorder %s10208_s18, %s11710_s6 }
 0x141   :  { %p10214_p2 = pnand %p10212_p1, %p10209_p0 }
 0x143   :  { %10217 = shalt.err (!%p10214_p2)
}
 0x144   :  { %s10218_s26 = scalar_lea.vmem %s291_s9, 32  ;;  %p10223_p4 = scmp.lt.s32.totalorder %s291_s9, %s291_s9 }
 0x145   :  { %p10219_p3 = scmp.ne.s32.totalorder %s291_s9, %s10218_s26  ;;  %p10224_p5 = scmp.lt.s32.totalorder %s10218_s26, %s10218_s26 }
 0x147   :  { %p10225_p6 = por %p10224_p5, %p10223_p4 }
 0x149   :  { %p10226_p7 = pnand %p10225_p6, %p10219_p3 }
 0x14b   :  { %10229 = shalt.err (!%p10226_p7)
}
 0x14c   :  { %s11711_s3 = sld [smem:[#allocation68_spill]]  ;;  %s10429_s24 = smov [#allocation25]  }
 0x14d   :  { %296 = dma.hbm_to_vmem [thread:$0]  %s11710_s6, 32, %s291_s9, [#allocation21], %s10410_s7, %s10410_s7, %s10411_s4  }
 0x14e   :  { %s314_s21 = sshll.u32 %s10429_s24, 4  ;;  %s315_s21 = int_to_ptr.vmem [resolvable:$true] %s314_s21 }
 0x152   :  { %s10230_s13 = scalar_lea.hbm %s11711_s3, 4096 }
 0x153   :  { %p10231_p8 = scmp.ne.s32.totalorder %s11711_s3, %s10230_s13  ;;  %p10234_p9 = scmp.lt.u32.totalorder %s10230_s13, %s11711_s3 }
 0x155   :  { %p10236_p10 = pnand %p10234_p9, %p10231_p8 }
 0x157   :  { %10239 = shalt.err (!%p10236_p10)
}
 0x158   :  { %s10240_s17 = scalar_lea.vmem %s315_s21, 4096  ;;  %p10245_p12 = scmp.lt.s32.totalorder %s315_s21, %s315_s21 }
 0x159   :  { %p10241_p11 = scmp.ne.s32.totalorder %s315_s21, %s10240_s17  ;;  %p10246_p13 = scmp.lt.s32.totalorder %s10240_s17, %s10240_s17 }
 0x15b   :  { %p10247_p0 = por %p10246_p13, %p10245_p12 }
 0x15d   :  { %p10248_p1 = pnand %p10247_p0, %p10241_p11 }
 0x15f   :  { %10251 = shalt.err (!%p10248_p1)
}
 0x160   :  { %s10430_s28 = smov 128   ;;  %s11712_s14 = sld [smem:[#allocation69_spill]] }
 0x161   :  { %s10431_s20 = smov 8   ;;  %s10432_s1 = smov [#allocation28]  }
 0x162   :  { %320 = dma.hbm_to_vmem [thread:$0]  %s11711_s3, 4096, %s315_s21, [#allocation24], %s10430_s28, %s10430_s28, %s10431_s20  }
 0x163   :  { %s338_s2 = sshll.u32 %s10432_s1, 4  ;;  %s10433_s10 = smov [#allocation29]   ;;  %s339_s2 = int_to_ptr.vmem [resolvable:$true] %s338_s2 }
 0x164   :  { %s350_s29 = sshll.u32 %s10433_s10, 4  ;;  %s10772_s29 = int_to_ptr.vmem [resolvable:$true] %s350_s29 }
 0x166   :  { %s10252_s11 = scalar_lea.hbm %s11712_s14, 4096 }
 0x167   :  { %p10253_p2 = scmp.ne.s32.totalorder %s11712_s14, %s10252_s11  ;;  %p10256_p3 = scmp.lt.u32.totalorder %s10252_s11, %s11712_s14 }
 0x169   :  { %p10258_p4 = pnand %p10256_p3, %p10253_p2 }
 0x16b   :  { %10261 = shalt.err (!%p10258_p4)
}
 0x16c   :  { %s10262_s12 = scalar_lea.vmem %s339_s2, 4096  ;;  %p10267_p6 = scmp.lt.s32.totalorder %s339_s2, %s339_s2 }
 0x16d   :  { %p10263_p5 = scmp.ne.s32.totalorder %s339_s2, %s10262_s12  ;;  %p10268_p7 = scmp.lt.s32.totalorder %s10262_s12, %s10262_s12 }
 0x16f   :  { %p10269_p8 = por %p10268_p7, %p10267_p6 }
 0x171   :  { %p10270_p9 = pnand %p10269_p8, %p10263_p5 }
 0x173   :  { %10273 = shalt.err (!%p10270_p9)
}
 0x174   :  { %s11713_s8 = sld [smem:[#allocation70_spill]] }
 0x175   :  { %344 = dma.hbm_to_vmem [thread:$0]  %s11712_s14, 4096, %s339_s2, [#allocation27], %s10421_s15, %s10421_s15, %s10422_s16  }
 0x17a   :  { %s10274_s27 = scalar_lea.hbm %s11713_s8, 32 }
 0x17b   :  { %p10275_p10 = scmp.ne.s32.totalorder %s11713_s8, %s10274_s27  ;;  %p10278_p11 = scmp.lt.u32.totalorder %s10274_s27, %s11713_s8 }
 0x17d   :  { %p10280_p12 = pnand %p10278_p11, %p10275_p10 }
 0x17f   :  { %10283 = shalt.err (!%p10280_p12)
}
 0x180   :  { %s10284_s9 = scalar_lea.vmem %s10772_s29, 32  ;;  %p10289_p0 = scmp.lt.s32.totalorder %s10772_s29, %s10772_s29 }
 0x181   :  { %p10285_p13 = scmp.ne.s32.totalorder %s10772_s29, %s10284_s9  ;;  %p10290_p1 = scmp.lt.s32.totalorder %s10284_s9, %s10284_s9 }
 0x183   :  { %p10291_p2 = por %p10290_p1, %p10289_p0 }
 0x185   :  { %p10292_p3 = pnand %p10291_p2, %p10285_p13 }
 0x187   :  { %10295 = shalt.err (!%p10292_p3)
}
 0x188   :  { %356 = dma.hbm_to_vmem [thread:$0]  %s11713_s8, 32, %s10772_s29, [#allocation30], %s10410_s7, %s10410_s7, %s10411_s4  }
 0x189   :  { %10340 = dma.done.wait [#allocation3], 1536  }
 0x18a   :  { %10341 = vsyncadd [#allocation3], 4294965760 }
 0x18b   :  { %10342 = dma.done.wait [#allocation6], 4160  }
 0x18c   :  { %10343 = vsyncadd [#allocation6], 4294963136 }
 0x18d   :  { %10344 = dma.done.wait [#allocation9], 544  }
 0x18e   :  { %10345 = vsyncadd [#allocation9], 4294966752 }
 0x18f   :  { %10346 = dma.done.wait [#allocation12], 32  }
 0x190   :  { %10347 = vsyncadd [#allocation12], 4294967264 }
 0x191   :  { %10348 = dma.done.wait [#allocation15], 64  }
 0x192   :  { %10349 = vsyncadd [#allocation15], 4294967232 }
 0x193   :  { %10350 = dma.done.wait [#allocation18], 2144  }
 0x194   :  { %10351 = vsyncadd [#allocation18], 4294965152 }
 0x195   :  { %10352 = dma.done.wait [#allocation21], 64  }
 0x196   :  { %10353 = vsyncadd [#allocation21], 4294967232 }
 0x197   :  { %10354 = dma.done.wait [#allocation24], 4128  }
 0x198   :  { %10355 = vsyncadd [#allocation24], 4294963168 }
 0x199   :  { %10356 = dma.done.wait [#allocation27], 4160  }
 0x19a   :  { %10357 = vsyncadd [#allocation27], 4294963136 }
 0x19b   :  { %10358 = dma.done.wait [#allocation30], 32  }
 0x19c   :  { %10359 = vsyncadd [#allocation30], 4294967264  ;;  %s11714_s7 = sld [smem:[#allocation46_spill]]  ;;  %v10434_v0 = vmov 0   ;;  %v9345_v1 = vld [vmem:[#allocation2] sm:$0xff]   ;;  %v9346_v2 = vld [vmem:[#allocation2 + $0x8] sm:$0xff]  }
 0x19d   :  { %527 = vmatprep.subr.bf16.mxu0 %v10434_v0  ;;  %826 = vmatprep.mubr.bf16.mxu1 %v10434_v0  ;;  %v9347_v3 = vld [vmem:[#allocation2 + $0x10] sm:$0xff]   ;;  %v9348_v4 = vld [vmem:[#allocation2 + $0x18] sm:$0xff]   ;;  %vm523_vm0 = vcmask 523264   ;;  %v9349_v7 = vld [vmem:[#allocation2 + $0x20] sm:$0xff]   ;;  %s11715_s4 = sld [smem:[#allocation50_spill]]  ;;  %s11716_s16 = sld [smem:[#allocation47_spill]] }
 0x19e   :  { %528 = vmatpush1.bf16.msra.mxu0 %v9345_v1  ;;  %v9350_v9 = vld [vmem:[#allocation2 + $0x28] sm:$0xff]   ;;  %v9351_v10 = vld [vmem:[#allocation2 + $0x30] sm:$0xff]   ;;  %v9352_v11 = vld [vmem:[#allocation2 + $0x38] sm:$0xff]   ;;  %s11717_s23 = sld [smem:[#allocation55_spill]]  ;;  %vm576_vm1 = vcmask 1041408   ;;  %s11718_s0 = sld [smem:[#allocation53_spill]] }
 0x19f   :  { %529 = vmatprep.subr.bf16.mxu0 %v10434_v0  ;;  %v9353_v12 = vld [vmem:[#allocation2 + $0x40] sm:$0xff]   ;;  %v9354_v13 = vld [vmem:[#allocation2 + $0x48] sm:$0xff]   ;;  %v9355_v14 = vld [vmem:[#allocation2 + $0x50] sm:$0xff]   ;;  %v10435_v56 = vmov 0.0   ;;  %s11719_s6 = sld [smem:[#allocation54_spill]]  ;;  %vm10436_vm2 = vmmov 0  }
 0x1a0   :  { %v9356_v15 = vld [vmem:[#allocation2 + $0x58] sm:$0xff]   ;;  %s11720_s18 = sld [smem:[#allocation56_spill]]  ;;  %vm878_vm3 = vcmask 261120   ;;  %s10437_s26 = smov 96   ;;  %vm10438_vm5 = vmmov 1   ;;  %vm974_vm7 = vcmask 74752  }
 0x1a1   :  { %vm10871_vm4 = vmpackc.low %vm878_vm3, %vm878_vm3  ;;  %s11725_s3 = sld [smem:[#allocation48_spill]]  ;;  %vm970_vm8 = vcmask 80896   ;;  %s11726_s24 = sld [smem:[#allocation57_spill]]  ;;  %vm1722_vm9 = vcmask 785408   ;;  %vm3979_vm10 = vcmask 64512   ;;  %vm4534_vm11 = vcmask 130048  }
 0x1a2   :  { %530 = vmatpush1.bf16.msra.mxu0 %v9346_v2  ;;  %v415_v5 = vld [vmem:[%s11714_s7 + $0x8] sm:$0xff]  ;;  %v417_v6 = vld [vmem:[%s11714_s7 + $0x18] sm:$0x3]  ;;  %v414_v16 = vld [vmem:[%s11714_s7] sm:$0xff]  ;;  %s11727_s21 = sld [smem:[#allocation58_spill]]  ;;  %s11728_s13 = sld [smem:[#allocation61_spill]] }
 0x1a3   :  { %531 = vmatprep.subr.bf16.mxu0 %v10434_v0  ;;  %v443_v8 = vpack.c.bf16 %v417_v6, %v415_v5  ;;  %v416_v17 = vld [vmem:[%s11714_s7 + $0x10] sm:$0x3]  ;;  %v7679_v21 = vld [vmem:[%s11715_s4] ss:$0 sm:$0xff]  ;;  %v569_v23 = vld [vmem:[%s11716_s16 + $0x8] sm:$0x3] }
 0x1a4   :  { %v442_v18 = vpack.c.bf16 %v416_v17, %v414_v16  ;;  %v568_v28 = vld [vmem:[%s11716_s16] sm:$0xff]  ;;  %v9360_v33 = vld [vmem:[%s11717_s23 + $0x1c] ss:$12 sps:$4 sm:$0xff]   ;;  %v9366_v46 = vld [vmem:[%s11717_s23 + $0x4c] ss:$12 sps:$4 sm:$0xff]   ;;  %s11729_s17 = sld [smem:[#allocation59_spill]] }
 0x1a5   :  { %7692 = vmatprep.mubr.msk.bf16.mxu0 %vm523_vm0, %v443_v8  ;;  %v9357_v31 = vld [vmem:[%s11717_s23 + $0x4] ss:$12 sps:$4 sm:$0xff]   ;;  %v9359_v32 = vld [vmem:[%s11717_s23] ss:$12 sps:$4 sm:$0xff]   ;;  %v9368_v47 = vld [vmem:[%s11717_s23 + $0x48] ss:$12 sps:$4 sm:$0xff]  }
 0x1a6   :  { %532 = vmatpush1.bf16.msra.mxu0 %v9347_v3  ;;  %794 = vmatprep.subr.bf16.mxu1 %v9357_v31  ;;  %v9362_v34 = vld [vmem:[%s11717_s23 + $0x18] ss:$12 sps:$4 sm:$0xff]   ;;  %v9363_v44 = vld [vmem:[%s11717_s23 + $0x34] ss:$12 sps:$4 sm:$0xff]   ;;  %v9365_v45 = vld [vmem:[%s11717_s23 + $0x30] ss:$12 sps:$4 sm:$0xff]  }
 0x1a7   :  { %533 = vmatprep.subr.bf16.mxu0 %v10434_v0  ;;  %795 = vmatpush1.bf16.msra.mxu1 %v9359_v32  ;;  %v9369_v48 = vld [vmem:[%s11717_s23 + $0x64] ss:$12 sps:$4 sm:$0xff]   ;;  %v9371_v49 = vld [vmem:[%s11717_s23 + $0x60] ss:$12 sps:$4 sm:$0xff]   ;;  %v9372_v50 = vld [vmem:[%s11717_s23 + $0x7c] ss:$12 sps:$4 sm:$0xff]  }
 0x1a8   :  { %796 = vmatprep.subr.bf16.mxu1 %v9360_v33  ;;  %v9374_v51 = vld [vmem:[%s11717_s23 + $0x78] ss:$12 sps:$4 sm:$0xff]   ;;  %v9375_v52 = vld [vmem:[%s11717_s23 + $0x94] ss:$12 sps:$4 sm:$0xff]   ;;  %v9377_v53 = vld [vmem:[%s11717_s23 + $0x90] ss:$12 sps:$4 sm:$0xff]  }
 0x1a9   :  { %v9378_v54 = vld [vmem:[%s11717_s23 + $0xac] ss:$12 sps:$4 sm:$0xff]   ;;  %v9380_v55 = vld [vmem:[%s11717_s23 + $0xa8] ss:$12 sps:$4 sm:$0xff]   ;;  %v7693_v2 = vld [vmem:[%s11718_s0] ss:$0 sm:$0xff] }
 0x1aa   :  { %534 = vmatpush1.bf16.msra.mxu0 %v9348_v4  ;;  %v7694_v6 = vld [vmem:[%s11719_s6] ss:$0 sm:$0xff]  ;;  %v9387_v17 = vld [vmem:[%s11717_s23 + $0x98] ss:$12 sps:$4 sm:$0xff]   ;;  %vm10892_vm6 = vmpackc.low %vm576_vm1, %vm10438_vm5  ;;  %s11730_s14 = sld [smem:[#allocation60_spill]]  ;;  %s11731_s1 = sld [smem:[#allocation51_spill]] }
 0x1ab   :  { %535 = vmatprep.subr.bf16.mxu0 %v10434_v0  ;;  %797 = vmatpush1.bf16.msra.mxu1 %v9362_v34  ;;  %v9386_v16 = vld [vmem:[%s11717_s23 + $0x80] ss:$12 sps:$4 sm:$0xff]   ;;  %s11732_s2 = sld [smem:[#allocation52_spill]]  ;;  %s11733_s10 = sld [smem:[#allocation49_spill]] }
 0x1ac   :  { %798 = vmatprep.subr.bf16.mxu1 %v9363_v44  ;;  %s11734_s29 = sld [smem:[#allocation62_spill]]  ;;  %s11735_s11 = sld [smem:[#allocation63_spill]] }
 0x1ae   :  { %536 = vmatpush1.bf16.msra.mxu0 %v9349_v7 }
 0x1af   :  { %537 = vmatprep.subr.bf16.mxu0 %v10434_v0  ;;  %799 = vmatpush1.bf16.msra.mxu1 %v9365_v45 }
 0x1b0   :  { %800 = vmatprep.subr.bf16.mxu1 %v9366_v46 }
 0x1b2   :  { %538 = vmatpush1.bf16.msra.mxu0 %v9350_v9 }
 0x1b3   :  { %539 = vmatprep.subr.bf16.mxu0 %v10434_v0  ;;  %801 = vmatpush1.bf16.msra.mxu1 %v9368_v47  ;;  %v9472_v47 = vld [vmem:[%s11726_s24 + $0x58] sm:$0xff]  }
 0x1b4   :  { %802 = vmatprep.subr.bf16.mxu1 %v9369_v48 }
 0x1b6   :  { %540 = vmatpush1.bf16.msra.mxu0 %v9351_v10  ;;  %v9381_v10 = vld [vmem:[%s11717_s23 + $0x8] ss:$12 sps:$4 sm:$0xff]  }
 0x1b7   :  { %541 = vmatprep.subr.bf16.mxu0 %v10434_v0  ;;  %803 = vmatpush1.bf16.msra.mxu1 %v9371_v49 }
 0x1b8   :  { %804 = vmatprep.subr.bf16.mxu1 %v9372_v50 }
 0x1ba   :  { %542 = vmatpush1.bf16.msra.mxu0 %v9352_v11 }
 0x1bb   :  { %543 = vmatprep.subr.bf16.mxu0 %v10434_v0  ;;  %805 = vmatpush1.bf16.msra.mxu1 %v9374_v51 }
 0x1bc   :  { %806 = vmatprep.subr.bf16.mxu1 %v9375_v52 }
 0x1be   :  { %544 = vmatpush1.bf16.msra.mxu0 %v9353_v12  ;;  %v9382_v12 = vld [vmem:[%s11717_s23 + $0x20] ss:$12 sps:$4 sm:$0xff]  }
 0x1bf   :  { %545 = vmatprep.subr.bf16.mxu0 %v10434_v0  ;;  %807 = vmatpush1.bf16.msra.mxu1 %v9377_v53 }
 0x1c0   :  { %808 = vmatprep.subr.bf16.mxu1 %v9378_v54 }
 0x1c2   :  { %546 = vmatpush1.bf16.msra.mxu0 %v9354_v13  ;;  %v9383_v13 = vld [vmem:[%s11717_s23 + $0x38] ss:$12 sps:$4 sm:$0xff]  }
 0x1c3   :  { %547 = vmatprep.subr.bf16.mxu0 %v10434_v0  ;;  %809 = vmatpush1.bf16.msra.mxu1 %v9380_v55 }
 0x1c4   :  { %8500 = vmatprep.subr.bf16.mxu1 %v10435_v56 }
 0x1c6   :  { %548 = vmatpush1.bf16.msra.mxu0 %v9355_v14  ;;  %v9384_v14 = vld [vmem:[%s11717_s23 + $0x50] ss:$12 sps:$4 sm:$0xff]  }
 0x1c7   :  { %549 = vmatprep.subr.bf16.mxu0 %v10434_v0 }
 0x1ca   :  { %550 = vmatpush1.bf16.msra.mxu0 %v9356_v15  ;;  %v9385_v15 = vld [vmem:[%s11717_s23 + $0x68] ss:$12 sps:$4 sm:$0xff]  }
 0x1cd   :  { %560 = vmatmul.mubr.bf16.vlgmr.msra.gmra.mrb[0].mxu0 %v442_v18  ;;  %v9388_v18 = vld [vmem:[%s11717_s23 + $0xb0] ss:$12 sps:$4 sm:$0xff]  }
 0x2a0   :  { %v561_v19 = vpop.f32.mrb[0].mxu0 }
 0x2a1   :  { %v563_v20 = vpop.f32.mrb[1].mxu0  ;;  %v562_v27 = vadd.f32 %v7679_v21, %v561_v19  ;;  %v651_v19 = vlaneseq }
 0x2a2   :  { %v564_v22 = vpop.f32.mrb[2].mxu0 }
 0x2a3   :  { %v565_v24 = vadd.f32 %v7679_v21, %v564_v22  ;;  %v566_v25 = vpop.f32.mrb[3].mxu0  ;;  %v10818_v30 = vadd.f32 %v568_v28, %v562_v27  ;;  %v652_v20 = vshrl.u32 %v651_v19, 7  ;;  %v649_v22 = vld [vmem:[%s11720_s18] sm:$0x7] }
 0x2a5   :  { %v10813_v26 = vadd.f32 %v569_v23, %v565_v24  ;;  %v10860_v21 = vsub.s32 0, %v652_v20  ;;  %v10863_v23 = vsub.s32 1, %v652_v20 }
 0x2a7   :  { %v577_v29 = vsel %vm576_vm1, %v10813_v26, 0.0  ;;  %v654_v24 = vrot.slane %v649_v22, %v10860_v21  ;;  %v658_v27 = vrot.slane %v649_v22, %v10863_v23 }
 0x2a8   :  { %578 = vadd.xlane.f32.xlu0 %v577_v29 }
 0x2ac   :  { %574 = vadd.xlane.f32.xlu0 %v10818_v30 }
 0x335   :  { %v579_v35 = vpop.xlane.xlu0 %578 }
 0x336   :  { %v582_v36 = vmul.f32 0.0078125, %v579_v35 }
 0x338   :  { %v584_v39 = vsub.f32 %v10813_v26, %v582_v36 }
 0x339   :  { %v575_v37 = vpop.xlane.xlu0 %574 }
 0x33a   :  { %v581_v38 = vmul.f32 0.0078125, %v575_v37  ;;  %v586_v42 = vmul.f32 %v584_v39, %v584_v39 }
 0x33c   :  { %v583_v40 = vsub.f32 %v10818_v30, %v581_v38  ;;  %v589_v43 = vsel %vm576_vm1, %v586_v42, 0.0 }
 0x33e   :  { %v585_v41 = vmul.f32 %v583_v40, %v583_v40 }
 0x340   :  { %587 = vadd.xlane.f32.xlu1 %v585_v41 }
 0x344   :  { %590 = vadd.xlane.f32.xlu1 %v589_v43 }
 0x3cd   :  { %v588_v57 = vpop.xlane.xlu1 %587 }
 0x3ce   :  { %v592_v58 = vmul.f32 0.0078125, %v588_v57 }
 0x3d0   :  { %v594_v59 = vadd.f32 1e-06, %v592_v58 }
 0x3d1   :  { %v591_v60 = vpop.xlane.xlu1 %590 }
 0x3d2   :  { %9682 = vrsqrt.f32 %v594_v59  ;;  %v593_v61 = vmul.f32 0.0078125, %v591_v60 }
 0x3d4   :  { %v595_v62 = vadd.f32 1e-06, %v593_v61 }
 0x3d6   :  { %9684 = vrsqrt.f32 %v595_v62 }
 0x3dc   :  { %v9683_v63 = vpop.eup %9682 }
 0x3dd   :  { %v598_v1 = vmul.f32 %v9683_v63, %v583_v40 }
 0x3df   :  { %v606_v5 = vmul.f32 %v7693_v2, %v598_v1 }
 0x3e0   :  { %v9685_v3 = vpop.eup %9684 }
 0x3e1   :  { %v599_v4 = vmul.f32 %v9685_v3, %v584_v39  ;;  %v614_v8 = vadd.f32 %v7694_v6, %v606_v5  ;;  %v10888_v39 = vsub.s32 2, %v652_v20 }
 0x3e3   :  { %v607_v7 = vmul.f32 %v7693_v2, %v599_v4  ;;  %v662_v40 = vrot.slane %v649_v22, %v10888_v39 }
 0x3e5   :  { %v615_v9 = vadd.f32 %v7694_v6, %v607_v7  ;;  %v413_v7 = vld [vmem:[%s11725_s3 + $0x8] sm:$0x3] }
 0x3e7   :  { %v648_v11 = vpack.c.bf16 %v615_v9, %v614_v8 }
 0x3e9   :  { %827 = vmatmul.mubr.bf16.vlgmr.msra.gmra.mrb[0].mxu1 %v648_v11 }
 0x3ea   :  { %8501 = vmatpush3.bf16.msra.mxu1 %v9381_v10  ;;  %8516 = vmatprep.mubr.msk.bf16.mxu1 %vm10436_vm2, %v10435_v56  ;;  %v412_v10 = vld [vmem:[%s11725_s3] sm:$0xff] }
 0x3eb   :  { %8502 = vmatprep.subr.bf16.mxu1 %v10435_v56 }
 0x3ee   :  { %8503 = vmatpush3.bf16.msra.mxu1 %v9382_v12 }
 0x3ef   :  { %8504 = vmatprep.subr.bf16.mxu1 %v10435_v56 }
 0x3f2   :  { %8505 = vmatpush3.bf16.msra.mxu1 %v9383_v13 }
 0x3f3   :  { %8506 = vmatprep.subr.bf16.mxu1 %v10435_v56 }
 0x3f6   :  { %8507 = vmatpush3.bf16.msra.mxu1 %v9384_v14 }
 0x3f7   :  { %8508 = vmatprep.subr.bf16.mxu1 %v10435_v56 }
 0x3fa   :  { %8509 = vmatpush3.bf16.msra.mxu1 %v9385_v15 }
 0x3fb   :  { %8510 = vmatprep.subr.bf16.mxu1 %v10435_v56 }
 0x3fe   :  { %8511 = vmatpush3.bf16.msra.mxu1 %v9386_v16 }
 0x3ff   :  { %8512 = vmatprep.subr.bf16.mxu1 %v10435_v56 }
 0x402   :  { %8513 = vmatpush3.bf16.msra.mxu1 %v9387_v17 }
 0x403   :  { %8514 = vmatprep.subr.bf16.mxu1 %v10435_v56 }
 0x406   :  { %8515 = vmatpush3.bf16.msra.mxu1 %v9388_v18 }
 0x409   :  { %8517 = vmatmul.mubr.bf16.vlgmr.msra.gmra.mrb[4].mxu1 %v648_v11 }
 0x4bc   :  { %v828_v25 = vpop.f32.mrb[0].mxu1 }
 0x4bd   :  { %v829_v28 = vadd.f32 %v828_v25, %v654_v24  ;;  %v830_v29 = vpop.f32.mrb[1].mxu1 }
 0x4be   :  { %v832_v31 = vpop.f32.mrb[2].mxu1  ;;  %v831_v33 = vadd.f32 %v830_v29, %v658_v27 }
 0x4bf   :  { %v834_v32 = vpop.f32.mrb[3].mxu1  ;;  %1078 = vrot.lane.b32.xlu1 %v829_v28, %s10437_s26  ;;  %8524 = vmatprep.mubr.msk.f32.mxu1 %vm878_vm3, %v829_v28  ;;  %v833_v38 = vadd.f32 %v832_v31, %v654_v24 }
 0x4c0   :  { %v835_v34 = vadd.f32 %v834_v32, %v658_v27 }
 0x4c2   :  { %v9165_v36 = vpack.i.bf16 %v835_v34, %v831_v33  ;;  %v8908_v37 = vpack.c.bf16 %v835_v34, %v831_v33 }
 0x4c4   :  { %9166 = vrot.lane.b32.xlu0 %v9165_v36, %s10437_s26  ;;  %8910 = vmatprep.subr.msk.bf16.mxu1 %vm10871_vm4, %v8908_v37 }
 0x4c5   :  { %9171 = vrot.lane.b32.xlu1 %v9165_v36, %s10421_s15  ;;  %8913 = vmatpush3.bf16.xpose.msk.msra.mxu1 %vm10871_vm4, %v8908_v37 }
 0x4c8   :  { %9176 = vrot.lane.b32.xlu0 %v9165_v36, %s10407_s22 }
 0x4c9   :  { %1080 = vrot.lane.b32.xlu1 %v833_v38, %s10437_s26 }
 0x4cc   :  { %1286 = vrot.lane.b32.xlu0 %v833_v38, %s10421_s15  ;;  %8525 = vmatmul.mubr.msk.f32.vlgmr.msra.gmra.mrb[8].mxu1 %vm878_vm3, %v833_v38 }
 0x4cd   :  { %1284 = vrot.lane.b32.xlu1 %v829_v28, %s10421_s15 }
 0x4d0   :  { %1491 = vrot.lane.b32.xlu0 %v833_v38, %s10407_s22 }
 0x4d1   :  { %1489 = vrot.lane.b32.xlu1 %v829_v28, %s10407_s22 }
 0x4dc   :  { %v871_v41 = vpop.f32.mrb[4].mxu1 }
 0x4dd   :  { %v8518_v42 = vpop.f32.mrb[5].mxu1  ;;  %v872_v44 = vadd.f32 %v871_v41, %v662_v40 }
 0x4de   :  { %v874_v43 = vpop.f32.mrb[6].mxu1 }
 0x4df   :  { %v875_v45 = vadd.f32 %v874_v43, %v662_v40  ;;  %v8519_v46 = vpop.f32.mrb[7].mxu1 }
 0x4e1   :  { %v8914_v48 = vpack.c.bf16 %v875_v45, %v872_v44  ;;  %v10896_v49 = vpack.i.bf16 %v875_v45, %v872_v44 }
 0x4e3   :  { %8916 = vmatprep.subr.msk.bf16.mxu0 %vm10892_vm6, %v8914_v48 }
 0x4e4   :  { %8919 = vmatpush3.bf16.msk.msra.mxu0 %vm10892_vm6, %v8914_v48 }
 0x531   :  { %v1079_v50 = vpop.permute.xlu1 %1078 }
 0x532   :  { %8538 = vmatprep.mubr.msk.f32.mxu1 %vm878_vm3, %v1079_v50 }
 0x536   :  { %v9167_v51 = vpop.permute.xlu0 %9166 }
 0x537   :  { %v9169_v52 = vunpack.i.h.bf16 %v9167_v51  ;;  %v9168_v53 = vunpack.i.l.bf16 %v9167_v51  ;;  %v9172_v54 = vpop.permute.xlu1 %9171 }
 0x538   :  { %v9174_v55 = vunpack.i.h.bf16 %v9172_v54  ;;  %v9173_v57 = vunpack.i.l.bf16 %v9172_v54 }
 0x539   :  { %v8920_v58 = vpack.c.bf16 %v9169_v52, %v9168_v53 }
 0x53a   :  { %v8932_v59 = vpack.c.bf16 %v9174_v55, %v9173_v57  ;;  %v9177_v60 = vpop.permute.xlu0 %9176 }
 0x53b   :  { %8922 = vmatprep.subr.msk.bf16.mxu1 %vm10871_vm4, %v8920_v58  ;;  %v1081_v61 = vpop.permute.xlu1 %1080  ;;  %v9179_v62 = vunpack.i.h.bf16 %v9177_v60  ;;  %v9178_v63 = vunpack.i.l.bf16 %v9177_v60 }
 0x53c   :  { %8925 = vmatpush3.bf16.xpose.msk.msra.mxu1 %vm10871_vm4, %v8920_v58 }
 0x53d   :  { %8934 = vmatprep.subr.msk.bf16.mxu1 %vm10871_vm4, %v8932_v59  ;;  %v8944_v1 = vpack.c.bf16 %v9179_v62, %v9178_v63 }
 0x53e   :  { %v1287_v3 = vpop.permute.xlu0 %1286 }
 0x53f   :  { %v1285_v2 = vpop.permute.xlu1 %1284 }
 0x542   :  { %v1492_v5 = vpop.permute.xlu0 %1491 }
 0x543   :  { %8539 = vmatmul.mubr.msk.f32.vlgmr.msra.gmra.mrb[10].mxu1 %vm878_vm3, %v1081_v61  ;;  %v1490_v4 = vpop.permute.xlu1 %1489 }
 0x544   :  { %8937 = vmatpush3.bf16.xpose.msk.msra.mxu1 %vm10871_vm4, %v8932_v59  ;;  %8552 = vmatprep.mubr.msk.f32.mxu1 %vm878_vm3, %v1285_v2 }
 0x545   :  { %8946 = vmatprep.subr.msk.bf16.mxu1 %vm10871_vm4, %v8944_v1 }
 0x54b   :  { %8553 = vmatmul.mubr.msk.f32.vlgmr.msra.gmra.mrb[12].mxu1 %vm878_vm3, %v1287_v3 }
 0x54c   :  { %8949 = vmatpush3.bf16.xpose.msk.msra.mxu1 %vm10871_vm4, %v8944_v1  ;;  %8566 = vmatprep.mubr.msk.f32.mxu1 %vm878_vm3, %v1490_v4 }
 0x553   :  { %8567 = vmatmul.mubr.msk.f32.vlgmr.msra.gmra.mrb[14].mxu1 %vm878_vm3, %v1492_v5 }
 0x554   :  { %2023 = vmatprep.mubr.bf16.mxu1 %v10434_v0 }
 0x59f   :  { %v8526_v6 = vpop.f32.mrb[8].mxu1 }
 0x5a0   :  { %v967_v8 = vmul.f32 0.17677669, %v8526_v6  ;;  %v957_v9 = vpop.f32.mrb[9].mxu1 }
 0x5a1   :  { %v966_v11 = vmul.f32 0.17677669, %v957_v9 }
 0x5a2   :  { %v969_v12 = vadd.f32 %v967_v8, %v413_v7 }
 0x5a3   :  { %v968_v13 = vadd.f32 %v966_v11, %v412_v10 }
 0x5a4   :  { %v975_v14 = vsel %vm974_vm7, %v969_v12, -inf }
 0x5a5   :  { %976 = vmax.xlane.f32.xlu0 %v975_v14  ;;  %v971_v15 = vsel %vm970_vm8, %v968_v13, -inf }
 0x5a6   :  { %972 = vmax.xlane.f32.xlu1 %v971_v15 }
 0x616   :  { %v8540_v16 = vpop.f32.mrb[10].mxu1 }
 0x617   :  { %v1160_v17 = vpop.f32.mrb[11].mxu1  ;;  %v1170_v18 = vmul.f32 0.17677669, %v8540_v16 }
 0x618   :  { %v1169_v19 = vmul.f32 0.17677669, %v1160_v17 }
 0x619   :  { %v1172_v24 = vadd.f32 %v1170_v18, %v413_v7 }
 0x61a   :  { %v1171_v20 = vadd.f32 %v1169_v19, %v412_v10 }
 0x61b   :  { %v1176_v31 = vsel %vm974_vm7, %v1172_v24, -inf }
 0x61c   :  { %v1173_v22 = vsel %vm970_vm8, %v1171_v20, -inf }
 0x61d   :  { %1174 = vmax.xlane.f32.xlu0 %v1173_v22 }
 0x61e   :  { %v8554_v25 = vpop.f32.mrb[12].mxu1 }
 0x61f   :  { %v1376_v27 = vmul.f32 0.17677669, %v8554_v25  ;;  %v1366_v28 = vpop.f32.mrb[13].mxu1 }
 0x620   :  { %v1375_v29 = vmul.f32 0.17677669, %v1366_v28 }
 0x621   :  { %1177 = vmax.xlane.f32.xlu0 %v1176_v31  ;;  %v1378_v32 = vadd.f32 %v1376_v27, %v413_v7 }
 0x622   :  { %v1377_v33 = vadd.f32 %v1375_v29, %v412_v10 }
 0x623   :  { %v1382_v34 = vsel %vm974_vm7, %v1378_v32, -inf }
 0x624   :  { %v1379_v36 = vsel %vm970_vm8, %v1377_v33, -inf }
 0x625   :  { %1383 = vmax.xlane.f32.xlu0 %v1382_v34  ;;  %1380 = vmax.xlane.f32.xlu1 %v1379_v36 }
 0x626   :  { %v8568_v37 = vpop.f32.mrb[14].mxu1 }
 0x627   :  { %v1581_v38 = vmul.f32 0.17677669, %v8568_v37  ;;  %v1571_v40 = vpop.f32.mrb[15].mxu1 }
 0x628   :  { %v1580_v41 = vmul.f32 0.17677669, %v1571_v40 }
 0x629   :  { %v1583_v42 = vadd.f32 %v1581_v38, %v413_v7 }
 0x62a   :  { %v1582_v43 = vadd.f32 %v1580_v41, %v412_v10 }
 0x62b   :  { %v1587_v44 = vsel %vm974_vm7, %v1583_v42, -inf }
 0x62c   :  { %1588 = vmax.xlane.f32.xlu0 %v1587_v44  ;;  %v1584_v45 = vsel %vm970_vm8, %v1582_v43, -inf }
 0x62d   :  { %1585 = vmax.xlane.f32.xlu1 %v1584_v45 }
 0x632   :  { %v977_v46 = vpop.xlane.xlu0 %976 }
 0x633   :  { %v979_v48 = vsub.f32 %v969_v12, %v977_v46  ;;  %v973_v53 = vpop.xlane.xlu1 %972 }
 0x634   :  { %v978_v54 = vsub.f32 %v968_v13, %v973_v53 }
 0x635   :  { %v982_v50 = vmul.f32 1.442695, %v979_v48 }
 0x636   :  { %v980_v55 = vmul.f32 1.442695, %v978_v54 }
 0x637   :  { %9686 = vpow2.f32 %v982_v50 }
 0x638   :  { %9688 = vpow2.f32 %v980_v55 }
 0x63e   :  { %9181 = vrot.lane.b32.xlu1 %v10896_v49, %s10437_s26 }
 0x641   :  { %v10933_v51 = vpop.eup %9686 }
 0x642   :  { %v987_v52 = vsel %vm974_vm7, %v10933_v51, 0.0  ;;  %v9689_v57 = vpop.eup %9688 }
 0x643   :  { %988 = vadd.xlane.f32.xlu0 %v987_v52  ;;  %v984_v58 = vsel %vm970_vm8, %v9689_v57, 0.0 }
 0x662   :  { %985 = vadd.xlane.f32.xlu1 %v984_v58 }
 0x6aa   :  { %v1175_v59 = vpop.xlane.xlu0 %1174 }
 0x6ab   :  { %v1179_v60 = vsub.f32 %v1171_v20, %v1175_v59 }
 0x6ad   :  { %v1181_v61 = vmul.f32 1.442695, %v1179_v60 }
 0x6ae   :  { %v1178_v62 = vpop.xlane.xlu0 %1177 }
 0x6af   :  { %9690 = vpow2.f32 %v1181_v61  ;;  %v1180_v63 = vsub.f32 %v1172_v24, %v1178_v62 }
 0x6b1   :  { %v1183_v1 = vmul.f32 1.442695, %v1180_v63 }
 0x6b2   :  { %v1384_v2 = vpop.xlane.xlu0 %1383  ;;  %v1381_v3 = vpop.xlane.xlu1 %1380 }
 0x6b3   :  { %9692 = vpow2.f32 %v1183_v1  ;;  %v1386_v4 = vsub.f32 %v1378_v32, %v1384_v2  ;;  %v1385_v5 = vsub.f32 %v1377_v33, %v1381_v3 }
 0x6b5   :  { %v1389_v6 = vmul.f32 1.442695, %v1386_v4  ;;  %v1387_v7 = vmul.f32 1.442695, %v1385_v5 }
 0x6b7   :  { %9694 = vpow2.f32 %v1389_v6 }
 0x6b8   :  { %9696 = vpow2.f32 %v1387_v7  ;;  %v9389_v7 = vld [vmem:[%s11726_s24] sm:$0xff]  }
 0x6b9   :  { %v9691_v8 = vpop.eup %9690  ;;  %v1589_v9 = vpop.xlane.xlu0 %1588 }
 0x6ba   :  { %v1591_v10 = vsub.f32 %v1583_v42, %v1589_v9  ;;  %v1586_v11 = vpop.xlane.xlu1 %1585  ;;  %v1185_v12 = vsel %vm970_vm8, %v9691_v8, 0.0  ;;  %v9391_v9 = vld [vmem:[%s11726_s24 + $0x10] sm:$0xff]  }
 0x6bb   :  { %v1590_v13 = vsub.f32 %v1582_v43, %v1586_v11  ;;  %1186 = vadd.xlane.f32.xlu1 %v1185_v12  ;;  %v9392_v12 = vld [vmem:[%s11726_s24 + $0x18] sm:$0xff]  }
 0x6bc   :  { %v1594_v14 = vmul.f32 1.442695, %v1591_v10 }
 0x6bd   :  { %v9693_v15 = vpop.eup %9692  ;;  %v1592_v16 = vmul.f32 1.442695, %v1590_v13  ;;  %v9393_v13 = vld [vmem:[%s11726_s24 + $0x20] sm:$0xff]  }
 0x6be   :  { %9698 = vpow2.f32 %v1594_v14  ;;  %v9182_v17 = vpop.permute.xlu1 %9181  ;;  %v1188_v18 = vsel %vm974_vm7, %v9693_v15, 0.0  ;;  %v9394_v14 = vld [vmem:[%s11726_s24 + $0x28] sm:$0xff]  }
 0x6bf   :  { %9700 = vpow2.f32 %v1592_v16  ;;  %v9184_v19 = vunpack.i.h.bf16 %v9182_v17  ;;  %v9183_v20 = vunpack.i.l.bf16 %v9182_v17  ;;  %1189 = vadd.xlane.f32.xlu0 %v1188_v18  ;;  %v9395_v18 = vld [vmem:[%s11726_s24 + $0x30] sm:$0xff]  }
 0x6c1   :  { %v9695_v22 = vpop.eup %9694  ;;  %v8926_v24 = vpack.c.bf16 %v9184_v19, %v9183_v20  ;;  %v9396_v19 = vld [vmem:[%s11726_s24 + $0x38] sm:$0xff]  }
 0x6c2   :  { %v9697_v25 = vpop.eup %9696  ;;  %v1394_v27 = vsel %vm974_vm7, %v9695_v22, 0.0 }
 0x6c3   :  { %1395 = vadd.xlane.f32.xlu0 %v1394_v27  ;;  %v1391_v28 = vsel %vm970_vm8, %v9697_v25, 0.0  ;;  %8928 = vmatprep.subr.msk.bf16.mxu0 %vm10892_vm6, %v8926_v24 }
 0x6c4   :  { %1392 = vadd.xlane.f32.xlu1 %v1391_v28 }
 0x6c8   :  { %v9699_v29 = vpop.eup %9698 }
 0x6c9   :  { %v9701_v31 = vpop.eup %9700  ;;  %v1599_v32 = vsel %vm974_vm7, %v9699_v29, 0.0 }
 0x6ca   :  { %1600 = vadd.xlane.f32.xlu0 %v1599_v32  ;;  %v1596_v33 = vsel %vm970_vm8, %v9701_v31, 0.0 }
 0x6cb   :  { %1597 = vadd.xlane.f32.xlu1 %v1596_v33 }
 0x6d0   :  { %v989_v34 = vpop.xlane.xlu0 %988 }
 0x6d1   :  { %9702 = vrcp.f32 %v989_v34 }
 0x6db   :  { %v9703_v37 = vpop.eup %9702 }
 0x6dc   :  { %9191 = vrot.lane.b32.xlu1 %v10896_v49, %s10407_s22  ;;  %v993_v41 = vmul.f32 %v9703_v37, %v10933_v51 }
 0x6e0   :  { %9186 = vrot.lane.b32.xlu0 %v10896_v49, %s10421_s15 }
 0x6ef   :  { %v986_v36 = vpop.xlane.xlu1 %985 }
 0x6f0   :  { %9704 = vrcp.f32 %v986_v36 }
 0x6fa   :  { %v9705_v38 = vpop.eup %9704 }
 0x6fb   :  { %v992_v40 = vmul.f32 %v9705_v38, %v9689_v57 }
 0x6fd   :  { %8531 = vmatprep.mubr.msk.f32.mxu0 %vm970_vm8, %v992_v40 }
 0x6fe   :  { %8532 = vmatmul.mubr.msk.f32.vlgmr.msra.gmra.mrb[4].mxu0 %vm970_vm8, %v993_v41 }
 0x6ff   :  { %8931 = vmatpush3.bf16.msk.msra.mxu0 %vm10892_vm6, %v8926_v24 }
 0x748   :  { %v1187_v42 = vpop.xlane.xlu1 %1186 }
 0x749   :  { %9706 = vrcp.f32 %v1187_v42 }
 0x74c   :  { %v1190_v43 = vpop.xlane.xlu0 %1189 }
 0x74d   :  { %9708 = vrcp.f32 %v1190_v43 }
 0x750   :  { %v1396_v44 = vpop.xlane.xlu0 %1395 }
 0x751   :  { %v1393_v49 = vpop.xlane.xlu1 %1392 }
 0x752   :  { %9710 = vrcp.f32 %v1393_v49 }
 0x753   :  { %v9707_v45 = vpop.eup %9706  ;;  %9712 = vrcp.f32 %v1396_v44 }
 0x754   :  { %v1193_v46 = vmul.f32 %v9707_v45, %v9691_v8  ;;  %v9390_v8 = vld [vmem:[%s11726_s24 + $0x8] sm:$0xff]  }
 0x756   :  { %8545 = vmatprep.mubr.msk.f32.mxu0 %vm970_vm8, %v1193_v46 }
 0x757   :  { %v9709_v48 = vpop.eup %9708  ;;  %v1601_v50 = vpop.xlane.xlu0 %1600 }
 0x758   :  { %9714 = vrcp.f32 %v1601_v50  ;;  %v1598_v51 = vpop.xlane.xlu1 %1597  ;;  %v1194_v52 = vmul.f32 %v9709_v48, %v9693_v15  ;;  %v7747_v48 = vld [vmem:[%s11727_s21] ss:$0 sm:$0xff] }
 0x759   :  { %9716 = vrcp.f32 %v1598_v51 }
 0x75a   :  { %8546 = vmatmul.mubr.msk.f32.vlgmr.msra.gmra.mrb[6].mxu0 %vm970_vm8, %v1194_v52 }
 0x75b   :  { %v9187_v53 = vpop.permute.xlu0 %9186 }
 0x75c   :  { %v9711_v54 = vpop.eup %9710  ;;  %v9189_v55 = vunpack.i.h.bf16 %v9187_v53  ;;  %v9188_v57 = vunpack.i.l.bf16 %v9187_v53  ;;  %v9192_v58 = vpop.permute.xlu1 %9191 }
 0x75d   :  { %v9194_v59 = vunpack.i.h.bf16 %v9192_v58  ;;  %v9193_v60 = vunpack.i.l.bf16 %v9192_v58  ;;  %v1399_v61 = vmul.f32 %v9711_v54, %v9697_v25  ;;  %v9713_v63 = vpop.eup %9712 }
 0x75e   :  { %v8938_v62 = vpack.c.bf16 %v9189_v55, %v9188_v57  ;;  %v1400_v3 = vmul.f32 %v9713_v63, %v9695_v22 }
 0x75f   :  { %v8950_v1 = vpack.c.bf16 %v9194_v59, %v9193_v60  ;;  %8559 = vmatprep.mubr.msk.f32.mxu0 %vm970_vm8, %v1399_v61  ;;  %v9397_v60 = vld [vmem:[%s11728_s13] ss:$8 sps:$4 sm:$0xff]   ;;  %v9399_v61 = vld [vmem:[%s11728_s13 + $0x4] ss:$8 sps:$4 sm:$0xff]  }
 0x760   :  { %8940 = vmatprep.subr.msk.bf16.mxu0 %vm10892_vm6, %v8938_v62  ;;  %1991 = vmatprep.subr.bf16.mxu1 %v9399_v61  ;;  %v9435_v61 = vld [vmem:[#allocation7 + $0x78] sm:$0xff]  }
 0x761   :  { %8943 = vmatpush3.bf16.msk.msra.mxu0 %vm10892_vm6, %v8938_v62  ;;  %v9402_v62 = vld [vmem:[%s11728_s13 + $0x14] ss:$8 sps:$4 sm:$0xff]   ;;  %1992 = vmatpush1.bf16.msra.mxu1 %v9397_v60 }
 0x762   :  { %v9715_v2 = vpop.eup %9714  ;;  %8952 = vmatprep.subr.msk.bf16.mxu0 %vm10892_vm6, %v8950_v1  ;;  %1993 = vmatprep.subr.bf16.mxu1 %v9402_v62  ;;  %v9434_v60 = vld [vmem:[#allocation7 + $0x30] sm:$0xff]   ;;  %v9436_v62 = vld [vmem:[#allocation7 + $0x38] sm:$0xff]  }
 0x763   :  { %v9717_v4 = vpop.eup %9716  ;;  %v1605_v6 = vmul.f32 %v9715_v2, %v9699_v29 }
 0x764   :  { %8560 = vmatmul.mubr.msk.f32.vlgmr.msra.gmra.mrb[8].mxu0 %vm970_vm8, %v1400_v3  ;;  %v1604_v5 = vmul.f32 %v9717_v4, %v9701_v31 }
 0x765   :  { %8955 = vmatpush3.bf16.msk.msra.mxu0 %vm10892_vm6, %v8950_v1 }
 0x766   :  { %8573 = vmatprep.mubr.msk.f32.mxu0 %vm970_vm8, %v1604_v5  ;;  %8576 = vmatprep.subr.bf16.mxu0 %v10435_v56 }
 0x768   :  { %8574 = vmatmul.mubr.msk.f32.vlgmr.msra.gmra.mrb[10].mxu0 %vm970_vm8, %v1605_v6 }
 0x769   :  { %8592 = vmatprep.mubr.msk.bf16.mxu0 %vm10436_vm2, %v10435_v56  ;;  %8577 = vmatpush3.bf16.msra.mxu0 %v9389_v7 }
 0x76a   :  { %8578 = vmatprep.subr.bf16.mxu0 %v10435_v56 }
 0x76d   :  { %8579 = vmatpush3.bf16.msra.mxu0 %v9390_v8  ;;  %v9405_v8 = vld [vmem:[%s11728_s13 + $0x24] ss:$8 sps:$4 sm:$0xff]  }
 0x76e   :  { %8580 = vmatprep.subr.bf16.mxu0 %v10435_v56 }
 0x771   :  { %8581 = vmatpush3.bf16.msra.mxu0 %v9391_v9  ;;  %v9403_v9 = vld [vmem:[%s11728_s13 + $0x20] ss:$8 sps:$4 sm:$0xff]  }
 0x772   :  { %8582 = vmatprep.subr.bf16.mxu0 %v10435_v56 }
 0x775   :  { %8583 = vmatpush3.bf16.msra.mxu0 %v9392_v12  ;;  %v9411_v12 = vld [vmem:[%s11728_s13 + $0x44] ss:$8 sps:$4 sm:$0xff]  }
 0x776   :  { %8584 = vmatprep.subr.bf16.mxu0 %v10435_v56 }
 0x779   :  { %8585 = vmatpush3.bf16.msra.mxu0 %v9393_v13  ;;  %v9409_v13 = vld [vmem:[%s11728_s13 + $0x40] ss:$8 sps:$4 sm:$0xff]  }
 0x77a   :  { %8586 = vmatprep.subr.bf16.mxu0 %v10435_v56 }
 0x77d   :  { %8587 = vmatpush3.bf16.msra.mxu0 %v9394_v14  ;;  %v9414_v14 = vld [vmem:[%s11728_s13 + $0x54] ss:$8 sps:$4 sm:$0xff]  }
 0x77e   :  { %8588 = vmatprep.subr.bf16.mxu0 %v10435_v56 }
 0x781   :  { %8589 = vmatpush3.bf16.msra.mxu0 %v9395_v18  ;;  %v9420_v18 = vld [vmem:[%s11728_s13 + $0x74] ss:$8 sps:$4 sm:$0xff]  }
 0x782   :  { %8590 = vmatprep.subr.bf16.mxu0 %v10435_v56 }
 0x785   :  { %8591 = vmatpush3.bf16.msra.mxu0 %v9396_v19  ;;  %v9418_v19 = vld [vmem:[%s11728_s13 + $0x70] ss:$8 sps:$4 sm:$0xff]  }
 0x7d1   :  { %v8533_v10 = vpop.f32.mrb[4].mxu0 }
 0x7d2   :  { %v1069_v11 = vpop.f32.mrb[5].mxu0 }
 0x82d   :  { %v8547_v15 = vpop.f32.mrb[6].mxu0 }
 0x82e   :  { %v1275_v16 = vpop.f32.mrb[7].mxu0 }
 0x82f   :  { %v9195_v17 = vpack.i.bf16 %v8547_v15, %v1275_v16  ;;  %v9412_v15 = vld [vmem:[%s11728_s13 + $0x50] ss:$8 sps:$4 sm:$0xff]   ;;  %v9417_v16 = vld [vmem:[%s11728_s13 + $0x64] ss:$8 sps:$4 sm:$0xff]  }
 0x831   :  { %9196 = vrot.lane.b32.xlu1 %v9195_v17, %s10407_s22  ;;  %v9415_v17 = vld [vmem:[%s11728_s13 + $0x60] ss:$8 sps:$4 sm:$0xff]  }
 0x837   :  { %v8561_v20 = vpop.f32.mrb[8].mxu0 }
 0x838   :  { %v1480_v22 = vpop.f32.mrb[9].mxu0 }
 0x839   :  { %v9200_v24 = vpack.i.bf16 %v8561_v20, %v1480_v22 }
 0x83b   :  { %9201 = vrot.lane.b32.xlu1 %v9200_v24, %s10421_s15  ;;  %v8575_v25 = vpop.f32.mrb[10].mxu0 }
 0x83c   :  { %v1685_v27 = vpop.f32.mrb[11].mxu0 }
 0x83d   :  { %v9205_v28 = vpack.i.bf16 %v8575_v25, %v1685_v27 }
 0x83f   :  { %9206 = vrot.lane.b32.xlu0 %v9205_v28, %s10437_s26 }
 0x8a3   :  { %v9197_v29 = vpop.permute.xlu1 %9196 }
 0x8a4   :  { %v9199_v32 = vunpack.i.h.bf16 %v9197_v29  ;;  %v9198_v33 = vunpack.i.l.bf16 %v9197_v29 }
 0x8a6   :  { %v1719_v38 = vsel %vm878_vm3, %v8533_v10, %v9199_v32  ;;  %v1718_v40 = vsel %vm878_vm3, %v1069_v11, %v9198_v33  ;;  %v9408_v10 = vld [vmem:[%s11728_s13 + $0x34] ss:$8 sps:$4 sm:$0xff]   ;;  %v9406_v11 = vld [vmem:[%s11728_s13 + $0x30] ss:$8 sps:$4 sm:$0xff]   ;;  %v7756_v32 = vld [vmem:[%s11729_s17] ss:$0 sm:$0xff] }
 0x8ad   :  { %v9202_v31 = vpop.permute.xlu1 %9201 }
 0x8ae   :  { %v9204_v34 = vunpack.i.h.bf16 %v9202_v31  ;;  %v9203_v36 = vunpack.i.l.bf16 %v9202_v31 }
 0x8b0   :  { %v1721_v43 = vsel %vm523_vm0, %v1719_v38, %v9204_v34  ;;  %v1720_v49 = vsel %vm523_vm0, %v1718_v40, %v9203_v36 }
 0x8b1   :  { %v9207_v37 = vpop.permute.xlu0 %9206 }
 0x8b2   :  { %v9209_v41 = vunpack.i.h.bf16 %v9207_v37  ;;  %v9208_v42 = vunpack.i.l.bf16 %v9207_v37  ;;  %v7757_v37 = vld [vmem:[%s11730_s14] ss:$0 sm:$0xff] }
 0x8b4   :  { %v1724_v44 = vsel %vm1722_vm9, %v1721_v43, %v9209_v41  ;;  %v1723_v45 = vsel %vm1722_vm9, %v1720_v49, %v9208_v42  ;;  %v9421_v43 = vld [vmem:[#allocation7 + $0x40] sm:$0xff]  }
 0x8b5   :  { %v1741_v46 = vpack.c.bf16 %v1724_v44, %v1723_v45  ;;  %v9422_v49 = vld [vmem:[#allocation7] sm:$0xff]   ;;  %8252 = vmatprep.subr.bf16.mxu0 %v9421_v43  ;;  %v9423_v44 = vld [vmem:[#allocation7 + $0x48] sm:$0xff]  }
 0x8b6   :  { %v9424_v45 = vld [vmem:[#allocation7 + $0x8] sm:$0xff]  }
 0x8b7   :  { %8593 = vmatmul.mubr.bf16.vlgmr.msra.gmra.mrb[12].mxu0 %v1741_v46  ;;  %v9425_v46 = vld [vmem:[#allocation7 + $0x50] sm:$0xff]  }
 0x8b8   :  { %8253 = vmatpush3.bf16.msra.mxu0 %v9422_v49 }
 0x8b9   :  { %8254 = vmatprep.subr.bf16.mxu0 %v9423_v44 }
 0x8bc   :  { %8255 = vmatpush3.bf16.msra.mxu0 %v9424_v45 }
 0x8bd   :  { %8256 = vmatprep.subr.bf16.mxu0 %v9425_v46 }
 0x98a   :  { %v1831_v50 = vpop.f32.mrb[12].mxu0 }
 0x98b   :  { %v1832_v51 = vadd.f32 %v7747_v48, %v1831_v50  ;;  %v8594_v52 = vpop.f32.mrb[13].mxu0  ;;  %v9427_v50 = vld [vmem:[#allocation7 + $0x58] sm:$0xff]  }
 0x98c   :  { %v1834_v53 = vpop.f32.mrb[14].mxu0  ;;  %v9429_v52 = vld [vmem:[#allocation7 + $0x60] sm:$0xff]  }
 0x98d   :  { %v10998_v54 = vadd.f32 %v1832_v51, %v10818_v30  ;;  %v1835_v55 = vadd.f32 %v7747_v48, %v1834_v53  ;;  %v8595_v57 = vpop.f32.mrb[15].mxu0  ;;  %v9400_v30 = vld [vmem:[%s11728_s13 + $0x10] ss:$8 sps:$4 sm:$0xff]   ;;  %v9428_v51 = vld [vmem:[#allocation7 + $0x18] sm:$0xff]   ;;  %v9430_v53 = vld [vmem:[#allocation7 + $0x20] sm:$0xff]  }
 0x98e   :  { %1994 = vmatpush1.bf16.msra.mxu1 %v9400_v30  ;;  %v9426_v48 = vld [vmem:[#allocation7 + $0x10] sm:$0xff]   ;;  %v9432_v57 = vld [vmem:[#allocation7 + $0x28] sm:$0xff]   ;;  %v1899_v30 = vld [vmem:[#allocation5] sm:$0x3] }
 0x98f   :  { %v11001_v58 = vadd.f32 %v1835_v55, %v10813_v26  ;;  %1842 = vadd.xlane.f32.xlu0 %v10998_v54  ;;  %1995 = vmatprep.subr.bf16.mxu1 %v9405_v8  ;;  %v9431_v55 = vld [vmem:[#allocation7 + $0x68] sm:$0xff]  }
 0x990   :  { %8257 = vmatpush3.bf16.msra.mxu0 %v9426_v48 }
 0x991   :  { %v1844_v59 = vsel %vm576_vm1, %v11001_v58, 0.0  ;;  %8258 = vmatprep.subr.bf16.mxu0 %v9427_v50 }
 0x992   :  { %1845 = vadd.xlane.f32.xlu1 %v1844_v59  ;;  %1996 = vmatpush1.bf16.msra.mxu1 %v9403_v9  ;;  %v9433_v59 = vld [vmem:[#allocation7 + $0x70] sm:$0xff]  }
 0x993   :  { %1997 = vmatprep.subr.bf16.mxu1 %v9408_v10 }
 0x994   :  { %8259 = vmatpush3.bf16.msra.mxu0 %v9428_v51 }
 0x995   :  { %8260 = vmatprep.subr.bf16.mxu0 %v9429_v52 }
 0x996   :  { %1998 = vmatpush1.bf16.msra.mxu1 %v9406_v11 }
 0x997   :  { %1999 = vmatprep.subr.bf16.mxu1 %v9411_v12 }
 0x998   :  { %8261 = vmatpush3.bf16.msra.mxu0 %v9430_v53 }
 0x999   :  { %8262 = vmatprep.subr.bf16.mxu0 %v9431_v55 }
 0x99a   :  { %2000 = vmatpush1.bf16.msra.mxu1 %v9409_v13 }
 0x99b   :  { %2001 = vmatprep.subr.bf16.mxu1 %v9414_v14 }
 0x99c   :  { %8263 = vmatpush3.bf16.msra.mxu0 %v9432_v57  ;;  %v7774_v57 = vld [vmem:[#allocation8] ss:$0 sm:$0xff] }
 0x99d   :  { %8264 = vmatprep.subr.bf16.mxu0 %v9433_v59 }
 0x99e   :  { %2002 = vmatpush1.bf16.msra.mxu1 %v9412_v15 }
 0x99f   :  { %2003 = vmatprep.subr.bf16.mxu1 %v9417_v16 }
 0x9a0   :  { %8265 = vmatpush3.bf16.msra.mxu0 %v9434_v60 }
 0x9a1   :  { %8266 = vmatprep.subr.bf16.mxu0 %v9435_v61 }
 0x9a2   :  { %2004 = vmatpush1.bf16.msra.mxu1 %v9415_v17 }
 0x9a3   :  { %2005 = vmatprep.subr.bf16.mxu1 %v9420_v18 }
 0x9a4   :  { %8267 = vmatpush3.bf16.msra.mxu0 %v9436_v62 }
 0x9a5   :  { %8596 = vmatprep.subr.bf16.mxu0 %v10435_v56 }
 0x9a6   :  { %2006 = vmatpush1.bf16.msra.mxu1 %v9418_v19 }
 0xa1c   :  { %v1843_v63 = vpop.xlane.xlu0 %1842 }
 0xa1d   :  { %v1847_v26 = vmul.f32 0.0078125, %v1843_v63  ;;  %v1904_v63 = vrot.slane %v1899_v30, %v10860_v21 }
 0xa1f   :  { %v1846_v1 = vpop.xlane.xlu1 %1845  ;;  %v1849_v2 = vsub.f32 %v10998_v54, %v1847_v26  ;;  %v1908_v26 = vrot.slane %v1899_v30, %v10863_v23 }
 0xa20   :  { %v1848_v3 = vmul.f32 0.0078125, %v1846_v1 }
 0xa21   :  { %v1851_v4 = vmul.f32 %v1849_v2, %v1849_v2 }
 0xa22   :  { %v1850_v5 = vsub.f32 %v11001_v58, %v1848_v3 }
 0xa23   :  { %1853 = vadd.xlane.f32.xlu0 %v1851_v4 }
 0xa24   :  { %v1852_v6 = vmul.f32 %v1850_v5, %v1850_v5 }
 0xa26   :  { %v1855_v7 = vsel %vm576_vm1, %v1852_v6, 0.0 }
 0xa27   :  { %1856 = vadd.xlane.f32.xlu0 %v1855_v7 }
 0xab0   :  { %v1854_v20 = vpop.xlane.xlu0 %1853 }
 0xab1   :  { %v1858_v22 = vmul.f32 0.0078125, %v1854_v20 }
 0xab3   :  { %v1860_v24 = vadd.f32 1e-06, %v1858_v22 }
 0xab4   :  { %v1857_v25 = vpop.xlane.xlu0 %1856 }
 0xab5   :  { %9718 = vrsqrt.f32 %v1860_v24  ;;  %v1859_v27 = vmul.f32 0.0078125, %v1857_v25 }
 0xab7   :  { %v1861_v28 = vadd.f32 1e-06, %v1859_v27 }
 0xab9   :  { %9720 = vrsqrt.f32 %v1861_v28 }
 0xabf   :  { %v9719_v29 = vpop.eup %9718 }
 0xac0   :  { %v1864_v31 = vmul.f32 %v9719_v29, %v1849_v2 }
 0xac2   :  { %v1872_v36 = vmul.f32 %v7756_v32, %v1864_v31 }
 0xac3   :  { %v9721_v33 = vpop.eup %9720 }
 0xac4   :  { %v1865_v34 = vmul.f32 %v9721_v33, %v1850_v5  ;;  %v1880_v40 = vadd.f32 %v7757_v37, %v1872_v36 }
 0xac6   :  { %v1873_v38 = vmul.f32 %v7756_v32, %v1865_v34 }
 0xac8   :  { %v1881_v41 = vadd.f32 %v7757_v37, %v1873_v38 }
 0xaca   :  { %v1898_v42 = vpack.c.bf16 %v1881_v41, %v1880_v40 }
 0xacc   :  { %2024 = vmatmul.mubr.bf16.vlgmr.msra.gmra.mrb[16].mxu1 %v1898_v42 }
 0xacd   :  { %2523 = vmatprep.mubr.bf16.mxu1 %v10434_v0 }
 0xb9f   :  { %v2025_v1 = vpop.f32.mrb[16].mxu1 }
 0xba0   :  { %v2026_v2 = vadd.f32 %v2025_v1, %v1904_v63  ;;  %v2027_v3 = vpop.f32.mrb[17].mxu1 }
 0xba1   :  { %v2028_v4 = vadd.f32 %v2027_v3, %v1908_v26  ;;  %v2029_v5 = vpop.f32.mrb[18].mxu1 }
 0xba2   :  { %v2038_v6 = vmul.f32 0.044715, %v2026_v2  ;;  %v2030_v7 = vadd.f32 %v2029_v5, %v1904_v63  ;;  %v2031_v8 = vpop.f32.mrb[19].mxu1  ;;  %v2034_v41 = vmul.f32 0.5, %v2026_v2  ;;  %v9439_v5 = vld [vmem:[%s11717_s23 + $0xc4] ss:$12 sps:$4 sm:$0xff]  }
 0xba3   :  { %v2039_v9 = vmul.f32 0.044715, %v2028_v4  ;;  %v2032_v10 = vadd.f32 %v2031_v8, %v1908_v26  ;;  %v2035_v49 = vmul.f32 0.5, %v2028_v4  ;;  %2491 = vmatprep.subr.bf16.mxu1 %v9439_v5  ;;  %v9441_v8 = vld [vmem:[%s11717_s23 + $0xd8] ss:$12 sps:$4 sm:$0xff]  }
 0xba4   :  { %v2042_v11 = vmul.f32 %v2038_v6, %v2026_v2  ;;  %v2040_v12 = vmul.f32 0.044715, %v2030_v7  ;;  %v2036_v42 = vmul.f32 0.5, %v2030_v7  ;;  %v9440_v6 = vld [vmem:[%s11717_s23 + $0xc8] ss:$12 sps:$4 sm:$0xff]  }
 0xba5   :  { %v2043_v13 = vmul.f32 %v2039_v9, %v2028_v4  ;;  %v2041_v14 = vmul.f32 0.044715, %v2032_v10  ;;  %v2037_v44 = vmul.f32 0.5, %v2032_v10 }
 0xba6   :  { %v2046_v15 = vmul.f32 %v2042_v11, %v2026_v2  ;;  %v2044_v16 = vmul.f32 %v2040_v12, %v2030_v7 }
 0xba7   :  { %v2047_v17 = vmul.f32 %v2043_v13, %v2028_v4  ;;  %v2045_v18 = vmul.f32 %v2041_v14, %v2032_v10 }
 0xba8   :  { %v2050_v19 = vadd.f32 %v2046_v15, %v2026_v2  ;;  %v2048_v20 = vmul.f32 %v2044_v16, %v2030_v7  ;;  %v9444_v16 = vld [vmem:[%s11717_s23 + $0xe0] ss:$12 sps:$4 sm:$0xff]  }
 0xba9   :  { %v2049_v22 = vmul.f32 %v2045_v18, %v2032_v10  ;;  %v2051_v24 = vadd.f32 %v2047_v17, %v2028_v4  ;;  %v9437_v4 = vld [vmem:[%s11717_s23 + $0xc0] ss:$12 sps:$4 sm:$0xff]   ;;  %v9445_v18 = vld [vmem:[%s11717_s23 + $0xf0] ss:$12 sps:$4 sm:$0xff]  }
 0xbaa   :  { %v2054_v25 = vmul.f32 0.7978846, %v2050_v19  ;;  %v2052_v27 = vadd.f32 %v2048_v20, %v2030_v7  ;;  %v9443_v7 = vld [vmem:[%s11717_s23 + $0xdc] ss:$12 sps:$4 sm:$0xff]   ;;  %2492 = vmatpush1.bf16.msra.mxu1 %v9437_v4  ;;  %v9447_v17 = vld [vmem:[%s11717_s23 + $0xf4] ss:$12 sps:$4 sm:$0xff]  }
 0xbab   :  { %v2053_v28 = vadd.f32 %v2049_v22, %v2032_v10  ;;  %v2055_v29 = vmul.f32 0.7978846, %v2051_v24  ;;  %2493 = vmatprep.subr.bf16.mxu1 %v9443_v7  ;;  %v9448_v19 = vld [vmem:[%s11717_s23 + $0xf8] ss:$12 sps:$4 sm:$0xff]   ;;  %v9449_v22 = vld [vmem:[%s11717_s23 + $0x108] ss:$12 sps:$4 sm:$0xff]  }
 0xbac   :  { %9722 = vtanh.f32 %v2054_v25  ;;  %v2056_v31 = vmul.f32 0.7978846, %v2052_v27  ;;  %v9451_v20 = vld [vmem:[%s11717_s23 + $0x10c] ss:$12 sps:$4 sm:$0xff]   ;;  %v9452_v24 = vld [vmem:[%s11717_s23 + $0x110] ss:$12 sps:$4 sm:$0xff]  }
 0xbad   :  { %v2057_v32 = vmul.f32 0.7978846, %v2053_v28  ;;  %9724 = vtanh.f32 %v2055_v29  ;;  %v9455_v25 = vld [vmem:[%s11717_s23 + $0x124] ss:$12 sps:$4 sm:$0xff]   ;;  %v9453_v27 = vld [vmem:[%s11717_s23 + $0x120] ss:$12 sps:$4 sm:$0xff]  }
 0xbae   :  { %9726 = vtanh.f32 %v2056_v31  ;;  %2494 = vmatpush1.bf16.msra.mxu1 %v9441_v8  ;;  %v9456_v28 = vld [vmem:[%s11717_s23 + $0x128] ss:$12 sps:$4 sm:$0xff]   ;;  %v9457_v31 = vld [vmem:[%s11717_s23 + $0x138] ss:$12 sps:$4 sm:$0xff]  }
 0xbaf   :  { %9728 = vtanh.f32 %v2057_v32  ;;  %2495 = vmatprep.subr.bf16.mxu1 %v9447_v17  ;;  %v9459_v29 = vld [vmem:[%s11717_s23 + $0x13c] ss:$12 sps:$4 sm:$0xff]   ;;  %v9460_v32 = vld [vmem:[%s11717_s23 + $0x140] ss:$12 sps:$4 sm:$0xff]  }
 0xbb2   :  { %2496 = vmatpush1.bf16.msra.mxu1 %v9445_v18 }
 0xbb3   :  { %2497 = vmatprep.subr.bf16.mxu1 %v9451_v20 }
 0xbb6   :  { %v9723_v33 = vpop.eup %9722  ;;  %2498 = vmatpush1.bf16.msra.mxu1 %v9449_v22 }
 0xbb7   :  { %v9725_v34 = vpop.eup %9724  ;;  %v2062_v36 = vadd.f32 1.0, %v9723_v33  ;;  %2499 = vmatprep.subr.bf16.mxu1 %v9455_v25  ;;  %v9463_v33 = vld [vmem:[%s11717_s23 + $0x154] ss:$12 sps:$4 sm:$0xff]  }
 0xbb8   :  { %v9727_v37 = vpop.eup %9726  ;;  %v2063_v38 = vadd.f32 1.0, %v9725_v34  ;;  %v9461_v34 = vld [vmem:[%s11717_s23 + $0x150] ss:$12 sps:$4 sm:$0xff]  }
 0xbb9   :  { %v9729_v40 = vpop.eup %9728  ;;  %v2064_v43 = vadd.f32 1.0, %v9727_v37  ;;  %v2066_v46 = vmul.f32 %v2062_v36, %v2034_v41  ;;  %v9464_v36 = vld [vmem:[%s11717_s23 + $0x158] ss:$12 sps:$4 sm:$0xff]  }
 0xbba   :  { %v2065_v45 = vadd.f32 1.0, %v9729_v40  ;;  %v2067_v50 = vmul.f32 %v2063_v38, %v2035_v49  ;;  %2500 = vmatpush1.bf16.msra.mxu1 %v9453_v27  ;;  %v9467_v37 = vld [vmem:[%s11717_s23 + $0x16c] ss:$12 sps:$4 sm:$0xff]   ;;  %v9465_v38 = vld [vmem:[%s11717_s23 + $0x168] ss:$12 sps:$4 sm:$0xff]  }
 0xbbb   :  { %v2068_v48 = vmul.f32 %v2064_v43, %v2036_v42  ;;  %2501 = vmatprep.subr.bf16.mxu1 %v9459_v29  ;;  %v9468_v40 = vld [vmem:[%s11717_s23 + $0x170] ss:$12 sps:$4 sm:$0xff]  }
 0xbbc   :  { %v2069_v51 = vmul.f32 %v2065_v45, %v2037_v44 }
 0xbbd   :  { %v2102_v52 = vpack.c.bf16 %v2068_v48, %v2066_v46  ;;  %v7791_v48 = vld [vmem:[%s11731_s1] ss:$0 sm:$0xff] }
 0xbbe   :  { %v2103_v53 = vpack.c.bf16 %v2069_v51, %v2067_v50  ;;  %2502 = vmatpush1.bf16.msra.mxu1 %v9457_v31  ;;  %v7792_v51 = vld [vmem:[%s11732_s2] ss:$0 sm:$0xff]  ;;  %v11111_v31 = vld [vmem:[%s11725_s3 + $0x8] sm:$0x3] }
 0xbbf   :  { %2503 = vmatprep.subr.bf16.mxu1 %v9463_v33  ;;  %v11115_v33 = vld [vmem:[%s11725_s3] sm:$0xff] }
 0xbc0   :  { %2239 = vmatprep.mubr.bf16.mxu0 %v2103_v53 }
 0xbc1   :  { %2240 = vmatmul.mubr.bf16.vlgmr.msra.gmra.mrb[16].mxu0 %v2102_v52  ;;  %v7795_v52 = vld [vmem:[%s11718_s0 + $0x1] ss:$0 sm:$0xff] }
 0xbc2   :  { %8612 = vmatprep.mubr.msk.bf16.mxu0 %vm10436_vm2, %v10435_v56  ;;  %8597 = vmatpush3.bf16.msra.mxu0 %v9440_v6 }
 0xbc3   :  { %8598 = vmatprep.subr.bf16.mxu0 %v10435_v56  ;;  %2504 = vmatpush1.bf16.msra.mxu1 %v9461_v34 }
 0xbc4   :  { %2505 = vmatprep.subr.bf16.mxu1 %v9467_v37 }
 0xbc6   :  { %8599 = vmatpush3.bf16.msra.mxu0 %v9444_v16 }
 0xbc7   :  { %8600 = vmatprep.subr.bf16.mxu0 %v10435_v56  ;;  %2506 = vmatpush1.bf16.msra.mxu1 %v9465_v38 }
 0xbca   :  { %8601 = vmatpush3.bf16.msra.mxu0 %v9448_v19 }
 0xbcb   :  { %8602 = vmatprep.subr.bf16.mxu0 %v10435_v56 }
 0xbce   :  { %8603 = vmatpush3.bf16.msra.mxu0 %v9452_v24 }
 0xbcf   :  { %8604 = vmatprep.subr.bf16.mxu0 %v10435_v56 }
 0xbd2   :  { %8605 = vmatpush3.bf16.msra.mxu0 %v9456_v28 }
 0xbd3   :  { %8606 = vmatprep.subr.bf16.mxu0 %v10435_v56 }
 0xbd6   :  { %8607 = vmatpush3.bf16.msra.mxu0 %v9460_v32 }
 0xbd7   :  { %8608 = vmatprep.subr.bf16.mxu0 %v10435_v56 }
 0xbda   :  { %8609 = vmatpush3.bf16.msra.mxu0 %v9464_v36 }
 0xbdb   :  { %8610 = vmatprep.subr.bf16.mxu0 %v10435_v56 }
 0xbde   :  { %8611 = vmatpush3.bf16.msra.mxu0 %v9468_v40 }
 0xc94   :  { %v8268_v55 = vpop.f32.mrb[16].mxu0 }
 0xc95   :  { %v8269_v59 = vpop.f32.mrb[17].mxu0 }
 0xc96   :  { %v8270_v60 = vadd.f32 %v8269_v59, %v8268_v55  ;;  %v8271_v61 = vpop.f32.mrb[18].mxu0 }
 0xc97   :  { %v8272_v62 = vpop.f32.mrb[19].mxu0 }
 0xc98   :  { %v2242_v30 = vadd.f32 %v8270_v60, %v7774_v57  ;;  %v8273_v63 = vadd.f32 %v8272_v62, %v8271_v61  ;;  %v7796_v61 = vld [vmem:[%s11719_s6 + $0x1] ss:$0 sm:$0xff] }
 0xc9a   :  { %v2245_v26 = vadd.f32 %v8273_v63, %v7774_v57  ;;  %v11034_v1 = vadd.f32 %v2242_v30, %v10998_v54 }
 0xc9c   :  { %v11037_v2 = vadd.f32 %v2245_v26, %v11001_v58  ;;  %2252 = vadd.xlane.f32.xlu0 %v11034_v1 }
 0xc9e   :  { %v2254_v3 = vsel %vm576_vm1, %v11037_v2, 0.0 }
 0xc9f   :  { %2255 = vadd.xlane.f32.xlu1 %v2254_v3  ;;  %v7829_v3 = vld [vmem:[%s11720_s18 + $0x3] sm:$0x7] }
 0xca0   :  { %v2351_v4 = vrot.slane %v7829_v3, %v10860_v21  ;;  %v2359_v5 = vrot.slane %v7829_v3, %v10888_v39  ;;  %v2355_v8 = vrot.slane %v7829_v3, %v10863_v23 }
 0xd29   :  { %v2253_v54 = vpop.xlane.xlu0 %2252 }
 0xd2a   :  { %v2257_v58 = vmul.f32 0.0078125, %v2253_v54 }
 0xd2c   :  { %v2256_v9 = vpop.xlane.xlu1 %2255  ;;  %v2259_v10 = vsub.f32 %v11034_v1, %v2257_v58 }
 0xd2d   :  { %v2258_v11 = vmul.f32 0.0078125, %v2256_v9 }
 0xd2e   :  { %v2261_v12 = vmul.f32 %v2259_v10, %v2259_v10 }
 0xd2f   :  { %v11050_v13 = vsub.f32 %v11037_v2, %v2258_v11 }
 0xd30   :  { %2263 = vadd.xlane.f32.xlu1 %v2261_v12 }
 0xd31   :  { %v2262_v14 = vmul.f32 %v11050_v13, %v11050_v13 }
 0xd33   :  { %v2265_v15 = vsel %vm576_vm1, %v2262_v14, 0.0 }
 0xd34   :  { %2266 = vadd.xlane.f32.xlu0 %v2265_v15 }
 0xdbd   :  { %v2264_v41 = vpop.xlane.xlu1 %2263 }
 0xdbe   :  { %v2268_v42 = vmul.f32 0.0078125, %v2264_v41 }
 0xdc0   :  { %v2270_v43 = vadd.f32 1e-06, %v2268_v42 }
 0xdc1   :  { %v2267_v49 = vpop.xlane.xlu0 %2266 }
 0xdc2   :  { %9730 = vrsqrt.f32 %v2270_v43  ;;  %v2269_v44 = vmul.f32 0.0078125, %v2267_v49 }
 0xdc4   :  { %v2271_v45 = vadd.f32 1e-06, %v2269_v44 }
 0xdc6   :  { %9732 = vrsqrt.f32 %v2271_v45 }
 0xdcc   :  { %v9731_v46 = vpop.eup %9730 }
 0xdcd   :  { %v2274_v50 = vmul.f32 %v9731_v46, %v2259_v10 }
 0xdcf   :  { %v2282_v53 = vmul.f32 %v7791_v48, %v2274_v50  ;;  %v2301_v60 = vmul.f32 %v7795_v52, %v2274_v50 }
 0xdd0   :  { %v9733_v55 = vpop.eup %9732 }
 0xdd1   :  { %v2275_v57 = vmul.f32 %v9733_v55, %v11050_v13  ;;  %v2289_v59 = vadd.f32 %v7792_v51, %v2282_v53  ;;  %v2309_v30 = vadd.f32 %v7796_v61, %v2301_v60 }
 0xdd3   :  { %2290 = vst [vmem:[%s10645_s19] sm:$0xff] %v2289_v59  ;;  %v2302_v62 = vmul.f32 %v7795_v52, %v2275_v57 }
 0xdd5   :  { %v2310_v63 = vadd.f32 %v7796_v61, %v2302_v62 }
 0xdd7   :  { %v2344_v26 = vpack.c.bf16 %v2310_v63, %v2309_v30 }
 0xdd9   :  { %2524 = vmatmul.mubr.bf16.vlgmr.msra.gmra.mrb[20].mxu1 %v2344_v26  ;;  %8613 = vmatmul.mubr.bf16.vlgmr.msra.gmra.mrb[20].mxu0 %v2344_v26 }
 0xeac   :  { %v2525_v6 = vpop.f32.mrb[20].mxu1  ;;  %v2568_v7 = vpop.f32.mrb[20].mxu0 }
 0xead   :  { %v11090_v54 = vadd.f32 %v2525_v6, %v2351_v4  ;;  %v2527_v58 = vpop.f32.mrb[21].mxu1  ;;  %v8614_v9 = vpop.f32.mrb[21].mxu0  ;;  %v2569_v12 = vadd.f32 %v2568_v7, %v2359_v5 }
 0xeae   :  { %v2529_v10 = vpop.f32.mrb[22].mxu1  ;;  %v2571_v11 = vpop.f32.mrb[22].mxu0  ;;  %v2528_v16 = vadd.f32 %v2527_v58, %v2355_v8 }
 0xeaf   :  { %v2572_v13 = vadd.f32 %v2571_v11, %v2359_v5  ;;  %v2531_v14 = vpop.f32.mrb[23].mxu1  ;;  %v8615_v15 = vpop.f32.mrb[23].mxu0  ;;  %8620 = vmatprep.mubr.msk.f32.mxu1 %vm878_vm3, %v11090_v54  ;;  %v11104_v24 = vadd.f32 %v2529_v10, %v2351_v4 }
 0xeb0   :  { %v2532_v17 = vadd.f32 %v2531_v14, %v2355_v8 }
 0xeb1   :  { %v8962_v18 = vpack.c.bf16 %v2572_v13, %v2569_v12  ;;  %v11094_v19 = vpack.i.bf16 %v2572_v13, %v2569_v12 }
 0xeb2   :  { %v8956_v20 = vpack.c.bf16 %v2532_v17, %v2528_v16  ;;  %v11096_v22 = vpack.i.bf16 %v2532_v17, %v2528_v16 }
 0xeb4   :  { %8958 = vmatprep.subr.msk.bf16.mxu1 %vm10871_vm4, %v8956_v20 }
 0xeb5   :  { %8961 = vmatpush3.bf16.xpose.msk.msra.mxu1 %vm10871_vm4, %v8956_v20 }
 0xeb6   :  { %8964 = vmatprep.subr.msk.bf16.mxu1 %vm10892_vm6, %v8962_v18 }
 0xebc   :  { %8621 = vmatmul.mubr.msk.f32.vlgmr.msra.gmra.mrb[24].mxu1 %vm878_vm3, %v11104_v24 }
 0xebd   :  { %8967 = vmatpush3.bf16.msk.msra.mxu1 %vm10892_vm6, %v8962_v18 }
 0xf8f   :  { %v8622_v25 = vpop.f32.mrb[24].mxu1 }
 0xf90   :  { %v2663_v27 = vmul.f32 0.17677669, %v8622_v25  ;;  %v2653_v28 = vpop.f32.mrb[25].mxu1 }
 0xf91   :  { %v2662_v29 = vmul.f32 0.17677669, %v2653_v28 }
 0xf92   :  { %v2665_v32 = vadd.f32 %v11111_v31, %v2663_v27 }
 0xf93   :  { %v2664_v34 = vadd.f32 %v11115_v33, %v2662_v29 }
 0xf94   :  { %v2669_v36 = vsel %vm974_vm7, %v2665_v32, -inf }
 0xf95   :  { %2670 = vmax.xlane.f32.xlu0 %v2669_v36  ;;  %v2666_v37 = vsel %vm970_vm8, %v2664_v34, -inf }
 0xf96   :  { %2667 = vmax.xlane.f32.xlu1 %v2666_v37 }
 0xfa7   :  { %9211 = vrot.lane.b32.xlu1 %v11096_v22, %s10437_s26 }
0x1022   :  { %v2671_v38 = vpop.xlane.xlu0 %2670 }
0x1023   :  { %v2673_v40 = vsub.f32 %v2665_v32, %v2671_v38  ;;  %v2668_v41 = vpop.xlane.xlu1 %2667 }
0x1024   :  { %v2672_v42 = vsub.f32 %v2664_v34, %v2668_v41 }
0x1025   :  { %v2676_v43 = vmul.f32 1.442695, %v2673_v40 }
0x1026   :  { %v2674_v49 = vmul.f32 1.442695, %v2672_v42 }
0x1027   :  { %9734 = vpow2.f32 %v2676_v43  ;;  %v9212_v44 = vpop.permute.xlu1 %9211 }
0x1028   :  { %9736 = vpow2.f32 %v2674_v49  ;;  %v9214_v45 = vunpack.i.h.bf16 %v9212_v44  ;;  %v9213_v46 = vunpack.i.l.bf16 %v9212_v44 }
0x102a   :  { %v8968_v48 = vpack.c.bf16 %v9214_v45, %v9213_v46 }
0x102c   :  { %8970 = vmatprep.subr.msk.bf16.mxu1 %vm10871_vm4, %v8968_v48 }
0x1031   :  { %v9735_v50 = vpop.eup %9734 }
0x1032   :  { %v9737_v51 = vpop.eup %9736  ;;  %v2681_v52 = vsel %vm974_vm7, %v9735_v50, 0.0 }
0x1033   :  { %2682 = vadd.xlane.f32.xlu0 %v2681_v52  ;;  %v2678_v53 = vsel %vm970_vm8, %v9737_v51, 0.0 }
0x1034   :  { %2679 = vadd.xlane.f32.xlu1 %v2678_v53 }
0x1045   :  { %2774 = vrot.lane.b32.xlu1 %v11104_v24, %s10437_s26 }
0x1049   :  { %2772 = vrot.lane.b32.xlu0 %v11090_v54, %s10437_s26 }
0x10c0   :  { %v2683_v55 = vpop.xlane.xlu0 %2682 }
0x10c1   :  { %9738 = vrcp.f32 %v2683_v55  ;;  %v2680_v57 = vpop.xlane.xlu1 %2679 }
0x10c2   :  { %9740 = vrcp.f32 %v2680_v57 }
0x10c4   :  { %v2773_v30 = vpop.permute.xlu0 %2772 }
0x10c5   :  { %v2775_v63 = vpop.permute.xlu1 %2774 }
0x10cb   :  { %v9739_v59 = vpop.eup %9738 }
0x10cc   :  { %v9741_v60 = vpop.eup %9740  ;;  %v2687_v62 = vmul.f32 %v9739_v59, %v9735_v50 }
0x10cd   :  { %v2686_v61 = vmul.f32 %v9741_v60, %v9737_v51 }
0x10cf   :  { %8627 = vmatprep.mubr.msk.f32.mxu1 %vm970_vm8, %v2686_v61 }
0x10d0   :  { %8628 = vmatmul.mubr.msk.f32.vlgmr.msra.gmra.mrb[26].mxu1 %vm970_vm8, %v2687_v62 }
0x10d1   :  { %8973 = vmatpush3.bf16.xpose.msk.msra.mxu1 %vm10871_vm4, %v8968_v48  ;;  %8634 = vmatprep.mubr.msk.f32.mxu1 %vm878_vm3, %v2773_v30 }
0x10d8   :  { %8635 = vmatmul.mubr.msk.f32.vlgmr.msra.gmra.mrb[28].mxu1 %vm878_vm3, %v2775_v63 }
0x11a3   :  { %v11136_v26 = vpop.f32.mrb[26].mxu1 }
0x11a4   :  { %v11138_v3 = vpop.f32.mrb[27].mxu1 }
0x11ab   :  { %v8636_v4 = vpop.f32.mrb[28].mxu1 }
0x11ac   :  { %v2864_v5 = vmul.f32 0.17677669, %v8636_v4  ;;  %v2854_v6 = vpop.f32.mrb[29].mxu1 }
0x11ad   :  { %v2863_v7 = vmul.f32 0.17677669, %v2854_v6 }
0x11ae   :  { %v2866_v8 = vadd.f32 %v11111_v31, %v2864_v5 }
0x11af   :  { %v2865_v58 = vadd.f32 %v11115_v33, %v2863_v7 }
0x11b0   :  { %v2870_v9 = vsel %vm974_vm7, %v2866_v8, -inf }
0x11b1   :  { %2871 = vmax.xlane.f32.xlu0 %v2870_v9  ;;  %v2867_v10 = vsel %vm970_vm8, %v2865_v58, -inf }
0x11b2   :  { %2868 = vmax.xlane.f32.xlu1 %v2867_v10 }
0x123e   :  { %v2872_v11 = vpop.xlane.xlu0 %2871 }
0x123f   :  { %v2874_v12 = vsub.f32 %v2866_v8, %v2872_v11  ;;  %v2869_v13 = vpop.xlane.xlu1 %2868 }
0x1240   :  { %v2873_v14 = vsub.f32 %v2865_v58, %v2869_v13 }
0x1241   :  { %v2877_v15 = vmul.f32 1.442695, %v2874_v12 }
0x1242   :  { %v2875_v16 = vmul.f32 1.442695, %v2873_v14 }
0x1243   :  { %9742 = vpow2.f32 %v2877_v15 }
0x1244   :  { %9744 = vpow2.f32 %v2875_v16 }
0x124d   :  { %v9743_v17 = vpop.eup %9742 }
0x124e   :  { %v9745_v18 = vpop.eup %9744  ;;  %v2882_v20 = vsel %vm974_vm7, %v9743_v17, 0.0 }
0x124f   :  { %2883 = vadd.xlane.f32.xlu1 %v2882_v20  ;;  %v2879_v25 = vsel %vm970_vm8, %v9745_v18, 0.0 }
0x1250   :  { %2880 = vadd.xlane.f32.xlu0 %v2879_v25 }
0x1260   :  { %9221 = vrot.lane.b32.xlu1 %v11096_v22, %s10421_s15 }
0x1264   :  { %9226 = vrot.lane.b32.xlu1 %v11096_v22, %s10407_s22 }
0x1266   :  { %9216 = vrot.lane.b32.xlu0 %v11094_v19, %s10437_s26 }
0x1268   :  { %2978 = vrot.lane.b32.xlu1 %v11090_v54, %s10421_s15 }
0x126a   :  { %2980 = vrot.lane.b32.xlu0 %v11104_v24, %s10421_s15 }
0x126c   :  { %3183 = vrot.lane.b32.xlu1 %v11090_v54, %s10407_s22 }
0x126e   :  { %3185 = vrot.lane.b32.xlu0 %v11104_v24, %s10407_s22 }
0x12dc   :  { %v2884_v27 = vpop.xlane.xlu1 %2883 }
0x12dd   :  { %9746 = vrcp.f32 %v2884_v27  ;;  %v2881_v28 = vpop.xlane.xlu0 %2880 }
0x12de   :  { %9748 = vrcp.f32 %v2881_v28 }
0x12e0   :  { %v9222_v22 = vpop.permute.xlu1 %9221 }
0x12e1   :  { %v9217_v29 = vpop.permute.xlu0 %9216  ;;  %v9224_v32 = vunpack.i.h.bf16 %v9222_v22  ;;  %v9223_v34 = vunpack.i.l.bf16 %v9222_v22 }
0x12e2   :  { %v9219_v36 = vunpack.i.h.bf16 %v9217_v29  ;;  %v9218_v37 = vunpack.i.l.bf16 %v9217_v29 }
0x12e3   :  { %v8980_v43 = vpack.c.bf16 %v9224_v32, %v9223_v34 }
0x12e4   :  { %v8974_v38 = vpack.c.bf16 %v9219_v36, %v9218_v37  ;;  %v9227_v40 = vpop.permute.xlu1 %9226 }
0x12e5   :  { %v9229_v41 = vunpack.i.h.bf16 %v9227_v40  ;;  %v9228_v42 = vunpack.i.l.bf16 %v9227_v40  ;;  %v2981_v46 = vpop.permute.xlu0 %2980 }
0x12e6   :  { %8976 = vmatprep.subr.msk.bf16.mxu1 %vm10892_vm6, %v8974_v38 }
0x12e7   :  { %v9747_v54 = vpop.eup %9746  ;;  %v8992_v24 = vpack.c.bf16 %v9229_v41, %v9228_v42  ;;  %8979 = vmatpush3.bf16.msk.msra.mxu1 %vm10892_vm6, %v8974_v38 }
0x12e8   :  { %v9749_v49 = vpop.eup %9748  ;;  %v2979_v44 = vpop.permute.xlu1 %2978  ;;  %8982 = vmatprep.subr.msk.bf16.mxu1 %vm10871_vm4, %v8980_v43  ;;  %v2888_v48 = vmul.f32 %v9747_v54, %v9743_v17 }
0x12e9   :  { %8994 = vmatprep.subr.msk.bf16.mxu0 %vm10871_vm4, %v8992_v24  ;;  %v2887_v45 = vmul.f32 %v9749_v49, %v9745_v18  ;;  %v3186_v51 = vpop.permute.xlu0 %3185 }
0x12ea   :  { %8997 = vmatpush3.bf16.xpose.msk.msra.mxu0 %vm10871_vm4, %v8992_v24 }
0x12eb   :  { %8641 = vmatprep.mubr.msk.f32.mxu1 %vm970_vm8, %v2887_v45  ;;  %8672 = vmatprep.subr.bf16.mxu0 %v10435_v56 }
0x12ec   :  { %8642 = vmatmul.mubr.msk.f32.vlgmr.msra.gmra.mrb[30].mxu1 %vm970_vm8, %v2888_v48  ;;  %v3184_v50 = vpop.permute.xlu1 %3183 }
0x12ed   :  { %8648 = vmatprep.mubr.msk.f32.mxu1 %vm878_vm3, %v2979_v44  ;;  %8662 = vmatprep.mubr.msk.f32.mxu0 %vm878_vm3, %v3184_v50 }
0x12f0   :  { %8985 = vmatpush3.bf16.xpose.msk.msra.mxu1 %vm10871_vm4, %v8980_v43 }
0x12f1   :  { %8663 = vmatmul.mubr.msk.f32.vlgmr.msra.gmra.mrb[24].mxu0 %vm878_vm3, %v3186_v51 }
0x12f2   :  { %8688 = vmatprep.mubr.msk.bf16.mxu0 %vm10436_vm2, %v10435_v56 }
0x12f7   :  { %8649 = vmatmul.mubr.msk.f32.vlgmr.msra.gmra.mrb[32].mxu1 %vm878_vm3, %v2981_v46 }
0x13bf   :  { %v8643_v52 = vpop.f32.mrb[30].mxu1 }
0x13c0   :  { %v2969_v53 = vpop.f32.mrb[31].mxu1 }
0x13c1   :  { %v9240_v55 = vpack.i.bf16 %v8643_v52, %v2969_v53 }
0x13c4   :  { %v8664_v57 = vpop.f32.mrb[24].mxu0 }
0x13c5   :  { %v3265_v59 = vpop.f32.mrb[25].mxu0  ;;  %v3275_v6 = vmul.f32 0.17677669, %v8664_v57 }
0x13c6   :  { %v3274_v61 = vmul.f32 0.17677669, %v3265_v59 }
0x13c7   :  { %v3277_v10 = vadd.f32 %v11111_v31, %v3275_v6  ;;  %v9476_v6 = vld [vmem:[%s11726_s24 + $0x78] sm:$0xff]  }
0x13c8   :  { %v3276_v8 = vadd.f32 %v11115_v33, %v3274_v61  ;;  %v9469_v61 = vld [vmem:[%s11726_s24 + $0x40] sm:$0xff]  }
0x13c9   :  { %v3281_v11 = vsel %vm974_vm7, %v3277_v10, -inf  ;;  %8673 = vmatpush3.bf16.msra.mxu0 %v9469_v61  ;;  %v9489_v61 = vld [vmem:[%s11728_s13 + $0xc0] ss:$8 sps:$4 sm:$0xff]  }
0x13ca   :  { %v8650_v60 = vpop.f32.mrb[32].mxu1  ;;  %v3278_v9 = vsel %vm970_vm8, %v3276_v8, -inf  ;;  %8674 = vmatprep.subr.bf16.mxu0 %v10435_v56 }
0x13cb   :  { %v3070_v62 = vmul.f32 0.17677669, %v8650_v60  ;;  %v3060_v30 = vpop.f32.mrb[33].mxu1 }
0x13cc   :  { %v3069_v63 = vmul.f32 0.17677669, %v3060_v30  ;;  %v9471_v30 = vld [vmem:[%s11726_s24 + $0x50] sm:$0xff]  }
0x13cd   :  { %v3072_v4 = vadd.f32 %v11111_v31, %v3070_v62  ;;  %v9470_v62 = vld [vmem:[%s11726_s24 + $0x48] sm:$0xff]  }
0x13ce   :  { %v3071_v5 = vadd.f32 %v11115_v33, %v3069_v63  ;;  %8675 = vmatpush3.bf16.msra.mxu0 %v9470_v62  ;;  %v9473_v63 = vld [vmem:[%s11726_s24 + $0x60] sm:$0xff]   ;;  %v9494_v62 = vld [vmem:[%s11728_s13 + $0xd4] ss:$8 sps:$4 sm:$0xff]  }
0x13cf   :  { %v3076_v7 = vsel %vm974_vm7, %v3072_v4, -inf  ;;  %8676 = vmatprep.subr.bf16.mxu0 %v10435_v56 }
0x13d0   :  { %3077 = vmax.xlane.f32.xlu0 %v3076_v7  ;;  %v3073_v58 = vsel %vm970_vm8, %v3071_v5, -inf }
0x13d1   :  { %3074 = vmax.xlane.f32.xlu1 %v3073_v58 }
0x13d2   :  { %8677 = vmatpush3.bf16.msra.mxu0 %v9471_v30  ;;  %v9492_v30 = vld [vmem:[%s11728_s13 + $0xd0] ss:$8 sps:$4 sm:$0xff]  }
0x13d3   :  { %8678 = vmatprep.subr.bf16.mxu0 %v10435_v56 }
0x13d4   :  { %3279 = vmax.xlane.f32.xlu0 %v3278_v9 }
0x13d6   :  { %8679 = vmatpush3.bf16.msra.mxu0 %v9472_v47  ;;  %v9497_v47 = vld [vmem:[%s11728_s13 + $0xe4] ss:$8 sps:$4 sm:$0xff]  }
0x13d7   :  { %8680 = vmatprep.subr.bf16.mxu0 %v10435_v56 }
0x13d8   :  { %3282 = vmax.xlane.f32.xlu0 %v3281_v11 }
0x13da   :  { %8681 = vmatpush3.bf16.msra.mxu0 %v9473_v63  ;;  %v9495_v63 = vld [vmem:[%s11728_s13 + $0xe0] ss:$8 sps:$4 sm:$0xff]  }
0x13db   :  { %8682 = vmatprep.subr.bf16.mxu0 %v10435_v56 }
0x145d   :  { %v3078_v12 = vpop.xlane.xlu0 %3077 }
0x145e   :  { %v3075_v13 = vpop.xlane.xlu1 %3074  ;;  %v3080_v17 = vsub.f32 %v3072_v4, %v3078_v12  ;;  %v9474_v4 = vld [vmem:[%s11726_s24 + $0x68] sm:$0xff]  }
0x145f   :  { %v3079_v14 = vsub.f32 %v3071_v5, %v3075_v13  ;;  %8683 = vmatpush3.bf16.msra.mxu0 %v9474_v4  ;;  %v9475_v5 = vld [vmem:[%s11726_s24 + $0x70] sm:$0xff]  }
0x1460   :  { %v3083_v27 = vmul.f32 1.442695, %v3080_v17  ;;  %8684 = vmatprep.subr.bf16.mxu0 %v10435_v56  ;;  %v9500_v4 = vld [vmem:[%s11728_s13 + $0xf4] ss:$8 sps:$4 sm:$0xff]  }
0x1461   :  { %v3280_v15 = vpop.xlane.xlu0 %3279  ;;  %v3081_v18 = vmul.f32 1.442695, %v3079_v14 }
0x1462   :  { %v3284_v16 = vsub.f32 %v3276_v8, %v3280_v15 }
0x1463   :  { %8685 = vmatpush3.bf16.msra.mxu0 %v9475_v5  ;;  %v9498_v5 = vld [vmem:[%s11728_s13 + $0xf0] ss:$8 sps:$4 sm:$0xff]  }
0x1464   :  { %v3286_v33 = vmul.f32 1.442695, %v3284_v16  ;;  %8686 = vmatprep.subr.bf16.mxu0 %v10435_v56 }
0x1465   :  { %v3283_v20 = vpop.xlane.xlu0 %3282 }
0x1466   :  { %9750 = vpow2.f32 %v3286_v33  ;;  %v3285_v25 = vsub.f32 %v3277_v10, %v3283_v20 }
0x1467   :  { %9752 = vpow2.f32 %v3081_v18  ;;  %8687 = vmatpush3.bf16.msra.mxu0 %v9476_v6 }
0x1468   :  { %v3288_v28 = vmul.f32 1.442695, %v3285_v25 }
0x146a   :  { %9754 = vpow2.f32 %v3288_v28 }
0x146b   :  { %9756 = vpow2.f32 %v3083_v27 }
0x1470   :  { %v9751_v31 = vpop.eup %9750 }
0x1471   :  { %v3290_v22 = vsel %vm970_vm8, %v9751_v31, 0.0  ;;  %v9753_v29 = vpop.eup %9752 }
0x1472   :  { %3291 = vadd.xlane.f32.xlu1 %v3290_v22  ;;  %v3085_v36 = vsel %vm970_vm8, %v9753_v29, 0.0 }
0x1474   :  { %v9755_v32 = vpop.eup %9754 }
0x1475   :  { %v3293_v34 = vsel %vm974_vm7, %v9755_v32, 0.0  ;;  %v9757_v37 = vpop.eup %9756 }
0x1476   :  { %3294 = vadd.xlane.f32.xlu0 %v3293_v34  ;;  %3086 = vadd.xlane.f32.xlu1 %v3085_v36  ;;  %v3088_v38 = vsel %vm974_vm7, %v9757_v37, 0.0  ;;  %v7899_v34 = vld [vmem:[%s11727_s21 + $0x1] ss:$0 sm:$0xff] }
0x147a   :  { %3089 = vadd.xlane.f32.xlu0 %v3088_v38 }
0x1487   :  { %9231 = vrot.lane.b32.xlu1 %v11094_v19, %s10421_s15 }
0x148b   :  { %9241 = vrot.lane.b32.xlu1 %v9240_v55, %s10407_s22 }
0x1490   :  { %9236 = vrot.lane.b32.xlu0 %v11094_v19, %s10407_s22 }
0x14ff   :  { %v3292_v40 = vpop.xlane.xlu1 %3291 }
0x1503   :  { %v3295_v41 = vpop.xlane.xlu0 %3294  ;;  %v3087_v42 = vpop.xlane.xlu1 %3086 }
0x1504   :  { %9758 = vrcp.f32 %v3087_v42 }
0x1505   :  { %9760 = vrcp.f32 %v3292_v40 }
0x1507   :  { %v3090_v43 = vpop.xlane.xlu0 %3089  ;;  %v9232_v54 = vpop.permute.xlu1 %9231 }
0x1508   :  { %9762 = vrcp.f32 %v3090_v43  ;;  %v9234_v24 = vunpack.i.h.bf16 %v9232_v54  ;;  %v9233_v49 = vunpack.i.l.bf16 %v9232_v54  ;;  %v9477_v54 = vld [vmem:[%s11728_s13 + $0x80] ss:$8 sps:$4 sm:$0xff]  }
0x1509   :  { %9764 = vrcp.f32 %v3295_v41 }
0x150a   :  { %v8986_v44 = vpack.c.bf16 %v9234_v24, %v9233_v49  ;;  %v9479_v24 = vld [vmem:[%s11728_s13 + $0x84] ss:$8 sps:$4 sm:$0xff]   ;;  %v9482_v49 = vld [vmem:[%s11728_s13 + $0x94] ss:$8 sps:$4 sm:$0xff]  }
0x150b   :  { %v9237_v45 = vpop.permute.xlu0 %9236  ;;  %v9242_v12 = vpop.permute.xlu1 %9241 }
0x150c   :  { %v9239_v46 = vunpack.i.h.bf16 %v9237_v45  ;;  %v9238_v48 = vunpack.i.l.bf16 %v9237_v45  ;;  %8988 = vmatprep.subr.msk.bf16.mxu1 %vm10892_vm6, %v8986_v44  ;;  %v9244_v14 = vunpack.i.h.bf16 %v9242_v12  ;;  %v9243_v15 = vunpack.i.l.bf16 %v9242_v12 }
0x150d   :  { %8991 = vmatpush3.bf16.msk.msra.mxu1 %vm10892_vm6, %v8986_v44  ;;  %v9480_v44 = vld [vmem:[%s11728_s13 + $0x90] ss:$8 sps:$4 sm:$0xff]  }
0x150e   :  { %v8998_v19 = vpack.c.bf16 %v9239_v46, %v9238_v48  ;;  %v9759_v50 = vpop.eup %9758  ;;  %v3413_v33 = vsel %vm878_vm3, %v11136_v26, %v9244_v14  ;;  %v3412_v20 = vsel %vm878_vm3, %v11138_v3, %v9243_v15 }
0x150f   :  { %v3093_v51 = vmul.f32 %v9759_v50, %v9753_v29  ;;  %v9761_v52 = vpop.eup %9760 }
0x1510   :  { %9000 = vmatprep.subr.msk.bf16.mxu1 %vm10892_vm6, %v8998_v19  ;;  %v3298_v59 = vmul.f32 %v9761_v52, %v9751_v31 }
0x1511   :  { %8655 = vmatprep.mubr.msk.f32.mxu1 %vm970_vm8, %v3093_v51 }
0x1512   :  { %v9763_v53 = vpop.eup %9762 }
0x1513   :  { %v3094_v55 = vmul.f32 %v9763_v53, %v9757_v37  ;;  %v9765_v57 = vpop.eup %9764  ;;  %v9485_v53 = vld [vmem:[%s11728_s13 + $0xa4] ss:$8 sps:$4 sm:$0xff]  }
0x1514   :  { %v3299_v60 = vmul.f32 %v9765_v57, %v9755_v32  ;;  %v9488_v57 = vld [vmem:[%s11728_s13 + $0xb4] ss:$8 sps:$4 sm:$0xff]  }
0x1515   :  { %8656 = vmatmul.mubr.msk.f32.vlgmr.msra.gmra.mrb[34].mxu1 %vm970_vm8, %v3094_v55  ;;  %v9483_v55 = vld [vmem:[%s11728_s13 + $0xa0] ss:$8 sps:$4 sm:$0xff]  }
0x1516   :  { %9003 = vmatpush3.bf16.msk.msra.mxu1 %vm10892_vm6, %v8998_v19  ;;  %8669 = vmatprep.mubr.msk.f32.mxu1 %vm970_vm8, %v3298_v59  ;;  %v9486_v59 = vld [vmem:[%s11728_s13 + $0xb0] ss:$8 sps:$4 sm:$0xff]  }
0x1517   :  { %3690 = vmatprep.subr.bf16.mxu1 %v9479_v24  ;;  %v3598_v24 = vld [vmem:[#allocation5 + $0x2] sm:$0x3] }
0x1519   :  { %8670 = vmatmul.mubr.msk.f32.vlgmr.msra.gmra.mrb[36].mxu1 %vm970_vm8, %v3299_v60  ;;  %v9491_v60 = vld [vmem:[%s11728_s13 + $0xc4] ss:$8 sps:$4 sm:$0xff]  }
0x151a   :  { %3722 = vmatprep.mubr.bf16.mxu1 %v10434_v0  ;;  %3691 = vmatpush1.bf16.msra.mxu1 %v9477_v54  ;;  %v9516_v54 = vld [vmem:[#allocation7 + $0xb8] sm:$0xff]  }
0x151b   :  { %3692 = vmatprep.subr.bf16.mxu1 %v9482_v49  ;;  %v3603_v49 = vrot.slane %v3598_v24, %v10860_v21 }
0x151e   :  { %3693 = vmatpush1.bf16.msra.mxu1 %v9480_v44  ;;  %v3607_v44 = vrot.slane %v3598_v24, %v10863_v23 }
0x151f   :  { %3694 = vmatprep.subr.bf16.mxu1 %v9485_v53 }
0x1522   :  { %3695 = vmatpush1.bf16.msra.mxu1 %v9483_v55 }
0x1523   :  { %3696 = vmatprep.subr.bf16.mxu1 %v9488_v57 }
0x1526   :  { %3697 = vmatpush1.bf16.msra.mxu1 %v9486_v59 }
0x1527   :  { %3698 = vmatprep.subr.bf16.mxu1 %v9491_v60 }
0x152a   :  { %3699 = vmatpush1.bf16.msra.mxu1 %v9489_v61 }
0x152b   :  { %3700 = vmatprep.subr.bf16.mxu1 %v9494_v62 }
0x152e   :  { %3701 = vmatpush1.bf16.msra.mxu1 %v9492_v30 }
0x152f   :  { %3702 = vmatprep.subr.bf16.mxu1 %v9497_v47 }
0x1532   :  { %3703 = vmatpush1.bf16.msra.mxu1 %v9495_v63 }
0x1533   :  { %3704 = vmatprep.subr.bf16.mxu1 %v9500_v4 }
0x1536   :  { %3705 = vmatpush1.bf16.msra.mxu1 %v9498_v5 }
0x1537   :  { %8692 = vmatprep.subr.mxu1 %v10435_v56 }
0x15e8   :  { %v8657_v7 = vpop.f32.mrb[34].mxu1 }
0x15e9   :  { %v3174_v8 = vpop.f32.mrb[35].mxu1 }
0x15ea   :  { %v9245_v58 = vpack.i.bf16 %v8657_v7, %v3174_v8 }
0x15ec   :  { %9246 = vrot.lane.b32.xlu1 %v9245_v58, %s10421_s15  ;;  %v8671_v9 = vpop.f32.mrb[36].mxu1 }
0x15ed   :  { %v3379_v10 = vpop.f32.mrb[37].mxu1 }
0x15ee   :  { %v9250_v11 = vpack.i.bf16 %v8671_v9, %v3379_v10 }
0x15f0   :  { %9251 = vrot.lane.b32.xlu1 %v9250_v11, %s10437_s26 }
0x165e   :  { %v9247_v13 = vpop.permute.xlu1 %9246 }
0x165f   :  { %v9249_v16 = vunpack.i.h.bf16 %v9247_v13  ;;  %v9248_v17 = vunpack.i.l.bf16 %v9247_v13  ;;  %v7910_v13 = vld [vmem:[%s11729_s17 + $0x1] ss:$0 sm:$0xff] }
0x1661   :  { %v3415_v28 = vsel %vm523_vm0, %v3413_v33, %v9249_v16  ;;  %v3414_v31 = vsel %vm523_vm0, %v3412_v20, %v9248_v17  ;;  %v7911_v17 = vld [vmem:[%s11730_s14 + $0x1] ss:$0 sm:$0xff] }
0x1662   :  { %v9252_v18 = vpop.permute.xlu1 %9251 }
0x1663   :  { %v9254_v25 = vunpack.i.h.bf16 %v9252_v18  ;;  %v9253_v27 = vunpack.i.l.bf16 %v9252_v18 }
0x1665   :  { %v3417_v22 = vsel %vm1722_vm9, %v3415_v28, %v9254_v25  ;;  %v3416_v29 = vsel %vm1722_vm9, %v3414_v31, %v9253_v27  ;;  %v9501_v27 = vld [vmem:[#allocation7 + $0xc0] sm:$0xff]   ;;  %v9503_v31 = vld [vmem:[#allocation7 + $0xc8] sm:$0xff]  }
0x1666   :  { %v3435_v32 = vpack.c.bf16 %v3417_v22, %v3416_v29  ;;  %v9502_v28 = vld [vmem:[#allocation7 + $0x80] sm:$0xff]   ;;  %8324 = vmatprep.subr.bf16.mxu0 %v9501_v27  ;;  %v9504_v22 = vld [vmem:[#allocation7 + $0x88] sm:$0xff]   ;;  %v9505_v29 = vld [vmem:[#allocation7 + $0xd0] sm:$0xff]  }
0x1668   :  { %8689 = vmatmul.mubr.bf16.vlgmr.msra.gmra.mrb[28].mxu0 %v3435_v32  ;;  %v9506_v32 = vld [vmem:[#allocation7 + $0x90] sm:$0xff]  }
0x1669   :  { %8325 = vmatpush3.bf16.msra.mxu0 %v9502_v28 }
0x166a   :  { %8326 = vmatprep.subr.bf16.mxu0 %v9503_v31 }
0x166d   :  { %8327 = vmatpush3.bf16.msra.mxu0 %v9504_v22 }
0x166e   :  { %8328 = vmatprep.subr.bf16.mxu0 %v9505_v29 }
0x1671   :  { %8329 = vmatpush3.bf16.msra.mxu0 %v9506_v32 }
0x173b   :  { %v3526_v26 = vpop.f32.mrb[28].mxu0 }
0x173c   :  { %v3527_v36 = vadd.f32 %v7899_v34, %v3526_v26  ;;  %v8690_v3 = vpop.f32.mrb[29].mxu0  ;;  %v9508_v26 = vld [vmem:[#allocation7 + $0x98] sm:$0xff]  }
0x173d   :  { %v3529_v37 = vpop.f32.mrb[30].mxu0  ;;  %v9510_v3 = vld [vmem:[#allocation7 + $0xa0] sm:$0xff]  }
0x173e   :  { %v11238_v38 = vadd.f32 %v3527_v36, %v11034_v1  ;;  %v3530_v40 = vadd.f32 %v7899_v34, %v3529_v37  ;;  %v8691_v41 = vpop.f32.mrb[31].mxu0  ;;  %v9507_v34 = vld [vmem:[#allocation7 + $0xd8] sm:$0xff]   ;;  %v9509_v36 = vld [vmem:[#allocation7 + $0xe0] sm:$0xff]   ;;  %v9511_v37 = vld [vmem:[#allocation7 + $0xe8] sm:$0xff]  }
0x173f   :  { %8330 = vmatprep.subr.bf16.mxu0 %v9507_v34  ;;  %v9513_v41 = vld [vmem:[#allocation7 + $0xf0] sm:$0xff]  }
0x1740   :  { %3539 = vadd.xlane.f32.xlu1 %v11238_v38  ;;  %v3534_v42 = vadd.f32 %v3530_v40, %v11037_v2  ;;  %8331 = vmatpush3.bf16.msra.mxu0 %v9508_v26  ;;  %v9512_v40 = vld [vmem:[#allocation7 + $0xa8] sm:$0xff]  }
0x1741   :  { %8332 = vmatprep.subr.bf16.mxu0 %v9509_v36 }
0x1742   :  { %v3541_v43 = vsel %vm576_vm1, %v3534_v42, 0.0 }
0x1743   :  { %3542 = vadd.xlane.f32.xlu0 %v3541_v43  ;;  %v9515_v43 = vld [vmem:[#allocation7 + $0xf8] sm:$0xff]  }
0x1744   :  { %8333 = vmatpush3.bf16.msra.mxu0 %v9510_v3  ;;  %v7944_v3 = vld [vmem:[#allocation8 + $0x1] ss:$0 sm:$0xff] }
0x1745   :  { %8334 = vmatprep.subr.bf16.mxu0 %v9511_v37 }
0x1748   :  { %8335 = vmatpush3.bf16.msra.mxu0 %v9512_v40 }
0x1749   :  { %8336 = vmatprep.subr.bf16.mxu0 %v9513_v41 }
0x17cd   :  { %v3540_v1 = vpop.xlane.xlu1 %3539 }
0x17ce   :  { %v3544_v45 = vmul.f32 0.0078125, %v3540_v1 }
0x17d0   :  { %v3546_v46 = vsub.f32 %v11238_v38, %v3544_v45  ;;  %v3543_v2 = vpop.xlane.xlu0 %3542 }
0x17d1   :  { %v3545_v48 = vmul.f32 0.0078125, %v3543_v2 }
0x17d2   :  { %v3548_v19 = vmul.f32 %v3546_v46, %v3546_v46 }
0x17d3   :  { %v3547_v50 = vsub.f32 %v3534_v42, %v3545_v48  ;;  %v9514_v42 = vld [vmem:[#allocation7 + $0xb0] sm:$0xff]  }
0x17d4   :  { %3550 = vadd.xlane.f32.xlu0 %v3548_v19  ;;  %8337 = vmatpush3.bf16.msra.mxu0 %v9514_v42 }
0x17d5   :  { %v3549_v51 = vmul.f32 %v3547_v50, %v3547_v50  ;;  %8338 = vmatprep.subr.bf16.mxu0 %v9515_v43 }
0x17d7   :  { %v3552_v52 = vsel %vm576_vm1, %v3549_v51, 0.0 }
0x17d8   :  { %3553 = vadd.xlane.f32.xlu0 %v3552_v52  ;;  %8339 = vmatpush3.bf16.msra.mxu0 %v9516_v54 }
0x17d9   :  { %8709 = vmatprep.subr.bf16.mxu0 %v10435_v56 }
0x1861   :  { %v3551_v6 = vpop.xlane.xlu0 %3550 }
0x1862   :  { %v3555_v7 = vmul.f32 0.0078125, %v3551_v6 }
0x1864   :  { %v3557_v8 = vadd.f32 1e-06, %v3555_v7 }
0x1865   :  { %v3554_v58 = vpop.xlane.xlu0 %3553 }
0x1866   :  { %9766 = vrsqrt.f32 %v3557_v8  ;;  %v3556_v9 = vmul.f32 0.0078125, %v3554_v58 }
0x1868   :  { %v3558_v10 = vadd.f32 1e-06, %v3556_v9 }
0x186a   :  { %9768 = vrsqrt.f32 %v3558_v10 }
0x1870   :  { %v9767_v11 = vpop.eup %9766 }
0x1871   :  { %v3561_v12 = vmul.f32 %v9767_v11, %v3546_v46 }
0x1873   :  { %v3569_v16 = vmul.f32 %v7910_v13, %v3561_v12 }
0x1874   :  { %v9769_v14 = vpop.eup %9768 }
0x1875   :  { %v3562_v15 = vmul.f32 %v9769_v14, %v3547_v50  ;;  %v3577_v33 = vadd.f32 %v7911_v17, %v3569_v16 }
0x1877   :  { %v3570_v18 = vmul.f32 %v7910_v13, %v3562_v15 }
0x1879   :  { %v3578_v20 = vadd.f32 %v7911_v17, %v3570_v18 }
0x187b   :  { %v3596_v25 = vpack.c.bf16 %v3578_v20, %v3577_v33 }
0x187d   :  { %3723 = vmatmul.mubr.bf16.vlgmr.msra.gmra.mrb[40].mxu1 %v3596_v25 }
0x187e   :  { %8694 = vmatprep.mubr.msk.f32.mxu1 %vm10436_vm2, %v10435_v56 }
0x1950   :  { %v3724_v1 = vpop.f32.mrb[40].mxu1 }
0x1951   :  { %v3725_v45 = vadd.f32 %v3724_v1, %v3603_v49  ;;  %v3726_v46 = vpop.f32.mrb[41].mxu1 }
0x1952   :  { %v3727_v2 = vadd.f32 %v3726_v46, %v3607_v44  ;;  %v3728_v48 = vpop.f32.mrb[42].mxu1 }
0x1953   :  { %v3737_v19 = vmul.f32 0.044715, %v3725_v45  ;;  %v3729_v50 = vadd.f32 %v3728_v48, %v3603_v49  ;;  %v3730_v51 = vpop.f32.mrb[43].mxu1  ;;  %v3733_v18 = vmul.f32 0.5, %v3725_v45 }
0x1954   :  { %v3738_v52 = vmul.f32 0.044715, %v3727_v2  ;;  %v3731_v53 = vadd.f32 %v3730_v51, %v3607_v44  ;;  %v3734_v25 = vmul.f32 0.5, %v3727_v2  ;;  %v7962_v51 = vld [vmem:[%s11732_s2] ss:$0 sm:$0xff] }
0x1955   :  { %v3741_v55 = vmul.f32 %v3737_v19, %v3725_v45  ;;  %v3739_v57 = vmul.f32 0.044715, %v3729_v50  ;;  %v3735_v33 = vmul.f32 0.5, %v3729_v50  ;;  %v7961_v19 = vld [vmem:[%s11731_s1] ss:$0 sm:$0xff] }
0x1956   :  { %v3742_v59 = vmul.f32 %v3738_v52, %v3727_v2  ;;  %v3740_v60 = vmul.f32 0.044715, %v3731_v53  ;;  %v3736_v27 = vmul.f32 0.5, %v3731_v53 }
0x1957   :  { %v3745_v61 = vmul.f32 %v3741_v55, %v3725_v45  ;;  %v3743_v62 = vmul.f32 %v3739_v57, %v3729_v50  ;;  %v3978_v55 = vld [vmem:[%s11733_s10] sm:$0x3]  ;;  %v9518_v57 = vld [vmem:[#allocation10 + $0x8] sm:$0xff]  }
0x1958   :  { %v3746_v30 = vmul.f32 %v3742_v59, %v3727_v2  ;;  %v3744_v47 = vmul.f32 %v3740_v60, %v3731_v53  ;;  %v9519_v59 = vld [vmem:[#allocation10 + $0x10] sm:$0xff]   ;;  %v9520_v60 = vld [vmem:[#allocation10 + $0x18] sm:$0xff]  }
0x1959   :  { %v3749_v63 = vadd.f32 %v3745_v61, %v3725_v45  ;;  %v3747_v4 = vmul.f32 %v3743_v62, %v3729_v50  ;;  %v9521_v61 = vld [vmem:[%s11734_s29] sm:$0xff]  }
0x195a   :  { %v3748_v5 = vmul.f32 %v3744_v47, %v3731_v53  ;;  %v3750_v6 = vadd.f32 %v3746_v30, %v3727_v2  ;;  %v4066_v47 = vld [vmem:[%s11735_s11] sm:$0xff] }
0x195b   :  { %v3753_v7 = vmul.f32 0.7978846, %v3749_v63  ;;  %v3751_v8 = vadd.f32 %v3747_v4, %v3729_v50  ;;  %v4067_v4 = vld [vmem:[%s11735_s11 + $0x8] sm:$0xff] }
0x195c   :  { %v3752_v58 = vadd.f32 %v3748_v5, %v3731_v53  ;;  %v3754_v9 = vmul.f32 0.7978846, %v3750_v6 }
0x195d   :  { %9770 = vtanh.f32 %v3753_v7  ;;  %v3755_v10 = vmul.f32 0.7978846, %v3751_v8 }
0x195e   :  { %v3756_v11 = vmul.f32 0.7978846, %v3752_v58  ;;  %9772 = vtanh.f32 %v3754_v9 }
0x195f   :  { %9774 = vtanh.f32 %v3755_v10 }
0x1960   :  { %9776 = vtanh.f32 %v3756_v11 }
0x1967   :  { %v9771_v12 = vpop.eup %9770 }
0x1968   :  { %v9773_v13 = vpop.eup %9772  ;;  %v3761_v14 = vadd.f32 1.0, %v9771_v12 }
0x1969   :  { %v9775_v15 = vpop.eup %9774  ;;  %v3762_v16 = vadd.f32 1.0, %v9773_v13 }
0x196a   :  { %v9777_v17 = vpop.eup %9776  ;;  %v3763_v20 = vadd.f32 1.0, %v9775_v15  ;;  %v3765_v31 = vmul.f32 %v3761_v14, %v3733_v18 }
0x196b   :  { %v3764_v28 = vadd.f32 1.0, %v9777_v17  ;;  %v3766_v29 = vmul.f32 %v3762_v16, %v3734_v25 }
0x196c   :  { %v3767_v22 = vmul.f32 %v3763_v20, %v3735_v33 }
0x196d   :  { %v3768_v32 = vmul.f32 %v3764_v28, %v3736_v27 }
0x196e   :  { %v3802_v34 = vpack.c.bf16 %v3767_v22, %v3765_v31 }
0x196f   :  { %v3803_v26 = vpack.c.bf16 %v3768_v32, %v3766_v29 }
0x1971   :  { %3940 = vmatprep.mubr.bf16.mxu0 %v3803_v26 }
0x1972   :  { %3941 = vmatmul.mubr.bf16.vlgmr.msra.gmra.mrb[32].mxu0 %v3802_v34 }
0x1973   :  { %8725 = vmatprep.mubr.msk.bf16.mxu0 %vm10436_vm2, %v10435_v56 }
0x1a45   :  { %v8340_v36 = vpop.f32.mrb[32].mxu0 }
0x1a46   :  { %v8341_v37 = vpop.f32.mrb[33].mxu0 }
0x1a47   :  { %v8342_v40 = vadd.f32 %v8341_v37, %v8340_v36  ;;  %v8343_v41 = vpop.f32.mrb[34].mxu0 }
0x1a48   :  { %v8344_v42 = vpop.f32.mrb[35].mxu0 }
0x1a49   :  { %v3943_v43 = vadd.f32 %v8342_v40, %v7944_v3 }
0x1a4b   :  { %v3948_v54 = vadd.f32 %v3943_v43, %v11238_v38  ;;  %v9517_v38 = vld [vmem:[#allocation10] sm:$0xff]  }
0x1a4d   :  { %3951 = vadd.xlane.f32.xlu0 %v3948_v54 }
0x1ada   :  { %v3952_v24 = vpop.xlane.xlu0 %3951 }
0x1adb   :  { %v3953_v49 = vmul.f32 0.0078125, %v3952_v24 }
0x1add   :  { %v3954_v44 = vsub.f32 %v3948_v54, %v3953_v49 }
0x1adf   :  { %v3955_v1 = vmul.f32 %v3954_v44, %v3954_v44 }
0x1ae1   :  { %3956 = vadd.xlane.f32.xlu1 %v3955_v1 }
0x1b6e   :  { %v3957_v45 = vpop.xlane.xlu1 %3956 }
0x1b6f   :  { %v3958_v46 = vmul.f32 0.0078125, %v3957_v45 }
0x1b71   :  { %v3959_v2 = vadd.f32 1e-06, %v3958_v46 }
0x1b73   :  { %9778 = vrsqrt.f32 %v3959_v2 }
0x1b7d   :  { %v9779_v48 = vpop.eup %9778 }
0x1b7e   :  { %v3961_v50 = vmul.f32 %v9779_v48, %v3954_v44 }
0x1b80   :  { %v3968_v52 = vmul.f32 %v7961_v19, %v3961_v50 }
0x1b82   :  { %v3975_v53 = vadd.f32 %v7962_v51, %v3968_v52  ;;  %v7971_v51 = vld [vmem:[#allocation14] ss:$0 sm:$0xff] }
0x1b84   :  { %7963 = vst [vmem:[%s10645_s19 + $0x8] sm:$0xff] %v3975_v53  ;;  %8693 = vmatpush3.msra.mxu1 %v3975_v53  ;;  %s11736_s19 = sld [smem:[#allocation66_spill]] }
0x1b85   :  { %8697 = vmatprep.subr.bf16.mxu1 %v10435_v56  ;;  %8695 = vmatmul.mubr.msk.f32.vlgmr.msra.gmra.mrb[38].mxu1 %vm3979_vm10, %v3978_v55 }
0x1b86   :  { %8698 = vmatpush3.bf16.msra.mxu1 %v9517_v38  ;;  %8705 = vmatprep.mubr.msk.bf16.mxu1 %vm10436_vm2, %v10435_v56 }
0x1b87   :  { %8699 = vmatprep.subr.bf16.mxu1 %v10435_v56 }
0x1b8a   :  { %8700 = vmatpush3.bf16.msra.mxu1 %v9518_v57  ;;  %v9522_v9 = vld [vmem:[%s11736_s19] ss:$12 sps:$4 sm:$0xff]   ;;  %v9524_v10 = vld [vmem:[%s11736_s19 + $0x4] ss:$12 sps:$4 sm:$0xff]   ;;  %v9525_v11 = vld [vmem:[%s11736_s19 + $0x8] ss:$12 sps:$4 sm:$0xff]  }
0x1b8b   :  { %8701 = vmatprep.subr.bf16.mxu1 %v10435_v56  ;;  %v9528_v12 = vld [vmem:[%s11736_s19 + $0x1c] ss:$12 sps:$4 sm:$0xff]   ;;  %8710 = vmatpush3.bf16.msra.mxu0 %v9525_v11  ;;  %v9529_v13 = vld [vmem:[%s11736_s19 + $0x20] ss:$12 sps:$4 sm:$0xff]   ;;  %v9526_v14 = vld [vmem:[%s11736_s19 + $0x18] ss:$12 sps:$4 sm:$0xff]  }
0x1b8c   :  { %8711 = vmatprep.subr.bf16.mxu0 %v10435_v56  ;;  %v9532_v28 = vld [vmem:[%s11736_s19 + $0x34] ss:$12 sps:$4 sm:$0xff]   ;;  %v9530_v31 = vld [vmem:[%s11736_s19 + $0x30] ss:$12 sps:$4 sm:$0xff]   ;;  %v9533_v22 = vld [vmem:[%s11736_s19 + $0x38] ss:$12 sps:$4 sm:$0xff]  }
0x1b8d   :  { %v9536_v29 = vld [vmem:[%s11736_s19 + $0x4c] ss:$12 sps:$4 sm:$0xff]   ;;  %v9534_v32 = vld [vmem:[%s11736_s19 + $0x48] ss:$12 sps:$4 sm:$0xff]   ;;  %v9537_v34 = vld [vmem:[%s11736_s19 + $0x50] ss:$12 sps:$4 sm:$0xff]  }
0x1b8e   :  { %8702 = vmatpush3.bf16.msra.mxu1 %v9519_v59  ;;  %v9540_v26 = vld [vmem:[%s11736_s19 + $0x64] ss:$12 sps:$4 sm:$0xff]   ;;  %v9538_v36 = vld [vmem:[%s11736_s19 + $0x60] ss:$12 sps:$4 sm:$0xff]   ;;  %v9541_v3 = vld [vmem:[%s11736_s19 + $0x68] ss:$12 sps:$4 sm:$0xff]  }
0x1b8f   :  { %8703 = vmatprep.subr.bf16.mxu1 %v10435_v56  ;;  %8712 = vmatpush3.bf16.msra.mxu0 %v9529_v13  ;;  %v9544_v37 = vld [vmem:[%s11736_s19 + $0x7c] ss:$12 sps:$4 sm:$0xff]   ;;  %v9542_v40 = vld [vmem:[%s11736_s19 + $0x78] ss:$12 sps:$4 sm:$0xff]   ;;  %v9545_v41 = vld [vmem:[%s11736_s19 + $0x80] ss:$12 sps:$4 sm:$0xff]  }
0x1b90   :  { %8713 = vmatprep.subr.bf16.mxu0 %v10435_v56  ;;  %v9548_v42 = vld [vmem:[%s11736_s19 + $0x94] ss:$12 sps:$4 sm:$0xff]   ;;  %v9546_v43 = vld [vmem:[%s11736_s19 + $0x90] ss:$12 sps:$4 sm:$0xff]   ;;  %v9549_v54 = vld [vmem:[%s11736_s19 + $0x98] ss:$12 sps:$4 sm:$0xff]  }
0x1b91   :  { %v9552_v24 = vld [vmem:[%s11736_s19 + $0xac] ss:$12 sps:$4 sm:$0xff]   ;;  %v9550_v49 = vld [vmem:[%s11736_s19 + $0xa8] ss:$12 sps:$4 sm:$0xff]   ;;  %v9553_v44 = vld [vmem:[%s11736_s19 + $0xb0] ss:$12 sps:$4 sm:$0xff]  }
0x1b92   :  { %8704 = vmatpush3.bf16.msra.mxu1 %v9520_v60  ;;  %v7972_v57 = vld [vmem:[#allocation16] ss:$0 sm:$0xff] }
0x1b93   :  { %4359 = vmatprep.subr.bf16.mxu1 %v9524_v10  ;;  %8714 = vmatpush3.bf16.msra.mxu0 %v9533_v22 }
0x1b94   :  { %8715 = vmatprep.subr.bf16.mxu0 %v10435_v56 }
0x1b95   :  { %8706 = vmatmul.mubr.msk.bf16.vlgmr.msra.gmra.mrb[44].mxu1 %vm523_vm0, %v9521_v61 }
0x1b96   :  { %4391 = vmatprep.mubr.bf16.mxu1 %v10434_v0  ;;  %4360 = vmatpush1.bf16.msra.mxu1 %v9522_v9 }
0x1b97   :  { %4361 = vmatprep.subr.bf16.mxu1 %v9528_v12  ;;  %8716 = vmatpush3.bf16.msra.mxu0 %v9537_v34 }
0x1b98   :  { %8717 = vmatprep.subr.bf16.mxu0 %v10435_v56 }
0x1b9a   :  { %4362 = vmatpush1.bf16.msra.mxu1 %v9526_v14 }
0x1b9b   :  { %4363 = vmatprep.subr.bf16.mxu1 %v9532_v28  ;;  %8718 = vmatpush3.bf16.msra.mxu0 %v9541_v3 }
0x1b9c   :  { %8719 = vmatprep.subr.bf16.mxu0 %v10435_v56 }
0x1b9e   :  { %4364 = vmatpush1.bf16.msra.mxu1 %v9530_v31 }
0x1b9f   :  { %4365 = vmatprep.subr.bf16.mxu1 %v9536_v29  ;;  %8720 = vmatpush3.bf16.msra.mxu0 %v9545_v41 }
0x1ba0   :  { %8721 = vmatprep.subr.bf16.mxu0 %v10435_v56 }
0x1ba2   :  { %4366 = vmatpush1.bf16.msra.mxu1 %v9534_v32 }
0x1ba3   :  { %4367 = vmatprep.subr.bf16.mxu1 %v9540_v26  ;;  %8722 = vmatpush3.bf16.msra.mxu0 %v9549_v54 }
0x1ba4   :  { %8723 = vmatprep.subr.bf16.mxu0 %v10435_v56 }
0x1ba6   :  { %4368 = vmatpush1.bf16.msra.mxu1 %v9538_v36 }
0x1ba7   :  { %4369 = vmatprep.subr.bf16.mxu1 %v9544_v37  ;;  %8724 = vmatpush3.bf16.msra.mxu0 %v9553_v44 }
0x1baa   :  { %4370 = vmatpush1.bf16.msra.mxu1 %v9542_v40 }
0x1bab   :  { %4371 = vmatprep.subr.bf16.mxu1 %v9548_v42 }
0x1bae   :  { %4372 = vmatpush1.bf16.msra.mxu1 %v9546_v43 }
0x1baf   :  { %4373 = vmatprep.subr.bf16.mxu1 %v9552_v24 }
0x1bb2   :  { %4374 = vmatpush1.bf16.msra.mxu1 %v9550_v49 }
0x1c58   :  { %v4049_v62 = vpop.f32.mrb[38].mxu1 }
0x1c59   :  { %4053 = vst [vmem:[%s10650_s30] sm:$0x3] %v4049_v62  ;;  %v8696_v30 = vpop.f32.mrb[39].mxu1  ;;  %s11737_s30 = sld [smem:[#allocation64_spill]] }
0x1c5a   :  { %v4214_v30 = vld [vmem:[#allocation17] sm:$0x7] }
0x1c5f   :  { %v11371_v54 = vld [vmem:[%s11737_s30 + $0x8] sm:$0xff]  ;;  %v11374_v44 = vld [vmem:[%s11737_s30] sm:$0xff] }
0x1c68   :  { %v4134_v63 = vpop.f32.mrb[44].mxu1 }
0x1c69   :  { %v11288_v5 = vadd.f32 %v4134_v63, %v4066_v47  ;;  %v8707_v6 = vpop.f32.mrb[45].mxu1  ;;  %v4219_v47 = vrot.slane %v4214_v30, %v10860_v21  ;;  %v4227_v63 = vrot.slane %v4214_v30, %v10888_v39 }
0x1c6a   :  { %v4137_v7 = vpop.f32.mrb[46].mxu1 }
0x1c6b   :  { %v11290_v8 = vadd.f32 %v4137_v7, %v4067_v4  ;;  %4143 = vadd.xlane.f32.xlu0 %v11288_v5  ;;  %v8708_v58 = vpop.f32.mrb[47].mxu1  ;;  %v4223_v7 = vrot.slane %v4214_v30, %v10863_v23 }
0x1c6d   :  { %4145 = vadd.xlane.f32.xlu1 %v11290_v8 }
0x1cf8   :  { %v4144_v15 = vpop.xlane.xlu0 %4143 }
0x1cf9   :  { %v4147_v16 = vmul.f32 0.0078125, %v4144_v15 }
0x1cfa   :  { %v4146_v17 = vpop.xlane.xlu1 %4145 }
0x1cfb   :  { %v4149_v18 = vsub.f32 %v11288_v5, %v4147_v16  ;;  %v4148_v33 = vmul.f32 0.0078125, %v4146_v17 }
0x1cfd   :  { %v4150_v20 = vsub.f32 %v11290_v8, %v4148_v33  ;;  %v4151_v25 = vmul.f32 %v4149_v18, %v4149_v18 }
0x1cff   :  { %4153 = vadd.xlane.f32.xlu0 %v4151_v25  ;;  %v4152_v27 = vmul.f32 %v4150_v20, %v4150_v20 }
0x1d01   :  { %4155 = vadd.xlane.f32.xlu1 %v4152_v27 }
0x1d8c   :  { %v4154_v1 = vpop.xlane.xlu0 %4153 }
0x1d8d   :  { %v4157_v45 = vmul.f32 0.0078125, %v4154_v1 }
0x1d8e   :  { %v4156_v46 = vpop.xlane.xlu1 %4155 }
0x1d8f   :  { %v4159_v2 = vadd.f32 1e-05, %v4157_v45  ;;  %v4158_v48 = vmul.f32 0.0078125, %v4156_v46 }
0x1d91   :  { %9780 = vrsqrt.f32 %v4159_v2  ;;  %v4160_v19 = vadd.f32 1e-05, %v4158_v48 }
0x1d93   :  { %9782 = vrsqrt.f32 %v4160_v19 }
0x1d9b   :  { %v9781_v50 = vpop.eup %9780 }
0x1d9c   :  { %v4163_v52 = vmul.f32 %v9781_v50, %v4149_v18 }
0x1d9d   :  { %v9783_v53 = vpop.eup %9782 }
0x1d9e   :  { %v4164_v55 = vmul.f32 %v9783_v53, %v4150_v20  ;;  %v4171_v38 = vmul.f32 %v7971_v51, %v4163_v52 }
0x1da0   :  { %v4172_v59 = vmul.f32 %v7971_v51, %v4164_v55  ;;  %v4179_v60 = vadd.f32 %v7972_v57, %v4171_v38 }
0x1da2   :  { %v4180_v61 = vadd.f32 %v7972_v57, %v4172_v59 }
0x1da4   :  { %v4213_v62 = vpack.c.bf16 %v4180_v61, %v4179_v60 }
0x1da6   :  { %4392 = vmatmul.mubr.bf16.vlgmr.msra.gmra.mrb[48].mxu1 %v4213_v62  ;;  %8726 = vmatmul.mubr.bf16.vlgmr.msra.gmra.mrb[36].mxu0 %v4213_v62 }
0x1e79   :  { %v4393_v4 = vpop.f32.mrb[48].mxu1  ;;  %v4436_v6 = vpop.f32.mrb[36].mxu0 }
0x1e7a   :  { %v11330_v58 = vadd.f32 %v4393_v4, %v4219_v47  ;;  %v4395_v9 = vpop.f32.mrb[49].mxu1  ;;  %v8727_v10 = vpop.f32.mrb[37].mxu0  ;;  %v4437_v13 = vadd.f32 %v4436_v6, %v4227_v63 }
0x1e7b   :  { %v4397_v11 = vpop.f32.mrb[50].mxu1  ;;  %v4439_v12 = vpop.f32.mrb[38].mxu0  ;;  %v4396_v17 = vadd.f32 %v4395_v9, %v4223_v7 }
0x1e7c   :  { %v4440_v14 = vadd.f32 %v4439_v12, %v4227_v63  ;;  %v4399_v15 = vpop.f32.mrb[51].mxu1  ;;  %v8728_v16 = vpop.f32.mrb[39].mxu0  ;;  %4638 = vrot.lane.b32.xlu1 %v11330_v58, %s10437_s26  ;;  %8733 = vmatprep.mubr.msk.f32.mxu1 %vm878_vm3, %v11330_v58  ;;  %v11348_v28 = vadd.f32 %v4397_v11, %v4219_v47 }
0x1e7d   :  { %v4400_v18 = vadd.f32 %v4399_v15, %v4223_v7 }
0x1e7e   :  { %v9010_v33 = vpack.c.bf16 %v4440_v14, %v4437_v13  ;;  %v11336_v20 = vpack.i.bf16 %v4440_v14, %v4437_v13 }
0x1e7f   :  { %v11338_v25 = vpack.i.bf16 %v4400_v18, %v4396_v17  ;;  %v9004_v27 = vpack.c.bf16 %v4400_v18, %v4396_v17 }
0x1e81   :  { %9256 = vrot.lane.b32.xlu0 %v11338_v25, %s10437_s26  ;;  %9006 = vmatprep.subr.msk.bf16.mxu1 %vm10871_vm4, %v9004_v27 }
0x1e82   :  { %9261 = vrot.lane.b32.xlu1 %v11338_v25, %s10421_s15  ;;  %9009 = vmatpush3.bf16.xpose.msk.msra.mxu1 %vm10871_vm4, %v9004_v27 }
0x1e83   :  { %9011 = vmatprep.subr.bf16.mxu1 %v9010_v33 }
0x1e85   :  { %4844 = vrot.lane.b32.xlu0 %v11330_v58, %s10421_s15 }
0x1e86   :  { %4640 = vrot.lane.b32.xlu1 %v11348_v28, %s10437_s26 }
0x1e89   :  { %8734 = vmatmul.mubr.msk.f32.vlgmr.msra.gmra.mrb[52].mxu1 %vm878_vm3, %v11348_v28 }
0x1e8a   :  { %4846 = vrot.lane.b32.xlu1 %v11348_v28, %s10421_s15  ;;  %9013 = vmatpush3.bf16.msra.mxu1 %v9010_v33 }
0x1eee   :  { %v4639_v31 = vpop.permute.xlu1 %4638 }
0x1eef   :  { %8747 = vmatprep.mubr.msk.f32.mxu0 %vm878_vm3, %v4639_v31 }
0x1ef3   :  { %v9257_v22 = vpop.permute.xlu0 %9256 }
0x1ef4   :  { %v9259_v29 = vunpack.i.h.bf16 %v9257_v22  ;;  %v9258_v32 = vunpack.i.l.bf16 %v9257_v22  ;;  %v9262_v34 = vpop.permute.xlu1 %9261 }
0x1ef5   :  { %v9264_v26 = vunpack.i.h.bf16 %v9262_v34  ;;  %v9263_v36 = vunpack.i.l.bf16 %v9262_v34 }
0x1ef6   :  { %v9014_v3 = vpack.c.bf16 %v9259_v29, %v9258_v32 }
0x1ef7   :  { %v9024_v37 = vpack.c.bf16 %v9264_v26, %v9263_v36  ;;  %v4845_v41 = vpop.permute.xlu0 %4844 }
0x1ef8   :  { %9016 = vmatprep.subr.msk.bf16.mxu0 %vm10871_vm4, %v9014_v3  ;;  %v4641_v40 = vpop.permute.xlu1 %4640 }
0x1ef9   :  { %9019 = vmatpush3.bf16.xpose.msk.msra.mxu0 %vm10871_vm4, %v9014_v3 }
0x1efa   :  { %9026 = vmatprep.subr.msk.bf16.mxu0 %vm10871_vm4, %v9024_v37 }
0x1efc   :  { %v4847_v42 = vpop.permute.xlu1 %4846 }
0x1f00   :  { %8748 = vmatmul.mubr.msk.f32.vlgmr.msra.gmra.mrb[26].mxu0 %vm878_vm3, %v4641_v40 }
0x1f01   :  { %9029 = vmatpush3.bf16.xpose.msk.msra.mxu0 %vm10871_vm4, %v9024_v37  ;;  %8761 = vmatprep.mubr.msk.f32.mxu0 %vm878_vm3, %v4845_v41 }
0x1f08   :  { %8762 = vmatmul.mubr.msk.f32.vlgmr.msra.gmra.mrb[40].mxu0 %vm878_vm3, %v4847_v42 }
0x1f5c   :  { %v8735_v43 = vpop.f32.mrb[52].mxu1 }
0x1f5d   :  { %v4531_v24 = vmul.f32 0.17677669, %v8735_v43  ;;  %v4521_v49 = vpop.f32.mrb[53].mxu1 }
0x1f5e   :  { %v4530_v1 = vmul.f32 0.17677669, %v4521_v49 }
0x1f5f   :  { %v4533_v45 = vadd.f32 %v4531_v24, %v11371_v54 }
0x1f60   :  { %v4532_v46 = vadd.f32 %v4530_v1, %v11374_v44 }
0x1f61   :  { %v4538_v2 = vsel %vm4534_vm11, %v4533_v45, -inf }
0x1f62   :  { %4539 = vmax.xlane.f32.xlu1 %v4538_v2  ;;  %v4535_v48 = vsel %vm4534_vm11, %v4532_v46, -inf }
0x1f63   :  { %4536 = vmax.xlane.f32.xlu0 %v4535_v48 }
0x1fd3   :  { %v8749_v19 = vpop.f32.mrb[26].mxu0 }
0x1fd4   :  { %v4720_v50 = vpop.f32.mrb[27].mxu0  ;;  %v4730_v51 = vmul.f32 0.17677669, %v8749_v19 }
0x1fd5   :  { %v4729_v52 = vmul.f32 0.17677669, %v4720_v50 }
0x1fd6   :  { %v4732_v38 = vadd.f32 %v4730_v51, %v11371_v54 }
0x1fd7   :  { %v4731_v53 = vadd.f32 %v4729_v52, %v11374_v44 }
0x1fd8   :  { %v4736_v62 = vsel %vm4534_vm11, %v4732_v38, -inf }
0x1fd9   :  { %v4733_v55 = vsel %vm4534_vm11, %v4731_v53, -inf }
0x1fda   :  { %4734 = vmax.xlane.f32.xlu0 %v4733_v55 }
0x1fdb   :  { %v8763_v57 = vpop.f32.mrb[40].mxu0 }
0x1fdc   :  { %v4936_v59 = vmul.f32 0.17677669, %v8763_v57  ;;  %v4926_v60 = vpop.f32.mrb[41].mxu0 }
0x1fdd   :  { %v4935_v61 = vmul.f32 0.17677669, %v4926_v60 }
0x1fde   :  { %4737 = vmax.xlane.f32.xlu0 %v4736_v62  ;;  %v4938_v30 = vadd.f32 %v4936_v59, %v11371_v54 }
0x1fdf   :  { %v4937_v47 = vadd.f32 %v4935_v61, %v11374_v44 }
0x1fe0   :  { %v4942_v63 = vsel %vm4534_vm11, %v4938_v30, -inf }
0x1fe1   :  { %4943 = vmax.xlane.f32.xlu1 %v4942_v63  ;;  %v4939_v4 = vsel %vm4534_vm11, %v4937_v47, -inf }
0x1fe2   :  { %4940 = vmax.xlane.f32.xlu0 %v4939_v4 }
0x1fef   :  { %v4540_v6 = vpop.xlane.xlu1 %4539 }
0x1ff0   :  { %v4542_v7 = vsub.f32 %v4533_v45, %v4540_v6  ;;  %v4537_v9 = vpop.xlane.xlu0 %4536 }
0x1ff1   :  { %v4541_v10 = vsub.f32 %v4532_v46, %v4537_v9 }
0x1ff2   :  { %v4545_v11 = vmul.f32 1.442695, %v4542_v7 }
0x1ff3   :  { %v4543_v12 = vmul.f32 1.442695, %v4541_v10 }
0x1ff4   :  { %9784 = vpow2.f32 %v4545_v11 }
0x1ff5   :  { %9786 = vpow2.f32 %v4543_v12 }
0x1ffe   :  { %v9785_v13 = vpop.eup %9784 }
0x1fff   :  { %v9787_v14 = vpop.eup %9786  ;;  %v4550_v15 = vsel %vm4534_vm11, %v9785_v13, 0.0 }
0x2000   :  { %4551 = vadd.xlane.f32.xlu1 %v4550_v15  ;;  %v4547_v16 = vsel %vm4534_vm11, %v9787_v14, 0.0 }
0x2001   :  { %4548 = vadd.xlane.f32.xlu0 %v4547_v16 }
0x2067   :  { %v4735_v17 = vpop.xlane.xlu0 %4734 }
0x2068   :  { %v4739_v18 = vsub.f32 %v4731_v53, %v4735_v17 }
0x206a   :  { %v4741_v33 = vmul.f32 1.442695, %v4739_v18 }
0x206b   :  { %v4738_v27 = vpop.xlane.xlu0 %4737 }
0x206c   :  { %9788 = vpow2.f32 %v4741_v33  ;;  %v4740_v31 = vsub.f32 %v4732_v38, %v4738_v27 }
0x206e   :  { %v4743_v22 = vmul.f32 1.442695, %v4740_v31  ;;  %v4944_v29 = vpop.xlane.xlu1 %4943 }
0x206f   :  { %v4946_v32 = vsub.f32 %v4938_v30, %v4944_v29  ;;  %v4941_v34 = vpop.xlane.xlu0 %4940 }
0x2070   :  { %9790 = vpow2.f32 %v4743_v22  ;;  %v4945_v26 = vsub.f32 %v4937_v47, %v4941_v34 }
0x2071   :  { %v4949_v36 = vmul.f32 1.442695, %v4946_v32 }
0x2072   :  { %v4947_v3 = vmul.f32 1.442695, %v4945_v26 }
0x2073   :  { %9792 = vpow2.f32 %v4949_v36 }
0x2074   :  { %9794 = vpow2.f32 %v4947_v3 }
0x2076   :  { %v9789_v37 = vpop.eup %9788 }
0x2077   :  { %v4745_v40 = vsel %vm4534_vm11, %v9789_v37, 0.0 }
0x2078   :  { %4746 = vadd.xlane.f32.xlu0 %v4745_v40 }
0x207a   :  { %v9791_v41 = vpop.eup %9790 }
0x207b   :  { %v4748_v42 = vsel %vm4534_vm11, %v9791_v41, 0.0 }
0x207c   :  { %4749 = vadd.xlane.f32.xlu1 %v4748_v42 }
0x207d   :  { %v9793_v43 = vpop.eup %9792 }
0x207e   :  { %v9795_v24 = vpop.eup %9794  ;;  %v4954_v49 = vsel %vm4534_vm11, %v9793_v43, 0.0 }
0x207f   :  { %v4951_v1 = vsel %vm4534_vm11, %v9795_v24, 0.0 }
0x2080   :  { %4955 = vadd.xlane.f32.xlu1 %v4954_v49  ;;  %4952 = vadd.xlane.f32.xlu0 %v4951_v1 }
0x208d   :  { %v4552_v45 = vpop.xlane.xlu1 %4551 }
0x208e   :  { %9796 = vrcp.f32 %v4552_v45  ;;  %v4549_v46 = vpop.xlane.xlu0 %4548 }
0x208f   :  { %9798 = vrcp.f32 %v4549_v46 }
0x2091   :  { %9271 = vrot.lane.b32.xlu1 %v11336_v20, %s10421_s15 }
0x2095   :  { %9276 = vrot.lane.b32.xlu1 %v11338_v25, %s10407_s22 }
0x2096   :  { %9266 = vrot.lane.b32.xlu0 %v11336_v20, %s10437_s26 }
0x2098   :  { %v9797_v2 = vpop.eup %9796 }
0x2099   :  { %v9799_v48 = vpop.eup %9798  ;;  %5048 = vrot.lane.b32.xlu1 %v11330_v58, %s10407_s22  ;;  %v4556_v50 = vmul.f32 %v9797_v2, %v9785_v13 }
0x209a   :  { %5050 = vrot.lane.b32.xlu0 %v11348_v28, %s10407_s22  ;;  %v4555_v19 = vmul.f32 %v9799_v48, %v9787_v14 }
0x209c   :  { %8740 = vmatprep.mubr.msk.f32.mxu1 %vm4534_vm11, %v4555_v19 }
0x209d   :  { %8741 = vmatmul.mubr.msk.f32.vlgmr.msra.gmra.mrb[54].mxu1 %vm4534_vm11, %v4556_v50 }
0x2105   :  { %v4747_v51 = vpop.xlane.xlu0 %4746 }
0x2106   :  { %9800 = vrcp.f32 %v4747_v51 }
0x2109   :  { %v4750_v25 = vpop.xlane.xlu1 %4749 }
0x210a   :  { %9802 = vrcp.f32 %v4750_v25 }
0x210d   :  { %v4956_v52 = vpop.xlane.xlu1 %4955  ;;  %v4953_v53 = vpop.xlane.xlu0 %4952 }
0x210e   :  { %9804 = vrcp.f32 %v4956_v52 }
0x210f   :  { %9806 = vrcp.f32 %v4953_v53 }
0x2110   :  { %v9801_v55 = vpop.eup %9800 }
0x2111   :  { %v9272_v38 = vpop.permute.xlu1 %9271  ;;  %v9267_v58 = vpop.permute.xlu0 %9266  ;;  %v4753_v57 = vmul.f32 %v9801_v55, %v9789_v37 }
0x2112   :  { %v9274_v59 = vunpack.i.h.bf16 %v9272_v38  ;;  %v9273_v28 = vunpack.i.l.bf16 %v9272_v38  ;;  %v9269_v60 = vunpack.i.h.bf16 %v9267_v58  ;;  %v9268_v61 = vunpack.i.l.bf16 %v9267_v58  ;;  %v9554_v58 = vld [vmem:[#allocation19] sm:$0xff]  }
0x2113   :  { %8754 = vmatprep.mubr.msk.f32.mxu1 %vm4534_vm11, %v4753_v57  ;;  %v9555_v57 = vld [vmem:[#allocation19 + $0x8] sm:$0xff]  }
0x2114   :  { %v9020_v62 = vpack.c.bf16 %v9269_v60, %v9268_v61  ;;  %v9803_v30 = vpop.eup %9802  ;;  %v9030_v63 = vpack.c.bf16 %v9274_v59, %v9273_v28  ;;  %v9556_v59 = vld [vmem:[#allocation19 + $0x10] sm:$0xff]   ;;  %v9557_v28 = vld [vmem:[#allocation19 + $0x18] sm:$0xff]   ;;  %v9558_v60 = vld [vmem:[#allocation19 + $0x20] sm:$0xff]  }
0x2115   :  { %v9277_v47 = vpop.permute.xlu1 %9276  ;;  %v4754_v9 = vmul.f32 %v9803_v30, %v9791_v41  ;;  %v5051_v15 = vpop.permute.xlu0 %5050  ;;  %v9559_v61 = vld [vmem:[#allocation19 + $0x28] sm:$0xff]   ;;  %v9561_v30 = vld [vmem:[#allocation19 + $0x38] sm:$0xff]  }
0x2116   :  { %v9279_v4 = vunpack.i.h.bf16 %v9277_v47  ;;  %v9278_v6 = vunpack.i.l.bf16 %v9277_v47  ;;  %9021 = vmatprep.subr.bf16.mxu1 %v9020_v62 }
0x2117   :  { %9023 = vmatpush3.bf16.msra.mxu1 %v9020_v62  ;;  %v9560_v62 = vld [vmem:[#allocation19 + $0x30] sm:$0xff]  }
0x2118   :  { %v9805_v7 = vpop.eup %9804  ;;  %9031 = vmatprep.subr.bf16.mxu1 %v9030_v63  ;;  %v9034_v11 = vpack.c.bf16 %v9279_v4, %v9278_v6 }
0x2119   :  { %v9807_v10 = vpop.eup %9806  ;;  %v4960_v13 = vmul.f32 %v9805_v7, %v9793_v43  ;;  %v5049_v14 = vpop.permute.xlu1 %5048 }
0x211a   :  { %8755 = vmatmul.mubr.msk.f32.vlgmr.msra.gmra.mrb[56].mxu1 %vm4534_vm11, %v4754_v9  ;;  %v4959_v12 = vmul.f32 %v9807_v10, %v9795_v24 }
0x211b   :  { %9033 = vmatpush3.bf16.msra.mxu1 %v9030_v63 }
0x211c   :  { %8768 = vmatprep.mubr.msk.f32.mxu1 %vm4534_vm11, %v4959_v12  ;;  %9036 = vmatprep.subr.msk.bf16.mxu1 %vm10871_vm4, %v9034_v11 }
0x211e   :  { %8769 = vmatmul.mubr.msk.f32.vlgmr.msra.gmra.mrb[58].mxu1 %vm4534_vm11, %v4960_v13 }
0x211f   :  { %8775 = vmatprep.mubr.msk.f32.mxu1 %vm878_vm3, %v5049_v14 }
0x2124   :  { %9039 = vmatpush3.bf16.xpose.msk.msra.mxu1 %vm10871_vm4, %v9034_v11 }
0x212b   :  { %8776 = vmatmul.mubr.msk.f32.vlgmr.msra.gmra.mrb[60].mxu1 %vm878_vm3, %v5051_v15 }
0x212c   :  { %5578 = vmatprep.mubr.bf16.mxu1 %v10434_v0 }
0x2170   :  { %v11417_v16 = vpop.f32.mrb[54].mxu1 }
0x2171   :  { %v11419_v17 = vpop.f32.mrb[55].mxu1 }
0x21ed   :  { %v8756_v18 = vpop.f32.mrb[56].mxu1 }
0x21ee   :  { %v4835_v33 = vpop.f32.mrb[57].mxu1 }
0x21ef   :  { %v9285_v27 = vpack.i.bf16 %v8756_v18, %v4835_v33 }
0x21f1   :  { %v8770_v31 = vpop.f32.mrb[58].mxu1 }
0x21f2   :  { %v5039_v22 = vpop.f32.mrb[59].mxu1 }
0x21f3   :  { %v9290_v29 = vpack.i.bf16 %v8770_v31, %v5039_v22 }
0x21fe   :  { %v8777_v32 = vpop.f32.mrb[60].mxu1 }
0x21ff   :  { %v5140_v34 = vmul.f32 0.17677669, %v8777_v32  ;;  %v5130_v26 = vpop.f32.mrb[61].mxu1 }
0x2200   :  { %v5139_v36 = vmul.f32 0.17677669, %v5130_v26 }
0x2201   :  { %v5142_v3 = vadd.f32 %v5140_v34, %v11371_v54  ;;  %v8021_v34 = vld [vmem:[#allocation20] ss:$0 sm:$0xff] }
0x2202   :  { %v5141_v37 = vadd.f32 %v5139_v36, %v11374_v44 }
0x2203   :  { %v5146_v40 = vsel %vm4534_vm11, %v5142_v3, -inf }
0x2204   :  { %5147 = vmax.xlane.f32.xlu0 %v5146_v40  ;;  %v5143_v41 = vsel %vm4534_vm11, %v5141_v37, -inf }
0x2205   :  { %5144 = vmax.xlane.f32.xlu1 %v5143_v41 }
0x2216   :  { %9281 = vrot.lane.b32.xlu1 %v11336_v20, %s10407_s22 }
0x221a   :  { %9291 = vrot.lane.b32.xlu1 %v9290_v29, %s10421_s15 }
0x2291   :  { %v5148_v42 = vpop.xlane.xlu0 %5147 }
0x2292   :  { %v5150_v43 = vsub.f32 %v5142_v3, %v5148_v42  ;;  %v5145_v24 = vpop.xlane.xlu1 %5144  ;;  %v9562_v42 = vld [vmem:[#allocation25] ss:$8 sps:$4 sm:$0xff]  }
0x2293   :  { %v5149_v49 = vsub.f32 %v5141_v37, %v5145_v24  ;;  %v9567_v24 = vld [vmem:[#allocation25 + $0x14] ss:$8 sps:$4 sm:$0xff]  }
0x2294   :  { %v5153_v1 = vmul.f32 1.442695, %v5150_v43  ;;  %v9564_v43 = vld [vmem:[#allocation25 + $0x4] ss:$8 sps:$4 sm:$0xff]  }
0x2295   :  { %v5151_v45 = vmul.f32 1.442695, %v5149_v49  ;;  %5546 = vmatprep.subr.bf16.mxu1 %v9564_v43  ;;  %v9565_v49 = vld [vmem:[#allocation25 + $0x10] ss:$8 sps:$4 sm:$0xff]   ;;  %v5454_v43 = vld [vmem:[#allocation26] sm:$0x3] }
0x2296   :  { %v9282_v54 = vpop.permute.xlu1 %9281  ;;  %5547 = vmatpush1.bf16.msra.mxu1 %v9562_v42  ;;  %v9601_v42 = vld [vmem:[#allocation28 + $0x38] sm:$0xff]  }
0x2297   :  { %9808 = vpow2.f32 %v5151_v45  ;;  %v9284_v44 = vunpack.i.h.bf16 %v9282_v54  ;;  %v9283_v46 = vunpack.i.l.bf16 %v9282_v54  ;;  %5548 = vmatprep.subr.bf16.mxu1 %v9567_v24  ;;  %v5459_v24 = vrot.slane %v5454_v43, %v10860_v21 }
0x2298   :  { %9810 = vpow2.f32 %v5153_v1 }
0x2299   :  { %v9040_v2 = vpack.c.bf16 %v9284_v44, %v9283_v46 }
0x229a   :  { %v9292_v10 = vpop.permute.xlu1 %9291  ;;  %5549 = vmatpush1.bf16.msra.mxu1 %v9565_v49  ;;  %v5463_v49 = vrot.slane %v5454_v43, %v10863_v23 }
0x229b   :  { %9041 = vmatprep.subr.bf16.mxu0 %v9040_v2  ;;  %v9294_v13 = vunpack.i.h.bf16 %v9292_v10  ;;  %v9293_v14 = vunpack.i.l.bf16 %v9292_v10  ;;  %v8031_v10 = vld [vmem:[#allocation23] ss:$0 sm:$0xff] }
0x229c   :  { %9043 = vmatpush3.bf16.msra.mxu0 %v9040_v2 }
0x229d   :  { %8785 = vmatprep.subr.bf16.mxu0 %v10435_v56 }
0x22a1   :  { %v9809_v48 = vpop.eup %9808 }
0x22a2   :  { %v5155_v20 = vsel %vm4534_vm11, %v9809_v48, 0.0  ;;  %v9811_v19 = vpop.eup %9810 }
0x22a3   :  { %5156 = vadd.xlane.f32.xlu0 %v5155_v20  ;;  %v5158_v50 = vsel %vm4534_vm11, %v9811_v19, 0.0  ;;  %v9568_v20 = vld [vmem:[#allocation25 + $0x20] ss:$8 sps:$4 sm:$0xff]  }
0x22a7   :  { %5159 = vadd.xlane.f32.xlu0 %v5158_v50  ;;  %v9571_v50 = vld [vmem:[#allocation25 + $0x30] ss:$8 sps:$4 sm:$0xff]  }
0x22bd   :  { %9286 = vrot.lane.b32.xlu0 %v9285_v27, %s10407_s22 }
0x2330   :  { %v5157_v51 = vpop.xlane.xlu0 %5156 }
0x2331   :  { %9812 = vrcp.f32 %v5157_v51  ;;  %v9576_v51 = vld [vmem:[#allocation25 + $0x44] ss:$8 sps:$4 sm:$0xff]  }
0x2334   :  { %v5160_v25 = vpop.xlane.xlu0 %5159 }
0x2335   :  { %9814 = vrcp.f32 %v5160_v25  ;;  %v9574_v25 = vld [vmem:[#allocation25 + $0x40] ss:$8 sps:$4 sm:$0xff]  }
0x2338   :  { %v9287_v6 = vpop.permute.xlu0 %9286 }
0x2339   :  { %v9289_v7 = vunpack.i.h.bf16 %v9287_v6  ;;  %v9288_v9 = vunpack.i.l.bf16 %v9287_v6 }
0x233b   :  { %v9813_v52 = vpop.eup %9812  ;;  %v5277_v11 = vsel %vm878_vm3, %v11417_v16, %v9289_v7  ;;  %v5276_v12 = vsel %vm878_vm3, %v11419_v17, %v9288_v9 }
0x233c   :  { %v5163_v53 = vmul.f32 %v9813_v52, %v9809_v48  ;;  %v5278_v27 = vsel %vm523_vm0, %v5276_v12, %v9293_v14  ;;  %v5279_v31 = vsel %vm523_vm0, %v5277_v11, %v9294_v13  ;;  %v9570_v48 = vld [vmem:[#allocation25 + $0x24] ss:$8 sps:$4 sm:$0xff]   ;;  %v9579_v52 = vld [vmem:[#allocation25 + $0x54] ss:$8 sps:$4 sm:$0xff]  }
0x233d   :  { %5550 = vmatprep.subr.bf16.mxu1 %v9570_v48 }
0x233e   :  { %8782 = vmatprep.mubr.msk.f32.mxu0 %vm4534_vm11, %v5163_v53  ;;  %5551 = vmatpush1.bf16.msra.mxu1 %v9568_v20  ;;  %v9577_v53 = vld [vmem:[#allocation25 + $0x50] ss:$8 sps:$4 sm:$0xff]  }
0x233f   :  { %v9815_v55 = vpop.eup %9814 }
0x2340   :  { %v5164_v38 = vmul.f32 %v9815_v55, %v9811_v19  ;;  %v9573_v19 = vld [vmem:[#allocation25 + $0x34] ss:$8 sps:$4 sm:$0xff]   ;;  %v9582_v55 = vld [vmem:[#allocation25 + $0x64] ss:$8 sps:$4 sm:$0xff]  }
0x2341   :  { %5552 = vmatprep.subr.bf16.mxu1 %v9573_v19 }
0x2342   :  { %8783 = vmatmul.mubr.msk.f32.vlgmr.msra.gmra.mrb[42].mxu0 %vm4534_vm11, %v5164_v38  ;;  %5553 = vmatpush1.bf16.msra.mxu1 %v9571_v50  ;;  %v9580_v38 = vld [vmem:[#allocation25 + $0x60] ss:$8 sps:$4 sm:$0xff]  }
0x2343   :  { %8801 = vmatprep.mubr.msk.bf16.mxu0 %vm10436_vm2, %v10435_v56  ;;  %8786 = vmatpush3.bf16.msra.mxu0 %v9554_v58  ;;  %v9585_v58 = vld [vmem:[#allocation25 + $0x74] ss:$8 sps:$4 sm:$0xff]  }
0x2344   :  { %8787 = vmatprep.subr.bf16.mxu0 %v10435_v56  ;;  %5554 = vmatprep.subr.bf16.mxu1 %v9576_v51 }
0x2346   :  { %5555 = vmatpush1.bf16.msra.mxu1 %v9574_v25 }
0x2347   :  { %8788 = vmatpush3.bf16.msra.mxu0 %v9555_v57  ;;  %5556 = vmatprep.subr.bf16.mxu1 %v9579_v52  ;;  %v9583_v57 = vld [vmem:[#allocation25 + $0x70] ss:$8 sps:$4 sm:$0xff]  }
0x2348   :  { %8789 = vmatprep.subr.bf16.mxu0 %v10435_v56 }
0x234a   :  { %5557 = vmatpush1.bf16.msra.mxu1 %v9577_v53 }
0x234b   :  { %8790 = vmatpush3.bf16.msra.mxu0 %v9556_v59  ;;  %5558 = vmatprep.subr.bf16.mxu1 %v9582_v55 }
0x234c   :  { %8791 = vmatprep.subr.bf16.mxu0 %v10435_v56 }
0x234e   :  { %5559 = vmatpush1.bf16.msra.mxu1 %v9580_v38 }
0x234f   :  { %8792 = vmatpush3.bf16.msra.mxu0 %v9557_v28  ;;  %5560 = vmatprep.subr.bf16.mxu1 %v9585_v58 }
0x2350   :  { %8793 = vmatprep.subr.bf16.mxu0 %v10435_v56 }
0x2352   :  { %5561 = vmatpush1.bf16.msra.mxu1 %v9583_v57 }
0x2353   :  { %8794 = vmatpush3.bf16.msra.mxu0 %v9558_v60 }
0x2354   :  { %8795 = vmatprep.subr.bf16.mxu0 %v10435_v56 }
0x2357   :  { %8796 = vmatpush3.bf16.msra.mxu0 %v9559_v61 }
0x2358   :  { %8797 = vmatprep.subr.bf16.mxu0 %v10435_v56 }
0x235b   :  { %8798 = vmatpush3.bf16.msra.mxu0 %v9560_v62 }
0x235c   :  { %8799 = vmatprep.subr.bf16.mxu0 %v10435_v56 }
0x235f   :  { %8800 = vmatpush3.bf16.msra.mxu0 %v9561_v30 }
0x2415   :  { %v8784_v47 = vpop.f32.mrb[42].mxu0 }
0x2416   :  { %v5243_v63 = vpop.f32.mrb[43].mxu0 }
0x2417   :  { %v9295_v4 = vpack.i.bf16 %v8784_v47, %v5243_v63 }
0x2419   :  { %9296 = vrot.lane.b32.xlu1 %v9295_v4, %s10437_s26  ;;  %v8030_v4 = vld [vmem:[#allocation22] ss:$0 sm:$0xff] }
0x248b   :  { %v9297_v15 = vpop.permute.xlu1 %9296 }
0x248c   :  { %v9299_v18 = vunpack.i.h.bf16 %v9297_v15  ;;  %v9298_v33 = vunpack.i.l.bf16 %v9297_v15  ;;  %v9586_v15 = vld [vmem:[#allocation28 + $0x40] sm:$0xff]  }
0x248d   :  { %8403 = vmatprep.subr.bf16.mxu0 %v9586_v15 }
0x248e   :  { %v5281_v22 = vsel %vm1722_vm9, %v5279_v31, %v9299_v18  ;;  %v5280_v29 = vsel %vm1722_vm9, %v5278_v27, %v9298_v33  ;;  %v9587_v18 = vld [vmem:[#allocation28] sm:$0xff]   ;;  %v9588_v33 = vld [vmem:[#allocation28 + $0x48] sm:$0xff]   ;;  %v9590_v31 = vld [vmem:[#allocation28 + $0x50] sm:$0xff]  }
0x248f   :  { %v5298_v32 = vpack.c.bf16 %v5281_v22, %v5280_v29  ;;  %v9589_v27 = vld [vmem:[#allocation28 + $0x8] sm:$0xff]   ;;  %v9591_v22 = vld [vmem:[#allocation28 + $0x10] sm:$0xff]   ;;  %v9592_v29 = vld [vmem:[#allocation28 + $0x58] sm:$0xff]  }
0x2491   :  { %8802 = vmatmul.mubr.bf16.vlgmr.msra.gmra.mrb[44].mxu0 %v5298_v32  ;;  %v9593_v32 = vld [vmem:[#allocation28 + $0x18] sm:$0xff]  }
0x2492   :  { %8404 = vmatpush3.bf16.msra.mxu0 %v9587_v18 }
0x2493   :  { %8405 = vmatprep.subr.bf16.mxu0 %v9588_v33 }
0x2496   :  { %8406 = vmatpush3.bf16.msra.mxu0 %v9589_v27 }
0x2497   :  { %8407 = vmatprep.subr.bf16.mxu0 %v9590_v31 }
0x249a   :  { %8408 = vmatpush3.bf16.msra.mxu0 %v9591_v22 }
0x249b   :  { %8409 = vmatprep.subr.bf16.mxu0 %v9592_v29 }
0x249e   :  { %8410 = vmatpush3.bf16.msra.mxu0 %v9593_v32 }
0x2564   :  { %v5388_v16 = vpop.f32.mrb[44].mxu0 }
0x2565   :  { %v5389_v26 = vadd.f32 %v8021_v34, %v5388_v16  ;;  %v8803_v36 = vpop.f32.mrb[45].mxu0  ;;  %v9595_v16 = vld [vmem:[#allocation28 + $0x20] sm:$0xff]  }
0x2566   :  { %v5391_v17 = vpop.f32.mrb[46].mxu0  ;;  %v9597_v36 = vld [vmem:[#allocation28 + $0x28] sm:$0xff]  }
0x2567   :  { %v11453_v3 = vadd.f32 %v5389_v26, %v11288_v5  ;;  %v5392_v37 = vadd.f32 %v8021_v34, %v5391_v17  ;;  %v8804_v40 = vpop.f32.mrb[47].mxu0  ;;  %v9594_v34 = vld [vmem:[#allocation28 + $0x60] sm:$0xff]   ;;  %v9596_v26 = vld [vmem:[#allocation28 + $0x68] sm:$0xff]   ;;  %v9598_v17 = vld [vmem:[#allocation28 + $0x70] sm:$0xff]  }
0x2568   :  { %8411 = vmatprep.subr.bf16.mxu0 %v9594_v34  ;;  %v9600_v40 = vld [vmem:[#allocation28 + $0x78] sm:$0xff]   ;;  %v9602_v34 = vld [vmem:[%s11736_s19 + $0xc0] ss:$12 sps:$4 sm:$0xff]  }
0x2569   :  { %v11456_v41 = vadd.f32 %v5392_v37, %v11290_v8  ;;  %5399 = vadd.xlane.f32.xlu1 %v11453_v3  ;;  %8412 = vmatpush3.bf16.msra.mxu0 %v9595_v16  ;;  %v9599_v37 = vld [vmem:[#allocation28 + $0x30] sm:$0xff]  }
0x256a   :  { %8413 = vmatprep.subr.bf16.mxu0 %v9596_v26  ;;  %v9604_v16 = vld [vmem:[%s11736_s19 + $0xc4] ss:$12 sps:$4 sm:$0xff]   ;;  %v9605_v26 = vld [vmem:[%s11736_s19 + $0xc8] ss:$12 sps:$4 sm:$0xff]  }
0x256b   :  { %5401 = vadd.xlane.f32.xlu0 %v11456_v41  ;;  %6023 = vmatprep.subr.bf16.mxu1 %v9604_v16 }
0x256d   :  { %8414 = vmatpush3.bf16.msra.mxu0 %v9597_v36  ;;  %v9608_v36 = vld [vmem:[%s11736_s19 + $0xdc] ss:$12 sps:$4 sm:$0xff]  }
0x256e   :  { %8415 = vmatprep.subr.bf16.mxu0 %v9598_v17  ;;  %v9609_v17 = vld [vmem:[%s11736_s19 + $0xe0] ss:$12 sps:$4 sm:$0xff]  }
0x2571   :  { %8416 = vmatpush3.bf16.msra.mxu0 %v9599_v37  ;;  %v9606_v37 = vld [vmem:[%s11736_s19 + $0xd8] ss:$12 sps:$4 sm:$0xff]  }
0x2572   :  { %8417 = vmatprep.subr.bf16.mxu0 %v9600_v40 }
0x2575   :  { %8418 = vmatpush3.bf16.msra.mxu0 %v9601_v42 }
0x2576   :  { %8805 = vmatprep.subr.bf16.mxu0 %v10435_v56 }
0x25f6   :  { %v5400_v1 = vpop.xlane.xlu1 %5399 }
0x25f7   :  { %v5403_v5 = vmul.f32 0.0078125, %v5400_v1 }
0x25f8   :  { %v5402_v45 = vpop.xlane.xlu0 %5401 }
0x25f9   :  { %v5405_v54 = vsub.f32 %v11453_v3, %v5403_v5  ;;  %v5404_v44 = vmul.f32 0.0078125, %v5402_v45 }
0x25fb   :  { %v5406_v8 = vsub.f32 %v11456_v41, %v5404_v44  ;;  %v5407_v46 = vmul.f32 %v5405_v54, %v5405_v54 }
0x25fd   :  { %5409 = vadd.xlane.f32.xlu0 %v5407_v46  ;;  %v5408_v2 = vmul.f32 %v5406_v8, %v5406_v8 }
0x2601   :  { %5411 = vadd.xlane.f32.xlu0 %v5408_v2 }
0x268a   :  { %v5410_v59 = vpop.xlane.xlu0 %5409 }
0x268b   :  { %v5413_v28 = vmul.f32 0.0078125, %v5410_v59 }
0x268d   :  { %v5415_v60 = vadd.f32 1e-05, %v5413_v28 }
0x268e   :  { %v5412_v61 = vpop.xlane.xlu0 %5411 }
0x268f   :  { %9816 = vrsqrt.f32 %v5415_v60  ;;  %v5414_v62 = vmul.f32 0.0078125, %v5412_v61 }
0x2691   :  { %v5416_v30 = vadd.f32 1e-05, %v5414_v62 }
0x2693   :  { %9818 = vrsqrt.f32 %v5416_v30 }
0x2699   :  { %v9817_v47 = vpop.eup %9816 }
0x269a   :  { %v5419_v63 = vmul.f32 %v9817_v47, %v5405_v54 }
0x269c   :  { %v5427_v9 = vmul.f32 %v8030_v4, %v5419_v63 }
0x269d   :  { %v9819_v6 = vpop.eup %9818 }
0x269e   :  { %v5420_v7 = vmul.f32 %v9819_v6, %v5406_v8  ;;  %v5435_v12 = vadd.f32 %v8031_v10, %v5427_v9 }
0x26a0   :  { %v5428_v11 = vmul.f32 %v8030_v4, %v5420_v7 }
0x26a2   :  { %v5436_v13 = vadd.f32 %v8031_v10, %v5428_v11 }
0x26a4   :  { %v5453_v14 = vpack.c.bf16 %v5436_v13, %v5435_v12  ;;  %v8052_v13 = vld [vmem:[#allocation29] ss:$0 sm:$0xff] }
0x26a6   :  { %5579 = vmatmul.mubr.bf16.vlgmr.msra.gmra.mrb[64].mxu1 %v5453_v14 }
0x26a7   :  { %6055 = vmatprep.mubr.bf16.mxu1 %v10434_v0  ;;  %6024 = vmatpush1.bf16.msra.mxu1 %v9602_v34 }
0x26a8   :  { %6025 = vmatprep.subr.bf16.mxu1 %v9608_v36 }
0x26ab   :  { %6026 = vmatpush1.bf16.msra.mxu1 %v9606_v37 }
0x2779   :  { %v5580_v1 = vpop.f32.mrb[64].mxu1 }
0x277a   :  { %v5581_v5 = vadd.f32 %v5580_v1, %v5459_v24  ;;  %v5582_v45 = vpop.f32.mrb[65].mxu1 }
0x277b   :  { %v5583_v54 = vadd.f32 %v5582_v45, %v5463_v49  ;;  %v5584_v44 = vpop.f32.mrb[66].mxu1  ;;  %v9610_v45 = vld [vmem:[%s11736_s19 + $0xf0] ss:$12 sps:$4 sm:$0xff]  }
0x277c   :  { %v8048_v8 = vmul.f32 -1.702, %v5581_v5  ;;  %v5585_v46 = vadd.f32 %v5584_v44, %v5459_v24  ;;  %v5586_v2 = vpop.f32.mrb[67].mxu1  ;;  %v9616_v44 = vld [vmem:[%s11736_s19 + $0x10c] ss:$12 sps:$4 sm:$0xff]  }
0x277d   :  { %v8049_v48 = vmul.f32 -1.702, %v5583_v54  ;;  %v5587_v20 = vadd.f32 %v5586_v2, %v5463_v49  ;;  %v9620_v2 = vld [vmem:[%s11736_s19 + $0x124] ss:$12 sps:$4 sm:$0xff]  }
0x277e   :  { %v5597_v19 = vmul.f32 1.442695, %v8048_v8  ;;  %v8050_v50 = vmul.f32 -1.702, %v5585_v46  ;;  %v9614_v8 = vld [vmem:[%s11736_s19 + $0x108] ss:$12 sps:$4 sm:$0xff]  }
0x277f   :  { %v5599_v51 = vmul.f32 1.442695, %v8049_v48  ;;  %v8051_v25 = vmul.f32 -1.702, %v5587_v20  ;;  %v9618_v48 = vld [vmem:[%s11736_s19 + $0x120] ss:$12 sps:$4 sm:$0xff]  }
0x2780   :  { %9820 = vpow2.f32 %v5597_v19  ;;  %v5601_v52 = vmul.f32 1.442695, %v8050_v50  ;;  %v9624_v19 = vld [vmem:[%s11736_s19 + $0x13c] ss:$12 sps:$4 sm:$0xff]   ;;  %v9622_v50 = vld [vmem:[%s11736_s19 + $0x138] ss:$12 sps:$4 sm:$0xff]  }
0x2781   :  { %9822 = vpow2.f32 %v5599_v51  ;;  %v5603_v53 = vmul.f32 1.442695, %v8051_v25  ;;  %v9625_v51 = vld [vmem:[%s11736_s19 + $0x140] ss:$12 sps:$4 sm:$0xff]  }
0x2782   :  { %9824 = vpow2.f32 %v5601_v52  ;;  %v9628_v25 = vld [vmem:[%s11736_s19 + $0x154] ss:$12 sps:$4 sm:$0xff]   ;;  %v9626_v52 = vld [vmem:[%s11736_s19 + $0x150] ss:$12 sps:$4 sm:$0xff]  }
0x2783   :  { %9826 = vpow2.f32 %v5603_v53  ;;  %v9629_v53 = vld [vmem:[%s11736_s19 + $0x158] ss:$12 sps:$4 sm:$0xff]  }
0x278a   :  { %v9821_v55 = vpop.eup %9820 }
0x278b   :  { %v9823_v38 = vpop.eup %9822  ;;  %v5605_v58 = vadd.f32 1.0, %v9821_v55  ;;  %v9632_v55 = vld [vmem:[%s11736_s19 + $0x16c] ss:$12 sps:$4 sm:$0xff]  }
0x278c   :  { %v9825_v57 = vpop.eup %9824  ;;  %v5606_v59 = vadd.f32 1.0, %v9823_v38  ;;  %v9630_v38 = vld [vmem:[%s11736_s19 + $0x168] ss:$12 sps:$4 sm:$0xff]  }
0x278d   :  { %v9827_v28 = vpop.eup %9826  ;;  %9828 = vrcp.f32 %v5605_v58  ;;  %v5607_v60 = vadd.f32 1.0, %v9825_v57  ;;  %v9633_v58 = vld [vmem:[%s11736_s19 + $0x170] ss:$12 sps:$4 sm:$0xff]  }
0x278e   :  { %9830 = vrcp.f32 %v5606_v59  ;;  %v5608_v61 = vadd.f32 1.0, %v9827_v28 }
0x278f   :  { %9832 = vrcp.f32 %v5607_v60 }
0x2790   :  { %9834 = vrcp.f32 %v5608_v61 }
0x2797   :  { %v9829_v62 = vpop.eup %9828 }
0x2798   :  { %v9831_v30 = vpop.eup %9830  ;;  %v5617_v4 = vmul.f32 %v9829_v62, %v5581_v5  ;;  %v9612_v5 = vld [vmem:[%s11736_s19 + $0xf4] ss:$12 sps:$4 sm:$0xff]  }
0x2799   :  { %v9833_v47 = vpop.eup %9832  ;;  %v5618_v7 = vmul.f32 %v9831_v30, %v5583_v54  ;;  %v9613_v54 = vld [vmem:[%s11736_s19 + $0xf8] ss:$12 sps:$4 sm:$0xff]   ;;  %6027 = vmatprep.subr.bf16.mxu1 %v9612_v5 }
0x279a   :  { %v9835_v63 = vpop.eup %9834  ;;  %v5619_v6 = vmul.f32 %v9833_v47, %v5585_v46  ;;  %6028 = vmatpush1.bf16.msra.mxu1 %v9610_v45  ;;  %v9617_v46 = vld [vmem:[%s11736_s19 + $0x110] ss:$12 sps:$4 sm:$0xff]   ;;  %v8069_v47 = vld [vmem:[#allocation14 + $0x1] ss:$0 sm:$0xff] }
0x279b   :  { %v5620_v9 = vmul.f32 %v9835_v63, %v5587_v20  ;;  %6029 = vmatprep.subr.bf16.mxu1 %v9616_v44  ;;  %v9621_v20 = vld [vmem:[%s11736_s19 + $0x128] ss:$12 sps:$4 sm:$0xff]  }
0x279c   :  { %v5653_v10 = vpack.c.bf16 %v5619_v6, %v5617_v4 }
0x279d   :  { %v5654_v11 = vpack.c.bf16 %v5620_v9, %v5618_v7  ;;  %v8070_v9 = vld [vmem:[#allocation16 + $0x1] ss:$0 sm:$0xff] }
0x279e   :  { %6030 = vmatpush1.bf16.msra.mxu1 %v9614_v8  ;;  %v11529_v8 = vld [vmem:[%s11737_s30 + $0x8] sm:$0xff] }
0x279f   :  { %5790 = vmatprep.mubr.bf16.mxu0 %v5654_v11  ;;  %6031 = vmatprep.subr.bf16.mxu1 %v9620_v2  ;;  %v11533_v2 = vld [vmem:[%s11737_s30] sm:$0xff] }
0x27a0   :  { %5791 = vmatmul.mubr.bf16.vlgmr.msra.gmra.mrb[48].mxu0 %v5653_v10 }
0x27a1   :  { %8821 = vmatprep.mubr.msk.bf16.mxu0 %vm10436_vm2, %v10435_v56  ;;  %8806 = vmatpush3.bf16.msra.mxu0 %v9605_v26 }
0x27a2   :  { %8807 = vmatprep.subr.bf16.mxu0 %v10435_v56  ;;  %6032 = vmatpush1.bf16.msra.mxu1 %v9618_v48 }
0x27a3   :  { %6033 = vmatprep.subr.bf16.mxu1 %v9624_v19 }
0x27a5   :  { %8808 = vmatpush3.bf16.msra.mxu0 %v9609_v17 }
0x27a6   :  { %8809 = vmatprep.subr.bf16.mxu0 %v10435_v56  ;;  %6034 = vmatpush1.bf16.msra.mxu1 %v9622_v50 }
0x27a7   :  { %6035 = vmatprep.subr.bf16.mxu1 %v9628_v25 }
0x27a9   :  { %8810 = vmatpush3.bf16.msra.mxu0 %v9613_v54 }
0x27aa   :  { %8811 = vmatprep.subr.bf16.mxu0 %v10435_v56  ;;  %6036 = vmatpush1.bf16.msra.mxu1 %v9626_v52 }
0x27ab   :  { %6037 = vmatprep.subr.bf16.mxu1 %v9632_v55 }
0x27ad   :  { %8812 = vmatpush3.bf16.msra.mxu0 %v9617_v46 }
0x27ae   :  { %8813 = vmatprep.subr.bf16.mxu0 %v10435_v56  ;;  %6038 = vmatpush1.bf16.msra.mxu1 %v9630_v38 }
0x27b1   :  { %8814 = vmatpush3.bf16.msra.mxu0 %v9621_v20 }
0x27b2   :  { %8815 = vmatprep.subr.bf16.mxu0 %v10435_v56 }
0x27b5   :  { %8816 = vmatpush3.bf16.msra.mxu0 %v9625_v51 }
0x27b6   :  { %8817 = vmatprep.subr.bf16.mxu0 %v10435_v56 }
0x27b9   :  { %8818 = vmatpush3.bf16.msra.mxu0 %v9629_v53 }
0x27ba   :  { %8819 = vmatprep.subr.bf16.mxu0 %v10435_v56 }
0x27bd   :  { %8820 = vmatpush3.bf16.msra.mxu0 %v9633_v58 }
0x2873   :  { %v8419_v12 = vpop.f32.mrb[48].mxu0 }
0x2874   :  { %v8420_v14 = vpop.f32.mrb[49].mxu0 }
0x2875   :  { %v8421_v15 = vadd.f32 %v8420_v14, %v8419_v12  ;;  %v8422_v18 = vpop.f32.mrb[50].mxu0  ;;  %v5878_v14 = vld [vmem:[#allocation17 + $0x3] sm:$0x7] }
0x2876   :  { %v8423_v33 = vpop.f32.mrb[51].mxu0 }
0x2877   :  { %v5793_v27 = vadd.f32 %v8421_v15, %v8052_v13  ;;  %v8424_v31 = vadd.f32 %v8423_v33, %v8422_v18  ;;  %v5883_v15 = vrot.slane %v5878_v14, %v10860_v21  ;;  %v5891_v18 = vrot.slane %v5878_v14, %v10888_v39 }
0x2879   :  { %v5796_v22 = vadd.f32 %v8424_v31, %v8052_v13  ;;  %v11469_v29 = vadd.f32 %v5793_v27, %v11453_v3  ;;  %v5887_v31 = vrot.slane %v5878_v14, %v10863_v23 }
0x287b   :  { %5805 = vadd.xlane.f32.xlu1 %v11469_v29  ;;  %v11473_v32 = vadd.f32 %v5796_v22, %v11456_v41 }
0x287d   :  { %5807 = vadd.xlane.f32.xlu0 %v11473_v32 }
0x2908   :  { %v5806_v3 = vpop.xlane.xlu1 %5805 }
0x2909   :  { %v5809_v41 = vmul.f32 0.0078125, %v5806_v3 }
0x290a   :  { %v5808_v40 = vpop.xlane.xlu0 %5807 }
0x290b   :  { %v5811_v42 = vsub.f32 %v11469_v29, %v5809_v41  ;;  %v5810_v43 = vmul.f32 0.0078125, %v5808_v40 }
0x290d   :  { %v5812_v24 = vsub.f32 %v11473_v32, %v5810_v43  ;;  %v5813_v49 = vmul.f32 %v5811_v42, %v5811_v42 }
0x290f   :  { %5815 = vadd.xlane.f32.xlu1 %v5813_v49  ;;  %v5814_v1 = vmul.f32 %v5812_v24, %v5812_v24 }
0x2911   :  { %5817 = vadd.xlane.f32.xlu0 %v5814_v1 }
0x299c   :  { %v5816_v57 = vpop.xlane.xlu1 %5815 }
0x299d   :  { %v5819_v59 = vmul.f32 0.0078125, %v5816_v57 }
0x299e   :  { %v5818_v28 = vpop.xlane.xlu0 %5817 }
0x299f   :  { %v5821_v60 = vadd.f32 1e-05, %v5819_v59  ;;  %v5820_v61 = vmul.f32 0.0078125, %v5818_v28 }
0x29a1   :  { %9836 = vrsqrt.f32 %v5821_v60  ;;  %v5822_v62 = vadd.f32 1e-05, %v5820_v61 }
0x29a3   :  { %9838 = vrsqrt.f32 %v5822_v62 }
0x29ab   :  { %v9837_v30 = vpop.eup %9836 }
0x29ac   :  { %v5825_v63 = vmul.f32 %v9837_v30, %v5811_v42 }
0x29ad   :  { %v9839_v4 = vpop.eup %9838 }
0x29ae   :  { %v5826_v6 = vmul.f32 %v9839_v4, %v5812_v24  ;;  %v5833_v7 = vmul.f32 %v8069_v47, %v5825_v63 }
0x29b0   :  { %v5834_v10 = vmul.f32 %v8069_v47, %v5826_v6  ;;  %v5841_v11 = vadd.f32 %v8070_v9, %v5833_v7 }
0x29b2   :  { %v5842_v12 = vadd.f32 %v8070_v9, %v5834_v10 }
0x29b4   :  { %v5876_v13 = vpack.c.bf16 %v5842_v12, %v5841_v11 }
0x29b6   :  { %6056 = vmatmul.mubr.bf16.vlgmr.msra.gmra.mrb[68].mxu1 %v5876_v13  ;;  %8822 = vmatmul.mubr.bf16.vlgmr.msra.gmra.mrb[52].mxu0 %v5876_v13 }
0x2a89   :  { %v6057_v33 = vpop.f32.mrb[68].mxu1  ;;  %v6100_v27 = vpop.f32.mrb[52].mxu0 }
0x2a8a   :  { %v11512_v22 = vadd.f32 %v6057_v33, %v5883_v15  ;;  %v6059_v34 = vpop.f32.mrb[69].mxu1  ;;  %v8823_v16 = vpop.f32.mrb[53].mxu0  ;;  %v6101_v17 = vadd.f32 %v6100_v27, %v5891_v18 }
0x2a8b   :  { %v6061_v26 = vpop.f32.mrb[70].mxu1  ;;  %v6103_v36 = vpop.f32.mrb[54].mxu0  ;;  %v6060_v40 = vadd.f32 %v6059_v34, %v5887_v31 }
0x2a8c   :  { %v6104_v37 = vadd.f32 %v6103_v36, %v5891_v18  ;;  %v6063_v3 = vpop.f32.mrb[71].mxu1  ;;  %v8824_v41 = vpop.f32.mrb[55].mxu0  ;;  %8829 = vmatprep.mubr.msk.f32.mxu1 %vm878_vm3, %v11512_v22  ;;  %v11524_v1 = vadd.f32 %v6061_v26, %v5883_v15 }
0x2a8d   :  { %v6064_v39 = vadd.f32 %v6063_v3, %v5887_v31 }
0x2a8e   :  { %v9050_v42 = vpack.c.bf16 %v6104_v37, %v6101_v17  ;;  %v11516_v43 = vpack.i.bf16 %v6104_v37, %v6101_v17 }
0x2a8f   :  { %v9044_v24 = vpack.c.bf16 %v6064_v39, %v6060_v40  ;;  %v11518_v49 = vpack.i.bf16 %v6064_v39, %v6060_v40 }
0x2a91   :  { %9046 = vmatprep.subr.msk.bf16.mxu1 %vm10871_vm4, %v9044_v24 }
0x2a92   :  { %9049 = vmatpush3.bf16.xpose.msk.msra.mxu1 %vm10871_vm4, %v9044_v24 }
0x2a93   :  { %9051 = vmatprep.subr.bf16.mxu1 %v9050_v42 }
0x2a99   :  { %8830 = vmatmul.mubr.msk.f32.vlgmr.msra.gmra.mrb[62].mxu1 %vm878_vm3, %v11524_v1 }
0x2a9a   :  { %9053 = vmatpush3.bf16.msra.mxu1 %v9050_v42 }
0x2b6c   :  { %v8831_v5 = vpop.f32.mrb[62].mxu1 }
0x2b6d   :  { %v6195_v45 = vmul.f32 0.17677669, %v8831_v5  ;;  %v6185_v54 = vpop.f32.mrb[63].mxu1 }
0x2b6e   :  { %v6194_v44 = vmul.f32 0.17677669, %v6185_v54 }
0x2b6f   :  { %v6197_v46 = vadd.f32 %v11529_v8, %v6195_v45 }
0x2b70   :  { %v6196_v48 = vadd.f32 %v11533_v2, %v6194_v44 }
0x2b71   :  { %v6201_v20 = vsel %vm4534_vm11, %v6197_v46, -inf }
0x2b72   :  { %6202 = vmax.xlane.f32.xlu0 %v6201_v20  ;;  %v6198_v19 = vsel %vm4534_vm11, %v6196_v48, -inf }
0x2b73   :  { %6199 = vmax.xlane.f32.xlu1 %v6198_v19 }
0x2b84   :  { %9301 = vrot.lane.b32.xlu1 %v11518_v49, %s10437_s26 }
0x2bff   :  { %v6203_v50 = vpop.xlane.xlu0 %6202 }
0x2c00   :  { %v6205_v51 = vsub.f32 %v6197_v46, %v6203_v50  ;;  %v6200_v25 = vpop.xlane.xlu1 %6199 }
0x2c01   :  { %v6204_v52 = vsub.f32 %v6196_v48, %v6200_v25 }
0x2c02   :  { %v6208_v53 = vmul.f32 1.442695, %v6205_v51 }
0x2c03   :  { %v6206_v55 = vmul.f32 1.442695, %v6204_v52 }
0x2c04   :  { %9840 = vpow2.f32 %v6208_v53  ;;  %v9302_v38 = vpop.permute.xlu1 %9301 }
0x2c05   :  { %9842 = vpow2.f32 %v6206_v55  ;;  %v9304_v58 = vunpack.i.h.bf16 %v9302_v38  ;;  %v9303_v57 = vunpack.i.l.bf16 %v9302_v38 }
0x2c07   :  { %v9054_v59 = vpack.c.bf16 %v9304_v58, %v9303_v57 }
0x2c09   :  { %9056 = vmatprep.subr.msk.bf16.mxu1 %vm10871_vm4, %v9054_v59 }
0x2c0e   :  { %v9841_v28 = vpop.eup %9840 }
0x2c0f   :  { %v9843_v60 = vpop.eup %9842  ;;  %v6213_v61 = vsel %vm4534_vm11, %v9841_v28, 0.0 }
0x2c10   :  { %6214 = vadd.xlane.f32.xlu0 %v6213_v61  ;;  %v6210_v62 = vsel %vm4534_vm11, %v9843_v60, 0.0 }
0x2c11   :  { %6211 = vadd.xlane.f32.xlu1 %v6210_v62 }
0x2c22   :  { %6303 = vrot.lane.b32.xlu1 %v11524_v1, %s10437_s26 }
0x2c26   :  { %6301 = vrot.lane.b32.xlu0 %v11512_v22, %s10437_s26 }
0x2c9d   :  { %v6215_v30 = vpop.xlane.xlu0 %6214 }
0x2c9e   :  { %9844 = vrcp.f32 %v6215_v30  ;;  %v6212_v47 = vpop.xlane.xlu1 %6211 }
0x2c9f   :  { %9846 = vrcp.f32 %v6212_v47 }
0x2ca1   :  { %v6302_v9 = vpop.permute.xlu0 %6301 }
0x2ca2   :  { %v6304_v10 = vpop.permute.xlu1 %6303 }
0x2ca8   :  { %v9845_v63 = vpop.eup %9844 }
0x2ca9   :  { %v9847_v4 = vpop.eup %9846  ;;  %v6219_v7 = vmul.f32 %v9845_v63, %v9841_v28 }
0x2caa   :  { %v6218_v6 = vmul.f32 %v9847_v4, %v9843_v60 }
0x2cac   :  { %8836 = vmatprep.mubr.msk.f32.mxu1 %vm4534_vm11, %v6218_v6 }
0x2cad   :  { %8837 = vmatmul.mubr.msk.f32.vlgmr.msra.gmra.mrb[72].mxu1 %vm4534_vm11, %v6219_v7 }
0x2cae   :  { %9059 = vmatpush3.bf16.xpose.msk.msra.mxu1 %vm10871_vm4, %v9054_v59  ;;  %8843 = vmatprep.mubr.msk.f32.mxu1 %vm878_vm3, %v6302_v9 }
0x2cb5   :  { %8844 = vmatmul.mubr.msk.f32.vlgmr.msra.gmra.mrb[74].mxu1 %vm878_vm3, %v6304_v10 }
0x2d80   :  { %v11554_v11 = vpop.f32.mrb[72].mxu1 }
0x2d81   :  { %v11556_v12 = vpop.f32.mrb[73].mxu1 }
0x2d88   :  { %v8845_v13 = vpop.f32.mrb[74].mxu1 }
0x2d89   :  { %v6393_v14 = vmul.f32 0.17677669, %v8845_v13  ;;  %v6383_v15 = vpop.f32.mrb[75].mxu1 }
0x2d8a   :  { %v6392_v18 = vmul.f32 0.17677669, %v6383_v15 }
0x2d8b   :  { %v6395_v33 = vadd.f32 %v11529_v8, %v6393_v14 }
0x2d8c   :  { %v6394_v27 = vadd.f32 %v11533_v2, %v6392_v18 }
0x2d8d   :  { %v6399_v31 = vsel %vm4534_vm11, %v6395_v33, -inf }
0x2d8e   :  { %6400 = vmax.xlane.f32.xlu0 %v6399_v31  ;;  %v6396_v34 = vsel %vm4534_vm11, %v6394_v27, -inf }
0x2d8f   :  { %6397 = vmax.xlane.f32.xlu1 %v6396_v34 }
0x2e1b   :  { %v6401_v16 = vpop.xlane.xlu0 %6400 }
0x2e1c   :  { %v6403_v26 = vsub.f32 %v6395_v33, %v6401_v16  ;;  %v6398_v36 = vpop.xlane.xlu1 %6397 }
0x2e1d   :  { %v6402_v17 = vsub.f32 %v6394_v27, %v6398_v36 }
0x2e1e   :  { %v6406_v37 = vmul.f32 1.442695, %v6403_v26 }
0x2e1f   :  { %v6404_v3 = vmul.f32 1.442695, %v6402_v17 }
0x2e20   :  { %9848 = vpow2.f32 %v6406_v37 }
0x2e21   :  { %9850 = vpow2.f32 %v6404_v3 }
0x2e2a   :  { %v9849_v41 = vpop.eup %9848 }
0x2e2b   :  { %v9851_v40 = vpop.eup %9850  ;;  %v6411_v39 = vsel %vm4534_vm11, %v9849_v41, 0.0 }
0x2e2c   :  { %6412 = vadd.xlane.f32.xlu1 %v6411_v39  ;;  %v6408_v42 = vsel %vm4534_vm11, %v9851_v40, 0.0 }
0x2e2d   :  { %6409 = vadd.xlane.f32.xlu0 %v6408_v42 }
0x2e3d   :  { %9311 = vrot.lane.b32.xlu1 %v11518_v49, %s10421_s15 }
0x2e41   :  { %9316 = vrot.lane.b32.xlu1 %v11518_v49, %s10407_s22 }
0x2e43   :  { %9306 = vrot.lane.b32.xlu0 %v11516_v43, %s10437_s26 }
0x2e45   :  { %6507 = vrot.lane.b32.xlu1 %v11512_v22, %s10421_s15 }
0x2e47   :  { %6509 = vrot.lane.b32.xlu0 %v11524_v1, %s10421_s15 }
0x2e49   :  { %6711 = vrot.lane.b32.xlu1 %v11512_v22, %s10407_s22 }
0x2e4b   :  { %6713 = vrot.lane.b32.xlu0 %v11524_v1, %s10407_s22 }
0x2eb9   :  { %v6413_v24 = vpop.xlane.xlu1 %6412 }
0x2eba   :  { %9852 = vrcp.f32 %v6413_v24  ;;  %v6410_v5 = vpop.xlane.xlu0 %6409 }
0x2ebb   :  { %9854 = vrcp.f32 %v6410_v5 }
0x2ebd   :  { %v9312_v49 = vpop.permute.xlu1 %9311 }
0x2ebe   :  { %v9307_v45 = vpop.permute.xlu0 %9306  ;;  %v9314_v54 = vunpack.i.h.bf16 %v9312_v49  ;;  %v9313_v44 = vunpack.i.l.bf16 %v9312_v49 }
0x2ebf   :  { %v9309_v46 = vunpack.i.h.bf16 %v9307_v45  ;;  %v9308_v48 = vunpack.i.l.bf16 %v9307_v45 }
0x2ec0   :  { %v9064_v25 = vpack.c.bf16 %v9314_v54, %v9313_v44 }
0x2ec1   :  { %v9060_v20 = vpack.c.bf16 %v9309_v46, %v9308_v48  ;;  %v9317_v19 = vpop.permute.xlu1 %9316 }
0x2ec2   :  { %v9319_v50 = vunpack.i.h.bf16 %v9317_v19  ;;  %v9318_v51 = vunpack.i.l.bf16 %v9317_v19  ;;  %v6510_v58 = vpop.permute.xlu0 %6509 }
0x2ec3   :  { %9061 = vmatprep.subr.bf16.mxu1 %v9060_v20 }
0x2ec4   :  { %v9853_v22 = vpop.eup %9852  ;;  %v9074_v52 = vpack.c.bf16 %v9319_v50, %v9318_v51  ;;  %9063 = vmatpush3.bf16.msra.mxu1 %v9060_v20 }
0x2ec5   :  { %v9855_v1 = vpop.eup %9854  ;;  %v6508_v53 = vpop.permute.xlu1 %6507  ;;  %9066 = vmatprep.subr.msk.bf16.mxu1 %vm10871_vm4, %v9064_v25  ;;  %v6417_v38 = vmul.f32 %v9853_v22, %v9849_v41 }
0x2ec6   :  { %9076 = vmatprep.subr.msk.bf16.mxu0 %vm10871_vm4, %v9074_v52  ;;  %v6416_v55 = vmul.f32 %v9855_v1, %v9851_v40  ;;  %v6714_v59 = vpop.permute.xlu0 %6713 }
0x2ec7   :  { %9079 = vmatpush3.bf16.xpose.msk.msra.mxu0 %vm10871_vm4, %v9074_v52 }
0x2ec8   :  { %8850 = vmatprep.mubr.msk.f32.mxu1 %vm4534_vm11, %v6416_v55  ;;  %8881 = vmatprep.subr.bf16.mxu0 %v10435_v56 }
0x2ec9   :  { %8851 = vmatmul.mubr.msk.f32.vlgmr.msra.gmra.mrb[76].mxu1 %vm4534_vm11, %v6417_v38  ;;  %v6712_v57 = vpop.permute.xlu1 %6711 }
0x2eca   :  { %8857 = vmatprep.mubr.msk.f32.mxu1 %vm878_vm3, %v6508_v53  ;;  %8871 = vmatprep.mubr.msk.f32.mxu0 %vm878_vm3, %v6712_v57 }
0x2ecd   :  { %9069 = vmatpush3.bf16.xpose.msk.msra.mxu1 %vm10871_vm4, %v9064_v25 }
0x2ece   :  { %8872 = vmatmul.mubr.msk.f32.vlgmr.msra.gmra.mrb[56].mxu0 %vm878_vm3, %v6714_v59 }
0x2ecf   :  { %8897 = vmatprep.mubr.msk.bf16.mxu0 %vm10436_vm2, %v10435_v56 }
0x2ed4   :  { %8858 = vmatmul.mubr.msk.f32.vlgmr.msra.gmra.mrb[78].mxu1 %vm878_vm3, %v6510_v58 }
0x2f9c   :  { %v8852_v28 = vpop.f32.mrb[76].mxu1 }
0x2f9d   :  { %v6498_v60 = vpop.f32.mrb[77].mxu1 }
0x2f9e   :  { %v9330_v61 = vpack.i.bf16 %v8852_v28, %v6498_v60 }
0x2fa1   :  { %v8873_v62 = vpop.f32.mrb[56].mxu0 }
0x2fa2   :  { %v6793_v30 = vpop.f32.mrb[57].mxu0  ;;  %v6803_v10 = vmul.f32 0.17677669, %v8873_v62  ;;  %v9634_v62 = vld [vmem:[#allocation19 + $0x40] sm:$0xff]  }
0x2fa3   :  { %v6802_v63 = vmul.f32 0.17677669, %v6793_v30  ;;  %8882 = vmatpush3.bf16.msra.mxu0 %v9634_v62  ;;  %v9635_v30 = vld [vmem:[#allocation19 + $0x48] sm:$0xff]   ;;  %v9665_v62 = vld [vmem:[#allocation25 + $0xf4] ss:$8 sps:$4 sm:$0xff]  }
0x2fa4   :  { %v6805_v18 = vadd.f32 %v11529_v8, %v6803_v10  ;;  %8883 = vmatprep.subr.bf16.mxu0 %v10435_v56 }
0x2fa5   :  { %v6804_v13 = vadd.f32 %v11533_v2, %v6802_v63  ;;  %v9637_v63 = vld [vmem:[#allocation19 + $0x58] sm:$0xff]  }
0x2fa6   :  { %v6809_v27 = vsel %vm4534_vm11, %v6805_v18, -inf }
0x2fa7   :  { %v8859_v47 = vpop.f32.mrb[78].mxu1  ;;  %v6806_v33 = vsel %vm4534_vm11, %v6804_v13, -inf  ;;  %8884 = vmatpush3.bf16.msra.mxu0 %v9635_v30  ;;  %v9663_v30 = vld [vmem:[#allocation25 + $0xf0] ss:$8 sps:$4 sm:$0xff]  }
0x2fa8   :  { %v6599_v4 = vmul.f32 0.17677669, %v8859_v47  ;;  %v6589_v6 = vpop.f32.mrb[79].mxu1  ;;  %v9636_v47 = vld [vmem:[#allocation19 + $0x50] sm:$0xff]   ;;  %8885 = vmatprep.subr.bf16.mxu0 %v10435_v56 }
0x2fa9   :  { %v6598_v7 = vmul.f32 0.17677669, %v6589_v6  ;;  %v9639_v6 = vld [vmem:[#allocation19 + $0x68] sm:$0xff]  }
0x2faa   :  { %v6601_v35 = vadd.f32 %v11529_v8, %v6599_v4  ;;  %v9638_v4 = vld [vmem:[#allocation19 + $0x60] sm:$0xff]  }
0x2fab   :  { %v6600_v9 = vadd.f32 %v11533_v2, %v6598_v7  ;;  %8886 = vmatpush3.bf16.msra.mxu0 %v9636_v47  ;;  %v9641_v7 = vld [vmem:[#allocation19 + $0x78] sm:$0xff]  }
0x2fac   :  { %v6605_v14 = vsel %vm4534_vm11, %v6601_v35, -inf  ;;  %8887 = vmatprep.subr.bf16.mxu0 %v10435_v56 }
0x2fad   :  { %6606 = vmax.xlane.f32.xlu0 %v6605_v14  ;;  %v6602_v15 = vsel %vm4534_vm11, %v6600_v9, -inf }
0x2fae   :  { %6603 = vmax.xlane.f32.xlu1 %v6602_v15 }
0x2faf   :  { %8888 = vmatpush3.bf16.msra.mxu0 %v9637_v63 }
0x2fb0   :  { %8889 = vmatprep.subr.bf16.mxu0 %v10435_v56 }
0x2fb1   :  { %6807 = vmax.xlane.f32.xlu0 %v6806_v33 }
0x2fb3   :  { %8890 = vmatpush3.bf16.msra.mxu0 %v9638_v4 }
0x2fb4   :  { %8891 = vmatprep.subr.bf16.mxu0 %v10435_v56 }
0x2fb5   :  { %6810 = vmax.xlane.f32.xlu0 %v6809_v27 }
0x2fb7   :  { %8892 = vmatpush3.bf16.msra.mxu0 %v9639_v6 }
0x2fb8   :  { %8893 = vmatprep.subr.bf16.mxu0 %v10435_v56 }
0x303a   :  { %v6607_v31 = vpop.xlane.xlu0 %6606 }
0x303b   :  { %v6604_v34 = vpop.xlane.xlu1 %6603  ;;  %v6609_v2 = vsub.f32 %v6601_v35, %v6607_v31 }
0x303c   :  { %v6608_v16 = vsub.f32 %v6600_v9, %v6604_v34 }
0x303d   :  { %v6612_v40 = vmul.f32 1.442695, %v6609_v2 }
0x303e   :  { %v6808_v26 = vpop.xlane.xlu0 %6807  ;;  %v6610_v17 = vmul.f32 1.442695, %v6608_v16 }
0x303f   :  { %v6812_v36 = vsub.f32 %v6804_v13, %v6808_v26 }
0x3041   :  { %v6814_v37 = vmul.f32 1.442695, %v6812_v36 }
0x3042   :  { %v6811_v3 = vpop.xlane.xlu0 %6810 }
0x3043   :  { %9856 = vpow2.f32 %v6814_v37  ;;  %v6813_v41 = vsub.f32 %v6805_v18, %v6811_v3 }
0x3044   :  { %9858 = vpow2.f32 %v6610_v17 }
0x3045   :  { %v6816_v8 = vmul.f32 1.442695, %v6813_v41 }
0x3047   :  { %9860 = vpow2.f32 %v6816_v8 }
0x3048   :  { %9862 = vpow2.f32 %v6612_v40 }
0x304d   :  { %v9857_v39 = vpop.eup %9856 }
0x304e   :  { %v6818_v42 = vsel %vm4534_vm11, %v9857_v39, 0.0  ;;  %v9859_v24 = vpop.eup %9858 }
0x304f   :  { %6819 = vadd.xlane.f32.xlu1 %v6818_v42  ;;  %v6614_v45 = vsel %vm4534_vm11, %v9859_v24, 0.0  ;;  %v8151_v42 = vld [vmem:[#allocation20 + $0x1] ss:$0 sm:$0xff] }
0x3051   :  { %v9861_v5 = vpop.eup %9860 }
0x3052   :  { %v6821_v49 = vsel %vm4534_vm11, %v9861_v5, 0.0  ;;  %v9863_v54 = vpop.eup %9862 }
0x3053   :  { %6822 = vadd.xlane.f32.xlu0 %v6821_v49  ;;  %6615 = vadd.xlane.f32.xlu1 %v6614_v45  ;;  %v6617_v44 = vsel %vm4534_vm11, %v9863_v54, 0.0 }
0x3057   :  { %6618 = vadd.xlane.f32.xlu0 %v6617_v44 }
0x3064   :  { %9321 = vrot.lane.b32.xlu1 %v11516_v43, %s10421_s15 }
0x3068   :  { %9331 = vrot.lane.b32.xlu1 %v9330_v61, %s10407_s22 }
0x306d   :  { %9326 = vrot.lane.b32.xlu0 %v11516_v43, %s10407_s22  ;;  %s11738_s22 = sld [smem:[#allocation65_spill]] }
0x30dc   :  { %v6820_v46 = vpop.xlane.xlu1 %6819 }
0x30e0   :  { %v6823_v48 = vpop.xlane.xlu0 %6822  ;;  %v6616_v20 = vpop.xlane.xlu1 %6615 }
0x30e1   :  { %9864 = vrcp.f32 %v6616_v20  ;;  %v9647_v20 = vld [vmem:[#allocation25 + $0x94] ss:$8 sps:$4 sm:$0xff]  }
0x30e2   :  { %9866 = vrcp.f32 %v6820_v46  ;;  %v9642_v46 = vld [vmem:[#allocation25 + $0x80] ss:$8 sps:$4 sm:$0xff]  }
0x30e4   :  { %v6619_v19 = vpop.xlane.xlu0 %6618  ;;  %v9322_v50 = vpop.permute.xlu1 %9321 }
0x30e5   :  { %9868 = vrcp.f32 %v6619_v19  ;;  %v9324_v51 = vunpack.i.h.bf16 %v9322_v50  ;;  %v9323_v25 = vunpack.i.l.bf16 %v9322_v50  ;;  %v9645_v19 = vld [vmem:[#allocation25 + $0x90] ss:$8 sps:$4 sm:$0xff]  }
0x30e6   :  { %9870 = vrcp.f32 %v6823_v48  ;;  %v9644_v48 = vld [vmem:[#allocation25 + $0x84] ss:$8 sps:$4 sm:$0xff]  }
0x30e7   :  { %v9070_v22 = vpack.c.bf16 %v9324_v51, %v9323_v25 }
0x30e8   :  { %v9327_v52 = vpop.permute.xlu0 %9326  ;;  %v9332_v18 = vpop.permute.xlu1 %9331 }
0x30e9   :  { %v9329_v1 = vunpack.i.h.bf16 %v9327_v52  ;;  %v9328_v53 = vunpack.i.l.bf16 %v9327_v52  ;;  %9071 = vmatprep.subr.bf16.mxu1 %v9070_v22  ;;  %v9334_v27 = vunpack.i.h.bf16 %v9332_v18  ;;  %v9333_v31 = vunpack.i.l.bf16 %v9332_v18  ;;  %v8161_v18 = vld [vmem:[#allocation23 + $0x1] ss:$0 sm:$0xff] }
0x30ea   :  { %9073 = vmatpush3.bf16.msra.mxu1 %v9070_v22 }
0x30eb   :  { %v9080_v55 = vpack.c.bf16 %v9329_v1, %v9328_v53  ;;  %v9865_v38 = vpop.eup %9864  ;;  %v6940_v36 = vsel %vm878_vm3, %v11554_v11, %v9334_v27  ;;  %v6939_v2 = vsel %vm878_vm3, %v11556_v12, %v9333_v31  ;;  %v9650_v53 = vld [vmem:[#allocation25 + $0xa4] ss:$8 sps:$4 sm:$0xff]  }
0x30ec   :  { %v6622_v43 = vmul.f32 %v9865_v38, %v9859_v24  ;;  %v9867_v58 = vpop.eup %9866  ;;  %v9653_v38 = vld [vmem:[#allocation25 + $0xb4] ss:$8 sps:$4 sm:$0xff]  }
0x30ed   :  { %9081 = vmatprep.subr.bf16.mxu1 %v9080_v55  ;;  %v6826_v60 = vmul.f32 %v9867_v58, %v9857_v39  ;;  %v9656_v58 = vld [vmem:[#allocation25 + $0xc4] ss:$8 sps:$4 sm:$0xff]  }
0x30ee   :  { %8864 = vmatprep.mubr.msk.f32.mxu1 %vm4534_vm11, %v6622_v43  ;;  %v9651_v43 = vld [vmem:[#allocation25 + $0xb0] ss:$8 sps:$4 sm:$0xff]  }
0x30ef   :  { %v9869_v57 = vpop.eup %9868 }
0x30f0   :  { %v6623_v59 = vmul.f32 %v9869_v57, %v9863_v54  ;;  %v9871_v28 = vpop.eup %9870  ;;  %v9654_v57 = vld [vmem:[#allocation25 + $0xc0] ss:$8 sps:$4 sm:$0xff]  }
0x30f1   :  { %v6827_v61 = vmul.f32 %v9871_v28, %v9861_v5  ;;  %v9657_v28 = vld [vmem:[#allocation25 + $0xd0] ss:$8 sps:$4 sm:$0xff]  }
0x30f2   :  { %8865 = vmatmul.mubr.msk.f32.vlgmr.msra.gmra.mrb[80].mxu1 %vm4534_vm11, %v6623_v59  ;;  %v9659_v59 = vld [vmem:[#allocation25 + $0xd4] ss:$8 sps:$4 sm:$0xff]  }
0x30f3   :  { %9083 = vmatpush3.bf16.msra.mxu1 %v9080_v55  ;;  %8878 = vmatprep.mubr.msk.f32.mxu1 %vm4534_vm11, %v6826_v60  ;;  %v9648_v55 = vld [vmem:[#allocation25 + $0xa0] ss:$8 sps:$4 sm:$0xff]   ;;  %v9662_v60 = vld [vmem:[#allocation25 + $0xe4] ss:$8 sps:$4 sm:$0xff]  }
0x30f4   :  { %7215 = vmatprep.subr.bf16.mxu1 %v9644_v48 }
0x30f6   :  { %8879 = vmatmul.mubr.msk.f32.vlgmr.msra.gmra.mrb[82].mxu1 %vm4534_vm11, %v6827_v61  ;;  %v9660_v61 = vld [vmem:[#allocation25 + $0xe0] ss:$8 sps:$4 sm:$0xff]  }
0x30f7   :  { %7247 = vmatprep.mubr.bf16.mxu1 %v10434_v0  ;;  %v9640_v0 = vld [vmem:[#allocation19 + $0x70] sm:$0xff]   ;;  %7216 = vmatpush1.bf16.msra.mxu1 %v9642_v46 }
0x30f8   :  { %8894 = vmatpush3.bf16.msra.mxu0 %v9640_v0  ;;  %7217 = vmatprep.subr.bf16.mxu1 %v9647_v20 }
0x30f9   :  { %8895 = vmatprep.subr.bf16.mxu0 %v10435_v56 }
0x30fb   :  { %7218 = vmatpush1.bf16.msra.mxu1 %v9645_v19 }
0x30fc   :  { %8896 = vmatpush3.bf16.msra.mxu0 %v9641_v7  ;;  %7219 = vmatprep.subr.bf16.mxu1 %v9650_v53 }
0x30ff   :  { %7220 = vmatpush1.bf16.msra.mxu1 %v9648_v55 }
0x3100   :  { %7221 = vmatprep.subr.bf16.mxu1 %v9653_v38 }
0x3103   :  { %7222 = vmatpush1.bf16.msra.mxu1 %v9651_v43 }
0x3104   :  { %7223 = vmatprep.subr.bf16.mxu1 %v9656_v58 }
0x3107   :  { %7224 = vmatpush1.bf16.msra.mxu1 %v9654_v57 }
0x3108   :  { %7225 = vmatprep.subr.bf16.mxu1 %v9659_v59 }
0x310b   :  { %7226 = vmatpush1.bf16.msra.mxu1 %v9657_v28 }
0x310c   :  { %7227 = vmatprep.subr.bf16.mxu1 %v9662_v60 }
0x310f   :  { %7228 = vmatpush1.bf16.msra.mxu1 %v9660_v61 }
0x3110   :  { %7229 = vmatprep.subr.bf16.mxu1 %v9665_v62 }
0x3113   :  { %7230 = vmatpush1.bf16.msra.mxu1 %v9663_v30 }
0x31c5   :  { %v8866_v35 = vpop.f32.mrb[80].mxu1 }
0x31c6   :  { %v6702_v9 = vpop.f32.mrb[81].mxu1 }
0x31c7   :  { %v9335_v10 = vpack.i.bf16 %v8866_v35, %v6702_v9 }
0x31c9   :  { %9336 = vrot.lane.b32.xlu1 %v9335_v10, %s10421_s15  ;;  %v8880_v13 = vpop.f32.mrb[82].mxu1  ;;  %v8160_v10 = vld [vmem:[#allocation22 + $0x1] ss:$0 sm:$0xff]  ;;  %s10440_s15 = smov [#allocation31]  }
0x31ca   :  { %v6906_v14 = vpop.f32.mrb[83].mxu1  ;;  %s7598_s12 = sshll.u32 %s10440_s15, 4  ;;  %s7599_s12 = int_to_ptr.vmem [resolvable:$true] %s7598_s12 }
0x31cb   :  { %v9340_v15 = vpack.i.bf16 %v8880_v13, %v6906_v14  ;;  %s10296_s8 = scalar_lea.vmem %s7599_s12, 256  ;;  %p10301_p5 = scmp.lt.s32.totalorder %s7599_s12, %s7599_s12 }
0x31cc   :  { %p10297_p4 = scmp.ne.s32.totalorder %s7599_s12, %s10296_s8  ;;  %p10302_p6 = scmp.lt.s32.totalorder %s10296_s8, %s10296_s8 }
0x31cd   :  { %9341 = vrot.lane.b32.xlu1 %v9340_v15, %s10437_s26 }
0x31ce   :  { %p10303_p7 = por %p10302_p6, %p10301_p5 }
0x31d0   :  { %p10304_p8 = pnand %p10303_p7, %p10297_p4 }
0x323b   :  { %v9337_v33 = vpop.permute.xlu1 %9336 }
0x323c   :  { %v9339_v34 = vunpack.i.h.bf16 %v9337_v33  ;;  %v9338_v16 = vunpack.i.l.bf16 %v9337_v33 }
0x323e   :  { %v6942_v3 = vsel %vm523_vm0, %v6940_v36, %v9339_v34  ;;  %v6941_v41 = vsel %vm523_vm0, %v6939_v2, %v9338_v16  ;;  %v9666_v16 = vld [vmem:[#allocation28 + $0xc0] sm:$0xff]   ;;  %v9668_v36 = vld [vmem:[#allocation28 + $0xc8] sm:$0xff]  }
0x323f   :  { %v9342_v26 = vpop.permute.xlu1 %9341  ;;  %8475 = vmatprep.subr.bf16.mxu0 %v9666_v16  ;;  %v9669_v2 = vld [vmem:[#allocation28 + $0x88] sm:$0xff]  }
0x3240   :  { %v9344_v17 = vunpack.i.h.bf16 %v9342_v26  ;;  %v9343_v37 = vunpack.i.l.bf16 %v9342_v26  ;;  %v9667_v26 = vld [vmem:[#allocation28 + $0x80] sm:$0xff]  }
0x3242   :  { %v6944_v40 = vsel %vm1722_vm9, %v6942_v3, %v9344_v17  ;;  %v6943_v8 = vsel %vm1722_vm9, %v6941_v41, %v9343_v37  ;;  %v9670_v17 = vld [vmem:[#allocation28 + $0xd0] sm:$0xff]   ;;  %v9672_v3 = vld [vmem:[#allocation28 + $0xd8] sm:$0xff]  }
0x3243   :  { %v6962_v39 = vpack.c.bf16 %v6944_v40, %v6943_v8  ;;  %v9671_v37 = vld [vmem:[#allocation28 + $0x90] sm:$0xff]   ;;  %v9673_v41 = vld [vmem:[#allocation28 + $0x98] sm:$0xff]   ;;  %v9674_v40 = vld [vmem:[#allocation28 + $0xe0] sm:$0xff]  }
0x3244   :  { %v9675_v8 = vld [vmem:[#allocation28 + $0xa0] sm:$0xff]  }
0x3245   :  { %8898 = vmatmul.mubr.bf16.vlgmr.msra.gmra.mrb[60].mxu0 %v6962_v39  ;;  %v9677_v39 = vld [vmem:[#allocation28 + $0xa8] sm:$0xff]  }
0x3246   :  { %8476 = vmatpush3.bf16.msra.mxu0 %v9667_v26 }
0x3247   :  { %8477 = vmatprep.subr.bf16.mxu0 %v9668_v36 }
0x324a   :  { %8478 = vmatpush3.bf16.msra.mxu0 %v9669_v2 }
0x324b   :  { %8479 = vmatprep.subr.bf16.mxu0 %v9670_v17 }
0x324e   :  { %8480 = vmatpush3.bf16.msra.mxu0 %v9671_v37 }
0x324f   :  { %8481 = vmatprep.subr.bf16.mxu0 %v9672_v3 }
0x3252   :  { %8482 = vmatpush3.bf16.msra.mxu0 %v9673_v41 }
0x3253   :  { %8483 = vmatprep.subr.bf16.mxu0 %v9674_v40 }
0x3256   :  { %8484 = vmatpush3.bf16.msra.mxu0 %v9675_v8 }
0x3318   :  { %v7053_v24 = vpop.f32.mrb[60].mxu0 }
0x3319   :  { %v7054_v5 = vadd.f32 %v8151_v42, %v7053_v24  ;;  %v8899_v49 = vpop.f32.mrb[61].mxu0  ;;  %v9679_v24 = vld [vmem:[#allocation28 + $0xb0] sm:$0xff]  }
0x331a   :  { %v7056_v11 = vpop.f32.mrb[62].mxu0  ;;  %v9681_v49 = vld [vmem:[#allocation28 + $0xb8] sm:$0xff]  }
0x331b   :  { %v11635_v45 = vadd.f32 %v7054_v5, %v11469_v29  ;;  %v7057_v12 = vadd.f32 %v8151_v42, %v7056_v11  ;;  %v8900_v54 = vpop.f32.mrb[63].mxu0  ;;  %v9678_v42 = vld [vmem:[#allocation28 + $0xf0] sm:$0xff]   ;;  %v9680_v5 = vld [vmem:[#allocation28 + $0xf8] sm:$0xff]  }
0x331c   :  { %v7123_v11 = vld [vmem:[#allocation26 + $0x2] sm:$0x3] }
0x331d   :  { %v11638_v44 = vadd.f32 %v7057_v12, %v11473_v32  ;;  %7066 = vadd.xlane.f32.xlu0 %v11635_v45  ;;  %v7128_v12 = vrot.slane %v7123_v11, %v10860_v21  ;;  %v7132_v54 = vrot.slane %v7123_v11, %v10863_v23  ;;  %v8199_v11 = vld [vmem:[#allocation11] ss:$0 sm:$0xff] }
0x331f   :  { %7068 = vadd.xlane.f32.xlu1 %v11638_v44 }
0x33aa   :  { %v7067_v50 = vpop.xlane.xlu0 %7066 }
0x33ab   :  { %v7070_v29 = vmul.f32 0.0078125, %v7067_v50 }
0x33ac   :  { %v7069_v51 = vpop.xlane.xlu1 %7068 }
0x33ad   :  { %v7072_v25 = vsub.f32 %v11635_v45, %v7070_v29  ;;  %v7071_v22 = vmul.f32 0.0078125, %v7069_v51 }
0x33af   :  { %v7073_v32 = vsub.f32 %v11638_v44, %v7071_v22  ;;  %v7074_v52 = vmul.f32 %v7072_v25, %v7072_v25 }
0x33b1   :  { %7076 = vadd.xlane.f32.xlu0 %v7074_v52  ;;  %v7075_v1 = vmul.f32 %v7073_v32, %v7073_v32 }
0x33b5   :  { %7078 = vadd.xlane.f32.xlu0 %v7075_v1 }
0x343e   :  { %v7077_v47 = vpop.xlane.xlu0 %7076 }
0x343f   :  { %v7080_v63 = vmul.f32 0.0078125, %v7077_v47 }
0x3441   :  { %v7082_v4 = vadd.f32 1e-05, %v7080_v63 }
0x3442   :  { %v7079_v6 = vpop.xlane.xlu0 %7078 }
0x3443   :  { %9872 = vrsqrt.f32 %v7082_v4  ;;  %v7081_v0 = vmul.f32 0.0078125, %v7079_v6 }
0x3445   :  { %v7083_v7 = vadd.f32 1e-05, %v7081_v0 }
0x3447   :  { %9874 = vrsqrt.f32 %v7083_v7 }
0x344d   :  { %v9873_v35 = vpop.eup %9872 }
0x344e   :  { %v7086_v9 = vmul.f32 %v9873_v35, %v7072_v25 }
0x3450   :  { %v7094_v15 = vmul.f32 %v8160_v10, %v7086_v9 }
0x3451   :  { %v9875_v13 = vpop.eup %9874 }
0x3452   :  { %v7087_v14 = vmul.f32 %v9875_v13, %v7073_v32  ;;  %v7102_v27 = vadd.f32 %v8161_v18, %v7094_v15  ;;  %v8182_v13 = vld [vmem:[#allocation29 + $0x1] ss:$0 sm:$0xff] }
0x3454   :  { %v7095_v33 = vmul.f32 %v8160_v10, %v7087_v14 }
0x3456   :  { %v7103_v31 = vadd.f32 %v8161_v18, %v7095_v33 }
0x3458   :  { %v7121_v34 = vpack.c.bf16 %v7103_v31, %v7102_v27 }
0x345a   :  { %7248 = vmatmul.mubr.bf16.vlgmr.msra.gmra.mrb[84].mxu1 %v7121_v34 }
0x345b   :  { %8905 = vmatprep.mubr.msk.f32.mxu1 %vm10436_vm2, %v10435_v56  ;;  %v9676_v56 = vld [vmem:[#allocation28 + $0xe8] sm:$0xff]  }
0x345c   :  { %8485 = vmatprep.subr.bf16.mxu0 %v9676_v56  ;;  %v10439_v56 = vmov 0.0|0.0  }
0x345d   :  { %8486 = vmatpush3.bf16.msra.mxu0 %v9677_v39  ;;  %9084 = vmatprep.subr.bf16.mxu1 %v10439_v56 }
0x345e   :  { %8487 = vmatprep.subr.bf16.mxu0 %v9678_v42 }
0x3461   :  { %8488 = vmatpush3.bf16.msra.mxu0 %v9679_v24 }
0x3462   :  { %8489 = vmatprep.subr.bf16.mxu0 %v9680_v5 }
0x3465   :  { %8490 = vmatpush3.bf16.msra.mxu0 %v9681_v49 }
0x352d   :  { %v7249_v46 = vpop.f32.mrb[84].mxu1 }
0x352e   :  { %v7250_v48 = vadd.f32 %v7249_v46, %v7128_v12  ;;  %v7251_v20 = vpop.f32.mrb[85].mxu1  ;;  %v8200_v46 = vld [vmem:[#allocation13] ss:$0 sm:$0xff] }
0x352f   :  { %v7252_v19 = vadd.f32 %v7251_v20, %v7132_v54  ;;  %v7253_v50 = vpop.f32.mrb[86].mxu1 }
0x3530   :  { %v8178_v29 = vmul.f32 -1.702, %v7250_v48  ;;  %v7254_v51 = vadd.f32 %v7253_v50, %v7128_v12  ;;  %v7255_v25 = vpop.f32.mrb[87].mxu1 }
0x3531   :  { %v8179_v22 = vmul.f32 -1.702, %v7252_v19  ;;  %v7256_v32 = vadd.f32 %v7255_v25, %v7132_v54  ;;  %v7514_v25 = vld [vmem:[%s11738_s22] sm:$0x3] }
0x3532   :  { %v7266_v52 = vmul.f32 1.442695, %v8178_v29  ;;  %v8180_v1 = vmul.f32 -1.702, %v7254_v51 }
0x3533   :  { %v7268_v53 = vmul.f32 1.442695, %v8179_v22  ;;  %v8181_v55 = vmul.f32 -1.702, %v7256_v32 }
0x3534   :  { %9876 = vpow2.f32 %v7266_v52  ;;  %v7270_v38 = vmul.f32 1.442695, %v8180_v1 }
0x3535   :  { %9878 = vpow2.f32 %v7268_v53  ;;  %v7272_v21 = vmul.f32 1.442695, %v8181_v55 }
0x3536   :  { %9880 = vpow2.f32 %v7270_v38 }
0x3537   :  { %9882 = vpow2.f32 %v7272_v21 }
0x353e   :  { %v9877_v23 = vpop.eup %9876 }
0x353f   :  { %v9879_v43 = vpop.eup %9878  ;;  %v7274_v58 = vadd.f32 1.0, %v9877_v23 }
0x3540   :  { %v9881_v57 = vpop.eup %9880  ;;  %v7275_v59 = vadd.f32 1.0, %v9879_v43 }
0x3541   :  { %v9883_v28 = vpop.eup %9882  ;;  %9884 = vrcp.f32 %v7274_v58  ;;  %v7276_v60 = vadd.f32 1.0, %v9881_v57 }
0x3542   :  { %9886 = vrcp.f32 %v7275_v59  ;;  %v7277_v61 = vadd.f32 1.0, %v9883_v28 }
0x3543   :  { %9888 = vrcp.f32 %v7276_v60 }
0x3544   :  { %9890 = vrcp.f32 %v7277_v61 }
0x354b   :  { %v9885_v62 = vpop.eup %9884 }
0x354c   :  { %v9887_v30 = vpop.eup %9886  ;;  %v7286_v4 = vmul.f32 %v9885_v62, %v7250_v48 }
0x354d   :  { %v9889_v47 = vpop.eup %9888  ;;  %v7287_v0 = vmul.f32 %v9887_v30, %v7252_v19 }
0x354e   :  { %v9891_v63 = vpop.eup %9890  ;;  %v7288_v6 = vmul.f32 %v9889_v47, %v7254_v51 }
0x354f   :  { %v7289_v7 = vmul.f32 %v9891_v63, %v7256_v32 }
0x3550   :  { %v7323_v35 = vpack.c.bf16 %v7288_v6, %v7286_v4 }
0x3551   :  { %v7324_v9 = vpack.c.bf16 %v7289_v7, %v7287_v0 }
0x3553   :  { %7461 = vmatprep.mubr.bf16.mxu0 %v7324_v9 }
0x3554   :  { %7462 = vmatmul.mubr.bf16.vlgmr.msra.gmra.mrb[64].mxu0 %v7323_v35 }
0x3627   :  { %v8491_v10 = vpop.f32.mrb[64].mxu0 }
0x3628   :  { %v8492_v14 = vpop.f32.mrb[65].mxu0 }
0x3629   :  { %v8493_v15 = vadd.f32 %v8492_v14, %v8491_v10  ;;  %v8494_v18 = vpop.f32.mrb[66].mxu0 }
0x362a   :  { %v8495_v33 = vpop.f32.mrb[67].mxu0 }
0x362b   :  { %v7464_v27 = vadd.f32 %v8493_v15, %v8182_v13  ;;  %v8496_v31 = vadd.f32 %v8495_v33, %v8494_v18 }
0x362d   :  { %v7467_v34 = vadd.f32 %v8496_v31, %v8182_v13  ;;  %v7470_v16 = vadd.f32 %v7464_v27, %v11635_v45 }
0x362f   :  { %7474 = vadd.xlane.f32.xlu0 %v7470_v16  ;;  %v7471_v26 = vadd.f32 %v7467_v34, %v11638_v44 }
0x3631   :  { %7476 = vadd.xlane.f32.xlu1 %v7471_v26 }
0x36bc   :  { %v7475_v36 = vpop.xlane.xlu0 %7474 }
0x36bd   :  { %v7478_v2 = vmul.f32 0.0078125, %v7475_v36 }
0x36be   :  { %v7477_v17 = vpop.xlane.xlu1 %7476 }
0x36bf   :  { %v7480_v37 = vsub.f32 %v7470_v16, %v7478_v2  ;;  %v7479_v3 = vmul.f32 0.0078125, %v7477_v17 }
0x36c1   :  { %v7481_v41 = vsub.f32 %v7471_v26, %v7479_v3  ;;  %v7482_v40 = vmul.f32 %v7480_v37, %v7480_v37 }
0x36c3   :  { %7484 = vadd.xlane.f32.xlu0 %v7482_v40  ;;  %v7483_v8 = vmul.f32 %v7481_v41, %v7481_v41 }
0x36c5   :  { %7486 = vadd.xlane.f32.xlu1 %v7483_v8 }
0x3750   :  { %v7485_v39 = vpop.xlane.xlu0 %7484 }
0x3751   :  { %v7488_v42 = vmul.f32 0.0078125, %v7485_v39 }
0x3752   :  { %v7487_v24 = vpop.xlane.xlu1 %7486 }
0x3753   :  { %v7490_v45 = vadd.f32 1e-05, %v7488_v42  ;;  %v7489_v5 = vmul.f32 0.0078125, %v7487_v24 }
0x3755   :  { %9892 = vrsqrt.f32 %v7490_v45  ;;  %v7491_v44 = vadd.f32 1e-05, %v7489_v5 }
0x3757   :  { %9894 = vrsqrt.f32 %v7491_v44 }
0x375f   :  { %v9893_v49 = vpop.eup %9892 }
0x3760   :  { %v7494_v12 = vmul.f32 %v9893_v49, %v7480_v37 }
0x3761   :  { %v9895_v54 = vpop.eup %9894 }
0x3762   :  { %v7495_v48 = vmul.f32 %v9895_v54, %v7481_v41  ;;  %v7502_v20 = vmul.f32 %v8199_v11, %v7494_v12 }
0x3764   :  { %v7503_v19 = vmul.f32 %v8199_v11, %v7495_v48  ;;  %v7510_v50 = vadd.f32 %v8200_v46, %v7502_v20 }
0x3766   :  { %v7511_v29 = vadd.f32 %v8200_v46, %v7503_v19  ;;  %7512 = vst [vmem:[#allocation31] sm:$0xff] %v7510_v50 }
0x3768   :  { %v9085_v51 = vpack.c.bf16 %v7511_v29, %v7510_v50  ;;  %7513 = vst [vmem:[#allocation31 + $0x8] sm:$0xff] %v7511_v29 }
0x376a   :  { %9086 = vmatpush3.bf16.msra.mxu1 %v9085_v51 }
0x376d   :  { %8906 = vmatmul.mubr.msk.f32.vlgmr.msra.gmra.mrb[88].mxu1 %vm4534_vm11, %v7514_v25 }
0x376e   :  { %10307 = shalt.err (!%p10304_p8)
}
0x376f   :  { %s10308_s27 = scalar_lea.hbm %s10655_s25, 256 }
0x3770   :  { %p10309_p9 = scmp.ne.s32.totalorder %s10655_s25, %s10308_s27  ;;  %p10312_p10 = scmp.lt.u32.totalorder %s10308_s27, %s10655_s25 }
0x3772   :  { %p10314_p11 = pnand %p10312_p10, %p10309_p9 }
0x3774   :  { %10317 = shalt.err (!%p10314_p11)
}
0x3775   :  { %7604 = dma.vmem_to_hbm [thread:$0]  %s7599_s12, 256, %s10655_s25, [#allocation4], %s10430_s28, %s10430_s28, %s10431_s20  }
0x3776   :  { %s10441_s9 = smov [#allocation32]  }
0x3777   :  { %s7611_s7 = sshll.u32 %s10441_s9, 4  ;;  %s7612_s7 = int_to_ptr.vmem [resolvable:$true] %s7611_s7 }
0x3778   :  { %s10318_s4 = scalar_lea.vmem %s7612_s7, 32  ;;  %p10323_p13 = scmp.lt.s32.totalorder %s7612_s7, %s7612_s7 }
0x3779   :  { %p10319_p12 = scmp.ne.s32.totalorder %s7612_s7, %s10318_s4  ;;  %p10324_p0 = scmp.lt.s32.totalorder %s10318_s4, %s10318_s4 }
0x377b   :  { %p10325_p1 = por %p10324_p0, %p10323_p13 }
0x377d   :  { %p10326_p2 = pnand %p10325_p1, %p10319_p12 }
0x3840   :  { %v7584_v22 = vpop.f32.mrb[88].mxu1 }
0x3841   :  { %7588 = vst [vmem:[#allocation32] sm:$0x3] %v7584_v22  ;;  %v8907_v32 = vpop.f32.mrb[89].mxu1 }
0x3842   :  { %10329 = shalt.err (!%p10326_p2)
}
0x3843   :  { %s10330_s16 = scalar_lea.hbm %s10660_s5, 32 }
0x3844   :  { %p10331_p3 = scmp.ne.s32.totalorder %s10660_s5, %s10330_s16  ;;  %p10334_p4 = scmp.lt.u32.totalorder %s10330_s16, %s10660_s5 }
0x3846   :  { %p10336_p5 = pnand %p10334_p4, %p10331_p3 }
0x3848   :  { %10339 = shalt.err (!%p10336_p5)
}
0x3849   :  { %7614 = dma.vmem_to_hbm [thread:$0]  %s7612_s7, 32, %s10660_s5, [#allocation33]  }
0x384a   :  { %10360 = dma.done.wait [#allocation4], 256  }
0x384b   :  { %10361 = vsyncadd [#allocation4], 4294967040 }
0x384c   :  { %10362 = dma.done.wait [#allocation33], 32  }
0x384d   :  { %10363 = vsyncadd [#allocation33], 4294967264 }
0x384e   :  { %7625 = vsyncpa [#allocation3], 1 }
0x384f   :  { %7626 = vsyncpa [#allocation6], 1 }
0x3850   :  { %7627 = vsyncpa [#allocation9], 1 }
0x3851   :  { %7628 = vsyncpa [#allocation12], 1 }
0x3852   :  { %7629 = vsyncpa [#allocation15], 1 }
0x3853   :  { %7630 = vsyncpa [#allocation18], 1 }
0x3854   :  { %7631 = vsyncpa [#allocation21], 1 }
0x3855   :  { %7632 = vsyncpa [#allocation24], 1 }
0x3856   :  { %7633 = vsyncpa [#allocation27], 1 }
0x3857   :  { %7634 = vsyncpa [#allocation30], 1 }
0x3858   :  { %7635 = vsyncpa [#allocation4], 1 }
0x3859   :  { %7636 = vsyncpa [#allocation33], 1 }

</bundles_post_ra>
